<compile_context>
chip_gen: v7x
topology: tpu7x:2x2x1
jax: 0.10.0
libtpu: 0.0.40
codegen_flags: <defaults>
</compile_context>

<pallas_src>
import math
import functools

import jax
import jax.numpy as jnp
from jax.experimental import pallas as pl
from jax.experimental.pallas import tpu as pltpu


# ----------------------------------------------------------------------------
# Whole-model Pallas kernel (single invocation, everything VMEM-resident)
# ----------------------------------------------------------------------------

def make_model_kernel(D, H, L, eps=1e-5):
    Dh = D // H
    scale = 1.0 / math.sqrt(Dh)
    sqrt_d = math.sqrt(D)
    f32 = jnp.float32

    def kernel(*refs):
        (src_ref, emb_w_ref, emb_b_ref, pe_ref, mask_ref,
         enc_wqkv, enc_bqkv, enc_wo, enc_bo, enc_ln1g, enc_ln1b,
         enc_w1, enc_b1, enc_w2, enc_b2, enc_ln2g, enc_ln2b,
         dec_wqkv, dec_bqkv, dec_wo1, dec_bo1, dec_ln1g, dec_ln1b,
         dec_wq, dec_bq, dec_wkv, dec_bkv, dec_wo2, dec_bo2, dec_ln2g, dec_ln2b,
         dec_w1, dec_b1, dec_w2, dec_b2, dec_ln3g, dec_ln3b,
         out_w_ref, out_b_ref,
         o_ref) = refs

        mask = mask_ref[...]          # (BS, BS): 0 within a batch, -1e30 across batches

        def mm(a, b):
            return jnp.dot(a, b, preferred_element_type=f32)

        def add_ln(x, r, g, b):
            y = x + r
            mean = jnp.mean(y, axis=-1, keepdims=True)
            var = jnp.mean((y - mean) ** 2, axis=-1, keepdims=True)
            return (y - mean) * jax.lax.rsqrt(var + eps) * g + b

        def sdpa_outproj(q, k, v, wo, bo):
            # Per-head scaled-dot-product attention over all batches at once
            # (cross-batch positions killed by the block-diagonal mask); the
            # output projection is fused into the per-head epilogue.
            acc = bo                                              # (1, D), broadcasts
            for h in range(H):
                lo, hi = h * Dh, (h + 1) * Dh
                q_h, k_h, v_h = q[:, lo:hi], k[:, lo:hi], v[:, lo:hi]
                s = jax.lax.dot_general(q_h, k_h, (((1,), (1,)), ((), ())),
                                        preferred_element_type=f32) * scale + mask
                m = jnp.max(s, axis=-1, keepdims=True)
                p = jnp.exp(s - m)
                p = p / jnp.sum(p, axis=-1, keepdims=True)        # f32 softmax
                o_h = mm(p, v_h)                                  # (BS, Dh)
                acc = acc + mm(o_h, wo[lo:hi, :])                 # fused out-proj
            return acc

        def self_attn(x, wqkv, bqkv, wo, bo):
            qkv = mm(x, wqkv) + bqkv                              # fused Q/K/V projection
            return sdpa_outproj(qkv[:, :D], qkv[:, D:2 * D], qkv[:, 2 * D:], wo, bo)

        def cross_attn(x, mem, wq, bq, wkv, bkv, wo, bo):
            q = mm(x, wq) + bq
            kv = mm(mem, wkv) + bkv                               # fused K/V projection
            return sdpa_outproj(q, kv[:, :D], kv[:, D:], wo, bo)

        def ffn(x, w1, b1, w2, b2):
            h = jnp.maximum(mm(x, w1) + b1, 0.0)                  # (BS, F) stays on-chip
            return mm(h, w2) + b2

        # embedding * sqrt(D) + positional encoding (dropout = identity at inference)
        x = (mm(src_ref[...], emb_w_ref[...]) + emb_b_ref[...]) * sqrt_d + pe_ref[...]

        # encoder stack
        for l in range(L):
            x = add_ln(x, self_attn(x, enc_wqkv[l], enc_bqkv[l], enc_wo[l], enc_bo[l]),
                       enc_ln1g[l], enc_ln1b[l])
            x = add_ln(x, ffn(x, enc_w1[l], enc_b1[l], enc_w2[l], enc_b2[l]),
                       enc_ln2g[l], enc_ln2b[l])
        memory = x

        # decoder stack: tgt = encoder output, memory = encoder output (no tgt_mask in the
        # PyTorch forward, so self-attention is unmasked)
        y = memory
        for l in range(L):
            y = add_ln(y, self_attn(y, dec_wqkv[l], dec_bqkv[l], dec_wo1[l], dec_bo1[l]),
                       dec_ln1g[l], dec_ln1b[l])
            y = add_ln(y, cross_attn(y, memory, dec_wq[l], dec_bq[l],
                                     dec_wkv[l], dec_bkv[l], dec_wo2[l], dec_bo2[l]),
                       dec_ln2g[l], dec_ln2b[l])
            y = add_ln(y, ffn(y, dec_w1[l], dec_b1[l], dec_w2[l], dec_b2[l]),
                       dec_ln3g[l], dec_ln3b[l])

        # classifier head (lane-padded to 128 → unmasked stores); wrapper keeps last token
        o_ref[...] = mm(y, out_w_ref[...]) + out_b_ref[...]

    return kernel


# ----------------------------------------------------------------------------
# Wrapper
# ----------------------------------------------------------------------------

def positional_encoding(seq_len, d_model):
    position = jnp.arange(seq_len, dtype=jnp.float32)[:, None]
    div_term = jnp.exp(jnp.arange(0, d_model, 2, dtype=jnp.float32)
                       * (-math.log(10000.0) / d_model))
    pe = jnp.zeros((seq_len, d_model), jnp.float32)
    pe = pe.at[:, 0::2].set(jnp.sin(position * div_term))
    pe = pe.at[:, 1::2].set(jnp.cos(position * div_term))
    return pe


def transformer_classifier_forward(src, params, cfg):
    """src: (B, S, input_dim) -> logits (B, num_classes)."""
    B, S, _ = src.shape
    D, H, L, C = cfg["hidden_dim"], cfg["num_heads"], cfg["num_layers"], cfg["num_classes"]
    Cp = pl.cdiv(C, 128) * 128                                   # lane-pad classifier output

    src2d = src.reshape(B * S, -1).astype(jnp.float32)           # batch-major (B*S, I)
    pe = jnp.tile(positional_encoding(S, D), (B, 1))             # (B*S, D)

    # additive attention mask: 0 inside a batch, -1e30 across batches
    bidx = jnp.arange(B * S) // S
    mask = jnp.where(bidx[:, None] == bidx[None, :], 0.0, -1e30).astype(jnp.float32)

    out_w = jnp.zeros((D, Cp), jnp.float32).at[:, :C].set(params["out_w"])
    out_b = jnp.zeros((1, Cp), jnp.float32).at[:, :C].set(params["out_b"])

    enc, dec = params["enc"], params["dec"]
    args = [src2d, params["emb_w"], params["emb_b"], pe, mask,
            enc["wqkv"], enc["bqkv"], enc["wo"], enc["bo"], enc["ln1_g"], enc["ln1_b"],
            enc["w1"], enc["b1"], enc["w2"], enc["b2"], enc["ln2_g"], enc["ln2_b"],
            dec["wqkv"], dec["bqkv"], dec["wo1"], dec["bo1"], dec["ln1_g"], dec["ln1_b"],
            dec["wq"], dec["bq"], dec["wkv"], dec["bkv"], dec["wo2"], dec["bo2"],
            dec["ln2_g"], dec["ln2_b"],
            dec["w1"], dec["b1"], dec["w2"], dec["b2"], dec["ln3_g"], dec["ln3_b"],
            out_w, out_b]

    # Whole model in one pallas_call: ~2.6 MiB of VMEM-resident weights + tiny activations,
    # far below the VMEM limit on v5e/v6e (128 MiB) and v7x (64 MiB).
    # TODO(synk): if B, S or ffn_dim are scaled up, re-derive the VMEM budget (v7x = 64 MiB)
    # and set pltpu.CompilerParams(vmem_limit_bytes=...) / re-introduce tiling accordingly.
    out = pl.pallas_call(
        make_model_kernel(D, H, L),
        out_shape=jax.ShapeDtypeStruct((B * S, Cp), jnp.float32),
        in_specs=[pl.BlockSpec(memory_space=pltpu.MemorySpace.VMEM)] * len(args),
        out_specs=pl.BlockSpec(memory_space=pltpu.MemorySpace.VMEM),
    )(*args)

    return out.reshape(B, S, Cp)[:, -1, :C]


# ----------------------------------------------------------------------------
# Deterministic parameter initialization (synthetic weights, pre-fused layouts)
# ----------------------------------------------------------------------------

def init_params(key, cfg):
    D, I = cfg["hidden_dim"], cfg["input_dim"]
    C, F, L = cfg["num_classes"], cfg["ffn_dim"], cfg["num_layers"]

    def nrm(k, shape, s=0.05):
        return jax.random.normal(k, shape, jnp.float32) * s

    def enc_layer(k):
        ks = jax.random.split(k, 8)
        return dict(
            wqkv=nrm(ks[0], (D, 3 * D)), bqkv=nrm(ks[1], (1, 3 * D), 0.01),
            wo=nrm(ks[2], (D, D)), bo=nrm(ks[3], (1, D), 0.01),
            ln1_g=jnp.ones((1, D), jnp.float32), ln1_b=jnp.zeros((1, D), jnp.float32),
            w1=nrm(ks[4], (D, F)), b1=nrm(ks[5], (1, F), 0.01),
            w2=nrm(ks[6], (F, D)), b2=nrm(ks[7], (1, D), 0.01),
            ln2_g=jnp.ones((1, D), jnp.float32), ln2_b=jnp.zeros((1, D), jnp.float32),
        )

    def dec_layer(k):
        ks = jax.random.split(k, 14)
        return dict(
            wqkv=nrm(ks[0], (D, 3 * D)), bqkv=nrm(ks[1], (1, 3 * D), 0.01),
            wo1=nrm(ks[2], (D, D)), bo1=nrm(ks[3], (1, D), 0.01),
            ln1_g=jnp.ones((1, D), jnp.float32), ln1_b=jnp.zeros((1, D), jnp.float32),
            wq=nrm(ks[4], (D, D)), bq=nrm(ks[5], (1, D), 0.01),
            wkv=nrm(ks[6], (D, 2 * D)), bkv=nrm(ks[7], (1, 2 * D), 0.01),
            wo2=nrm(ks[8], (D, D)), bo2=nrm(ks[9], (1, D), 0.01),
            ln2_g=jnp.ones((1, D), jnp.float32), ln2_b=jnp.zeros((1, D), jnp.float32),
            w1=nrm(ks[10], (D, F)), b1=nrm(ks[11], (1, F), 0.01),
            w2=nrm(ks[12], (F, D)), b2=nrm(ks[13], (1, D), 0.01),
            ln3_g=jnp.ones((1, D), jnp.float32), ln3_b=jnp.zeros((1, D), jnp.float32),
        )

    keys = jax.random.split(key, 4 + 2 * L)
    enc_layers = [enc_layer(keys[4 + i]) for i in range(L)]
    dec_layers = [dec_layer(keys[4 + L + i]) for i in range(L)]
    enc = {name: jnp.stack([lyr[name] for lyr in enc_layers]) for name in enc_layers[0]}
    dec = {name: jnp.stack([lyr[name] for lyr in dec_layers]) for name in dec_layers[0]}

    return dict(
        emb_w=nrm(keys[0], (I, D)),
        emb_b=nrm(keys[1], (1, D), 0.01),
        out_w=nrm(keys[2], (D, C)),
        out_b=nrm(keys[3], (C,), 0.01),
        enc=enc, dec=dec,
    )


# ----------------------------------------------------------------------------
# Main
# ----------------------------------------------------------------------------

if __name__ == "__main__":
    cfg = dict(
        input_dim=16,
        hidden_dim=32,
        num_layers=2,
        num_heads=4,
        num_classes=5,
        ffn_dim=2048,   # nn.TransformerEncoderLayer / DecoderLayer default dim_feedforward
    )

    root = jax.random.PRNGKey(0)
    k_param, k_in = jax.random.split(root)
    params = init_params(k_param, cfg)

    B, S = 2, 8
    src = jax.random.normal(k_in, (B, S, cfg["input_dim"]), jnp.float32)

    fwd = jax.jit(functools.partial(transformer_classifier_forward, cfg=cfg))
    logits = fwd(src, params)
    logits = jax.block_until_ready(logits)

    assert logits.shape == (B, cfg["num_classes"])
    assert bool(jnp.all(jnp.isfinite(logits)))
    print("KERNEL_OK")
</pallas_src>

<mosaic_0001>
module attributes {stable_mosaic.version = 11 : i64} {
  func.func @kernel(%arg0: memref<16x16xf32, #tpu.memory_space<vmem>>, %arg1: memref<16x32xf32, #tpu.memory_space<vmem>>, %arg2: memref<1x32xf32, #tpu.memory_space<vmem>>, %arg3: memref<16x32xf32, #tpu.memory_space<vmem>>, %arg4: memref<16x16xf32, #tpu.memory_space<vmem>>, %arg5: memref<2x32x96xf32, #tpu.memory_space<vmem>>, %arg6: memref<2x1x96xf32, #tpu.memory_space<vmem>>, %arg7: memref<2x32x32xf32, #tpu.memory_space<vmem>>, %arg8: memref<2x1x32xf32, #tpu.memory_space<vmem>>, %arg9: memref<2x1x32xf32, #tpu.memory_space<vmem>>, %arg10: memref<2x1x32xf32, #tpu.memory_space<vmem>>, %arg11: memref<2x32x2048xf32, #tpu.memory_space<vmem>>, %arg12: memref<2x1x2048xf32, #tpu.memory_space<vmem>>, %arg13: memref<2x2048x32xf32, #tpu.memory_space<vmem>>, %arg14: memref<2x1x32xf32, #tpu.memory_space<vmem>>, %arg15: memref<2x1x32xf32, #tpu.memory_space<vmem>>, %arg16: memref<2x1x32xf32, #tpu.memory_space<vmem>>, %arg17: memref<2x32x96xf32, #tpu.memory_space<vmem>>, %arg18: memref<2x1x96xf32, #tpu.memory_space<vmem>>, %arg19: memref<2x32x32xf32, #tpu.memory_space<vmem>>, %arg20: memref<2x1x32xf32, #tpu.memory_space<vmem>>, %arg21: memref<2x1x32xf32, #tpu.memory_space<vmem>>, %arg22: memref<2x1x32xf32, #tpu.memory_space<vmem>>, %arg23: memref<2x32x32xf32, #tpu.memory_space<vmem>>, %arg24: memref<2x1x32xf32, #tpu.memory_space<vmem>>, %arg25: memref<2x32x64xf32, #tpu.memory_space<vmem>>, %arg26: memref<2x1x64xf32, #tpu.memory_space<vmem>>, %arg27: memref<2x32x32xf32, #tpu.memory_space<vmem>>, %arg28: memref<2x1x32xf32, #tpu.memory_space<vmem>>, %arg29: memref<2x1x32xf32, #tpu.memory_space<vmem>>, %arg30: memref<2x1x32xf32, #tpu.memory_space<vmem>>, %arg31: memref<2x32x2048xf32, #tpu.memory_space<vmem>>, %arg32: memref<2x1x2048xf32, #tpu.memory_space<vmem>>, %arg33: memref<2x2048x32xf32, #tpu.memory_space<vmem>>, %arg34: memref<2x1x32xf32, #tpu.memory_space<vmem>>, %arg35: memref<2x1x32xf32, #tpu.memory_space<vmem>>, %arg36: memref<2x1x32xf32, #tpu.memory_space<vmem>>, %arg37: memref<32x128xf32, #tpu.memory_space<vmem>>, %arg38: memref<1x128xf32, #tpu.memory_space<vmem>>, %arg39: memref<16x128xf32, #tpu.memory_space<vmem>>) attributes {dimension_semantics = [], scalar_prefetch = 0 : i64, scratch_operands = 0 : i64, tpu.core_type = #tpu.core_type<tc>} {
    %c0 = arith.constant 0 : index
    %c0_0 = arith.constant 0 : index
    %0 = vector.load %arg4[%c0, %c0_0] : memref<16x16xf32, #tpu.memory_space<vmem>>, vector<16x16xf32>
    %c0_1 = arith.constant 0 : index
    %c0_2 = arith.constant 0 : index
    %1 = vector.load %arg0[%c0_1, %c0_2] : memref<16x16xf32, #tpu.memory_space<vmem>>, vector<16x16xf32>
    %c0_3 = arith.constant 0 : index
    %c0_4 = arith.constant 0 : index
    %2 = vector.load %arg1[%c0_3, %c0_4] : memref<16x32xf32, #tpu.memory_space<vmem>>, vector<16x32xf32>
    %cst = arith.constant dense<0.000000e+00> : vector<16x32xf32>
    %3 = tpu.matmul %1, %2, %cst {dimension_numbers = #tpu.dot_dimension_numbers<[1], [0], [0], [1], [0, 0, 1, 1], [], []>} : vector<16x16xf32>, vector<16x32xf32>, vector<16x32xf32> -> vector<16x32xf32>
    %c0_5 = arith.constant 0 : index
    %c0_6 = arith.constant 0 : index
    %4 = vector.load %arg2[%c0_5, %c0_6] : memref<1x32xf32, #tpu.memory_space<vmem>>, vector<1x32xf32>
    %5 = vector.broadcast %4 : vector<1x32xf32> to vector<16x32xf32>
    %6 = arith.addf %3, %5 : vector<16x32xf32>
    %cst_7 = arith.constant 5.65685415 : f32
    %7 = vector.broadcast %cst_7 : f32 to vector<16x32xf32>
    %8 = arith.mulf %6, %7 : vector<16x32xf32>
    %c0_8 = arith.constant 0 : index
    %c0_9 = arith.constant 0 : index
    %9 = vector.load %arg3[%c0_8, %c0_9] : memref<16x32xf32, #tpu.memory_space<vmem>>, vector<16x32xf32>
    %10 = arith.addf %8, %9 : vector<16x32xf32>
    %c0_10 = arith.constant 0 : index
    %c0_11 = arith.constant 0 : index
    %c0_12 = arith.constant 0 : index
    %11 = vector.load %arg5[%c0_10, %c0_11, %c0_12] : memref<2x32x96xf32, #tpu.memory_space<vmem>>, vector<1x32x96xf32>
    %12 = vector.shape_cast %11 : vector<1x32x96xf32> to vector<32x96xf32>
    %c0_13 = arith.constant 0 : index
    %c0_14 = arith.constant 0 : index
    %c0_15 = arith.constant 0 : index
    %13 = vector.load %arg6[%c0_13, %c0_14, %c0_15] : memref<2x1x96xf32, #tpu.memory_space<vmem>>, vector<1x1x96xf32>
    %14 = vector.shape_cast %13 : vector<1x1x96xf32> to vector<1x96xf32>
    %c0_16 = arith.constant 0 : index
    %c0_17 = arith.constant 0 : index
    %c0_18 = arith.constant 0 : index
    %15 = vector.load %arg7[%c0_16, %c0_17, %c0_18] : memref<2x32x32xf32, #tpu.memory_space<vmem>>, vector<1x32x32xf32>
    %16 = vector.shape_cast %15 : vector<1x32x32xf32> to vector<32x32xf32>
    %c0_19 = arith.constant 0 : index
    %c0_20 = arith.constant 0 : index
    %c0_21 = arith.constant 0 : index
    %17 = vector.load %arg8[%c0_19, %c0_20, %c0_21] : memref<2x1x32xf32, #tpu.memory_space<vmem>>, vector<1x1x32xf32>
    %18 = vector.shape_cast %17 : vector<1x1x32xf32> to vector<1x32xf32>
    %cst_22 = arith.constant dense<0.000000e+00> : vector<16x96xf32>
    %19 = tpu.matmul %10, %12, %cst_22 {dimension_numbers = #tpu.dot_dimension_numbers<[1], [0], [0], [1], [0, 0, 1, 1], [], []>} : vector<16x32xf32>, vector<32x96xf32>, vector<16x96xf32> -> vector<16x96xf32>
    %20 = vector.broadcast %14 : vector<1x96xf32> to vector<16x96xf32>
    %21 = arith.addf %19, %20 : vector<16x96xf32>
    %22 = vector.extract_strided_slice %21 {offsets = [0, 0], sizes = [16, 32], strides = [1, 1]} : vector<16x96xf32> to vector<16x32xf32>
    %23 = vector.extract_strided_slice %21 {offsets = [0, 32], sizes = [16, 32], strides = [1, 1]} : vector<16x96xf32> to vector<16x32xf32>
    %24 = vector.extract_strided_slice %21 {offsets = [0, 64], sizes = [16, 32], strides = [1, 1]} : vector<16x96xf32> to vector<16x32xf32>
    %25 = vector.extract_strided_slice %22 {offsets = [0, 0], sizes = [16, 8], strides = [1, 1]} : vector<16x32xf32> to vector<16x8xf32>
    %26 = vector.extract_strided_slice %23 {offsets = [0, 0], sizes = [16, 8], strides = [1, 1]} : vector<16x32xf32> to vector<16x8xf32>
    %27 = vector.extract_strided_slice %24 {offsets = [0, 0], sizes = [16, 8], strides = [1, 1]} : vector<16x32xf32> to vector<16x8xf32>
    %cst_23 = arith.constant dense<0.000000e+00> : vector<16x16xf32>
    %28 = tpu.matmul %25, %26, %cst_23 {dimension_numbers = #tpu.dot_dimension_numbers<[1], [1], [0], [0], [0, 0, 1, 0], [], []>} : vector<16x8xf32>, vector<16x8xf32>, vector<16x16xf32> -> vector<16x16xf32>
    %cst_24 = arith.constant 0.353553385 : f32
    %29 = vector.broadcast %cst_24 : f32 to vector<16x16xf32>
    %30 = arith.mulf %28, %29 : vector<16x16xf32>
    %31 = arith.addf %30, %0 : vector<16x16xf32>
    %cst_25 = arith.constant dense<0xFF800000> : vector<16xf32>
    %32 = vector.multi_reduction <maximumf>, %31, %cst_25 [1] : vector<16x16xf32> to vector<16xf32>
    %33 = vector.shape_cast %32 : vector<16xf32> to vector<16x1xf32>
    %34 = vector.broadcast %33 : vector<16x1xf32> to vector<16x16xf32>
    %35 = arith.subf %31, %34 : vector<16x16xf32>
    %36 = math.exp %35 : vector<16x16xf32>
    %cst_26 = arith.constant dense<0.000000e+00> : vector<16xf32>
    %37 = vector.multi_reduction <add>, %36, %cst_26 [1] : vector<16x16xf32> to vector<16xf32>
    %38 = vector.shape_cast %37 : vector<16xf32> to vector<16x1xf32>
    %39 = vector.broadcast %38 : vector<16x1xf32> to vector<16x16xf32>
    %40 = arith.divf %36, %39 : vector<16x16xf32>
    %cst_27 = arith.constant dense<0.000000e+00> : vector<16x8xf32>
    %41 = tpu.matmul %40, %27, %cst_27 {dimension_numbers = #tpu.dot_dimension_numbers<[1], [0], [0], [1], [0, 0, 1, 1], [], []>} : vector<16x16xf32>, vector<16x8xf32>, vector<16x8xf32> -> vector<16x8xf32>
    %42 = vector.extract_strided_slice %16 {offsets = [0, 0], sizes = [8, 32], strides = [1, 1]} : vector<32x32xf32> to vector<8x32xf32>
    %cst_28 = arith.constant dense<0.000000e+00> : vector<16x32xf32>
    %43 = tpu.matmul %41, %42, %cst_28 {dimension_numbers = #tpu.dot_dimension_numbers<[1], [0], [0], [1], [0, 0, 1, 1], [], []>} : vector<16x8xf32>, vector<8x32xf32>, vector<16x32xf32> -> vector<16x32xf32>
    %44 = vector.broadcast %18 : vector<1x32xf32> to vector<16x32xf32>
    %45 = arith.addf %44, %43 : vector<16x32xf32>
    %46 = vector.extract_strided_slice %22 {offsets = [0, 8], sizes = [16, 8], strides = [1, 1]} : vector<16x32xf32> to vector<16x8xf32>
    %47 = vector.extract_strided_slice %23 {offsets = [0, 8], sizes = [16, 8], strides = [1, 1]} : vector<16x32xf32> to vector<16x8xf32>
    %48 = vector.extract_strided_slice %24 {offsets = [0, 8], sizes = [16, 8], strides = [1, 1]} : vector<16x32xf32> to vector<16x8xf32>
    %cst_29 = arith.constant dense<0.000000e+00> : vector<16x16xf32>
    %49 = tpu.matmul %46, %47, %cst_29 {dimension_numbers = #tpu.dot_dimension_numbers<[1], [1], [0], [0], [0, 0, 1, 0], [], []>} : vector<16x8xf32>, vector<16x8xf32>, vector<16x16xf32> -> vector<16x16xf32>
    %cst_30 = arith.constant 0.353553385 : f32
    %50 = vector.broadcast %cst_30 : f32 to vector<16x16xf32>
    %51 = arith.mulf %49, %50 : vector<16x16xf32>
    %52 = arith.addf %51, %0 : vector<16x16xf32>
    %cst_31 = arith.constant dense<0xFF800000> : vector<16xf32>
    %53 = vector.multi_reduction <maximumf>, %52, %cst_31 [1] : vector<16x16xf32> to vector<16xf32>
    %54 = vector.shape_cast %53 : vector<16xf32> to vector<16x1xf32>
    %55 = vector.broadcast %54 : vector<16x1xf32> to vector<16x16xf32>
    %56 = arith.subf %52, %55 : vector<16x16xf32>
    %57 = math.exp %56 : vector<16x16xf32>
    %cst_32 = arith.constant dense<0.000000e+00> : vector<16xf32>
    %58 = vector.multi_reduction <add>, %57, %cst_32 [1] : vector<16x16xf32> to vector<16xf32>
    %59 = vector.shape_cast %58 : vector<16xf32> to vector<16x1xf32>
    %60 = vector.broadcast %59 : vector<16x1xf32> to vector<16x16xf32>
    %61 = arith.divf %57, %60 : vector<16x16xf32>
    %cst_33 = arith.constant dense<0.000000e+00> : vector<16x8xf32>
    %62 = tpu.matmul %61, %48, %cst_33 {dimension_numbers = #tpu.dot_dimension_numbers<[1], [0], [0], [1], [0, 0, 1, 1], [], []>} : vector<16x16xf32>, vector<16x8xf32>, vector<16x8xf32> -> vector<16x8xf32>
    %63 = vector.extract_strided_slice %16 {offsets = [8, 0], sizes = [8, 32], strides = [1, 1]} : vector<32x32xf32> to vector<8x32xf32>
    %cst_34 = arith.constant dense<0.000000e+00> : vector<16x32xf32>
    %64 = tpu.matmul %62, %63, %cst_34 {dimension_numbers = #tpu.dot_dimension_numbers<[1], [0], [0], [1], [0, 0, 1, 1], [], []>} : vector<16x8xf32>, vector<8x32xf32>, vector<16x32xf32> -> vector<16x32xf32>
    %65 = arith.addf %45, %64 : vector<16x32xf32>
    %66 = vector.extract_strided_slice %22 {offsets = [0, 16], sizes = [16, 8], strides = [1, 1]} : vector<16x32xf32> to vector<16x8xf32>
    %67 = vector.extract_strided_slice %23 {offsets = [0, 16], sizes = [16, 8], strides = [1, 1]} : vector<16x32xf32> to vector<16x8xf32>
    %68 = vector.extract_strided_slice %24 {offsets = [0, 16], sizes = [16, 8], strides = [1, 1]} : vector<16x32xf32> to vector<16x8xf32>
    %cst_35 = arith.constant dense<0.000000e+00> : vector<16x16xf32>
    %69 = tpu.matmul %66, %67, %cst_35 {dimension_numbers = #tpu.dot_dimension_numbers<[1], [1], [0], [0], [0, 0, 1, 0], [], []>} : vector<16x8xf32>, vector<16x8xf32>, vector<16x16xf32> -> vector<16x16xf32>
    %cst_36 = arith.constant 0.353553385 : f32
    %70 = vector.broadcast %cst_36 : f32 to vector<16x16xf32>
    %71 = arith.mulf %69, %70 : vector<16x16xf32>
    %72 = arith.addf %71, %0 : vector<16x16xf32>
    %cst_37 = arith.constant dense<0xFF800000> : vector<16xf32>
    %73 = vector.multi_reduction <maximumf>, %72, %cst_37 [1] : vector<16x16xf32> to vector<16xf32>
    %74 = vector.shape_cast %73 : vector<16xf32> to vector<16x1xf32>
    %75 = vector.broadcast %74 : vector<16x1xf32> to vector<16x16xf32>
    %76 = arith.subf %72, %75 : vector<16x16xf32>
    %77 = math.exp %76 : vector<16x16xf32>
    %cst_38 = arith.constant dense<0.000000e+00> : vector<16xf32>
    %78 = vector.multi_reduction <add>, %77, %cst_38 [1] : vector<16x16xf32> to vector<16xf32>
    %79 = vector.shape_cast %78 : vector<16xf32> to vector<16x1xf32>
    %80 = vector.broadcast %79 : vector<16x1xf32> to vector<16x16xf32>
    %81 = arith.divf %77, %80 : vector<16x16xf32>
    %cst_39 = arith.constant dense<0.000000e+00> : vector<16x8xf32>
    %82 = tpu.matmul %81, %68, %cst_39 {dimension_numbers = #tpu.dot_dimension_numbers<[1], [0], [0], [1], [0, 0, 1, 1], [], []>} : vector<16x16xf32>, vector<16x8xf32>, vector<16x8xf32> -> vector<16x8xf32>
    %83 = vector.extract_strided_slice %16 {offsets = [16, 0], sizes = [8, 32], strides = [1, 1]} : vector<32x32xf32> to vector<8x32xf32>
    %cst_40 = arith.constant dense<0.000000e+00> : vector<16x32xf32>
    %84 = tpu.matmul %82, %83, %cst_40 {dimension_numbers = #tpu.dot_dimension_numbers<[1], [0], [0], [1], [0, 0, 1, 1], [], []>} : vector<16x8xf32>, vector<8x32xf32>, vector<16x32xf32> -> vector<16x32xf32>
    %85 = arith.addf %65, %84 : vector<16x32xf32>
    %86 = vector.extract_strided_slice %22 {offsets = [0, 24], sizes = [16, 8], strides = [1, 1]} : vector<16x32xf32> to vector<16x8xf32>
    %87 = vector.extract_strided_slice %23 {offsets = [0, 24], sizes = [16, 8], strides = [1, 1]} : vector<16x32xf32> to vector<16x8xf32>
    %88 = vector.extract_strided_slice %24 {offsets = [0, 24], sizes = [16, 8], strides = [1, 1]} : vector<16x32xf32> to vector<16x8xf32>
    %cst_41 = arith.constant dense<0.000000e+00> : vector<16x16xf32>
    %89 = tpu.matmul %86, %87, %cst_41 {dimension_numbers = #tpu.dot_dimension_numbers<[1], [1], [0], [0], [0, 0, 1, 0], [], []>} : vector<16x8xf32>, vector<16x8xf32>, vector<16x16xf32> -> vector<16x16xf32>
    %cst_42 = arith.constant 0.353553385 : f32
    %90 = vector.broadcast %cst_42 : f32 to vector<16x16xf32>
    %91 = arith.mulf %89, %90 : vector<16x16xf32>
    %92 = arith.addf %91, %0 : vector<16x16xf32>
    %cst_43 = arith.constant dense<0xFF800000> : vector<16xf32>
    %93 = vector.multi_reduction <maximumf>, %92, %cst_43 [1] : vector<16x16xf32> to vector<16xf32>
    %94 = vector.shape_cast %93 : vector<16xf32> to vector<16x1xf32>
    %95 = vector.broadcast %94 : vector<16x1xf32> to vector<16x16xf32>
    %96 = arith.subf %92, %95 : vector<16x16xf32>
    %97 = math.exp %96 : vector<16x16xf32>
    %cst_44 = arith.constant dense<0.000000e+00> : vector<16xf32>
    %98 = vector.multi_reduction <add>, %97, %cst_44 [1] : vector<16x16xf32> to vector<16xf32>
    %99 = vector.shape_cast %98 : vector<16xf32> to vector<16x1xf32>
    %100 = vector.broadcast %99 : vector<16x1xf32> to vector<16x16xf32>
    %101 = arith.divf %97, %100 : vector<16x16xf32>
    %cst_45 = arith.constant dense<0.000000e+00> : vector<16x8xf32>
    %102 = tpu.matmul %101, %88, %cst_45 {dimension_numbers = #tpu.dot_dimension_numbers<[1], [0], [0], [1], [0, 0, 1, 1], [], []>} : vector<16x16xf32>, vector<16x8xf32>, vector<16x8xf32> -> vector<16x8xf32>
    %103 = vector.extract_strided_slice %16 {offsets = [24, 0], sizes = [8, 32], strides = [1, 1]} : vector<32x32xf32> to vector<8x32xf32>
    %cst_46 = arith.constant dense<0.000000e+00> : vector<16x32xf32>
    %104 = tpu.matmul %102, %103, %cst_46 {dimension_numbers = #tpu.dot_dimension_numbers<[1], [0], [0], [1], [0, 0, 1, 1], [], []>} : vector<16x8xf32>, vector<8x32xf32>, vector<16x32xf32> -> vector<16x32xf32>
    %105 = arith.addf %85, %104 : vector<16x32xf32>
    %c0_47 = arith.constant 0 : index
    %c0_48 = arith.constant 0 : index
    %c0_49 = arith.constant 0 : index
    %106 = vector.load %arg9[%c0_47, %c0_48, %c0_49] : memref<2x1x32xf32, #tpu.memory_space<vmem>>, vector<1x1x32xf32>
    %107 = vector.shape_cast %106 : vector<1x1x32xf32> to vector<1x32xf32>
    %c0_50 = arith.constant 0 : index
    %c0_51 = arith.constant 0 : index
    %c0_52 = arith.constant 0 : index
    %108 = vector.load %arg10[%c0_50, %c0_51, %c0_52] : memref<2x1x32xf32, #tpu.memory_space<vmem>>, vector<1x1x32xf32>
    %109 = vector.shape_cast %108 : vector<1x1x32xf32> to vector<1x32xf32>
    %110 = arith.addf %10, %105 : vector<16x32xf32>
    %cst_53 = arith.constant dense<0.000000e+00> : vector<16xf32>
    %111 = vector.multi_reduction <add>, %110, %cst_53 [1] : vector<16x32xf32> to vector<16xf32>
    %112 = vector.shape_cast %111 : vector<16xf32> to vector<16x1xf32>
    %cst_54 = arith.constant 3.200000e+01 : f32
    %113 = vector.broadcast %cst_54 : f32 to vector<16x1xf32>
    %114 = arith.divf %112, %113 : vector<16x1xf32>
    %115 = vector.broadcast %114 : vector<16x1xf32> to vector<16x32xf32>
    %116 = arith.subf %110, %115 : vector<16x32xf32>
    %117 = arith.mulf %116, %116 : vector<16x32xf32>
    %cst_55 = arith.constant dense<0.000000e+00> : vector<16xf32>
    %118 = vector.multi_reduction <add>, %117, %cst_55 [1] : vector<16x32xf32> to vector<16xf32>
    %119 = vector.shape_cast %118 : vector<16xf32> to vector<16x1xf32>
    %cst_56 = arith.constant 3.200000e+01 : f32
    %120 = vector.broadcast %cst_56 : f32 to vector<16x1xf32>
    %121 = arith.divf %119, %120 : vector<16x1xf32>
    %122 = vector.broadcast %114 : vector<16x1xf32> to vector<16x32xf32>
    %123 = arith.subf %110, %122 : vector<16x32xf32>
    %cst_57 = arith.constant 9.99999974E-6 : f32
    %124 = vector.broadcast %cst_57 : f32 to vector<16x1xf32>
    %125 = arith.addf %121, %124 : vector<16x1xf32>
    %126 = math.rsqrt %125 : vector<16x1xf32>
    %127 = vector.broadcast %126 : vector<16x1xf32> to vector<16x32xf32>
    %128 = arith.mulf %123, %127 : vector<16x32xf32>
    %129 = vector.broadcast %107 : vector<1x32xf32> to vector<16x32xf32>
    %130 = arith.mulf %128, %129 : vector<16x32xf32>
    %131 = vector.broadcast %109 : vector<1x32xf32> to vector<16x32xf32>
    %132 = arith.addf %130, %131 : vector<16x32xf32>
    %c0_58 = arith.constant 0 : index
    %c0_59 = arith.constant 0 : index
    %c0_60 = arith.constant 0 : index
    %133 = vector.load %arg11[%c0_58, %c0_59, %c0_60] : memref<2x32x2048xf32, #tpu.memory_space<vmem>>, vector<1x32x2048xf32>
    %134 = vector.shape_cast %133 : vector<1x32x2048xf32> to vector<32x2048xf32>
    %c0_61 = arith.constant 0 : index
    %c0_62 = arith.constant 0 : index
    %c0_63 = arith.constant 0 : index
    %135 = vector.load %arg12[%c0_61, %c0_62, %c0_63] : memref<2x1x2048xf32, #tpu.memory_space<vmem>>, vector<1x1x2048xf32>
    %136 = vector.shape_cast %135 : vector<1x1x2048xf32> to vector<1x2048xf32>
    %c0_64 = arith.constant 0 : index
    %c0_65 = arith.constant 0 : index
    %c0_66 = arith.constant 0 : index
    %137 = vector.load %arg13[%c0_64, %c0_65, %c0_66] : memref<2x2048x32xf32, #tpu.memory_space<vmem>>, vector<1x2048x32xf32>
    %138 = vector.shape_cast %137 : vector<1x2048x32xf32> to vector<2048x32xf32>
    %c0_67 = arith.constant 0 : index
    %c0_68 = arith.constant 0 : index
    %c0_69 = arith.constant 0 : index
    %139 = vector.load %arg14[%c0_67, %c0_68, %c0_69] : memref<2x1x32xf32, #tpu.memory_space<vmem>>, vector<1x1x32xf32>
    %140 = vector.shape_cast %139 : vector<1x1x32xf32> to vector<1x32xf32>
    %cst_70 = arith.constant dense<0.000000e+00> : vector<16x2048xf32>
    %141 = tpu.matmul %132, %134, %cst_70 {dimension_numbers = #tpu.dot_dimension_numbers<[1], [0], [0], [1], [0, 0, 1, 1], [], []>} : vector<16x32xf32>, vector<32x2048xf32>, vector<16x2048xf32> -> vector<16x2048xf32>
    %142 = vector.broadcast %136 : vector<1x2048xf32> to vector<16x2048xf32>
    %143 = arith.addf %141, %142 : vector<16x2048xf32>
    %cst_71 = arith.constant 0.000000e+00 : f32
    %144 = vector.broadcast %cst_71 : f32 to vector<16x2048xf32>
    %145 = arith.maximumf %143, %144 : vector<16x2048xf32>
    %cst_72 = arith.constant dense<0.000000e+00> : vector<16x32xf32>
    %146 = tpu.matmul %145, %138, %cst_72 {dimension_numbers = #tpu.dot_dimension_numbers<[1], [0], [0], [1], [0, 0, 1, 1], [], []>} : vector<16x2048xf32>, vector<2048x32xf32>, vector<16x32xf32> -> vector<16x32xf32>
    %147 = vector.broadcast %140 : vector<1x32xf32> to vector<16x32xf32>
    %148 = arith.addf %146, %147 : vector<16x32xf32>
    %c0_73 = arith.constant 0 : index
    %c0_74 = arith.constant 0 : index
    %c0_75 = arith.constant 0 : index
    %149 = vector.load %arg15[%c0_73, %c0_74, %c0_75] : memref<2x1x32xf32, #tpu.memory_space<vmem>>, vector<1x1x32xf32>
    %150 = vector.shape_cast %149 : vector<1x1x32xf32> to vector<1x32xf32>
    %c0_76 = arith.constant 0 : index
    %c0_77 = arith.constant 0 : index
    %c0_78 = arith.constant 0 : index
    %151 = vector.load %arg16[%c0_76, %c0_77, %c0_78] : memref<2x1x32xf32, #tpu.memory_space<vmem>>, vector<1x1x32xf32>
    %152 = vector.shape_cast %151 : vector<1x1x32xf32> to vector<1x32xf32>
    %153 = arith.addf %132, %148 : vector<16x32xf32>
    %cst_79 = arith.constant dense<0.000000e+00> : vector<16xf32>
    %154 = vector.multi_reduction <add>, %153, %cst_79 [1] : vector<16x32xf32> to vector<16xf32>
    %155 = vector.shape_cast %154 : vector<16xf32> to vector<16x1xf32>
    %cst_80 = arith.constant 3.200000e+01 : f32
    %156 = vector.broadcast %cst_80 : f32 to vector<16x1xf32>
    %157 = arith.divf %155, %156 : vector<16x1xf32>
    %158 = vector.broadcast %157 : vector<16x1xf32> to vector<16x32xf32>
    %159 = arith.subf %153, %158 : vector<16x32xf32>
    %160 = arith.mulf %159, %159 : vector<16x32xf32>
    %cst_81 = arith.constant dense<0.000000e+00> : vector<16xf32>
    %161 = vector.multi_reduction <add>, %160, %cst_81 [1] : vector<16x32xf32> to vector<16xf32>
    %162 = vector.shape_cast %161 : vector<16xf32> to vector<16x1xf32>
    %cst_82 = arith.constant 3.200000e+01 : f32
    %163 = vector.broadcast %cst_82 : f32 to vector<16x1xf32>
    %164 = arith.divf %162, %163 : vector<16x1xf32>
    %165 = vector.broadcast %157 : vector<16x1xf32> to vector<16x32xf32>
    %166 = arith.subf %153, %165 : vector<16x32xf32>
    %cst_83 = arith.constant 9.99999974E-6 : f32
    %167 = vector.broadcast %cst_83 : f32 to vector<16x1xf32>
    %168 = arith.addf %164, %167 : vector<16x1xf32>
    %169 = math.rsqrt %168 : vector<16x1xf32>
    %170 = vector.broadcast %169 : vector<16x1xf32> to vector<16x32xf32>
    %171 = arith.mulf %166, %170 : vector<16x32xf32>
    %172 = vector.broadcast %150 : vector<1x32xf32> to vector<16x32xf32>
    %173 = arith.mulf %171, %172 : vector<16x32xf32>
    %174 = vector.broadcast %152 : vector<1x32xf32> to vector<16x32xf32>
    %175 = arith.addf %173, %174 : vector<16x32xf32>
    %c1 = arith.constant 1 : index
    %c0_84 = arith.constant 0 : index
    %c0_85 = arith.constant 0 : index
    %176 = vector.load %arg5[%c1, %c0_84, %c0_85] : memref<2x32x96xf32, #tpu.memory_space<vmem>>, vector<1x32x96xf32>
    %177 = vector.shape_cast %176 : vector<1x32x96xf32> to vector<32x96xf32>
    %c1_86 = arith.constant 1 : index
    %c0_87 = arith.constant 0 : index
    %c0_88 = arith.constant 0 : index
    %178 = vector.load %arg6[%c1_86, %c0_87, %c0_88] : memref<2x1x96xf32, #tpu.memory_space<vmem>>, vector<1x1x96xf32>
    %179 = vector.shape_cast %178 : vector<1x1x96xf32> to vector<1x96xf32>
    %c1_89 = arith.constant 1 : index
    %c0_90 = arith.constant 0 : index
    %c0_91 = arith.constant 0 : index
    %180 = vector.load %arg7[%c1_89, %c0_90, %c0_91] : memref<2x32x32xf32, #tpu.memory_space<vmem>>, vector<1x32x32xf32>
    %181 = vector.shape_cast %180 : vector<1x32x32xf32> to vector<32x32xf32>
    %c1_92 = arith.constant 1 : index
    %c0_93 = arith.constant 0 : index
    %c0_94 = arith.constant 0 : index
    %182 = vector.load %arg8[%c1_92, %c0_93, %c0_94] : memref<2x1x32xf32, #tpu.memory_space<vmem>>, vector<1x1x32xf32>
    %183 = vector.shape_cast %182 : vector<1x1x32xf32> to vector<1x32xf32>
    %cst_95 = arith.constant dense<0.000000e+00> : vector<16x96xf32>
    %184 = tpu.matmul %175, %177, %cst_95 {dimension_numbers = #tpu.dot_dimension_numbers<[1], [0], [0], [1], [0, 0, 1, 1], [], []>} : vector<16x32xf32>, vector<32x96xf32>, vector<16x96xf32> -> vector<16x96xf32>
    %185 = vector.broadcast %179 : vector<1x96xf32> to vector<16x96xf32>
    %186 = arith.addf %184, %185 : vector<16x96xf32>
    %187 = vector.extract_strided_slice %186 {offsets = [0, 0], sizes = [16, 32], strides = [1, 1]} : vector<16x96xf32> to vector<16x32xf32>
    %188 = vector.extract_strided_slice %186 {offsets = [0, 32], sizes = [16, 32], strides = [1, 1]} : vector<16x96xf32> to vector<16x32xf32>
    %189 = vector.extract_strided_slice %186 {offsets = [0, 64], sizes = [16, 32], strides = [1, 1]} : vector<16x96xf32> to vector<16x32xf32>
    %190 = vector.extract_strided_slice %187 {offsets = [0, 0], sizes = [16, 8], strides = [1, 1]} : vector<16x32xf32> to vector<16x8xf32>
    %191 = vector.extract_strided_slice %188 {offsets = [0, 0], sizes = [16, 8], strides = [1, 1]} : vector<16x32xf32> to vector<16x8xf32>
    %192 = vector.extract_strided_slice %189 {offsets = [0, 0], sizes = [16, 8], strides = [1, 1]} : vector<16x32xf32> to vector<16x8xf32>
    %cst_96 = arith.constant dense<0.000000e+00> : vector<16x16xf32>
    %193 = tpu.matmul %190, %191, %cst_96 {dimension_numbers = #tpu.dot_dimension_numbers<[1], [1], [0], [0], [0, 0, 1, 0], [], []>} : vector<16x8xf32>, vector<16x8xf32>, vector<16x16xf32> -> vector<16x16xf32>
    %cst_97 = arith.constant 0.353553385 : f32
    %194 = vector.broadcast %cst_97 : f32 to vector<16x16xf32>
    %195 = arith.mulf %193, %194 : vector<16x16xf32>
    %196 = arith.addf %195, %0 : vector<16x16xf32>
    %cst_98 = arith.constant dense<0xFF800000> : vector<16xf32>
    %197 = vector.multi_reduction <maximumf>, %196, %cst_98 [1] : vector<16x16xf32> to vector<16xf32>
    %198 = vector.shape_cast %197 : vector<16xf32> to vector<16x1xf32>
    %199 = vector.broadcast %198 : vector<16x1xf32> to vector<16x16xf32>
    %200 = arith.subf %196, %199 : vector<16x16xf32>
    %201 = math.exp %200 : vector<16x16xf32>
    %cst_99 = arith.constant dense<0.000000e+00> : vector<16xf32>
    %202 = vector.multi_reduction <add>, %201, %cst_99 [1] : vector<16x16xf32> to vector<16xf32>
    %203 = vector.shape_cast %202 : vector<16xf32> to vector<16x1xf32>
    %204 = vector.broadcast %203 : vector<16x1xf32> to vector<16x16xf32>
    %205 = arith.divf %201, %204 : vector<16x16xf32>
    %cst_100 = arith.constant dense<0.000000e+00> : vector<16x8xf32>
    %206 = tpu.matmul %205, %192, %cst_100 {dimension_numbers = #tpu.dot_dimension_numbers<[1], [0], [0], [1], [0, 0, 1, 1], [], []>} : vector<16x16xf32>, vector<16x8xf32>, vector<16x8xf32> -> vector<16x8xf32>
    %207 = vector.extract_strided_slice %181 {offsets = [0, 0], sizes = [8, 32], strides = [1, 1]} : vector<32x32xf32> to vector<8x32xf32>
    %cst_101 = arith.constant dense<0.000000e+00> : vector<16x32xf32>
    %208 = tpu.matmul %206, %207, %cst_101 {dimension_numbers = #tpu.dot_dimension_numbers<[1], [0], [0], [1], [0, 0, 1, 1], [], []>} : vector<16x8xf32>, vector<8x32xf32>, vector<16x32xf32> -> vector<16x32xf32>
    %209 = vector.broadcast %183 : vector<1x32xf32> to vector<16x32xf32>
    %210 = arith.addf %209, %208 : vector<16x32xf32>
    %211 = vector.extract_strided_slice %187 {offsets = [0, 8], sizes = [16, 8], strides = [1, 1]} : vector<16x32xf32> to vector<16x8xf32>
    %212 = vector.extract_strided_slice %188 {offsets = [0, 8], sizes = [16, 8], strides = [1, 1]} : vector<16x32xf32> to vector<16x8xf32>
    %213 = vector.extract_strided_slice %189 {offsets = [0, 8], sizes = [16, 8], strides = [1, 1]} : vector<16x32xf32> to vector<16x8xf32>
    %cst_102 = arith.constant dense<0.000000e+00> : vector<16x16xf32>
    %214 = tpu.matmul %211, %212, %cst_102 {dimension_numbers = #tpu.dot_dimension_numbers<[1], [1], [0], [0], [0, 0, 1, 0], [], []>} : vector<16x8xf32>, vector<16x8xf32>, vector<16x16xf32> -> vector<16x16xf32>
    %cst_103 = arith.constant 0.353553385 : f32
    %215 = vector.broadcast %cst_103 : f32 to vector<16x16xf32>
    %216 = arith.mulf %214, %215 : vector<16x16xf32>
    %217 = arith.addf %216, %0 : vector<16x16xf32>
    %cst_104 = arith.constant dense<0xFF800000> : vector<16xf32>
    %218 = vector.multi_reduction <maximumf>, %217, %cst_104 [1] : vector<16x16xf32> to vector<16xf32>
    %219 = vector.shape_cast %218 : vector<16xf32> to vector<16x1xf32>
    %220 = vector.broadcast %219 : vector<16x1xf32> to vector<16x16xf32>
    %221 = arith.subf %217, %220 : vector<16x16xf32>
    %222 = math.exp %221 : vector<16x16xf32>
    %cst_105 = arith.constant dense<0.000000e+00> : vector<16xf32>
    %223 = vector.multi_reduction <add>, %222, %cst_105 [1] : vector<16x16xf32> to vector<16xf32>
    %224 = vector.shape_cast %223 : vector<16xf32> to vector<16x1xf32>
    %225 = vector.broadcast %224 : vector<16x1xf32> to vector<16x16xf32>
    %226 = arith.divf %222, %225 : vector<16x16xf32>
    %cst_106 = arith.constant dense<0.000000e+00> : vector<16x8xf32>
    %227 = tpu.matmul %226, %213, %cst_106 {dimension_numbers = #tpu.dot_dimension_numbers<[1], [0], [0], [1], [0, 0, 1, 1], [], []>} : vector<16x16xf32>, vector<16x8xf32>, vector<16x8xf32> -> vector<16x8xf32>
    %228 = vector.extract_strided_slice %181 {offsets = [8, 0], sizes = [8, 32], strides = [1, 1]} : vector<32x32xf32> to vector<8x32xf32>
    %cst_107 = arith.constant dense<0.000000e+00> : vector<16x32xf32>
    %229 = tpu.matmul %227, %228, %cst_107 {dimension_numbers = #tpu.dot_dimension_numbers<[1], [0], [0], [1], [0, 0, 1, 1], [], []>} : vector<16x8xf32>, vector<8x32xf32>, vector<16x32xf32> -> vector<16x32xf32>
    %230 = arith.addf %210, %229 : vector<16x32xf32>
    %231 = vector.extract_strided_slice %187 {offsets = [0, 16], sizes = [16, 8], strides = [1, 1]} : vector<16x32xf32> to vector<16x8xf32>
    %232 = vector.extract_strided_slice %188 {offsets = [0, 16], sizes = [16, 8], strides = [1, 1]} : vector<16x32xf32> to vector<16x8xf32>
    %233 = vector.extract_strided_slice %189 {offsets = [0, 16], sizes = [16, 8], strides = [1, 1]} : vector<16x32xf32> to vector<16x8xf32>
    %cst_108 = arith.constant dense<0.000000e+00> : vector<16x16xf32>
    %234 = tpu.matmul %231, %232, %cst_108 {dimension_numbers = #tpu.dot_dimension_numbers<[1], [1], [0], [0], [0, 0, 1, 0], [], []>} : vector<16x8xf32>, vector<16x8xf32>, vector<16x16xf32> -> vector<16x16xf32>
    %cst_109 = arith.constant 0.353553385 : f32
    %235 = vector.broadcast %cst_109 : f32 to vector<16x16xf32>
    %236 = arith.mulf %234, %235 : vector<16x16xf32>
    %237 = arith.addf %236, %0 : vector<16x16xf32>
    %cst_110 = arith.constant dense<0xFF800000> : vector<16xf32>
    %238 = vector.multi_reduction <maximumf>, %237, %cst_110 [1] : vector<16x16xf32> to vector<16xf32>
    %239 = vector.shape_cast %238 : vector<16xf32> to vector<16x1xf32>
    %240 = vector.broadcast %239 : vector<16x1xf32> to vector<16x16xf32>
    %241 = arith.subf %237, %240 : vector<16x16xf32>
    %242 = math.exp %241 : vector<16x16xf32>
    %cst_111 = arith.constant dense<0.000000e+00> : vector<16xf32>
    %243 = vector.multi_reduction <add>, %242, %cst_111 [1] : vector<16x16xf32> to vector<16xf32>
    %244 = vector.shape_cast %243 : vector<16xf32> to vector<16x1xf32>
    %245 = vector.broadcast %244 : vector<16x1xf32> to vector<16x16xf32>
    %246 = arith.divf %242, %245 : vector<16x16xf32>
    %cst_112 = arith.constant dense<0.000000e+00> : vector<16x8xf32>
    %247 = tpu.matmul %246, %233, %cst_112 {dimension_numbers = #tpu.dot_dimension_numbers<[1], [0], [0], [1], [0, 0, 1, 1], [], []>} : vector<16x16xf32>, vector<16x8xf32>, vector<16x8xf32> -> vector<16x8xf32>
    %248 = vector.extract_strided_slice %181 {offsets = [16, 0], sizes = [8, 32], strides = [1, 1]} : vector<32x32xf32> to vector<8x32xf32>
    %cst_113 = arith.constant dense<0.000000e+00> : vector<16x32xf32>
    %249 = tpu.matmul %247, %248, %cst_113 {dimension_numbers = #tpu.dot_dimension_numbers<[1], [0], [0], [1], [0, 0, 1, 1], [], []>} : vector<16x8xf32>, vector<8x32xf32>, vector<16x32xf32> -> vector<16x32xf32>
    %250 = arith.addf %230, %249 : vector<16x32xf32>
    %251 = vector.extract_strided_slice %187 {offsets = [0, 24], sizes = [16, 8], strides = [1, 1]} : vector<16x32xf32> to vector<16x8xf32>
    %252 = vector.extract_strided_slice %188 {offsets = [0, 24], sizes = [16, 8], strides = [1, 1]} : vector<16x32xf32> to vector<16x8xf32>
    %253 = vector.extract_strided_slice %189 {offsets = [0, 24], sizes = [16, 8], strides = [1, 1]} : vector<16x32xf32> to vector<16x8xf32>
    %cst_114 = arith.constant dense<0.000000e+00> : vector<16x16xf32>
    %254 = tpu.matmul %251, %252, %cst_114 {dimension_numbers = #tpu.dot_dimension_numbers<[1], [1], [0], [0], [0, 0, 1, 0], [], []>} : vector<16x8xf32>, vector<16x8xf32>, vector<16x16xf32> -> vector<16x16xf32>
    %cst_115 = arith.constant 0.353553385 : f32
    %255 = vector.broadcast %cst_115 : f32 to vector<16x16xf32>
    %256 = arith.mulf %254, %255 : vector<16x16xf32>
    %257 = arith.addf %256, %0 : vector<16x16xf32>
    %cst_116 = arith.constant dense<0xFF800000> : vector<16xf32>
    %258 = vector.multi_reduction <maximumf>, %257, %cst_116 [1] : vector<16x16xf32> to vector<16xf32>
    %259 = vector.shape_cast %258 : vector<16xf32> to vector<16x1xf32>
    %260 = vector.broadcast %259 : vector<16x1xf32> to vector<16x16xf32>
    %261 = arith.subf %257, %260 : vector<16x16xf32>
    %262 = math.exp %261 : vector<16x16xf32>
    %cst_117 = arith.constant dense<0.000000e+00> : vector<16xf32>
    %263 = vector.multi_reduction <add>, %262, %cst_117 [1] : vector<16x16xf32> to vector<16xf32>
    %264 = vector.shape_cast %263 : vector<16xf32> to vector<16x1xf32>
    %265 = vector.broadcast %264 : vector<16x1xf32> to vector<16x16xf32>
    %266 = arith.divf %262, %265 : vector<16x16xf32>
    %cst_118 = arith.constant dense<0.000000e+00> : vector<16x8xf32>
    %267 = tpu.matmul %266, %253, %cst_118 {dimension_numbers = #tpu.dot_dimension_numbers<[1], [0], [0], [1], [0, 0, 1, 1], [], []>} : vector<16x16xf32>, vector<16x8xf32>, vector<16x8xf32> -> vector<16x8xf32>
    %268 = vector.extract_strided_slice %181 {offsets = [24, 0], sizes = [8, 32], strides = [1, 1]} : vector<32x32xf32> to vector<8x32xf32>
    %cst_119 = arith.constant dense<0.000000e+00> : vector<16x32xf32>
    %269 = tpu.matmul %267, %268, %cst_119 {dimension_numbers = #tpu.dot_dimension_numbers<[1], [0], [0], [1], [0, 0, 1, 1], [], []>} : vector<16x8xf32>, vector<8x32xf32>, vector<16x32xf32> -> vector<16x32xf32>
    %270 = arith.addf %250, %269 : vector<16x32xf32>
    %c1_120 = arith.constant 1 : index
    %c0_121 = arith.constant 0 : index
    %c0_122 = arith.constant 0 : index
    %271 = vector.load %arg9[%c1_120, %c0_121, %c0_122] : memref<2x1x32xf32, #tpu.memory_space<vmem>>, vector<1x1x32xf32>
    %272 = vector.shape_cast %271 : vector<1x1x32xf32> to vector<1x32xf32>
    %c1_123 = arith.constant 1 : index
    %c0_124 = arith.constant 0 : index
    %c0_125 = arith.constant 0 : index
    %273 = vector.load %arg10[%c1_123, %c0_124, %c0_125] : memref<2x1x32xf32, #tpu.memory_space<vmem>>, vector<1x1x32xf32>
    %274 = vector.shape_cast %273 : vector<1x1x32xf32> to vector<1x32xf32>
    %275 = arith.addf %175, %270 : vector<16x32xf32>
    %cst_126 = arith.constant dense<0.000000e+00> : vector<16xf32>
    %276 = vector.multi_reduction <add>, %275, %cst_126 [1] : vector<16x32xf32> to vector<16xf32>
    %277 = vector.shape_cast %276 : vector<16xf32> to vector<16x1xf32>
    %cst_127 = arith.constant 3.200000e+01 : f32
    %278 = vector.broadcast %cst_127 : f32 to vector<16x1xf32>
    %279 = arith.divf %277, %278 : vector<16x1xf32>
    %280 = vector.broadcast %279 : vector<16x1xf32> to vector<16x32xf32>
    %281 = arith.subf %275, %280 : vector<16x32xf32>
    %282 = arith.mulf %281, %281 : vector<16x32xf32>
    %cst_128 = arith.constant dense<0.000000e+00> : vector<16xf32>
    %283 = vector.multi_reduction <add>, %282, %cst_128 [1] : vector<16x32xf32> to vector<16xf32>
    %284 = vector.shape_cast %283 : vector<16xf32> to vector<16x1xf32>
    %cst_129 = arith.constant 3.200000e+01 : f32
    %285 = vector.broadcast %cst_129 : f32 to vector<16x1xf32>
    %286 = arith.divf %284, %285 : vector<16x1xf32>
    %287 = vector.broadcast %279 : vector<16x1xf32> to vector<16x32xf32>
    %288 = arith.subf %275, %287 : vector<16x32xf32>
    %cst_130 = arith.constant 9.99999974E-6 : f32
    %289 = vector.broadcast %cst_130 : f32 to vector<16x1xf32>
    %290 = arith.addf %286, %289 : vector<16x1xf32>
    %291 = math.rsqrt %290 : vector<16x1xf32>
    %292 = vector.broadcast %291 : vector<16x1xf32> to vector<16x32xf32>
    %293 = arith.mulf %288, %292 : vector<16x32xf32>
    %294 = vector.broadcast %272 : vector<1x32xf32> to vector<16x32xf32>
    %295 = arith.mulf %293, %294 : vector<16x32xf32>
    %296 = vector.broadcast %274 : vector<1x32xf32> to vector<16x32xf32>
    %297 = arith.addf %295, %296 : vector<16x32xf32>
    %c1_131 = arith.constant 1 : index
    %c0_132 = arith.constant 0 : index
    %c0_133 = arith.constant 0 : index
    %298 = vector.load %arg11[%c1_131, %c0_132, %c0_133] : memref<2x32x2048xf32, #tpu.memory_space<vmem>>, vector<1x32x2048xf32>
    %299 = vector.shape_cast %298 : vector<1x32x2048xf32> to vector<32x2048xf32>
    %c1_134 = arith.constant 1 : index
    %c0_135 = arith.constant 0 : index
    %c0_136 = arith.constant 0 : index
    %300 = vector.load %arg12[%c1_134, %c0_135, %c0_136] : memref<2x1x2048xf32, #tpu.memory_space<vmem>>, vector<1x1x2048xf32>
    %301 = vector.shape_cast %300 : vector<1x1x2048xf32> to vector<1x2048xf32>
    %c1_137 = arith.constant 1 : index
    %c0_138 = arith.constant 0 : index
    %c0_139 = arith.constant 0 : index
    %302 = vector.load %arg13[%c1_137, %c0_138, %c0_139] : memref<2x2048x32xf32, #tpu.memory_space<vmem>>, vector<1x2048x32xf32>
    %303 = vector.shape_cast %302 : vector<1x2048x32xf32> to vector<2048x32xf32>
    %c1_140 = arith.constant 1 : index
    %c0_141 = arith.constant 0 : index
    %c0_142 = arith.constant 0 : index
    %304 = vector.load %arg14[%c1_140, %c0_141, %c0_142] : memref<2x1x32xf32, #tpu.memory_space<vmem>>, vector<1x1x32xf32>
    %305 = vector.shape_cast %304 : vector<1x1x32xf32> to vector<1x32xf32>
    %cst_143 = arith.constant dense<0.000000e+00> : vector<16x2048xf32>
    %306 = tpu.matmul %297, %299, %cst_143 {dimension_numbers = #tpu.dot_dimension_numbers<[1], [0], [0], [1], [0, 0, 1, 1], [], []>} : vector<16x32xf32>, vector<32x2048xf32>, vector<16x2048xf32> -> vector<16x2048xf32>
    %307 = vector.broadcast %301 : vector<1x2048xf32> to vector<16x2048xf32>
    %308 = arith.addf %306, %307 : vector<16x2048xf32>
    %cst_144 = arith.constant 0.000000e+00 : f32
    %309 = vector.broadcast %cst_144 : f32 to vector<16x2048xf32>
    %310 = arith.maximumf %308, %309 : vector<16x2048xf32>
    %cst_145 = arith.constant dense<0.000000e+00> : vector<16x32xf32>
    %311 = tpu.matmul %310, %303, %cst_145 {dimension_numbers = #tpu.dot_dimension_numbers<[1], [0], [0], [1], [0, 0, 1, 1], [], []>} : vector<16x2048xf32>, vector<2048x32xf32>, vector<16x32xf32> -> vector<16x32xf32>
    %312 = vector.broadcast %305 : vector<1x32xf32> to vector<16x32xf32>
    %313 = arith.addf %311, %312 : vector<16x32xf32>
    %c1_146 = arith.constant 1 : index
    %c0_147 = arith.constant 0 : index
    %c0_148 = arith.constant 0 : index
    %314 = vector.load %arg15[%c1_146, %c0_147, %c0_148] : memref<2x1x32xf32, #tpu.memory_space<vmem>>, vector<1x1x32xf32>
    %315 = vector.shape_cast %314 : vector<1x1x32xf32> to vector<1x32xf32>
    %c1_149 = arith.constant 1 : index
    %c0_150 = arith.constant 0 : index
    %c0_151 = arith.constant 0 : index
    %316 = vector.load %arg16[%c1_149, %c0_150, %c0_151] : memref<2x1x32xf32, #tpu.memory_space<vmem>>, vector<1x1x32xf32>
    %317 = vector.shape_cast %316 : vector<1x1x32xf32> to vector<1x32xf32>
    %318 = arith.addf %297, %313 : vector<16x32xf32>
    %cst_152 = arith.constant dense<0.000000e+00> : vector<16xf32>
    %319 = vector.multi_reduction <add>, %318, %cst_152 [1] : vector<16x32xf32> to vector<16xf32>
    %320 = vector.shape_cast %319 : vector<16xf32> to vector<16x1xf32>
    %cst_153 = arith.constant 3.200000e+01 : f32
    %321 = vector.broadcast %cst_153 : f32 to vector<16x1xf32>
    %322 = arith.divf %320, %321 : vector<16x1xf32>
    %323 = vector.broadcast %322 : vector<16x1xf32> to vector<16x32xf32>
    %324 = arith.subf %318, %323 : vector<16x32xf32>
    %325 = arith.mulf %324, %324 : vector<16x32xf32>
    %cst_154 = arith.constant dense<0.000000e+00> : vector<16xf32>
    %326 = vector.multi_reduction <add>, %325, %cst_154 [1] : vector<16x32xf32> to vector<16xf32>
    %327 = vector.shape_cast %326 : vector<16xf32> to vector<16x1xf32>
    %cst_155 = arith.constant 3.200000e+01 : f32
    %328 = vector.broadcast %cst_155 : f32 to vector<16x1xf32>
    %329 = arith.divf %327, %328 : vector<16x1xf32>
    %330 = vector.broadcast %322 : vector<16x1xf32> to vector<16x32xf32>
    %331 = arith.subf %318, %330 : vector<16x32xf32>
    %cst_156 = arith.constant 9.99999974E-6 : f32
    %332 = vector.broadcast %cst_156 : f32 to vector<16x1xf32>
    %333 = arith.addf %329, %332 : vector<16x1xf32>
    %334 = math.rsqrt %333 : vector<16x1xf32>
    %335 = vector.broadcast %334 : vector<16x1xf32> to vector<16x32xf32>
    %336 = arith.mulf %331, %335 : vector<16x32xf32>
    %337 = vector.broadcast %315 : vector<1x32xf32> to vector<16x32xf32>
    %338 = arith.mulf %336, %337 : vector<16x32xf32>
    %339 = vector.broadcast %317 : vector<1x32xf32> to vector<16x32xf32>
    %340 = arith.addf %338, %339 : vector<16x32xf32>
    %c0_157 = arith.constant 0 : index
    %c0_158 = arith.constant 0 : index
    %c0_159 = arith.constant 0 : index
    %341 = vector.load %arg17[%c0_157, %c0_158, %c0_159] : memref<2x32x96xf32, #tpu.memory_space<vmem>>, vector<1x32x96xf32>
    %342 = vector.shape_cast %341 : vector<1x32x96xf32> to vector<32x96xf32>
    %c0_160 = arith.constant 0 : index
    %c0_161 = arith.constant 0 : index
    %c0_162 = arith.constant 0 : index
    %343 = vector.load %arg18[%c0_160, %c0_161, %c0_162] : memref<2x1x96xf32, #tpu.memory_space<vmem>>, vector<1x1x96xf32>
    %344 = vector.shape_cast %343 : vector<1x1x96xf32> to vector<1x96xf32>
    %c0_163 = arith.constant 0 : index
    %c0_164 = arith.constant 0 : index
    %c0_165 = arith.constant 0 : index
    %345 = vector.load %arg19[%c0_163, %c0_164, %c0_165] : memref<2x32x32xf32, #tpu.memory_space<vmem>>, vector<1x32x32xf32>
    %346 = vector.shape_cast %345 : vector<1x32x32xf32> to vector<32x32xf32>
    %c0_166 = arith.constant 0 : index
    %c0_167 = arith.constant 0 : index
    %c0_168 = arith.constant 0 : index
    %347 = vector.load %arg20[%c0_166, %c0_167, %c0_168] : memref<2x1x32xf32, #tpu.memory_space<vmem>>, vector<1x1x32xf32>
    %348 = vector.shape_cast %347 : vector<1x1x32xf32> to vector<1x32xf32>
    %cst_169 = arith.constant dense<0.000000e+00> : vector<16x96xf32>
    %349 = tpu.matmul %340, %342, %cst_169 {dimension_numbers = #tpu.dot_dimension_numbers<[1], [0], [0], [1], [0, 0, 1, 1], [], []>} : vector<16x32xf32>, vector<32x96xf32>, vector<16x96xf32> -> vector<16x96xf32>
    %350 = vector.broadcast %344 : vector<1x96xf32> to vector<16x96xf32>
    %351 = arith.addf %349, %350 : vector<16x96xf32>
    %352 = vector.extract_strided_slice %351 {offsets = [0, 0], sizes = [16, 32], strides = [1, 1]} : vector<16x96xf32> to vector<16x32xf32>
    %353 = vector.extract_strided_slice %351 {offsets = [0, 32], sizes = [16, 32], strides = [1, 1]} : vector<16x96xf32> to vector<16x32xf32>
    %354 = vector.extract_strided_slice %351 {offsets = [0, 64], sizes = [16, 32], strides = [1, 1]} : vector<16x96xf32> to vector<16x32xf32>
    %355 = vector.extract_strided_slice %352 {offsets = [0, 0], sizes = [16, 8], strides = [1, 1]} : vector<16x32xf32> to vector<16x8xf32>
    %356 = vector.extract_strided_slice %353 {offsets = [0, 0], sizes = [16, 8], strides = [1, 1]} : vector<16x32xf32> to vector<16x8xf32>
    %357 = vector.extract_strided_slice %354 {offsets = [0, 0], sizes = [16, 8], strides = [1, 1]} : vector<16x32xf32> to vector<16x8xf32>
    %cst_170 = arith.constant dense<0.000000e+00> : vector<16x16xf32>
    %358 = tpu.matmul %355, %356, %cst_170 {dimension_numbers = #tpu.dot_dimension_numbers<[1], [1], [0], [0], [0, 0, 1, 0], [], []>} : vector<16x8xf32>, vector<16x8xf32>, vector<16x16xf32> -> vector<16x16xf32>
    %cst_171 = arith.constant 0.353553385 : f32
    %359 = vector.broadcast %cst_171 : f32 to vector<16x16xf32>
    %360 = arith.mulf %358, %359 : vector<16x16xf32>
    %361 = arith.addf %360, %0 : vector<16x16xf32>
    %cst_172 = arith.constant dense<0xFF800000> : vector<16xf32>
    %362 = vector.multi_reduction <maximumf>, %361, %cst_172 [1] : vector<16x16xf32> to vector<16xf32>
    %363 = vector.shape_cast %362 : vector<16xf32> to vector<16x1xf32>
    %364 = vector.broadcast %363 : vector<16x1xf32> to vector<16x16xf32>
    %365 = arith.subf %361, %364 : vector<16x16xf32>
    %366 = math.exp %365 : vector<16x16xf32>
    %cst_173 = arith.constant dense<0.000000e+00> : vector<16xf32>
    %367 = vector.multi_reduction <add>, %366, %cst_173 [1] : vector<16x16xf32> to vector<16xf32>
    %368 = vector.shape_cast %367 : vector<16xf32> to vector<16x1xf32>
    %369 = vector.broadcast %368 : vector<16x1xf32> to vector<16x16xf32>
    %370 = arith.divf %366, %369 : vector<16x16xf32>
    %cst_174 = arith.constant dense<0.000000e+00> : vector<16x8xf32>
    %371 = tpu.matmul %370, %357, %cst_174 {dimension_numbers = #tpu.dot_dimension_numbers<[1], [0], [0], [1], [0, 0, 1, 1], [], []>} : vector<16x16xf32>, vector<16x8xf32>, vector<16x8xf32> -> vector<16x8xf32>
    %372 = vector.extract_strided_slice %346 {offsets = [0, 0], sizes = [8, 32], strides = [1, 1]} : vector<32x32xf32> to vector<8x32xf32>
    %cst_175 = arith.constant dense<0.000000e+00> : vector<16x32xf32>
    %373 = tpu.matmul %371, %372, %cst_175 {dimension_numbers = #tpu.dot_dimension_numbers<[1], [0], [0], [1], [0, 0, 1, 1], [], []>} : vector<16x8xf32>, vector<8x32xf32>, vector<16x32xf32> -> vector<16x32xf32>
    %374 = vector.broadcast %348 : vector<1x32xf32> to vector<16x32xf32>
    %375 = arith.addf %374, %373 : vector<16x32xf32>
    %376 = vector.extract_strided_slice %352 {offsets = [0, 8], sizes = [16, 8], strides = [1, 1]} : vector<16x32xf32> to vector<16x8xf32>
    %377 = vector.extract_strided_slice %353 {offsets = [0, 8], sizes = [16, 8], strides = [1, 1]} : vector<16x32xf32> to vector<16x8xf32>
    %378 = vector.extract_strided_slice %354 {offsets = [0, 8], sizes = [16, 8], strides = [1, 1]} : vector<16x32xf32> to vector<16x8xf32>
    %cst_176 = arith.constant dense<0.000000e+00> : vector<16x16xf32>
    %379 = tpu.matmul %376, %377, %cst_176 {dimension_numbers = #tpu.dot_dimension_numbers<[1], [1], [0], [0], [0, 0, 1, 0], [], []>} : vector<16x8xf32>, vector<16x8xf32>, vector<16x16xf32> -> vector<16x16xf32>
    %cst_177 = arith.constant 0.353553385 : f32
    %380 = vector.broadcast %cst_177 : f32 to vector<16x16xf32>
    %381 = arith.mulf %379, %380 : vector<16x16xf32>
    %382 = arith.addf %381, %0 : vector<16x16xf32>
    %cst_178 = arith.constant dense<0xFF800000> : vector<16xf32>
    %383 = vector.multi_reduction <maximumf>, %382, %cst_178 [1] : vector<16x16xf32> to vector<16xf32>
    %384 = vector.shape_cast %383 : vector<16xf32> to vector<16x1xf32>
    %385 = vector.broadcast %384 : vector<16x1xf32> to vector<16x16xf32>
    %386 = arith.subf %382, %385 : vector<16x16xf32>
    %387 = math.exp %386 : vector<16x16xf32>
    %cst_179 = arith.constant dense<0.000000e+00> : vector<16xf32>
    %388 = vector.multi_reduction <add>, %387, %cst_179 [1] : vector<16x16xf32> to vector<16xf32>
    %389 = vector.shape_cast %388 : vector<16xf32> to vector<16x1xf32>
    %390 = vector.broadcast %389 : vector<16x1xf32> to vector<16x16xf32>
    %391 = arith.divf %387, %390 : vector<16x16xf32>
    %cst_180 = arith.constant dense<0.000000e+00> : vector<16x8xf32>
    %392 = tpu.matmul %391, %378, %cst_180 {dimension_numbers = #tpu.dot_dimension_numbers<[1], [0], [0], [1], [0, 0, 1, 1], [], []>} : vector<16x16xf32>, vector<16x8xf32>, vector<16x8xf32> -> vector<16x8xf32>
    %393 = vector.extract_strided_slice %346 {offsets = [8, 0], sizes = [8, 32], strides = [1, 1]} : vector<32x32xf32> to vector<8x32xf32>
    %cst_181 = arith.constant dense<0.000000e+00> : vector<16x32xf32>
    %394 = tpu.matmul %392, %393, %cst_181 {dimension_numbers = #tpu.dot_dimension_numbers<[1], [0], [0], [1], [0, 0, 1, 1], [], []>} : vector<16x8xf32>, vector<8x32xf32>, vector<16x32xf32> -> vector<16x32xf32>
    %395 = arith.addf %375, %394 : vector<16x32xf32>
    %396 = vector.extract_strided_slice %352 {offsets = [0, 16], sizes = [16, 8], strides = [1, 1]} : vector<16x32xf32> to vector<16x8xf32>
    %397 = vector.extract_strided_slice %353 {offsets = [0, 16], sizes = [16, 8], strides = [1, 1]} : vector<16x32xf32> to vector<16x8xf32>
    %398 = vector.extract_strided_slice %354 {offsets = [0, 16], sizes = [16, 8], strides = [1, 1]} : vector<16x32xf32> to vector<16x8xf32>
    %cst_182 = arith.constant dense<0.000000e+00> : vector<16x16xf32>
    %399 = tpu.matmul %396, %397, %cst_182 {dimension_numbers = #tpu.dot_dimension_numbers<[1], [1], [0], [0], [0, 0, 1, 0], [], []>} : vector<16x8xf32>, vector<16x8xf32>, vector<16x16xf32> -> vector<16x16xf32>
    %cst_183 = arith.constant 0.353553385 : f32
    %400 = vector.broadcast %cst_183 : f32 to vector<16x16xf32>
    %401 = arith.mulf %399, %400 : vector<16x16xf32>
    %402 = arith.addf %401, %0 : vector<16x16xf32>
    %cst_184 = arith.constant dense<0xFF800000> : vector<16xf32>
    %403 = vector.multi_reduction <maximumf>, %402, %cst_184 [1] : vector<16x16xf32> to vector<16xf32>
    %404 = vector.shape_cast %403 : vector<16xf32> to vector<16x1xf32>
    %405 = vector.broadcast %404 : vector<16x1xf32> to vector<16x16xf32>
    %406 = arith.subf %402, %405 : vector<16x16xf32>
    %407 = math.exp %406 : vector<16x16xf32>
    %cst_185 = arith.constant dense<0.000000e+00> : vector<16xf32>
    %408 = vector.multi_reduction <add>, %407, %cst_185 [1] : vector<16x16xf32> to vector<16xf32>
    %409 = vector.shape_cast %408 : vector<16xf32> to vector<16x1xf32>
    %410 = vector.broadcast %409 : vector<16x1xf32> to vector<16x16xf32>
    %411 = arith.divf %407, %410 : vector<16x16xf32>
    %cst_186 = arith.constant dense<0.000000e+00> : vector<16x8xf32>
    %412 = tpu.matmul %411, %398, %cst_186 {dimension_numbers = #tpu.dot_dimension_numbers<[1], [0], [0], [1], [0, 0, 1, 1], [], []>} : vector<16x16xf32>, vector<16x8xf32>, vector<16x8xf32> -> vector<16x8xf32>
    %413 = vector.extract_strided_slice %346 {offsets = [16, 0], sizes = [8, 32], strides = [1, 1]} : vector<32x32xf32> to vector<8x32xf32>
    %cst_187 = arith.constant dense<0.000000e+00> : vector<16x32xf32>
    %414 = tpu.matmul %412, %413, %cst_187 {dimension_numbers = #tpu.dot_dimension_numbers<[1], [0], [0], [1], [0, 0, 1, 1], [], []>} : vector<16x8xf32>, vector<8x32xf32>, vector<16x32xf32> -> vector<16x32xf32>
    %415 = arith.addf %395, %414 : vector<16x32xf32>
    %416 = vector.extract_strided_slice %352 {offsets = [0, 24], sizes = [16, 8], strides = [1, 1]} : vector<16x32xf32> to vector<16x8xf32>
    %417 = vector.extract_strided_slice %353 {offsets = [0, 24], sizes = [16, 8], strides = [1, 1]} : vector<16x32xf32> to vector<16x8xf32>
    %418 = vector.extract_strided_slice %354 {offsets = [0, 24], sizes = [16, 8], strides = [1, 1]} : vector<16x32xf32> to vector<16x8xf32>
    %cst_188 = arith.constant dense<0.000000e+00> : vector<16x16xf32>
    %419 = tpu.matmul %416, %417, %cst_188 {dimension_numbers = #tpu.dot_dimension_numbers<[1], [1], [0], [0], [0, 0, 1, 0], [], []>} : vector<16x8xf32>, vector<16x8xf32>, vector<16x16xf32> -> vector<16x16xf32>
    %cst_189 = arith.constant 0.353553385 : f32
    %420 = vector.broadcast %cst_189 : f32 to vector<16x16xf32>
    %421 = arith.mulf %419, %420 : vector<16x16xf32>
    %422 = arith.addf %421, %0 : vector<16x16xf32>
    %cst_190 = arith.constant dense<0xFF800000> : vector<16xf32>
    %423 = vector.multi_reduction <maximumf>, %422, %cst_190 [1] : vector<16x16xf32> to vector<16xf32>
    %424 = vector.shape_cast %423 : vector<16xf32> to vector<16x1xf32>
    %425 = vector.broadcast %424 : vector<16x1xf32> to vector<16x16xf32>
    %426 = arith.subf %422, %425 : vector<16x16xf32>
    %427 = math.exp %426 : vector<16x16xf32>
    %cst_191 = arith.constant dense<0.000000e+00> : vector<16xf32>
    %428 = vector.multi_reduction <add>, %427, %cst_191 [1] : vector<16x16xf32> to vector<16xf32>
    %429 = vector.shape_cast %428 : vector<16xf32> to vector<16x1xf32>
    %430 = vector.broadcast %429 : vector<16x1xf32> to vector<16x16xf32>
    %431 = arith.divf %427, %430 : vector<16x16xf32>
    %cst_192 = arith.constant dense<0.000000e+00> : vector<16x8xf32>
    %432 = tpu.matmul %431, %418, %cst_192 {dimension_numbers = #tpu.dot_dimension_numbers<[1], [0], [0], [1], [0, 0, 1, 1], [], []>} : vector<16x16xf32>, vector<16x8xf32>, vector<16x8xf32> -> vector<16x8xf32>
    %433 = vector.extract_strided_slice %346 {offsets = [24, 0], sizes = [8, 32], strides = [1, 1]} : vector<32x32xf32> to vector<8x32xf32>
    %cst_193 = arith.constant dense<0.000000e+00> : vector<16x32xf32>
    %434 = tpu.matmul %432, %433, %cst_193 {dimension_numbers = #tpu.dot_dimension_numbers<[1], [0], [0], [1], [0, 0, 1, 1], [], []>} : vector<16x8xf32>, vector<8x32xf32>, vector<16x32xf32> -> vector<16x32xf32>
    %435 = arith.addf %415, %434 : vector<16x32xf32>
    %c0_194 = arith.constant 0 : index
    %c0_195 = arith.constant 0 : index
    %c0_196 = arith.constant 0 : index
    %436 = vector.load %arg21[%c0_194, %c0_195, %c0_196] : memref<2x1x32xf32, #tpu.memory_space<vmem>>, vector<1x1x32xf32>
    %437 = vector.shape_cast %436 : vector<1x1x32xf32> to vector<1x32xf32>
    %c0_197 = arith.constant 0 : index
    %c0_198 = arith.constant 0 : index
    %c0_199 = arith.constant 0 : index
    %438 = vector.load %arg22[%c0_197, %c0_198, %c0_199] : memref<2x1x32xf32, #tpu.memory_space<vmem>>, vector<1x1x32xf32>
    %439 = vector.shape_cast %438 : vector<1x1x32xf32> to vector<1x32xf32>
    %440 = arith.addf %340, %435 : vector<16x32xf32>
    %cst_200 = arith.constant dense<0.000000e+00> : vector<16xf32>
    %441 = vector.multi_reduction <add>, %440, %cst_200 [1] : vector<16x32xf32> to vector<16xf32>
    %442 = vector.shape_cast %441 : vector<16xf32> to vector<16x1xf32>
    %cst_201 = arith.constant 3.200000e+01 : f32
    %443 = vector.broadcast %cst_201 : f32 to vector<16x1xf32>
    %444 = arith.divf %442, %443 : vector<16x1xf32>
    %445 = vector.broadcast %444 : vector<16x1xf32> to vector<16x32xf32>
    %446 = arith.subf %440, %445 : vector<16x32xf32>
    %447 = arith.mulf %446, %446 : vector<16x32xf32>
    %cst_202 = arith.constant dense<0.000000e+00> : vector<16xf32>
    %448 = vector.multi_reduction <add>, %447, %cst_202 [1] : vector<16x32xf32> to vector<16xf32>
    %449 = vector.shape_cast %448 : vector<16xf32> to vector<16x1xf32>
    %cst_203 = arith.constant 3.200000e+01 : f32
    %450 = vector.broadcast %cst_203 : f32 to vector<16x1xf32>
    %451 = arith.divf %449, %450 : vector<16x1xf32>
    %452 = vector.broadcast %444 : vector<16x1xf32> to vector<16x32xf32>
    %453 = arith.subf %440, %452 : vector<16x32xf32>
    %cst_204 = arith.constant 9.99999974E-6 : f32
    %454 = vector.broadcast %cst_204 : f32 to vector<16x1xf32>
    %455 = arith.addf %451, %454 : vector<16x1xf32>
    %456 = math.rsqrt %455 : vector<16x1xf32>
    %457 = vector.broadcast %456 : vector<16x1xf32> to vector<16x32xf32>
    %458 = arith.mulf %453, %457 : vector<16x32xf32>
    %459 = vector.broadcast %437 : vector<1x32xf32> to vector<16x32xf32>
    %460 = arith.mulf %458, %459 : vector<16x32xf32>
    %461 = vector.broadcast %439 : vector<1x32xf32> to vector<16x32xf32>
    %462 = arith.addf %460, %461 : vector<16x32xf32>
    %c0_205 = arith.constant 0 : index
    %c0_206 = arith.constant 0 : index
    %c0_207 = arith.constant 0 : index
    %463 = vector.load %arg23[%c0_205, %c0_206, %c0_207] : memref<2x32x32xf32, #tpu.memory_space<vmem>>, vector<1x32x32xf32>
    %464 = vector.shape_cast %463 : vector<1x32x32xf32> to vector<32x32xf32>
    %c0_208 = arith.constant 0 : index
    %c0_209 = arith.constant 0 : index
    %c0_210 = arith.constant 0 : index
    %465 = vector.load %arg24[%c0_208, %c0_209, %c0_210] : memref<2x1x32xf32, #tpu.memory_space<vmem>>, vector<1x1x32xf32>
    %466 = vector.shape_cast %465 : vector<1x1x32xf32> to vector<1x32xf32>
    %c0_211 = arith.constant 0 : index
    %c0_212 = arith.constant 0 : index
    %c0_213 = arith.constant 0 : index
    %467 = vector.load %arg25[%c0_211, %c0_212, %c0_213] : memref<2x32x64xf32, #tpu.memory_space<vmem>>, vector<1x32x64xf32>
    %468 = vector.shape_cast %467 : vector<1x32x64xf32> to vector<32x64xf32>
    %c0_214 = arith.constant 0 : index
    %c0_215 = arith.constant 0 : index
    %c0_216 = arith.constant 0 : index
    %469 = vector.load %arg26[%c0_214, %c0_215, %c0_216] : memref<2x1x64xf32, #tpu.memory_space<vmem>>, vector<1x1x64xf32>
    %470 = vector.shape_cast %469 : vector<1x1x64xf32> to vector<1x64xf32>
    %c0_217 = arith.constant 0 : index
    %c0_218 = arith.constant 0 : index
    %c0_219 = arith.constant 0 : index
    %471 = vector.load %arg27[%c0_217, %c0_218, %c0_219] : memref<2x32x32xf32, #tpu.memory_space<vmem>>, vector<1x32x32xf32>
    %472 = vector.shape_cast %471 : vector<1x32x32xf32> to vector<32x32xf32>
    %c0_220 = arith.constant 0 : index
    %c0_221 = arith.constant 0 : index
    %c0_222 = arith.constant 0 : index
    %473 = vector.load %arg28[%c0_220, %c0_221, %c0_222] : memref<2x1x32xf32, #tpu.memory_space<vmem>>, vector<1x1x32xf32>
    %474 = vector.shape_cast %473 : vector<1x1x32xf32> to vector<1x32xf32>
    %cst_223 = arith.constant dense<0.000000e+00> : vector<16x32xf32>
    %475 = tpu.matmul %462, %464, %cst_223 {dimension_numbers = #tpu.dot_dimension_numbers<[1], [0], [0], [1], [0, 0, 1, 1], [], []>} : vector<16x32xf32>, vector<32x32xf32>, vector<16x32xf32> -> vector<16x32xf32>
    %476 = vector.broadcast %466 : vector<1x32xf32> to vector<16x32xf32>
    %477 = arith.addf %475, %476 : vector<16x32xf32>
    %cst_224 = arith.constant dense<0.000000e+00> : vector<16x64xf32>
    %478 = tpu.matmul %340, %468, %cst_224 {dimension_numbers = #tpu.dot_dimension_numbers<[1], [0], [0], [1], [0, 0, 1, 1], [], []>} : vector<16x32xf32>, vector<32x64xf32>, vector<16x64xf32> -> vector<16x64xf32>
    %479 = vector.broadcast %470 : vector<1x64xf32> to vector<16x64xf32>
    %480 = arith.addf %478, %479 : vector<16x64xf32>
    %481 = vector.extract_strided_slice %480 {offsets = [0, 0], sizes = [16, 32], strides = [1, 1]} : vector<16x64xf32> to vector<16x32xf32>
    %482 = vector.extract_strided_slice %480 {offsets = [0, 32], sizes = [16, 32], strides = [1, 1]} : vector<16x64xf32> to vector<16x32xf32>
    %483 = vector.extract_strided_slice %477 {offsets = [0, 0], sizes = [16, 8], strides = [1, 1]} : vector<16x32xf32> to vector<16x8xf32>
    %484 = vector.extract_strided_slice %481 {offsets = [0, 0], sizes = [16, 8], strides = [1, 1]} : vector<16x32xf32> to vector<16x8xf32>
    %485 = vector.extract_strided_slice %482 {offsets = [0, 0], sizes = [16, 8], strides = [1, 1]} : vector<16x32xf32> to vector<16x8xf32>
    %cst_225 = arith.constant dense<0.000000e+00> : vector<16x16xf32>
    %486 = tpu.matmul %483, %484, %cst_225 {dimension_numbers = #tpu.dot_dimension_numbers<[1], [1], [0], [0], [0, 0, 1, 0], [], []>} : vector<16x8xf32>, vector<16x8xf32>, vector<16x16xf32> -> vector<16x16xf32>
    %cst_226 = arith.constant 0.353553385 : f32
    %487 = vector.broadcast %cst_226 : f32 to vector<16x16xf32>
    %488 = arith.mulf %486, %487 : vector<16x16xf32>
    %489 = arith.addf %488, %0 : vector<16x16xf32>
    %cst_227 = arith.constant dense<0xFF800000> : vector<16xf32>
    %490 = vector.multi_reduction <maximumf>, %489, %cst_227 [1] : vector<16x16xf32> to vector<16xf32>
    %491 = vector.shape_cast %490 : vector<16xf32> to vector<16x1xf32>
    %492 = vector.broadcast %491 : vector<16x1xf32> to vector<16x16xf32>
    %493 = arith.subf %489, %492 : vector<16x16xf32>
    %494 = math.exp %493 : vector<16x16xf32>
    %cst_228 = arith.constant dense<0.000000e+00> : vector<16xf32>
    %495 = vector.multi_reduction <add>, %494, %cst_228 [1] : vector<16x16xf32> to vector<16xf32>
    %496 = vector.shape_cast %495 : vector<16xf32> to vector<16x1xf32>
    %497 = vector.broadcast %496 : vector<16x1xf32> to vector<16x16xf32>
    %498 = arith.divf %494, %497 : vector<16x16xf32>
    %cst_229 = arith.constant dense<0.000000e+00> : vector<16x8xf32>
    %499 = tpu.matmul %498, %485, %cst_229 {dimension_numbers = #tpu.dot_dimension_numbers<[1], [0], [0], [1], [0, 0, 1, 1], [], []>} : vector<16x16xf32>, vector<16x8xf32>, vector<16x8xf32> -> vector<16x8xf32>
    %500 = vector.extract_strided_slice %472 {offsets = [0, 0], sizes = [8, 32], strides = [1, 1]} : vector<32x32xf32> to vector<8x32xf32>
    %cst_230 = arith.constant dense<0.000000e+00> : vector<16x32xf32>
    %501 = tpu.matmul %499, %500, %cst_230 {dimension_numbers = #tpu.dot_dimension_numbers<[1], [0], [0], [1], [0, 0, 1, 1], [], []>} : vector<16x8xf32>, vector<8x32xf32>, vector<16x32xf32> -> vector<16x32xf32>
    %502 = vector.broadcast %474 : vector<1x32xf32> to vector<16x32xf32>
    %503 = arith.addf %502, %501 : vector<16x32xf32>
    %504 = vector.extract_strided_slice %477 {offsets = [0, 8], sizes = [16, 8], strides = [1, 1]} : vector<16x32xf32> to vector<16x8xf32>
    %505 = vector.extract_strided_slice %481 {offsets = [0, 8], sizes = [16, 8], strides = [1, 1]} : vector<16x32xf32> to vector<16x8xf32>
    %506 = vector.extract_strided_slice %482 {offsets = [0, 8], sizes = [16, 8], strides = [1, 1]} : vector<16x32xf32> to vector<16x8xf32>
    %cst_231 = arith.constant dense<0.000000e+00> : vector<16x16xf32>
    %507 = tpu.matmul %504, %505, %cst_231 {dimension_numbers = #tpu.dot_dimension_numbers<[1], [1], [0], [0], [0, 0, 1, 0], [], []>} : vector<16x8xf32>, vector<16x8xf32>, vector<16x16xf32> -> vector<16x16xf32>
    %cst_232 = arith.constant 0.353553385 : f32
    %508 = vector.broadcast %cst_232 : f32 to vector<16x16xf32>
    %509 = arith.mulf %507, %508 : vector<16x16xf32>
    %510 = arith.addf %509, %0 : vector<16x16xf32>
    %cst_233 = arith.constant dense<0xFF800000> : vector<16xf32>
    %511 = vector.multi_reduction <maximumf>, %510, %cst_233 [1] : vector<16x16xf32> to vector<16xf32>
    %512 = vector.shape_cast %511 : vector<16xf32> to vector<16x1xf32>
    %513 = vector.broadcast %512 : vector<16x1xf32> to vector<16x16xf32>
    %514 = arith.subf %510, %513 : vector<16x16xf32>
    %515 = math.exp %514 : vector<16x16xf32>
    %cst_234 = arith.constant dense<0.000000e+00> : vector<16xf32>
    %516 = vector.multi_reduction <add>, %515, %cst_234 [1] : vector<16x16xf32> to vector<16xf32>
    %517 = vector.shape_cast %516 : vector<16xf32> to vector<16x1xf32>
    %518 = vector.broadcast %517 : vector<16x1xf32> to vector<16x16xf32>
    %519 = arith.divf %515, %518 : vector<16x16xf32>
    %cst_235 = arith.constant dense<0.000000e+00> : vector<16x8xf32>
    %520 = tpu.matmul %519, %506, %cst_235 {dimension_numbers = #tpu.dot_dimension_numbers<[1], [0], [0], [1], [0, 0, 1, 1], [], []>} : vector<16x16xf32>, vector<16x8xf32>, vector<16x8xf32> -> vector<16x8xf32>
    %521 = vector.extract_strided_slice %472 {offsets = [8, 0], sizes = [8, 32], strides = [1, 1]} : vector<32x32xf32> to vector<8x32xf32>
    %cst_236 = arith.constant dense<0.000000e+00> : vector<16x32xf32>
    %522 = tpu.matmul %520, %521, %cst_236 {dimension_numbers = #tpu.dot_dimension_numbers<[1], [0], [0], [1], [0, 0, 1, 1], [], []>} : vector<16x8xf32>, vector<8x32xf32>, vector<16x32xf32> -> vector<16x32xf32>
    %523 = arith.addf %503, %522 : vector<16x32xf32>
    %524 = vector.extract_strided_slice %477 {offsets = [0, 16], sizes = [16, 8], strides = [1, 1]} : vector<16x32xf32> to vector<16x8xf32>
    %525 = vector.extract_strided_slice %481 {offsets = [0, 16], sizes = [16, 8], strides = [1, 1]} : vector<16x32xf32> to vector<16x8xf32>
    %526 = vector.extract_strided_slice %482 {offsets = [0, 16], sizes = [16, 8], strides = [1, 1]} : vector<16x32xf32> to vector<16x8xf32>
    %cst_237 = arith.constant dense<0.000000e+00> : vector<16x16xf32>
    %527 = tpu.matmul %524, %525, %cst_237 {dimension_numbers = #tpu.dot_dimension_numbers<[1], [1], [0], [0], [0, 0, 1, 0], [], []>} : vector<16x8xf32>, vector<16x8xf32>, vector<16x16xf32> -> vector<16x16xf32>
    %cst_238 = arith.constant 0.353553385 : f32
    %528 = vector.broadcast %cst_238 : f32 to vector<16x16xf32>
    %529 = arith.mulf %527, %528 : vector<16x16xf32>
    %530 = arith.addf %529, %0 : vector<16x16xf32>
    %cst_239 = arith.constant dense<0xFF800000> : vector<16xf32>
    %531 = vector.multi_reduction <maximumf>, %530, %cst_239 [1] : vector<16x16xf32> to vector<16xf32>
    %532 = vector.shape_cast %531 : vector<16xf32> to vector<16x1xf32>
    %533 = vector.broadcast %532 : vector<16x1xf32> to vector<16x16xf32>
    %534 = arith.subf %530, %533 : vector<16x16xf32>
    %535 = math.exp %534 : vector<16x16xf32>
    %cst_240 = arith.constant dense<0.000000e+00> : vector<16xf32>
    %536 = vector.multi_reduction <add>, %535, %cst_240 [1] : vector<16x16xf32> to vector<16xf32>
    %537 = vector.shape_cast %536 : vector<16xf32> to vector<16x1xf32>
    %538 = vector.broadcast %537 : vector<16x1xf32> to vector<16x16xf32>
    %539 = arith.divf %535, %538 : vector<16x16xf32>
    %cst_241 = arith.constant dense<0.000000e+00> : vector<16x8xf32>
    %540 = tpu.matmul %539, %526, %cst_241 {dimension_numbers = #tpu.dot_dimension_numbers<[1], [0], [0], [1], [0, 0, 1, 1], [], []>} : vector<16x16xf32>, vector<16x8xf32>, vector<16x8xf32> -> vector<16x8xf32>
    %541 = vector.extract_strided_slice %472 {offsets = [16, 0], sizes = [8, 32], strides = [1, 1]} : vector<32x32xf32> to vector<8x32xf32>
    %cst_242 = arith.constant dense<0.000000e+00> : vector<16x32xf32>
    %542 = tpu.matmul %540, %541, %cst_242 {dimension_numbers = #tpu.dot_dimension_numbers<[1], [0], [0], [1], [0, 0, 1, 1], [], []>} : vector<16x8xf32>, vector<8x32xf32>, vector<16x32xf32> -> vector<16x32xf32>
    %543 = arith.addf %523, %542 : vector<16x32xf32>
    %544 = vector.extract_strided_slice %477 {offsets = [0, 24], sizes = [16, 8], strides = [1, 1]} : vector<16x32xf32> to vector<16x8xf32>
    %545 = vector.extract_strided_slice %481 {offsets = [0, 24], sizes = [16, 8], strides = [1, 1]} : vector<16x32xf32> to vector<16x8xf32>
    %546 = vector.extract_strided_slice %482 {offsets = [0, 24], sizes = [16, 8], strides = [1, 1]} : vector<16x32xf32> to vector<16x8xf32>
    %cst_243 = arith.constant dense<0.000000e+00> : vector<16x16xf32>
    %547 = tpu.matmul %544, %545, %cst_243 {dimension_numbers = #tpu.dot_dimension_numbers<[1], [1], [0], [0], [0, 0, 1, 0], [], []>} : vector<16x8xf32>, vector<16x8xf32>, vector<16x16xf32> -> vector<16x16xf32>
    %cst_244 = arith.constant 0.353553385 : f32
    %548 = vector.broadcast %cst_244 : f32 to vector<16x16xf32>
    %549 = arith.mulf %547, %548 : vector<16x16xf32>
    %550 = arith.addf %549, %0 : vector<16x16xf32>
    %cst_245 = arith.constant dense<0xFF800000> : vector<16xf32>
    %551 = vector.multi_reduction <maximumf>, %550, %cst_245 [1] : vector<16x16xf32> to vector<16xf32>
    %552 = vector.shape_cast %551 : vector<16xf32> to vector<16x1xf32>
    %553 = vector.broadcast %552 : vector<16x1xf32> to vector<16x16xf32>
    %554 = arith.subf %550, %553 : vector<16x16xf32>
    %555 = math.exp %554 : vector<16x16xf32>
    %cst_246 = arith.constant dense<0.000000e+00> : vector<16xf32>
    %556 = vector.multi_reduction <add>, %555, %cst_246 [1] : vector<16x16xf32> to vector<16xf32>
    %557 = vector.shape_cast %556 : vector<16xf32> to vector<16x1xf32>
    %558 = vector.broadcast %557 : vector<16x1xf32> to vector<16x16xf32>
    %559 = arith.divf %555, %558 : vector<16x16xf32>
    %cst_247 = arith.constant dense<0.000000e+00> : vector<16x8xf32>
    %560 = tpu.matmul %559, %546, %cst_247 {dimension_numbers = #tpu.dot_dimension_numbers<[1], [0], [0], [1], [0, 0, 1, 1], [], []>} : vector<16x16xf32>, vector<16x8xf32>, vector<16x8xf32> -> vector<16x8xf32>
    %561 = vector.extract_strided_slice %472 {offsets = [24, 0], sizes = [8, 32], strides = [1, 1]} : vector<32x32xf32> to vector<8x32xf32>
    %cst_248 = arith.constant dense<0.000000e+00> : vector<16x32xf32>
    %562 = tpu.matmul %560, %561, %cst_248 {dimension_numbers = #tpu.dot_dimension_numbers<[1], [0], [0], [1], [0, 0, 1, 1], [], []>} : vector<16x8xf32>, vector<8x32xf32>, vector<16x32xf32> -> vector<16x32xf32>
    %563 = arith.addf %543, %562 : vector<16x32xf32>
    %c0_249 = arith.constant 0 : index
    %c0_250 = arith.constant 0 : index
    %c0_251 = arith.constant 0 : index
    %564 = vector.load %arg29[%c0_249, %c0_250, %c0_251] : memref<2x1x32xf32, #tpu.memory_space<vmem>>, vector<1x1x32xf32>
    %565 = vector.shape_cast %564 : vector<1x1x32xf32> to vector<1x32xf32>
    %c0_252 = arith.constant 0 : index
    %c0_253 = arith.constant 0 : index
    %c0_254 = arith.constant 0 : index
    %566 = vector.load %arg30[%c0_252, %c0_253, %c0_254] : memref<2x1x32xf32, #tpu.memory_space<vmem>>, vector<1x1x32xf32>
    %567 = vector.shape_cast %566 : vector<1x1x32xf32> to vector<1x32xf32>
    %568 = arith.addf %462, %563 : vector<16x32xf32>
    %cst_255 = arith.constant dense<0.000000e+00> : vector<16xf32>
    %569 = vector.multi_reduction <add>, %568, %cst_255 [1] : vector<16x32xf32> to vector<16xf32>
    %570 = vector.shape_cast %569 : vector<16xf32> to vector<16x1xf32>
    %cst_256 = arith.constant 3.200000e+01 : f32
    %571 = vector.broadcast %cst_256 : f32 to vector<16x1xf32>
    %572 = arith.divf %570, %571 : vector<16x1xf32>
    %573 = vector.broadcast %572 : vector<16x1xf32> to vector<16x32xf32>
    %574 = arith.subf %568, %573 : vector<16x32xf32>
    %575 = arith.mulf %574, %574 : vector<16x32xf32>
    %cst_257 = arith.constant dense<0.000000e+00> : vector<16xf32>
    %576 = vector.multi_reduction <add>, %575, %cst_257 [1] : vector<16x32xf32> to vector<16xf32>
    %577 = vector.shape_cast %576 : vector<16xf32> to vector<16x1xf32>
    %cst_258 = arith.constant 3.200000e+01 : f32
    %578 = vector.broadcast %cst_258 : f32 to vector<16x1xf32>
    %579 = arith.divf %577, %578 : vector<16x1xf32>
    %580 = vector.broadcast %572 : vector<16x1xf32> to vector<16x32xf32>
    %581 = arith.subf %568, %580 : vector<16x32xf32>
    %cst_259 = arith.constant 9.99999974E-6 : f32
    %582 = vector.broadcast %cst_259 : f32 to vector<16x1xf32>
    %583 = arith.addf %579, %582 : vector<16x1xf32>
    %584 = math.rsqrt %583 : vector<16x1xf32>
    %585 = vector.broadcast %584 : vector<16x1xf32> to vector<16x32xf32>
    %586 = arith.mulf %581, %585 : vector<16x32xf32>
    %587 = vector.broadcast %565 : vector<1x32xf32> to vector<16x32xf32>
    %588 = arith.mulf %586, %587 : vector<16x32xf32>
    %589 = vector.broadcast %567 : vector<1x32xf32> to vector<16x32xf32>
    %590 = arith.addf %588, %589 : vector<16x32xf32>
    %c0_260 = arith.constant 0 : index
    %c0_261 = arith.constant 0 : index
    %c0_262 = arith.constant 0 : index
    %591 = vector.load %arg31[%c0_260, %c0_261, %c0_262] : memref<2x32x2048xf32, #tpu.memory_space<vmem>>, vector<1x32x2048xf32>
    %592 = vector.shape_cast %591 : vector<1x32x2048xf32> to vector<32x2048xf32>
    %c0_263 = arith.constant 0 : index
    %c0_264 = arith.constant 0 : index
    %c0_265 = arith.constant 0 : index
    %593 = vector.load %arg32[%c0_263, %c0_264, %c0_265] : memref<2x1x2048xf32, #tpu.memory_space<vmem>>, vector<1x1x2048xf32>
    %594 = vector.shape_cast %593 : vector<1x1x2048xf32> to vector<1x2048xf32>
    %c0_266 = arith.constant 0 : index
    %c0_267 = arith.constant 0 : index
    %c0_268 = arith.constant 0 : index
    %595 = vector.load %arg33[%c0_266, %c0_267, %c0_268] : memref<2x2048x32xf32, #tpu.memory_space<vmem>>, vector<1x2048x32xf32>
    %596 = vector.shape_cast %595 : vector<1x2048x32xf32> to vector<2048x32xf32>
    %c0_269 = arith.constant 0 : index
    %c0_270 = arith.constant 0 : index
    %c0_271 = arith.constant 0 : index
    %597 = vector.load %arg34[%c0_269, %c0_270, %c0_271] : memref<2x1x32xf32, #tpu.memory_space<vmem>>, vector<1x1x32xf32>
    %598 = vector.shape_cast %597 : vector<1x1x32xf32> to vector<1x32xf32>
    %cst_272 = arith.constant dense<0.000000e+00> : vector<16x2048xf32>
    %599 = tpu.matmul %590, %592, %cst_272 {dimension_numbers = #tpu.dot_dimension_numbers<[1], [0], [0], [1], [0, 0, 1, 1], [], []>} : vector<16x32xf32>, vector<32x2048xf32>, vector<16x2048xf32> -> vector<16x2048xf32>
    %600 = vector.broadcast %594 : vector<1x2048xf32> to vector<16x2048xf32>
    %601 = arith.addf %599, %600 : vector<16x2048xf32>
    %cst_273 = arith.constant 0.000000e+00 : f32
    %602 = vector.broadcast %cst_273 : f32 to vector<16x2048xf32>
    %603 = arith.maximumf %601, %602 : vector<16x2048xf32>
    %cst_274 = arith.constant dense<0.000000e+00> : vector<16x32xf32>
    %604 = tpu.matmul %603, %596, %cst_274 {dimension_numbers = #tpu.dot_dimension_numbers<[1], [0], [0], [1], [0, 0, 1, 1], [], []>} : vector<16x2048xf32>, vector<2048x32xf32>, vector<16x32xf32> -> vector<16x32xf32>
    %605 = vector.broadcast %598 : vector<1x32xf32> to vector<16x32xf32>
    %606 = arith.addf %604, %605 : vector<16x32xf32>
    %c0_275 = arith.constant 0 : index
    %c0_276 = arith.constant 0 : index
    %c0_277 = arith.constant 0 : index
    %607 = vector.load %arg35[%c0_275, %c0_276, %c0_277] : memref<2x1x32xf32, #tpu.memory_space<vmem>>, vector<1x1x32xf32>
    %608 = vector.shape_cast %607 : vector<1x1x32xf32> to vector<1x32xf32>
    %c0_278 = arith.constant 0 : index
    %c0_279 = arith.constant 0 : index
    %c0_280 = arith.constant 0 : index
    %609 = vector.load %arg36[%c0_278, %c0_279, %c0_280] : memref<2x1x32xf32, #tpu.memory_space<vmem>>, vector<1x1x32xf32>
    %610 = vector.shape_cast %609 : vector<1x1x32xf32> to vector<1x32xf32>
    %611 = arith.addf %590, %606 : vector<16x32xf32>
    %cst_281 = arith.constant dense<0.000000e+00> : vector<16xf32>
    %612 = vector.multi_reduction <add>, %611, %cst_281 [1] : vector<16x32xf32> to vector<16xf32>
    %613 = vector.shape_cast %612 : vector<16xf32> to vector<16x1xf32>
    %cst_282 = arith.constant 3.200000e+01 : f32
    %614 = vector.broadcast %cst_282 : f32 to vector<16x1xf32>
    %615 = arith.divf %613, %614 : vector<16x1xf32>
    %616 = vector.broadcast %615 : vector<16x1xf32> to vector<16x32xf32>
    %617 = arith.subf %611, %616 : vector<16x32xf32>
    %618 = arith.mulf %617, %617 : vector<16x32xf32>
    %cst_283 = arith.constant dense<0.000000e+00> : vector<16xf32>
    %619 = vector.multi_reduction <add>, %618, %cst_283 [1] : vector<16x32xf32> to vector<16xf32>
    %620 = vector.shape_cast %619 : vector<16xf32> to vector<16x1xf32>
    %cst_284 = arith.constant 3.200000e+01 : f32
    %621 = vector.broadcast %cst_284 : f32 to vector<16x1xf32>
    %622 = arith.divf %620, %621 : vector<16x1xf32>
    %623 = vector.broadcast %615 : vector<16x1xf32> to vector<16x32xf32>
    %624 = arith.subf %611, %623 : vector<16x32xf32>
    %cst_285 = arith.constant 9.99999974E-6 : f32
    %625 = vector.broadcast %cst_285 : f32 to vector<16x1xf32>
    %626 = arith.addf %622, %625 : vector<16x1xf32>
    %627 = math.rsqrt %626 : vector<16x1xf32>
    %628 = vector.broadcast %627 : vector<16x1xf32> to vector<16x32xf32>
    %629 = arith.mulf %624, %628 : vector<16x32xf32>
    %630 = vector.broadcast %608 : vector<1x32xf32> to vector<16x32xf32>
    %631 = arith.mulf %629, %630 : vector<16x32xf32>
    %632 = vector.broadcast %610 : vector<1x32xf32> to vector<16x32xf32>
    %633 = arith.addf %631, %632 : vector<16x32xf32>
    %c1_286 = arith.constant 1 : index
    %c0_287 = arith.constant 0 : index
    %c0_288 = arith.constant 0 : index
    %634 = vector.load %arg17[%c1_286, %c0_287, %c0_288] : memref<2x32x96xf32, #tpu.memory_space<vmem>>, vector<1x32x96xf32>
    %635 = vector.shape_cast %634 : vector<1x32x96xf32> to vector<32x96xf32>
    %c1_289 = arith.constant 1 : index
    %c0_290 = arith.constant 0 : index
    %c0_291 = arith.constant 0 : index
    %636 = vector.load %arg18[%c1_289, %c0_290, %c0_291] : memref<2x1x96xf32, #tpu.memory_space<vmem>>, vector<1x1x96xf32>
    %637 = vector.shape_cast %636 : vector<1x1x96xf32> to vector<1x96xf32>
    %c1_292 = arith.constant 1 : index
    %c0_293 = arith.constant 0 : index
    %c0_294 = arith.constant 0 : index
    %638 = vector.load %arg19[%c1_292, %c0_293, %c0_294] : memref<2x32x32xf32, #tpu.memory_space<vmem>>, vector<1x32x32xf32>
    %639 = vector.shape_cast %638 : vector<1x32x32xf32> to vector<32x32xf32>
    %c1_295 = arith.constant 1 : index
    %c0_296 = arith.constant 0 : index
    %c0_297 = arith.constant 0 : index
    %640 = vector.load %arg20[%c1_295, %c0_296, %c0_297] : memref<2x1x32xf32, #tpu.memory_space<vmem>>, vector<1x1x32xf32>
    %641 = vector.shape_cast %640 : vector<1x1x32xf32> to vector<1x32xf32>
    %cst_298 = arith.constant dense<0.000000e+00> : vector<16x96xf32>
    %642 = tpu.matmul %633, %635, %cst_298 {dimension_numbers = #tpu.dot_dimension_numbers<[1], [0], [0], [1], [0, 0, 1, 1], [], []>} : vector<16x32xf32>, vector<32x96xf32>, vector<16x96xf32> -> vector<16x96xf32>
    %643 = vector.broadcast %637 : vector<1x96xf32> to vector<16x96xf32>
    %644 = arith.addf %642, %643 : vector<16x96xf32>
    %645 = vector.extract_strided_slice %644 {offsets = [0, 0], sizes = [16, 32], strides = [1, 1]} : vector<16x96xf32> to vector<16x32xf32>
    %646 = vector.extract_strided_slice %644 {offsets = [0, 32], sizes = [16, 32], strides = [1, 1]} : vector<16x96xf32> to vector<16x32xf32>
    %647 = vector.extract_strided_slice %644 {offsets = [0, 64], sizes = [16, 32], strides = [1, 1]} : vector<16x96xf32> to vector<16x32xf32>
    %648 = vector.extract_strided_slice %645 {offsets = [0, 0], sizes = [16, 8], strides = [1, 1]} : vector<16x32xf32> to vector<16x8xf32>
    %649 = vector.extract_strided_slice %646 {offsets = [0, 0], sizes = [16, 8], strides = [1, 1]} : vector<16x32xf32> to vector<16x8xf32>
    %650 = vector.extract_strided_slice %647 {offsets = [0, 0], sizes = [16, 8], strides = [1, 1]} : vector<16x32xf32> to vector<16x8xf32>
    %cst_299 = arith.constant dense<0.000000e+00> : vector<16x16xf32>
    %651 = tpu.matmul %648, %649, %cst_299 {dimension_numbers = #tpu.dot_dimension_numbers<[1], [1], [0], [0], [0, 0, 1, 0], [], []>} : vector<16x8xf32>, vector<16x8xf32>, vector<16x16xf32> -> vector<16x16xf32>
    %cst_300 = arith.constant 0.353553385 : f32
    %652 = vector.broadcast %cst_300 : f32 to vector<16x16xf32>
    %653 = arith.mulf %651, %652 : vector<16x16xf32>
    %654 = arith.addf %653, %0 : vector<16x16xf32>
    %cst_301 = arith.constant dense<0xFF800000> : vector<16xf32>
    %655 = vector.multi_reduction <maximumf>, %654, %cst_301 [1] : vector<16x16xf32> to vector<16xf32>
    %656 = vector.shape_cast %655 : vector<16xf32> to vector<16x1xf32>
    %657 = vector.broadcast %656 : vector<16x1xf32> to vector<16x16xf32>
    %658 = arith.subf %654, %657 : vector<16x16xf32>
    %659 = math.exp %658 : vector<16x16xf32>
    %cst_302 = arith.constant dense<0.000000e+00> : vector<16xf32>
    %660 = vector.multi_reduction <add>, %659, %cst_302 [1] : vector<16x16xf32> to vector<16xf32>
    %661 = vector.shape_cast %660 : vector<16xf32> to vector<16x1xf32>
    %662 = vector.broadcast %661 : vector<16x1xf32> to vector<16x16xf32>
    %663 = arith.divf %659, %662 : vector<16x16xf32>
    %cst_303 = arith.constant dense<0.000000e+00> : vector<16x8xf32>
    %664 = tpu.matmul %663, %650, %cst_303 {dimension_numbers = #tpu.dot_dimension_numbers<[1], [0], [0], [1], [0, 0, 1, 1], [], []>} : vector<16x16xf32>, vector<16x8xf32>, vector<16x8xf32> -> vector<16x8xf32>
    %665 = vector.extract_strided_slice %639 {offsets = [0, 0], sizes = [8, 32], strides = [1, 1]} : vector<32x32xf32> to vector<8x32xf32>
    %cst_304 = arith.constant dense<0.000000e+00> : vector<16x32xf32>
    %666 = tpu.matmul %664, %665, %cst_304 {dimension_numbers = #tpu.dot_dimension_numbers<[1], [0], [0], [1], [0, 0, 1, 1], [], []>} : vector<16x8xf32>, vector<8x32xf32>, vector<16x32xf32> -> vector<16x32xf32>
    %667 = vector.broadcast %641 : vector<1x32xf32> to vector<16x32xf32>
    %668 = arith.addf %667, %666 : vector<16x32xf32>
    %669 = vector.extract_strided_slice %645 {offsets = [0, 8], sizes = [16, 8], strides = [1, 1]} : vector<16x32xf32> to vector<16x8xf32>
    %670 = vector.extract_strided_slice %646 {offsets = [0, 8], sizes = [16, 8], strides = [1, 1]} : vector<16x32xf32> to vector<16x8xf32>
    %671 = vector.extract_strided_slice %647 {offsets = [0, 8], sizes = [16, 8], strides = [1, 1]} : vector<16x32xf32> to vector<16x8xf32>
    %cst_305 = arith.constant dense<0.000000e+00> : vector<16x16xf32>
    %672 = tpu.matmul %669, %670, %cst_305 {dimension_numbers = #tpu.dot_dimension_numbers<[1], [1], [0], [0], [0, 0, 1, 0], [], []>} : vector<16x8xf32>, vector<16x8xf32>, vector<16x16xf32> -> vector<16x16xf32>
    %cst_306 = arith.constant 0.353553385 : f32
    %673 = vector.broadcast %cst_306 : f32 to vector<16x16xf32>
    %674 = arith.mulf %672, %673 : vector<16x16xf32>
    %675 = arith.addf %674, %0 : vector<16x16xf32>
    %cst_307 = arith.constant dense<0xFF800000> : vector<16xf32>
    %676 = vector.multi_reduction <maximumf>, %675, %cst_307 [1] : vector<16x16xf32> to vector<16xf32>
    %677 = vector.shape_cast %676 : vector<16xf32> to vector<16x1xf32>
    %678 = vector.broadcast %677 : vector<16x1xf32> to vector<16x16xf32>
    %679 = arith.subf %675, %678 : vector<16x16xf32>
    %680 = math.exp %679 : vector<16x16xf32>
    %cst_308 = arith.constant dense<0.000000e+00> : vector<16xf32>
    %681 = vector.multi_reduction <add>, %680, %cst_308 [1] : vector<16x16xf32> to vector<16xf32>
    %682 = vector.shape_cast %681 : vector<16xf32> to vector<16x1xf32>
    %683 = vector.broadcast %682 : vector<16x1xf32> to vector<16x16xf32>
    %684 = arith.divf %680, %683 : vector<16x16xf32>
    %cst_309 = arith.constant dense<0.000000e+00> : vector<16x8xf32>
    %685 = tpu.matmul %684, %671, %cst_309 {dimension_numbers = #tpu.dot_dimension_numbers<[1], [0], [0], [1], [0, 0, 1, 1], [], []>} : vector<16x16xf32>, vector<16x8xf32>, vector<16x8xf32> -> vector<16x8xf32>
    %686 = vector.extract_strided_slice %639 {offsets = [8, 0], sizes = [8, 32], strides = [1, 1]} : vector<32x32xf32> to vector<8x32xf32>
    %cst_310 = arith.constant dense<0.000000e+00> : vector<16x32xf32>
    %687 = tpu.matmul %685, %686, %cst_310 {dimension_numbers = #tpu.dot_dimension_numbers<[1], [0], [0], [1], [0, 0, 1, 1], [], []>} : vector<16x8xf32>, vector<8x32xf32>, vector<16x32xf32> -> vector<16x32xf32>
    %688 = arith.addf %668, %687 : vector<16x32xf32>
    %689 = vector.extract_strided_slice %645 {offsets = [0, 16], sizes = [16, 8], strides = [1, 1]} : vector<16x32xf32> to vector<16x8xf32>
    %690 = vector.extract_strided_slice %646 {offsets = [0, 16], sizes = [16, 8], strides = [1, 1]} : vector<16x32xf32> to vector<16x8xf32>
    %691 = vector.extract_strided_slice %647 {offsets = [0, 16], sizes = [16, 8], strides = [1, 1]} : vector<16x32xf32> to vector<16x8xf32>
    %cst_311 = arith.constant dense<0.000000e+00> : vector<16x16xf32>
    %692 = tpu.matmul %689, %690, %cst_311 {dimension_numbers = #tpu.dot_dimension_numbers<[1], [1], [0], [0], [0, 0, 1, 0], [], []>} : vector<16x8xf32>, vector<16x8xf32>, vector<16x16xf32> -> vector<16x16xf32>
    %cst_312 = arith.constant 0.353553385 : f32
    %693 = vector.broadcast %cst_312 : f32 to vector<16x16xf32>
    %694 = arith.mulf %692, %693 : vector<16x16xf32>
    %695 = arith.addf %694, %0 : vector<16x16xf32>
    %cst_313 = arith.constant dense<0xFF800000> : vector<16xf32>
    %696 = vector.multi_reduction <maximumf>, %695, %cst_313 [1] : vector<16x16xf32> to vector<16xf32>
    %697 = vector.shape_cast %696 : vector<16xf32> to vector<16x1xf32>
    %698 = vector.broadcast %697 : vector<16x1xf32> to vector<16x16xf32>
    %699 = arith.subf %695, %698 : vector<16x16xf32>
    %700 = math.exp %699 : vector<16x16xf32>
    %cst_314 = arith.constant dense<0.000000e+00> : vector<16xf32>
    %701 = vector.multi_reduction <add>, %700, %cst_314 [1] : vector<16x16xf32> to vector<16xf32>
    %702 = vector.shape_cast %701 : vector<16xf32> to vector<16x1xf32>
    %703 = vector.broadcast %702 : vector<16x1xf32> to vector<16x16xf32>
    %704 = arith.divf %700, %703 : vector<16x16xf32>
    %cst_315 = arith.constant dense<0.000000e+00> : vector<16x8xf32>
    %705 = tpu.matmul %704, %691, %cst_315 {dimension_numbers = #tpu.dot_dimension_numbers<[1], [0], [0], [1], [0, 0, 1, 1], [], []>} : vector<16x16xf32>, vector<16x8xf32>, vector<16x8xf32> -> vector<16x8xf32>
    %706 = vector.extract_strided_slice %639 {offsets = [16, 0], sizes = [8, 32], strides = [1, 1]} : vector<32x32xf32> to vector<8x32xf32>
    %cst_316 = arith.constant dense<0.000000e+00> : vector<16x32xf32>
    %707 = tpu.matmul %705, %706, %cst_316 {dimension_numbers = #tpu.dot_dimension_numbers<[1], [0], [0], [1], [0, 0, 1, 1], [], []>} : vector<16x8xf32>, vector<8x32xf32>, vector<16x32xf32> -> vector<16x32xf32>
    %708 = arith.addf %688, %707 : vector<16x32xf32>
    %709 = vector.extract_strided_slice %645 {offsets = [0, 24], sizes = [16, 8], strides = [1, 1]} : vector<16x32xf32> to vector<16x8xf32>
    %710 = vector.extract_strided_slice %646 {offsets = [0, 24], sizes = [16, 8], strides = [1, 1]} : vector<16x32xf32> to vector<16x8xf32>
    %711 = vector.extract_strided_slice %647 {offsets = [0, 24], sizes = [16, 8], strides = [1, 1]} : vector<16x32xf32> to vector<16x8xf32>
    %cst_317 = arith.constant dense<0.000000e+00> : vector<16x16xf32>
    %712 = tpu.matmul %709, %710, %cst_317 {dimension_numbers = #tpu.dot_dimension_numbers<[1], [1], [0], [0], [0, 0, 1, 0], [], []>} : vector<16x8xf32>, vector<16x8xf32>, vector<16x16xf32> -> vector<16x16xf32>
    %cst_318 = arith.constant 0.353553385 : f32
    %713 = vector.broadcast %cst_318 : f32 to vector<16x16xf32>
    %714 = arith.mulf %712, %713 : vector<16x16xf32>
    %715 = arith.addf %714, %0 : vector<16x16xf32>
    %cst_319 = arith.constant dense<0xFF800000> : vector<16xf32>
    %716 = vector.multi_reduction <maximumf>, %715, %cst_319 [1] : vector<16x16xf32> to vector<16xf32>
    %717 = vector.shape_cast %716 : vector<16xf32> to vector<16x1xf32>
    %718 = vector.broadcast %717 : vector<16x1xf32> to vector<16x16xf32>
    %719 = arith.subf %715, %718 : vector<16x16xf32>
    %720 = math.exp %719 : vector<16x16xf32>
    %cst_320 = arith.constant dense<0.000000e+00> : vector<16xf32>
    %721 = vector.multi_reduction <add>, %720, %cst_320 [1] : vector<16x16xf32> to vector<16xf32>
    %722 = vector.shape_cast %721 : vector<16xf32> to vector<16x1xf32>
    %723 = vector.broadcast %722 : vector<16x1xf32> to vector<16x16xf32>
    %724 = arith.divf %720, %723 : vector<16x16xf32>
    %cst_321 = arith.constant dense<0.000000e+00> : vector<16x8xf32>
    %725 = tpu.matmul %724, %711, %cst_321 {dimension_numbers = #tpu.dot_dimension_numbers<[1], [0], [0], [1], [0, 0, 1, 1], [], []>} : vector<16x16xf32>, vector<16x8xf32>, vector<16x8xf32> -> vector<16x8xf32>
    %726 = vector.extract_strided_slice %639 {offsets = [24, 0], sizes = [8, 32], strides = [1, 1]} : vector<32x32xf32> to vector<8x32xf32>
    %cst_322 = arith.constant dense<0.000000e+00> : vector<16x32xf32>
    %727 = tpu.matmul %725, %726, %cst_322 {dimension_numbers = #tpu.dot_dimension_numbers<[1], [0], [0], [1], [0, 0, 1, 1], [], []>} : vector<16x8xf32>, vector<8x32xf32>, vector<16x32xf32> -> vector<16x32xf32>
    %728 = arith.addf %708, %727 : vector<16x32xf32>
    %c1_323 = arith.constant 1 : index
    %c0_324 = arith.constant 0 : index
    %c0_325 = arith.constant 0 : index
    %729 = vector.load %arg21[%c1_323, %c0_324, %c0_325] : memref<2x1x32xf32, #tpu.memory_space<vmem>>, vector<1x1x32xf32>
    %730 = vector.shape_cast %729 : vector<1x1x32xf32> to vector<1x32xf32>
    %c1_326 = arith.constant 1 : index
    %c0_327 = arith.constant 0 : index
    %c0_328 = arith.constant 0 : index
    %731 = vector.load %arg22[%c1_326, %c0_327, %c0_328] : memref<2x1x32xf32, #tpu.memory_space<vmem>>, vector<1x1x32xf32>
    %732 = vector.shape_cast %731 : vector<1x1x32xf32> to vector<1x32xf32>
    %733 = arith.addf %633, %728 : vector<16x32xf32>
    %cst_329 = arith.constant dense<0.000000e+00> : vector<16xf32>
    %734 = vector.multi_reduction <add>, %733, %cst_329 [1] : vector<16x32xf32> to vector<16xf32>
    %735 = vector.shape_cast %734 : vector<16xf32> to vector<16x1xf32>
    %cst_330 = arith.constant 3.200000e+01 : f32
    %736 = vector.broadcast %cst_330 : f32 to vector<16x1xf32>
    %737 = arith.divf %735, %736 : vector<16x1xf32>
    %738 = vector.broadcast %737 : vector<16x1xf32> to vector<16x32xf32>
    %739 = arith.subf %733, %738 : vector<16x32xf32>
    %740 = arith.mulf %739, %739 : vector<16x32xf32>
    %cst_331 = arith.constant dense<0.000000e+00> : vector<16xf32>
    %741 = vector.multi_reduction <add>, %740, %cst_331 [1] : vector<16x32xf32> to vector<16xf32>
    %742 = vector.shape_cast %741 : vector<16xf32> to vector<16x1xf32>
    %cst_332 = arith.constant 3.200000e+01 : f32
    %743 = vector.broadcast %cst_332 : f32 to vector<16x1xf32>
    %744 = arith.divf %742, %743 : vector<16x1xf32>
    %745 = vector.broadcast %737 : vector<16x1xf32> to vector<16x32xf32>
    %746 = arith.subf %733, %745 : vector<16x32xf32>
    %cst_333 = arith.constant 9.99999974E-6 : f32
    %747 = vector.broadcast %cst_333 : f32 to vector<16x1xf32>
    %748 = arith.addf %744, %747 : vector<16x1xf32>
    %749 = math.rsqrt %748 : vector<16x1xf32>
    %750 = vector.broadcast %749 : vector<16x1xf32> to vector<16x32xf32>
    %751 = arith.mulf %746, %750 : vector<16x32xf32>
    %752 = vector.broadcast %730 : vector<1x32xf32> to vector<16x32xf32>
    %753 = arith.mulf %751, %752 : vector<16x32xf32>
    %754 = vector.broadcast %732 : vector<1x32xf32> to vector<16x32xf32>
    %755 = arith.addf %753, %754 : vector<16x32xf32>
    %c1_334 = arith.constant 1 : index
    %c0_335 = arith.constant 0 : index
    %c0_336 = arith.constant 0 : index
    %756 = vector.load %arg23[%c1_334, %c0_335, %c0_336] : memref<2x32x32xf32, #tpu.memory_space<vmem>>, vector<1x32x32xf32>
    %757 = vector.shape_cast %756 : vector<1x32x32xf32> to vector<32x32xf32>
    %c1_337 = arith.constant 1 : index
    %c0_338 = arith.constant 0 : index
    %c0_339 = arith.constant 0 : index
    %758 = vector.load %arg24[%c1_337, %c0_338, %c0_339] : memref<2x1x32xf32, #tpu.memory_space<vmem>>, vector<1x1x32xf32>
    %759 = vector.shape_cast %758 : vector<1x1x32xf32> to vector<1x32xf32>
    %c1_340 = arith.constant 1 : index
    %c0_341 = arith.constant 0 : index
    %c0_342 = arith.constant 0 : index
    %760 = vector.load %arg25[%c1_340, %c0_341, %c0_342] : memref<2x32x64xf32, #tpu.memory_space<vmem>>, vector<1x32x64xf32>
    %761 = vector.shape_cast %760 : vector<1x32x64xf32> to vector<32x64xf32>
    %c1_343 = arith.constant 1 : index
    %c0_344 = arith.constant 0 : index
    %c0_345 = arith.constant 0 : index
    %762 = vector.load %arg26[%c1_343, %c0_344, %c0_345] : memref<2x1x64xf32, #tpu.memory_space<vmem>>, vector<1x1x64xf32>
    %763 = vector.shape_cast %762 : vector<1x1x64xf32> to vector<1x64xf32>
    %c1_346 = arith.constant 1 : index
    %c0_347 = arith.constant 0 : index
    %c0_348 = arith.constant 0 : index
    %764 = vector.load %arg27[%c1_346, %c0_347, %c0_348] : memref<2x32x32xf32, #tpu.memory_space<vmem>>, vector<1x32x32xf32>
    %765 = vector.shape_cast %764 : vector<1x32x32xf32> to vector<32x32xf32>
    %c1_349 = arith.constant 1 : index
    %c0_350 = arith.constant 0 : index
    %c0_351 = arith.constant 0 : index
    %766 = vector.load %arg28[%c1_349, %c0_350, %c0_351] : memref<2x1x32xf32, #tpu.memory_space<vmem>>, vector<1x1x32xf32>
    %767 = vector.shape_cast %766 : vector<1x1x32xf32> to vector<1x32xf32>
    %cst_352 = arith.constant dense<0.000000e+00> : vector<16x32xf32>
    %768 = tpu.matmul %755, %757, %cst_352 {dimension_numbers = #tpu.dot_dimension_numbers<[1], [0], [0], [1], [0, 0, 1, 1], [], []>} : vector<16x32xf32>, vector<32x32xf32>, vector<16x32xf32> -> vector<16x32xf32>
    %769 = vector.broadcast %759 : vector<1x32xf32> to vector<16x32xf32>
    %770 = arith.addf %768, %769 : vector<16x32xf32>
    %cst_353 = arith.constant dense<0.000000e+00> : vector<16x64xf32>
    %771 = tpu.matmul %340, %761, %cst_353 {dimension_numbers = #tpu.dot_dimension_numbers<[1], [0], [0], [1], [0, 0, 1, 1], [], []>} : vector<16x32xf32>, vector<32x64xf32>, vector<16x64xf32> -> vector<16x64xf32>
    %772 = vector.broadcast %763 : vector<1x64xf32> to vector<16x64xf32>
    %773 = arith.addf %771, %772 : vector<16x64xf32>
    %774 = vector.extract_strided_slice %773 {offsets = [0, 0], sizes = [16, 32], strides = [1, 1]} : vector<16x64xf32> to vector<16x32xf32>
    %775 = vector.extract_strided_slice %773 {offsets = [0, 32], sizes = [16, 32], strides = [1, 1]} : vector<16x64xf32> to vector<16x32xf32>
    %776 = vector.extract_strided_slice %770 {offsets = [0, 0], sizes = [16, 8], strides = [1, 1]} : vector<16x32xf32> to vector<16x8xf32>
    %777 = vector.extract_strided_slice %774 {offsets = [0, 0], sizes = [16, 8], strides = [1, 1]} : vector<16x32xf32> to vector<16x8xf32>
    %778 = vector.extract_strided_slice %775 {offsets = [0, 0], sizes = [16, 8], strides = [1, 1]} : vector<16x32xf32> to vector<16x8xf32>
    %cst_354 = arith.constant dense<0.000000e+00> : vector<16x16xf32>
    %779 = tpu.matmul %776, %777, %cst_354 {dimension_numbers = #tpu.dot_dimension_numbers<[1], [1], [0], [0], [0, 0, 1, 0], [], []>} : vector<16x8xf32>, vector<16x8xf32>, vector<16x16xf32> -> vector<16x16xf32>
    %cst_355 = arith.constant 0.353553385 : f32
    %780 = vector.broadcast %cst_355 : f32 to vector<16x16xf32>
    %781 = arith.mulf %779, %780 : vector<16x16xf32>
    %782 = arith.addf %781, %0 : vector<16x16xf32>
    %cst_356 = arith.constant dense<0xFF800000> : vector<16xf32>
    %783 = vector.multi_reduction <maximumf>, %782, %cst_356 [1] : vector<16x16xf32> to vector<16xf32>
    %784 = vector.shape_cast %783 : vector<16xf32> to vector<16x1xf32>
    %785 = vector.broadcast %784 : vector<16x1xf32> to vector<16x16xf32>
    %786 = arith.subf %782, %785 : vector<16x16xf32>
    %787 = math.exp %786 : vector<16x16xf32>
    %cst_357 = arith.constant dense<0.000000e+00> : vector<16xf32>
    %788 = vector.multi_reduction <add>, %787, %cst_357 [1] : vector<16x16xf32> to vector<16xf32>
    %789 = vector.shape_cast %788 : vector<16xf32> to vector<16x1xf32>
    %790 = vector.broadcast %789 : vector<16x1xf32> to vector<16x16xf32>
    %791 = arith.divf %787, %790 : vector<16x16xf32>
    %cst_358 = arith.constant dense<0.000000e+00> : vector<16x8xf32>
    %792 = tpu.matmul %791, %778, %cst_358 {dimension_numbers = #tpu.dot_dimension_numbers<[1], [0], [0], [1], [0, 0, 1, 1], [], []>} : vector<16x16xf32>, vector<16x8xf32>, vector<16x8xf32> -> vector<16x8xf32>
    %793 = vector.extract_strided_slice %765 {offsets = [0, 0], sizes = [8, 32], strides = [1, 1]} : vector<32x32xf32> to vector<8x32xf32>
    %cst_359 = arith.constant dense<0.000000e+00> : vector<16x32xf32>
    %794 = tpu.matmul %792, %793, %cst_359 {dimension_numbers = #tpu.dot_dimension_numbers<[1], [0], [0], [1], [0, 0, 1, 1], [], []>} : vector<16x8xf32>, vector<8x32xf32>, vector<16x32xf32> -> vector<16x32xf32>
    %795 = vector.broadcast %767 : vector<1x32xf32> to vector<16x32xf32>
    %796 = arith.addf %795, %794 : vector<16x32xf32>
    %797 = vector.extract_strided_slice %770 {offsets = [0, 8], sizes = [16, 8], strides = [1, 1]} : vector<16x32xf32> to vector<16x8xf32>
    %798 = vector.extract_strided_slice %774 {offsets = [0, 8], sizes = [16, 8], strides = [1, 1]} : vector<16x32xf32> to vector<16x8xf32>
    %799 = vector.extract_strided_slice %775 {offsets = [0, 8], sizes = [16, 8], strides = [1, 1]} : vector<16x32xf32> to vector<16x8xf32>
    %cst_360 = arith.constant dense<0.000000e+00> : vector<16x16xf32>
    %800 = tpu.matmul %797, %798, %cst_360 {dimension_numbers = #tpu.dot_dimension_numbers<[1], [1], [0], [0], [0, 0, 1, 0], [], []>} : vector<16x8xf32>, vector<16x8xf32>, vector<16x16xf32> -> vector<16x16xf32>
    %cst_361 = arith.constant 0.353553385 : f32
    %801 = vector.broadcast %cst_361 : f32 to vector<16x16xf32>
    %802 = arith.mulf %800, %801 : vector<16x16xf32>
    %803 = arith.addf %802, %0 : vector<16x16xf32>
    %cst_362 = arith.constant dense<0xFF800000> : vector<16xf32>
    %804 = vector.multi_reduction <maximumf>, %803, %cst_362 [1] : vector<16x16xf32> to vector<16xf32>
    %805 = vector.shape_cast %804 : vector<16xf32> to vector<16x1xf32>
    %806 = vector.broadcast %805 : vector<16x1xf32> to vector<16x16xf32>
    %807 = arith.subf %803, %806 : vector<16x16xf32>
    %808 = math.exp %807 : vector<16x16xf32>
    %cst_363 = arith.constant dense<0.000000e+00> : vector<16xf32>
    %809 = vector.multi_reduction <add>, %808, %cst_363 [1] : vector<16x16xf32> to vector<16xf32>
    %810 = vector.shape_cast %809 : vector<16xf32> to vector<16x1xf32>
    %811 = vector.broadcast %810 : vector<16x1xf32> to vector<16x16xf32>
    %812 = arith.divf %808, %811 : vector<16x16xf32>
    %cst_364 = arith.constant dense<0.000000e+00> : vector<16x8xf32>
    %813 = tpu.matmul %812, %799, %cst_364 {dimension_numbers = #tpu.dot_dimension_numbers<[1], [0], [0], [1], [0, 0, 1, 1], [], []>} : vector<16x16xf32>, vector<16x8xf32>, vector<16x8xf32> -> vector<16x8xf32>
    %814 = vector.extract_strided_slice %765 {offsets = [8, 0], sizes = [8, 32], strides = [1, 1]} : vector<32x32xf32> to vector<8x32xf32>
    %cst_365 = arith.constant dense<0.000000e+00> : vector<16x32xf32>
    %815 = tpu.matmul %813, %814, %cst_365 {dimension_numbers = #tpu.dot_dimension_numbers<[1], [0], [0], [1], [0, 0, 1, 1], [], []>} : vector<16x8xf32>, vector<8x32xf32>, vector<16x32xf32> -> vector<16x32xf32>
    %816 = arith.addf %796, %815 : vector<16x32xf32>
    %817 = vector.extract_strided_slice %770 {offsets = [0, 16], sizes = [16, 8], strides = [1, 1]} : vector<16x32xf32> to vector<16x8xf32>
    %818 = vector.extract_strided_slice %774 {offsets = [0, 16], sizes = [16, 8], strides = [1, 1]} : vector<16x32xf32> to vector<16x8xf32>
    %819 = vector.extract_strided_slice %775 {offsets = [0, 16], sizes = [16, 8], strides = [1, 1]} : vector<16x32xf32> to vector<16x8xf32>
    %cst_366 = arith.constant dense<0.000000e+00> : vector<16x16xf32>
    %820 = tpu.matmul %817, %818, %cst_366 {dimension_numbers = #tpu.dot_dimension_numbers<[1], [1], [0], [0], [0, 0, 1, 0], [], []>} : vector<16x8xf32>, vector<16x8xf32>, vector<16x16xf32> -> vector<16x16xf32>
    %cst_367 = arith.constant 0.353553385 : f32
    %821 = vector.broadcast %cst_367 : f32 to vector<16x16xf32>
    %822 = arith.mulf %820, %821 : vector<16x16xf32>
    %823 = arith.addf %822, %0 : vector<16x16xf32>
    %cst_368 = arith.constant dense<0xFF800000> : vector<16xf32>
    %824 = vector.multi_reduction <maximumf>, %823, %cst_368 [1] : vector<16x16xf32> to vector<16xf32>
    %825 = vector.shape_cast %824 : vector<16xf32> to vector<16x1xf32>
    %826 = vector.broadcast %825 : vector<16x1xf32> to vector<16x16xf32>
    %827 = arith.subf %823, %826 : vector<16x16xf32>
    %828 = math.exp %827 : vector<16x16xf32>
    %cst_369 = arith.constant dense<0.000000e+00> : vector<16xf32>
    %829 = vector.multi_reduction <add>, %828, %cst_369 [1] : vector<16x16xf32> to vector<16xf32>
    %830 = vector.shape_cast %829 : vector<16xf32> to vector<16x1xf32>
    %831 = vector.broadcast %830 : vector<16x1xf32> to vector<16x16xf32>
    %832 = arith.divf %828, %831 : vector<16x16xf32>
    %cst_370 = arith.constant dense<0.000000e+00> : vector<16x8xf32>
    %833 = tpu.matmul %832, %819, %cst_370 {dimension_numbers = #tpu.dot_dimension_numbers<[1], [0], [0], [1], [0, 0, 1, 1], [], []>} : vector<16x16xf32>, vector<16x8xf32>, vector<16x8xf32> -> vector<16x8xf32>
    %834 = vector.extract_strided_slice %765 {offsets = [16, 0], sizes = [8, 32], strides = [1, 1]} : vector<32x32xf32> to vector<8x32xf32>
    %cst_371 = arith.constant dense<0.000000e+00> : vector<16x32xf32>
    %835 = tpu.matmul %833, %834, %cst_371 {dimension_numbers = #tpu.dot_dimension_numbers<[1], [0], [0], [1], [0, 0, 1, 1], [], []>} : vector<16x8xf32>, vector<8x32xf32>, vector<16x32xf32> -> vector<16x32xf32>
    %836 = arith.addf %816, %835 : vector<16x32xf32>
    %837 = vector.extract_strided_slice %770 {offsets = [0, 24], sizes = [16, 8], strides = [1, 1]} : vector<16x32xf32> to vector<16x8xf32>
    %838 = vector.extract_strided_slice %774 {offsets = [0, 24], sizes = [16, 8], strides = [1, 1]} : vector<16x32xf32> to vector<16x8xf32>
    %839 = vector.extract_strided_slice %775 {offsets = [0, 24], sizes = [16, 8], strides = [1, 1]} : vector<16x32xf32> to vector<16x8xf32>
    %cst_372 = arith.constant dense<0.000000e+00> : vector<16x16xf32>
    %840 = tpu.matmul %837, %838, %cst_372 {dimension_numbers = #tpu.dot_dimension_numbers<[1], [1], [0], [0], [0, 0, 1, 0], [], []>} : vector<16x8xf32>, vector<16x8xf32>, vector<16x16xf32> -> vector<16x16xf32>
    %cst_373 = arith.constant 0.353553385 : f32
    %841 = vector.broadcast %cst_373 : f32 to vector<16x16xf32>
    %842 = arith.mulf %840, %841 : vector<16x16xf32>
    %843 = arith.addf %842, %0 : vector<16x16xf32>
    %cst_374 = arith.constant dense<0xFF800000> : vector<16xf32>
    %844 = vector.multi_reduction <maximumf>, %843, %cst_374 [1] : vector<16x16xf32> to vector<16xf32>
    %845 = vector.shape_cast %844 : vector<16xf32> to vector<16x1xf32>
    %846 = vector.broadcast %845 : vector<16x1xf32> to vector<16x16xf32>
    %847 = arith.subf %843, %846 : vector<16x16xf32>
    %848 = math.exp %847 : vector<16x16xf32>
    %cst_375 = arith.constant dense<0.000000e+00> : vector<16xf32>
    %849 = vector.multi_reduction <add>, %848, %cst_375 [1] : vector<16x16xf32> to vector<16xf32>
    %850 = vector.shape_cast %849 : vector<16xf32> to vector<16x1xf32>
    %851 = vector.broadcast %850 : vector<16x1xf32> to vector<16x16xf32>
    %852 = arith.divf %848, %851 : vector<16x16xf32>
    %cst_376 = arith.constant dense<0.000000e+00> : vector<16x8xf32>
    %853 = tpu.matmul %852, %839, %cst_376 {dimension_numbers = #tpu.dot_dimension_numbers<[1], [0], [0], [1], [0, 0, 1, 1], [], []>} : vector<16x16xf32>, vector<16x8xf32>, vector<16x8xf32> -> vector<16x8xf32>
    %854 = vector.extract_strided_slice %765 {offsets = [24, 0], sizes = [8, 32], strides = [1, 1]} : vector<32x32xf32> to vector<8x32xf32>
    %cst_377 = arith.constant dense<0.000000e+00> : vector<16x32xf32>
    %855 = tpu.matmul %853, %854, %cst_377 {dimension_numbers = #tpu.dot_dimension_numbers<[1], [0], [0], [1], [0, 0, 1, 1], [], []>} : vector<16x8xf32>, vector<8x32xf32>, vector<16x32xf32> -> vector<16x32xf32>
    %856 = arith.addf %836, %855 : vector<16x32xf32>
    %c1_378 = arith.constant 1 : index
    %c0_379 = arith.constant 0 : index
    %c0_380 = arith.constant 0 : index
    %857 = vector.load %arg29[%c1_378, %c0_379, %c0_380] : memref<2x1x32xf32, #tpu.memory_space<vmem>>, vector<1x1x32xf32>
    %858 = vector.shape_cast %857 : vector<1x1x32xf32> to vector<1x32xf32>
    %c1_381 = arith.constant 1 : index
    %c0_382 = arith.constant 0 : index
    %c0_383 = arith.constant 0 : index
    %859 = vector.load %arg30[%c1_381, %c0_382, %c0_383] : memref<2x1x32xf32, #tpu.memory_space<vmem>>, vector<1x1x32xf32>
    %860 = vector.shape_cast %859 : vector<1x1x32xf32> to vector<1x32xf32>
    %861 = arith.addf %755, %856 : vector<16x32xf32>
    %cst_384 = arith.constant dense<0.000000e+00> : vector<16xf32>
    %862 = vector.multi_reduction <add>, %861, %cst_384 [1] : vector<16x32xf32> to vector<16xf32>
    %863 = vector.shape_cast %862 : vector<16xf32> to vector<16x1xf32>
    %cst_385 = arith.constant 3.200000e+01 : f32
    %864 = vector.broadcast %cst_385 : f32 to vector<16x1xf32>
    %865 = arith.divf %863, %864 : vector<16x1xf32>
    %866 = vector.broadcast %865 : vector<16x1xf32> to vector<16x32xf32>
    %867 = arith.subf %861, %866 : vector<16x32xf32>
    %868 = arith.mulf %867, %867 : vector<16x32xf32>
    %cst_386 = arith.constant dense<0.000000e+00> : vector<16xf32>
    %869 = vector.multi_reduction <add>, %868, %cst_386 [1] : vector<16x32xf32> to vector<16xf32>
    %870 = vector.shape_cast %869 : vector<16xf32> to vector<16x1xf32>
    %cst_387 = arith.constant 3.200000e+01 : f32
    %871 = vector.broadcast %cst_387 : f32 to vector<16x1xf32>
    %872 = arith.divf %870, %871 : vector<16x1xf32>
    %873 = vector.broadcast %865 : vector<16x1xf32> to vector<16x32xf32>
    %874 = arith.subf %861, %873 : vector<16x32xf32>
    %cst_388 = arith.constant 9.99999974E-6 : f32
    %875 = vector.broadcast %cst_388 : f32 to vector<16x1xf32>
    %876 = arith.addf %872, %875 : vector<16x1xf32>
    %877 = math.rsqrt %876 : vector<16x1xf32>
    %878 = vector.broadcast %877 : vector<16x1xf32> to vector<16x32xf32>
    %879 = arith.mulf %874, %878 : vector<16x32xf32>
    %880 = vector.broadcast %858 : vector<1x32xf32> to vector<16x32xf32>
    %881 = arith.mulf %879, %880 : vector<16x32xf32>
    %882 = vector.broadcast %860 : vector<1x32xf32> to vector<16x32xf32>
    %883 = arith.addf %881, %882 : vector<16x32xf32>
    %c1_389 = arith.constant 1 : index
    %c0_390 = arith.constant 0 : index
    %c0_391 = arith.constant 0 : index
    %884 = vector.load %arg31[%c1_389, %c0_390, %c0_391] : memref<2x32x2048xf32, #tpu.memory_space<vmem>>, vector<1x32x2048xf32>
    %885 = vector.shape_cast %884 : vector<1x32x2048xf32> to vector<32x2048xf32>
    %c1_392 = arith.constant 1 : index
    %c0_393 = arith.constant 0 : index
    %c0_394 = arith.constant 0 : index
    %886 = vector.load %arg32[%c1_392, %c0_393, %c0_394] : memref<2x1x2048xf32, #tpu.memory_space<vmem>>, vector<1x1x2048xf32>
    %887 = vector.shape_cast %886 : vector<1x1x2048xf32> to vector<1x2048xf32>
    %c1_395 = arith.constant 1 : index
    %c0_396 = arith.constant 0 : index
    %c0_397 = arith.constant 0 : index
    %888 = vector.load %arg33[%c1_395, %c0_396, %c0_397] : memref<2x2048x32xf32, #tpu.memory_space<vmem>>, vector<1x2048x32xf32>
    %889 = vector.shape_cast %888 : vector<1x2048x32xf32> to vector<2048x32xf32>
    %c1_398 = arith.constant 1 : index
    %c0_399 = arith.constant 0 : index
    %c0_400 = arith.constant 0 : index
    %890 = vector.load %arg34[%c1_398, %c0_399, %c0_400] : memref<2x1x32xf32, #tpu.memory_space<vmem>>, vector<1x1x32xf32>
    %891 = vector.shape_cast %890 : vector<1x1x32xf32> to vector<1x32xf32>
    %cst_401 = arith.constant dense<0.000000e+00> : vector<16x2048xf32>
    %892 = tpu.matmul %883, %885, %cst_401 {dimension_numbers = #tpu.dot_dimension_numbers<[1], [0], [0], [1], [0, 0, 1, 1], [], []>} : vector<16x32xf32>, vector<32x2048xf32>, vector<16x2048xf32> -> vector<16x2048xf32>
    %893 = vector.broadcast %887 : vector<1x2048xf32> to vector<16x2048xf32>
    %894 = arith.addf %892, %893 : vector<16x2048xf32>
    %cst_402 = arith.constant 0.000000e+00 : f32
    %895 = vector.broadcast %cst_402 : f32 to vector<16x2048xf32>
    %896 = arith.maximumf %894, %895 : vector<16x2048xf32>
    %cst_403 = arith.constant dense<0.000000e+00> : vector<16x32xf32>
    %897 = tpu.matmul %896, %889, %cst_403 {dimension_numbers = #tpu.dot_dimension_numbers<[1], [0], [0], [1], [0, 0, 1, 1], [], []>} : vector<16x2048xf32>, vector<2048x32xf32>, vector<16x32xf32> -> vector<16x32xf32>
    %898 = vector.broadcast %891 : vector<1x32xf32> to vector<16x32xf32>
    %899 = arith.addf %897, %898 : vector<16x32xf32>
    %c1_404 = arith.constant 1 : index
    %c0_405 = arith.constant 0 : index
    %c0_406 = arith.constant 0 : index
    %900 = vector.load %arg35[%c1_404, %c0_405, %c0_406] : memref<2x1x32xf32, #tpu.memory_space<vmem>>, vector<1x1x32xf32>
    %901 = vector.shape_cast %900 : vector<1x1x32xf32> to vector<1x32xf32>
    %c1_407 = arith.constant 1 : index
    %c0_408 = arith.constant 0 : index
    %c0_409 = arith.constant 0 : index
    %902 = vector.load %arg36[%c1_407, %c0_408, %c0_409] : memref<2x1x32xf32, #tpu.memory_space<vmem>>, vector<1x1x32xf32>
    %903 = vector.shape_cast %902 : vector<1x1x32xf32> to vector<1x32xf32>
    %904 = arith.addf %883, %899 : vector<16x32xf32>
    %cst_410 = arith.constant dense<0.000000e+00> : vector<16xf32>
    %905 = vector.multi_reduction <add>, %904, %cst_410 [1] : vector<16x32xf32> to vector<16xf32>
    %906 = vector.shape_cast %905 : vector<16xf32> to vector<16x1xf32>
    %cst_411 = arith.constant 3.200000e+01 : f32
    %907 = vector.broadcast %cst_411 : f32 to vector<16x1xf32>
    %908 = arith.divf %906, %907 : vector<16x1xf32>
    %909 = vector.broadcast %908 : vector<16x1xf32> to vector<16x32xf32>
    %910 = arith.subf %904, %909 : vector<16x32xf32>
    %911 = arith.mulf %910, %910 : vector<16x32xf32>
    %cst_412 = arith.constant dense<0.000000e+00> : vector<16xf32>
    %912 = vector.multi_reduction <add>, %911, %cst_412 [1] : vector<16x32xf32> to vector<16xf32>
    %913 = vector.shape_cast %912 : vector<16xf32> to vector<16x1xf32>
    %cst_413 = arith.constant 3.200000e+01 : f32
    %914 = vector.broadcast %cst_413 : f32 to vector<16x1xf32>
    %915 = arith.divf %913, %914 : vector<16x1xf32>
    %916 = vector.broadcast %908 : vector<16x1xf32> to vector<16x32xf32>
    %917 = arith.subf %904, %916 : vector<16x32xf32>
    %cst_414 = arith.constant 9.99999974E-6 : f32
    %918 = vector.broadcast %cst_414 : f32 to vector<16x1xf32>
    %919 = arith.addf %915, %918 : vector<16x1xf32>
    %920 = math.rsqrt %919 : vector<16x1xf32>
    %921 = vector.broadcast %920 : vector<16x1xf32> to vector<16x32xf32>
    %922 = arith.mulf %917, %921 : vector<16x32xf32>
    %923 = vector.broadcast %901 : vector<1x32xf32> to vector<16x32xf32>
    %924 = arith.mulf %922, %923 : vector<16x32xf32>
    %925 = vector.broadcast %903 : vector<1x32xf32> to vector<16x32xf32>
    %926 = arith.addf %924, %925 : vector<16x32xf32>
    %c0_415 = arith.constant 0 : index
    %c0_416 = arith.constant 0 : index
    %927 = vector.load %arg37[%c0_415, %c0_416] : memref<32x128xf32, #tpu.memory_space<vmem>>, vector<32x128xf32>
    %cst_417 = arith.constant dense<0.000000e+00> : vector<16x128xf32>
    %928 = tpu.matmul %926, %927, %cst_417 {dimension_numbers = #tpu.dot_dimension_numbers<[1], [0], [0], [1], [0, 0, 1, 1], [], []>} : vector<16x32xf32>, vector<32x128xf32>, vector<16x128xf32> -> vector<16x128xf32>
    %c0_418 = arith.constant 0 : index
    %c0_419 = arith.constant 0 : index
    %929 = vector.load %arg38[%c0_418, %c0_419] : memref<1x128xf32, #tpu.memory_space<vmem>>, vector<1x128xf32>
    %930 = vector.broadcast %929 : vector<1x128xf32> to vector<16x128xf32>
    %931 = arith.addf %928, %930 : vector<16x128xf32>
    %c0_420 = arith.constant 0 : index
    %c0_421 = arith.constant 0 : index
    %932 = vector.load %arg39[%c0_420, %c0_421] : memref<16x128xf32, #tpu.memory_space<vmem>>, vector<16x128xf32>
    tpu.vector_store %arg39[%c0_420, %c0_421], %931 {strides = array<i32>} : memref<16x128xf32, #tpu.memory_space<vmem>>, vector<16x128xf32>,
    return
  }
}

</mosaic_0001>

<bundles_post_ra>
// kernel: transformer_classifier_forward.1
= control target key start
LH: loop header
LB: loop body
LE: loop exit
PB: predicated region body
PF: predicated region fallthrough
CT: control target
= control target key end

     0   :  { %s20487_s3 = smov 1   ;;  %vm175_vm0 = vcmask 130048   ;;  %s20488_s10 = smov 5   ;;  %vm279_vm1 = vcmask 261120   ;;  %vm367_vm2 = vcmask 64512   ;;  %s23629_s0 = inlined_call_operand.smem [shape: u32[40], index: -1, kind: input, shape index: {}] }
   0x1   :  { %s15178_s6 = sld [smem:[%s23629_s0 + %s20487_s3]]   ;;  %s20489_s14 = smov 2   ;;  %vm20594_vm3 = vmpackc.low %vm367_vm2, %vm367_vm2 }
   0x2   :  { %s1_s9 = sld [smem:[%s23629_s0]]   ;;  %s20490_s18 = smov 3  }
   0x3   :  { %s20554_s13 = sld [smem:[%s23629_s0 + %s20488_s10]]   ;;  %s20491_s22 = smov 6  }
   0x4   :  { %s15179_s17 = sld [smem:[%s23629_s0 + %s20489_s14]]   ;;  %s20492_s26 = smov 96  }
   0x5   :  { %s15180_s21 = sld [smem:[%s23629_s0 + %s20490_s18]]   ;;  %s20493_s27 = smov 4  }
   0x6   :  { %s20577_s25 = sld [smem:[%s23629_s0 + %s20491_s22]]   ;;  %s23643_s1 = smov 64  }
   0x7   :  { %v166_v0 = vld [vmem:[%s15178_s6] sm:$0xff]  ;;  %v167_v1 = vld [vmem:[%s15178_s6 + $0x8] sm:$0xff]  ;;  %s20607_s30 = sld [smem:[%s23629_s0 + %s20493_s27]]   ;;  %s20495_s2 = smov 88  }
   0x8   :  { %v164_v2 = vld [vmem:[%s1_s9] sm:$0xff]  ;;  %v18324_v3 = vpack.c.bf16 %v167_v1, %v166_v0  ;;  %v165_v4 = vld [vmem:[%s1_s9 + $0x8] sm:$0xff]  ;;  %s20496_s3 = smov 120   ;;  %s20497_s4 = smov 80  }
   0x9   :  { %17766 = vmatprep.mubr.msk.f32.mxu0 %vm175_vm0, %v164_v2  ;;  %v263_v5 = vld [vmem:[%s20554_s13] sm:$0xff]  ;;  %v264_v6 = vld [vmem:[%s20554_s13 + $0x8] sm:$0xff]  ;;  %v265_v8 = vld [vmem:[%s20554_s13 + $0x10] sm:$0xff]  ;;  %s23644_s5 = smov 112   ;;  %s20499_s6 = smov 7  }
   0xa   :  { %18325 = vmatprep.subr.bf16.mxu0 %v18324_v3  ;;  %v18328_v7 = vpack.c.bf16 %v264_v6, %v263_v5  ;;  %v266_v9 = vld [vmem:[%s20554_s13 + $0x18] sm:$0xff]  ;;  %v15217_v11 = vld [vmem:[%s15179_s17] ss:$0 sm:$0xff]  ;;  %s20652_s9 = sld [smem:[%s23629_s0 + %s20499_s6]]   ;;  %s23635_s10 = smov 56  }
   0xb   :  { %18327 = vmatpush3.bf16.msra.mxu0 %v18324_v3  ;;  %v18332_v10 = vpack.c.bf16 %v266_v9, %v265_v8  ;;  %v259_v17 = vld [vmem:[%s15180_s21] sm:$0xff]  ;;  %v260_v18 = vld [vmem:[%s15180_s21 + $0x8] sm:$0xff]  ;;  %s23641_s11 = smov 72   ;;  %s23639_s12 = smov 104  }
   0xc   :  { %18329 = vmatprep.subr.bf16.mxu1 %v18328_v7  ;;  %v15220_v22 = vld [vmem:[%s20577_s25] ss:$0 sm:$0xff]  ;;  %s23634_s14 = smov 48   ;;  %s23633_s15 = smov 40  }
   0xd   :  { %18331 = vmatpush3.bf16.msra.mxu1 %v18328_v7  ;;  %v20610_v34 = vld [vmem:[%s20607_s30 + $0x8] sm:$0xff]  ;;  %v20613_v37 = vld [vmem:[%s20607_s30] sm:$0xff]  ;;  %s20505_s16 = smov 8   ;;  %s20506_s20 = smov 11  }
   0xe   :  { %17767 = vmatmul.mubr.msk.f32.vlgmr.msra.gmra.mrb[0].mxu0 %vm175_vm0, %v165_v4  ;;  %18333 = vmatprep.subr.bf16.mxu1 %v18332_v10  ;;  %s20711_s19 = sld [smem:[%s23629_s0 + %s20505_s16]]   ;;  %s20508_s24 = smov 9  }
   0xf   :  { %s20731_s23 = sld [smem:[%s23629_s0 + %s20506_s20]]   ;;  %s20509_s6 = smov 10  }
  0x10   :  { %s20758_s29 = sld [smem:[%s23629_s0 + %s20508_s24]]   ;;  %s20510_s17 = smov 13  }
  0x11   :  { %18335 = vmatpush3.bf16.msra.mxu1 %v18332_v10  ;;  %s20763_s16 = sld [smem:[%s23629_s0 + %s20509_s6]]   ;;  %s20511_s22 = smov 12  }
  0x12   :  { %s20817_s21 = sld [smem:[%s23629_s0 + %s20510_s17]]   ;;  %s20512_s6 = smov 14  }
  0x13   :  { %s20939_s28 = sld [smem:[%s23629_s0 + %s20511_s22]]   ;;  %s20513_s18 = smov 15  }
  0x14   :  { %s21286_s17 = sld [smem:[%s23629_s0 + %s20512_s6]]   ;;  %s20517_s8 = smov 19  }
  0x15   :  { %s21302_s24 = sld [smem:[%s23629_s0 + %s20513_s18]]   ;;  %s20518_s22 = smov 25  }
  0x16   :  { %s22039_s20 = sld [smem:[%s23629_s0 + %s20517_s8]]   ;;  %s20519_s6 = smov 23  }
  0x17   :  { %s22096_s27 = sld [smem:[%s23629_s0 + %s20518_s22]]   ;;  %s20521_s8 = smov 26  }
  0x18   :  { %s22126_s22 = sld [smem:[%s23629_s0 + %s20521_s8]]   ;;  %s20524_s8 = smov 24  }
  0xe1   :  { %v17768_v12 = vpop.f32.mrb[0].mxu0 }
  0xe2   :  { %v254_v13 = vadd.f32 %v17768_v12, %v15217_v11  ;;  %v248_v14 = vpop.f32.mrb[1].mxu0 }
  0xe3   :  { %v249_v15 = vadd.f32 %v15217_v11, %v248_v14  ;;  %v268_v11 = vld [vmem:[%s20652_s9] sm:$0xff] }
  0xe4   :  { %v258_v16 = vmul.f32 5.656854, %v254_v13 }
  0xe5   :  { %v257_v19 = vmul.f32 5.656854, %v249_v15 }
  0xe6   :  { %v20568_v21 = vadd.f32 %v260_v18, %v258_v16 }
  0xe7   :  { %v20566_v20 = vadd.f32 %v259_v17, %v257_v19 }
  0xe9   :  { %17777 = vmatprep.mubr.msk.f32.mxu1 %vm279_vm1, %v20566_v20 }
  0xea   :  { %17778 = vmatmul.mubr.msk.f32.vlgmr.msra.gmra.mrb[0].mxu1 %vm279_vm1, %v20568_v21 }
 0x1bd   :  { %v17779_v23 = vpop.f32.mrb[0].mxu1 }
 0x1be   :  { %v20580_v24 = vadd.f32 %v17779_v23, %v15220_v22  ;;  %v352_v25 = vpop.f32.mrb[1].mxu1 }
 0x1bf   :  { %v20582_v26 = vadd.f32 %v15220_v22, %v352_v25 }
 0x1c1   :  { %17784 = vmatprep.mubr.msk.f32.mxu0 %vm367_vm2, %v20582_v26  ;;  %v20588_v27 = vpack.i.bf16 %v20580_v24, %v20582_v26 }
 0x1c3   :  { %20020 = vrot.lane.b32.xlu0 %v20588_v27, %s20492_s26 }
 0x235   :  { %v20021_v28 = vpop.permute.xlu0 %20020 }
 0x236   :  { %v20023_v29 = vunpack.i.h.bf16 %v20021_v28  ;;  %v20022_v30 = vunpack.i.l.bf16 %v20021_v28 }
 0x238   :  { %v18336_v32 = vpack.c.bf16 %v20023_v29, %v20022_v30 }
 0x23a   :  { %18338 = vmatprep.subr.msk.bf16.mxu0 %vm20594_vm3, %v18336_v32 }
 0x23b   :  { %18341 = vmatpush3.bf16.xpose.msk.msra.mxu0 %vm20594_vm3, %v18336_v32 }
 0x23c   :  { %17794 = vmatprep.subr.mxu0 %v268_v11 }
 0x242   :  { %17785 = vmatmul.mubr.msk.f32.vlgmr.msra.gmra.mrb[2].mxu0 %vm367_vm2, %v20580_v24 }
 0x243   :  { %17795 = vmatpush3.msra.mxu0 %v268_v11 }
 0x315   :  { %v17786_v33 = vpop.f32.mrb[2].mxu0 }
 0x316   :  { %v452_v35 = vmul.f32 0.35355338, %v17786_v33  ;;  %v442_v36 = vpop.f32.mrb[3].mxu0 }
 0x317   :  { %v451_v38 = vmul.f32 0.35355338, %v442_v36 }
 0x318   :  { %v454_v39 = vadd.f32 %v452_v35, %v20610_v34 }
 0x319   :  { %v453_v40 = vadd.f32 %v451_v38, %v20613_v37 }
 0x31a   :  { %v458_v41 = vsel %vm175_vm0, %v454_v39, -inf }
 0x31b   :  { %459 = vmax.xlane.f32.xlu1 %v458_v41  ;;  %v455_v42 = vsel %vm175_vm0, %v453_v40, -inf }
 0x31c   :  { %456 = vmax.xlane.f32.xlu0 %v455_v42 }
 0x32c   :  { %20025 = vrot.lane.b32.xlu1 %v20588_v27, %s23643_s1 }
 0x330   :  { %20030 = vrot.lane.b32.xlu1 %v20588_v27, %s20495_s2 }
 0x332   :  { %655 = vrot.lane.b32.xlu0 %v20580_v24, %s20496_s3 }
 0x3a8   :  { %v460_v43 = vpop.xlane.xlu1 %459 }
 0x3a9   :  { %v462_v44 = vsub.f32 %v454_v39, %v460_v43  ;;  %v457_v45 = vpop.xlane.xlu0 %456 }
 0x3aa   :  { %v461_v46 = vsub.f32 %v453_v40, %v457_v45 }
 0x3ab   :  { %v465_v47 = vmul.f32 1.442695, %v462_v44 }
 0x3ac   :  { %v463_v48 = vmul.f32 1.442695, %v461_v46  ;;  %v20026_v49 = vpop.permute.xlu1 %20025 }
 0x3ad   :  { %20249 = vpow2.f32 %v465_v47  ;;  %v20028_v50 = vunpack.i.h.bf16 %v20026_v49  ;;  %v20027_v51 = vunpack.i.l.bf16 %v20026_v49  ;;  %v656_v8 = vpop.permute.xlu0 %655 }
 0x3ae   :  { %20251 = vpow2.f32 %v463_v48 }
 0x3af   :  { %v18342_v52 = vpack.c.bf16 %v20028_v50, %v20027_v51 }
 0x3b0   :  { %v20031_v53 = vpop.permute.xlu1 %20030 }
 0x3b1   :  { %v20033_v54 = vunpack.i.h.bf16 %v20031_v53  ;;  %v20032_v55 = vunpack.i.l.bf16 %v20031_v53  ;;  %18343 = vmatprep.subr.bf16.mxu1 %v18342_v52 }
 0x3b2   :  { %18345 = vmatpush3.bf16.msra.mxu1 %v18342_v52 }
 0x3b3   :  { %v18346_v56 = vpack.c.bf16 %v20033_v54, %v20032_v55 }
 0x3b5   :  { %18348 = vmatprep.subr.msk.bf16.mxu1 %vm20594_vm3, %v18346_v56 }
 0x3b7   :  { %v20250_v57 = vpop.eup %20249 }
 0x3b8   :  { %v470_v58 = vsel %vm175_vm0, %v20250_v57, 0.0  ;;  %v20252_v59 = vpop.eup %20251 }
 0x3b9   :  { %471 = vadd.xlane.f32.xlu1 %v470_v58  ;;  %v467_v60 = vsel %vm175_vm0, %v20252_v59, 0.0 }
 0x3bd   :  { %468 = vadd.xlane.f32.xlu1 %v467_v60 }
 0x3ce   :  { %653 = vrot.lane.b32.xlu1 %v20582_v26, %s20496_s3 }
 0x3d2   :  { %20035 = vrot.lane.b32.xlu1 %v20588_v27, %s20497_s4 }
 0x3d6   :  { %940 = vrot.lane.b32.xlu1 %v20582_v26, %s23644_s5 }
 0x3da   :  { %942 = vrot.lane.b32.xlu1 %v20580_v24, %s23644_s5 }
 0x446   :  { %v472_v61 = vpop.xlane.xlu1 %471 }
 0x447   :  { %20253 = vrcp.f32 %v472_v61 }
 0x44a   :  { %v469_v62 = vpop.xlane.xlu1 %468 }
 0x44b   :  { %20255 = vrcp.f32 %v469_v62 }
 0x44e   :  { %v654_v63 = vpop.permute.xlu1 %653 }
 0x451   :  { %v20254_v1 = vpop.eup %20253 }
 0x452   :  { %v20036_v0 = vpop.permute.xlu1 %20035  ;;  %v476_v6 = vmul.f32 %v20254_v1, %v20250_v57  ;;  %v269_v57 = vld [vmem:[%s20652_s9 + $0x8] sm:$0xff] }
 0x453   :  { %v20038_v3 = vunpack.i.h.bf16 %v20036_v0  ;;  %v20037_v4 = vunpack.i.l.bf16 %v20036_v0 }
 0x455   :  { %v20256_v2 = vpop.eup %20255  ;;  %v18356_v7 = vpack.c.bf16 %v20038_v3, %v20037_v4 }
 0x456   :  { %v474_v5 = vmul.f32 %v20256_v2, %v20252_v59  ;;  %v941_v9 = vpop.permute.xlu1 %940 }
 0x458   :  { %17791 = vmatprep.mubr.msk.f32.mxu1 %vm175_vm0, %v474_v5 }
 0x459   :  { %17792 = vmatmul.mubr.msk.f32.vlgmr.msra.gmra.mrb[2].mxu1 %vm175_vm0, %v476_v6 }
 0x45a   :  { %18351 = vmatpush3.bf16.xpose.msk.msra.mxu1 %vm20594_vm3, %v18346_v56  ;;  %17803 = vmatprep.mubr.msk.f32.mxu1 %vm367_vm2, %v654_v63  ;;  %v943_v10 = vpop.permute.xlu1 %942 }
 0x45b   :  { %18358 = vmatprep.subr.msk.bf16.mxu1 %vm20594_vm3, %v18356_v7 }
 0x461   :  { %17804 = vmatmul.mubr.msk.f32.vlgmr.msra.gmra.mrb[4].mxu1 %vm367_vm2, %v656_v8 }
 0x462   :  { %18361 = vmatpush3.bf16.xpose.msk.msra.mxu1 %vm20594_vm3, %v18356_v7  ;;  %17822 = vmatprep.mubr.msk.f32.mxu1 %vm367_vm2, %v941_v9 }
 0x469   :  { %17823 = vmatmul.mubr.msk.f32.vlgmr.msra.gmra.mrb[6].mxu1 %vm367_vm2, %v943_v10 }
 0x52c   :  { %v17793_v12 = vpop.f32.mrb[2].mxu1 }
 0x52d   :  { %v555_v13 = vpop.f32.mrb[3].mxu1 }
 0x52e   :  { %17796 = vmatprep.mubr.msk.f32.mxu0 %vm367_vm2, %v555_v13 }
 0x52f   :  { %17797 = vmatmul.mubr.msk.f32.vlgmr.msra.gmra.mrb[4].mxu0 %vm367_vm2, %v17793_v12 }
 0x534   :  { %v17805_v14 = vpop.f32.mrb[4].mxu1 }
 0x535   :  { %v745_v15 = vmul.f32 0.35355338, %v17805_v14  ;;  %v735_v16 = vpop.f32.mrb[5].mxu1 }
 0x536   :  { %v744_v17 = vmul.f32 0.35355338, %v735_v16 }
 0x537   :  { %v747_v18 = vadd.f32 %v745_v15, %v20610_v34 }
 0x538   :  { %v746_v19 = vadd.f32 %v744_v17, %v20613_v37 }
 0x539   :  { %v751_v22 = vsel %vm175_vm0, %v747_v18, -inf }
 0x53a   :  { %752 = vmax.xlane.f32.xlu0 %v751_v22  ;;  %v748_v23 = vsel %vm175_vm0, %v746_v19, -inf }
 0x53b   :  { %749 = vmax.xlane.f32.xlu1 %v748_v23  ;;  %v270_v23 = vld [vmem:[%s20652_s9 + $0x10] sm:$0xff] }
 0x53c   :  { %v17824_v25 = vpop.f32.mrb[6].mxu1 }
 0x53d   :  { %v1022_v28 = vpop.f32.mrb[7].mxu1  ;;  %v1032_v45 = vmul.f32 0.35355338, %v17824_v25 }
 0x53e   :  { %v1031_v42 = vmul.f32 0.35355338, %v1022_v28 }
 0x53f   :  { %v1034_v46 = vadd.f32 %v1032_v45, %v20610_v34 }
 0x540   :  { %v1033_v43 = vadd.f32 %v1031_v42, %v20613_v37 }
 0x541   :  { %v1038_v47 = vsel %vm175_vm0, %v1034_v46, -inf }
 0x542   :  { %v1035_v44 = vsel %vm175_vm0, %v1033_v43, -inf }
 0x5c7   :  { %v753_v29 = vpop.xlane.xlu0 %752 }
 0x5c8   :  { %v755_v30 = vsub.f32 %v747_v18, %v753_v29  ;;  %v750_v32 = vpop.xlane.xlu1 %749 }
 0x5c9   :  { %v754_v33 = vsub.f32 %v746_v19, %v750_v32 }
 0x5ca   :  { %v758_v35 = vmul.f32 1.442695, %v755_v30 }
 0x5cb   :  { %v756_v36 = vmul.f32 1.442695, %v754_v33 }
 0x5cc   :  { %20257 = vpow2.f32 %v758_v35 }
 0x5cd   :  { %20259 = vpow2.f32 %v756_v36 }
 0x5d6   :  { %v20258_v38 = vpop.eup %20257 }
 0x5d7   :  { %v20260_v39 = vpop.eup %20259  ;;  %v763_v40 = vsel %vm175_vm0, %v20258_v38, 0.0 }
 0x5d8   :  { %764 = vadd.xlane.f32.xlu0 %v763_v40  ;;  %v760_v41 = vsel %vm175_vm0, %v20260_v39, 0.0 }
 0x5d9   :  { %761 = vadd.xlane.f32.xlu1 %v760_v41 }
 0x5ea   :  { %20040 = vrot.lane.b32.xlu1 %v20588_v27, %s23635_s10 }
 0x5ee   :  { %20045 = vrot.lane.b32.xlu0 %v20588_v27, %s23641_s11  ;;  %1227 = vrot.lane.b32.xlu1 %v20582_v26, %s23639_s12 }
 0x5f2   :  { %1229 = vrot.lane.b32.xlu1 %v20580_v24, %s23639_s12 }
 0x60d   :  { %1036 = vmax.xlane.f32.xlu0 %v1035_v44 }
 0x616   :  { %1039 = vmax.xlane.f32.xlu1 %v1038_v47 }
 0x627   :  { %20050 = vrot.lane.b32.xlu1 %v20588_v27, %s23634_s14 }
 0x62b   :  { %20055 = vrot.lane.b32.xlu1 %v20588_v27, %s23633_s15 }
 0x665   :  { %v765_v24 = vpop.xlane.xlu0 %764 }
 0x666   :  { %20261 = vrcp.f32 %v765_v24  ;;  %v762_v26 = vpop.xlane.xlu1 %761 }
 0x667   :  { %20263 = vrcp.f32 %v762_v26 }
 0x669   :  { %v20046_v48 = vpop.permute.xlu0 %20045 }
 0x66a   :  { %v20048_v49 = vunpack.i.h.bf16 %v20046_v48  ;;  %v20047_v50 = vunpack.i.l.bf16 %v20046_v48  ;;  %v20041_v51 = vpop.permute.xlu1 %20040 }
 0x66b   :  { %v20043_v52 = vunpack.i.h.bf16 %v20041_v51  ;;  %v20042_v53 = vunpack.i.l.bf16 %v20041_v51 }
 0x66c   :  { %v18366_v54 = vpack.c.bf16 %v20048_v49, %v20047_v50  ;;  %v271_v49 = vld [vmem:[%s20652_s9 + $0x18] sm:$0xff] }
 0x66d   :  { %v18352_v55 = vpack.c.bf16 %v20043_v52, %v20042_v53 }
 0x66e   :  { %18368 = vmatprep.subr.msk.bf16.mxu1 %vm20594_vm3, %v18366_v54  ;;  %v1228_v56 = vpop.permute.xlu1 %1227 }
 0x66f   :  { %18353 = vmatprep.subr.bf16.mxu0 %v18352_v55  ;;  %18371 = vmatpush3.bf16.xpose.msk.msra.mxu1 %vm20594_vm3, %v18366_v54 }
 0x670   :  { %v20262_v27 = vpop.eup %20261  ;;  %17841 = vmatprep.mubr.msk.f32.mxu1 %vm367_vm2, %v1228_v56  ;;  %18355 = vmatpush3.bf16.msra.mxu0 %v18352_v55 }
 0x671   :  { %v20264_v58 = vpop.eup %20263  ;;  %17813 = vmatprep.subr.mxu0 %v269_v57  ;;  %v769_v60 = vmul.f32 %v20262_v27, %v20258_v38  ;;  %v15231_v27 = vld [vmem:[%s20711_s19] ss:$0 sm:$0xff] }
 0x672   :  { %v767_v59 = vmul.f32 %v20264_v58, %v20260_v39  ;;  %v1230_v61 = vpop.permute.xlu1 %1229 }
 0x674   :  { %17810 = vmatprep.mubr.msk.f32.mxu0 %vm175_vm0, %v767_v59 }
 0x675   :  { %17811 = vmatmul.mubr.msk.f32.vlgmr.msra.gmra.mrb[6].mxu0 %vm175_vm0, %v769_v60 }
 0x676   :  { %17842 = vmatmul.mubr.msk.f32.vlgmr.msra.gmra.mrb[8].mxu1 %vm367_vm2, %v1230_v61  ;;  %17814 = vmatpush3.msra.mxu0 %v269_v57 }
 0x69a   :  { %v1037_v62 = vpop.xlane.xlu0 %1036 }
 0x69b   :  { %v1041_v63 = vsub.f32 %v1033_v43, %v1037_v62 }
 0x69d   :  { %v1043_v0 = vmul.f32 1.442695, %v1041_v63 }
 0x69f   :  { %20265 = vpow2.f32 %v1043_v0 }
 0x6a3   :  { %v1040_v1 = vpop.xlane.xlu1 %1039 }
 0x6a4   :  { %v1042_v2 = vsub.f32 %v1034_v46, %v1040_v1 }
 0x6a6   :  { %v1045_v3 = vmul.f32 1.442695, %v1042_v2 }
 0x6a7   :  { %v20051_v4 = vpop.permute.xlu1 %20050 }
 0x6a8   :  { %20267 = vpow2.f32 %v1045_v3  ;;  %v20053_v5 = vunpack.i.h.bf16 %v20051_v4  ;;  %v20052_v6 = vunpack.i.l.bf16 %v20051_v4 }
 0x6a9   :  { %v20266_v7 = vpop.eup %20265 }
 0x6aa   :  { %v1047_v8 = vsel %vm175_vm0, %v20266_v7, 0.0  ;;  %v18362_v9 = vpack.c.bf16 %v20053_v5, %v20052_v6 }
 0x6ab   :  { %1048 = vadd.xlane.f32.xlu0 %v1047_v8  ;;  %v20056_v15 = vpop.permute.xlu1 %20055 }
 0x6ac   :  { %18363 = vmatprep.subr.bf16.mxu0 %v18362_v9  ;;  %v20058_v25 = vunpack.i.h.bf16 %v20056_v15  ;;  %v20057_v28 = vunpack.i.l.bf16 %v20056_v15  ;;  %v1561_v15 = vld [vmem:[%s20731_s23] sm:$0xff] }
 0x6ae   :  { %v18372_v38 = vpack.c.bf16 %v20058_v25, %v20057_v28  ;;  %v1594_v25 = vld [vmem:[%s20731_s23 + $0x108] sm:$0xff] }
 0x6af   :  { %v1610_v28 = vld [vmem:[%s20731_s23 + $0x188] sm:$0xff] }
 0x6b2   :  { %v20268_v10 = vpop.eup %20267 }
 0x6b3   :  { %v1050_v11 = vsel %vm175_vm0, %v20268_v10, 0.0 }
 0x6b4   :  { %1051 = vadd.xlane.f32.xlu0 %v1050_v11  ;;  %v1578_v11 = vld [vmem:[%s20731_s23 + $0x88] sm:$0xff] }
 0x738   :  { %v1049_v12 = vpop.xlane.xlu0 %1048 }
 0x739   :  { %20269 = vrcp.f32 %v1049_v12  ;;  %v1564_v12 = vld [vmem:[%s20731_s23 + $0x18] sm:$0xff] }
 0x741   :  { %v1052_v13 = vpop.xlane.xlu0 %1051 }
 0x742   :  { %20271 = vrcp.f32 %v1052_v13 }
 0x743   :  { %v20270_v14 = vpop.eup %20269 }
 0x744   :  { %v1054_v22 = vmul.f32 %v20270_v14, %v20266_v7  ;;  %v1580_v14 = vld [vmem:[%s20731_s23 + $0x98] sm:$0xff] }
 0x748   :  { %v17812_v16 = vpop.f32.mrb[6].mxu0 }
 0x749   :  { %v848_v17 = vpop.f32.mrb[7].mxu0  ;;  %v17843_v18 = vpop.f32.mrb[8].mxu1 }
 0x74a   :  { %17815 = vmatprep.mubr.msk.f32.mxu0 %vm367_vm2, %v848_v17  ;;  %v1309_v19 = vpop.f32.mrb[9].mxu1  ;;  %v1319_v29 = vmul.f32 0.35355338, %v17843_v18  ;;  %v18384_v17 = vpack.c.bf16 %v1580_v14, %v1564_v12  ;;  %v1572_v12 = vld [vmem:[%s20731_s23 + $0x58] sm:$0xff] }
 0x74b   :  { %v1318_v30 = vmul.f32 0.35355338, %v1309_v19  ;;  %17816 = vmatmul.mubr.msk.f32.vlgmr.msra.gmra.mrb[4].mxu0 %vm367_vm2, %v17812_v16  ;;  %v1577_v16 = vld [vmem:[%s20731_s23 + $0x80] sm:$0xff]  ;;  %v1563_v19 = vld [vmem:[%s20731_s23 + $0x10] sm:$0xff] }
 0x74c   :  { %v20272_v32 = vpop.eup %20271  ;;  %18365 = vmatpush3.bf16.msra.mxu0 %v18362_v9  ;;  %17829 = vmatprep.mubr.msk.f32.mxu0 %vm175_vm0, %v1054_v22  ;;  %v1321_v39 = vadd.f32 %v1319_v29, %v20610_v34  ;;  %v18378_v18 = vpack.c.bf16 %v1577_v16, %v1561_v15  ;;  %v1579_v22 = vld [vmem:[%s20731_s23 + $0x90] sm:$0xff]  ;;  %v1596_v29 = vld [vmem:[%s20731_s23 + $0x118] sm:$0xff]  ;;  %v1569_v15 = vld [vmem:[%s20731_s23 + $0x40] sm:$0xff] }
 0x74d   :  { %17832 = vmatprep.subr.mxu0 %v270_v23  ;;  %v1056_v33 = vmul.f32 %v20272_v32, %v20268_v10  ;;  %v1320_v35 = vadd.f32 %v1318_v30, %v20613_v37  ;;  %v1562_v10 = vld [vmem:[%s20731_s23 + $0x8] sm:$0xff]  ;;  %v18380_v30 = vpack.c.bf16 %v1610_v28, %v1594_v25  ;;  %v1612_v32 = vld [vmem:[%s20731_s23 + $0x198] sm:$0xff] }
 0x74e   :  { %v1325_v40 = vsel %vm175_vm0, %v1321_v39, -inf  ;;  %v18376_v13 = vpack.c.bf16 %v1578_v11, %v1562_v10  ;;  %v1586_v11 = vld [vmem:[%s20731_s23 + $0xc8] sm:$0xff] }
 0x74f   :  { %17830 = vmatmul.mubr.msk.f32.vlgmr.msra.gmra.mrb[8].mxu0 %vm175_vm0, %v1056_v33  ;;  %v1322_v36 = vsel %vm175_vm0, %v1320_v35, -inf  ;;  %v1593_v33 = vld [vmem:[%s20731_s23 + $0x100] sm:$0xff]  ;;  %v1602_v25 = vld [vmem:[%s20731_s23 + $0x148] sm:$0xff] }
 0x750   :  { %17833 = vmatpush3.msra.mxu0 %v270_v23  ;;  %1323 = vmax.xlane.f32.xlu0 %v1322_v36  ;;  %v18386_v23 = vpack.c.bf16 %v1579_v22, %v1563_v19  ;;  %v18388_v36 = vpack.c.bf16 %v1612_v32, %v1596_v29  ;;  %v1587_v19 = vld [vmem:[%s20731_s23 + $0xd0] sm:$0xff]  ;;  %v1618_v28 = vld [vmem:[%s20731_s23 + $0x1c8] sm:$0xff]  ;;  %v1604_v29 = vld [vmem:[%s20731_s23 + $0x158] sm:$0xff] }
 0x751   :  { %18373 = vmatprep.subr.bf16.mxu0 %v18372_v38  ;;  %18377 = vmatprep.subr.bf16.mxu1 %v18376_v13 }
 0x752   :  { %18379 = vmatpush1.bf16.msra.mxu1 %v18378_v18  ;;  %v1571_v18 = vld [vmem:[%s20731_s23 + $0x50] sm:$0xff] }
 0x753   :  { %18381 = vmatprep.subr.bf16.mxu1 %v18380_v30  ;;  %v1620_v30 = vld [vmem:[%s20731_s23 + $0x1d8] sm:$0xff] }
 0x754   :  { %1326 = vmax.xlane.f32.xlu0 %v1325_v40  ;;  %v1611_v40 = vld [vmem:[%s20731_s23 + $0x190] sm:$0xff] }
 0x7dd   :  { %v1324_v41 = vpop.xlane.xlu0 %1323 }
 0x7de   :  { %v1328_v42 = vsub.f32 %v1320_v35, %v1324_v41  ;;  %v1609_v35 = vld [vmem:[%s20731_s23 + $0x180] sm:$0xff] }
 0x7e0   :  { %v1330_v43 = vmul.f32 1.442695, %v1328_v42  ;;  %v1566_v42 = vld [vmem:[%s20731_s23 + $0x28] sm:$0xff] }
 0x7e1   :  { %v1327_v44 = vpop.xlane.xlu0 %1326 }
 0x7e2   :  { %20273 = vpow2.f32 %v1330_v43  ;;  %v1329_v37 = vsub.f32 %v1321_v39, %v1327_v44  ;;  %v1595_v39 = vld [vmem:[%s20731_s23 + $0x110] sm:$0xff]  ;;  %v1582_v43 = vld [vmem:[%s20731_s23 + $0xa8] sm:$0xff]  ;;  %v1568_v44 = vld [vmem:[%s20731_s23 + $0x38] sm:$0xff] }
 0x7e3   :  { %v18390_v41 = vpack.c.bf16 %v1611_v40, %v1595_v39  ;;  %v1619_v39 = vld [vmem:[%s20731_s23 + $0x1d0] sm:$0xff]  ;;  %v18412_v40 = vpack.c.bf16 %v1618_v28, %v1602_v25  ;;  %v1647_v25 = vld [vmem:[%s20817_s21 + $0xa0] sm:$0xff]  ;;  %v1648_v28 = vld [vmem:[%s20817_s21 + $0xa8] sm:$0xff] }
 0x7e4   :  { %v1332_v45 = vmul.f32 1.442695, %v1329_v37  ;;  %v18392_v37 = vpack.c.bf16 %v1582_v43, %v1566_v42  ;;  %v1574_v42 = vld [vmem:[%s20731_s23 + $0x68] sm:$0xff] }
 0x7e5   :  { %v1590_v43 = vld [vmem:[%s20731_s23 + $0xe8] sm:$0xff] }
 0x7e6   :  { %20275 = vpow2.f32 %v1332_v45  ;;  %v1584_v45 = vld [vmem:[%s20731_s23 + $0xb8] sm:$0xff] }
 0x7ec   :  { %v20274_v46 = vpop.eup %20273 }
 0x7ed   :  { %v1334_v47 = vsel %vm175_vm0, %v20274_v46, 0.0 }
 0x7ee   :  { %1335 = vadd.xlane.f32.xlu0 %v1334_v47  ;;  %v18400_v47 = vpack.c.bf16 %v1584_v45, %v1568_v44  ;;  %v1576_v44 = vld [vmem:[%s20731_s23 + $0x78] sm:$0xff] }
 0x7f0   :  { %v20276_v34 = vpop.eup %20275 }
 0x7f1   :  { %v1337_v24 = vsel %vm175_vm0, %v20276_v34, 0.0 }
 0x7f2   :  { %1338 = vadd.xlane.f32.xlu0 %v1337_v24 }
 0x822   :  { %v17831_v26 = vpop.f32.mrb[8].mxu0 }
 0x823   :  { %v1135_v48 = vpop.f32.mrb[9].mxu0 }
 0x824   :  { %17834 = vmatprep.mubr.msk.f32.mxu0 %vm367_vm2, %v1135_v48 }
 0x825   :  { %17835 = vmatmul.mubr.msk.f32.vlgmr.msra.gmra.mrb[4].mxu0 %vm367_vm2, %v17831_v26 }
 0x826   :  { %18375 = vmatpush3.bf16.msra.mxu0 %v18372_v38  ;;  %v18382_v38 = vpack.c.bf16 %v1609_v35, %v1593_v33  ;;  %v18418_v33 = vpack.c.bf16 %v1587_v19, %v1571_v18  ;;  %v1601_v35 = vld [vmem:[%s20731_s23 + $0x140] sm:$0xff] }
 0x827   :  { %17851 = vmatprep.subr.mxu0 %v271_v49 }
 0x828   :  { %18383 = vmatpush1.bf16.msra.mxu1 %v18382_v38  ;;  %v1603_v38 = vld [vmem:[%s20731_s23 + $0x150] sm:$0xff] }
 0x829   :  { %18393 = vmatprep.subr.bf16.mxu1 %v18392_v37  ;;  %v1592_v37 = vld [vmem:[%s20731_s23 + $0xf8] sm:$0xff] }
 0x87b   :  { %v1336_v50 = vpop.xlane.xlu0 %1335 }
 0x87c   :  { %20277 = vrcp.f32 %v1336_v50 }
 0x87f   :  { %v1339_v51 = vpop.xlane.xlu0 %1338 }
 0x880   :  { %20279 = vrcp.f32 %v1339_v51 }
 0x886   :  { %v20278_v52 = vpop.eup %20277 }
 0x887   :  { %v1341_v53 = vmul.f32 %v20278_v52, %v20274_v46  ;;  %v23630_v46 = vmov 0.0   ;;  %v15256_v52 = vld [vmem:[%s20758_s29] ss:$0 sm:$0xff] }
 0x888   :  { %2036 = vmatprep.mubr.f32.mxu1 %v23630_v46 }
 0x889   :  { %17848 = vmatprep.mubr.msk.f32.mxu0 %vm175_vm0, %v1341_v53  ;;  %v1565_v53 = vld [vmem:[%s20731_s23 + $0x20] sm:$0xff] }
 0x88a   :  { %v20280_v54 = vpop.eup %20279 }
 0x88b   :  { %v1343_v55 = vmul.f32 %v20280_v54, %v20276_v34 }
 0x88d   :  { %17849 = vmatmul.mubr.msk.f32.vlgmr.msra.gmra.mrb[10].mxu0 %vm175_vm0, %v1343_v55  ;;  %v1581_v55 = vld [vmem:[%s20731_s23 + $0xa0] sm:$0xff] }
 0x88e   :  { %17852 = vmatpush3.msra.mxu0 %v271_v49 }
 0x88f   :  { %18385 = vmatprep.subr.bf16.mxu0 %v18384_v17  ;;  %v1585_v17 = vld [vmem:[%s20731_s23 + $0xc0] sm:$0xff] }
 0x890   :  { %v18410_v32 = vpack.c.bf16 %v1585_v17, %v1569_v15  ;;  %v1629_v15 = vld [vmem:[%s20817_s21 + $0x10] sm:$0xff]  ;;  %v1630_v17 = vld [vmem:[%s20817_s21 + $0x18] sm:$0xff] }
 0x960   :  { %v17850_v56 = vpop.f32.mrb[10].mxu0 }
 0x961   :  { %v1422_v57 = vpop.f32.mrb[11].mxu0 }
 0x962   :  { %17853 = vmatprep.mubr.msk.f32.mxu0 %vm367_vm2, %v1422_v57  ;;  %v1583_v57 = vld [vmem:[%s20731_s23 + $0xb0] sm:$0xff] }
 0x963   :  { %17854 = vmatmul.mubr.msk.f32.vlgmr.msra.gmra.mrb[4].mxu0 %vm367_vm2, %v17850_v56  ;;  %v1567_v56 = vld [vmem:[%s20731_s23 + $0x30] sm:$0xff] }
 0x964   :  { %18387 = vmatpush1.bf16.msra.mxu0 %v18386_v23  ;;  %2113 = vmatprep.mubr.f32.mxu0 %v23630_v46 }
 0x965   :  { %18389 = vmatprep.subr.bf16.mxu0 %v18388_v36  ;;  %v1617_v36 = vld [vmem:[%s20731_s23 + $0x1c0] sm:$0xff] }
 0x966   :  { %v18414_v45 = vpack.c.bf16 %v1617_v36, %v1601_v35  ;;  %v1631_v35 = vld [vmem:[%s20817_s21 + $0x20] sm:$0xff]  ;;  %v1632_v36 = vld [vmem:[%s20817_s21 + $0x28] sm:$0xff] }
 0x968   :  { %18391 = vmatpush1.bf16.msra.mxu0 %v18390_v41  ;;  %v18420_v41 = vpack.c.bf16 %v1620_v30, %v1604_v29  ;;  %v1679_v29 = vld [vmem:[%s20817_s21 + $0x1a0] sm:$0xff]  ;;  %v1680_v30 = vld [vmem:[%s20817_s21 + $0x1a8] sm:$0xff] }
 0x969   :  { %18401 = vmatprep.subr.bf16.mxu0 %v18400_v47  ;;  %v18422_v47 = vpack.c.bf16 %v1619_v39, %v1603_v38  ;;  %v18448_v38 = vpack.c.bf16 %v1648_v28, %v1647_v25  ;;  %v18480_v39 = vpack.c.bf16 %v1680_v30, %v1679_v29  ;;  %v1657_v29 = vld [vmem:[%s20817_s21 + $0xf0] sm:$0xff]  ;;  %v1658_v30 = vld [vmem:[%s20817_s21 + $0xf8] sm:$0xff] }
 0xa36   :  { %v17855_v58 = vpop.f32.mrb[4].mxu0 }
 0xa37   :  { %v19920_v59 = vadd.f32 %v17855_v58, %v15231_v27  ;;  %v1503_v60 = vpop.f32.mrb[5].mxu0  ;;  %v1598_v58 = vld [vmem:[%s20731_s23 + $0x128] sm:$0xff] }
 0xa38   :  { %v19921_v61 = vadd.f32 %v15231_v27, %v1503_v60  ;;  %v15257_v27 = vld [vmem:[%s20763_s16] ss:$0 sm:$0xff]  ;;  %v1614_v60 = vld [vmem:[%s20731_s23 + $0x1a8] sm:$0xff] }
 0xa39   :  { %v1517_v62 = vadd.f32 %v19920_v59, %v20568_v21 }
 0xa3a   :  { %v1516_v63 = vadd.f32 %v19921_v61, %v20566_v20  ;;  %v1600_v61 = vld [vmem:[%s20731_s23 + $0x138] sm:$0xff] }
 0xa3b   :  { %v1521_v0 = vsel %vm279_vm1, %v1517_v62, 0.0 }
 0xa3c   :  { %1522 = vadd.xlane.f32.xlu1 %v1521_v0  ;;  %v1518_v1 = vsel %vm279_vm1, %v1516_v63, 0.0  ;;  %v18394_v0 = vpack.c.bf16 %v1581_v55, %v1565_v53  ;;  %v1608_v53 = vld [vmem:[%s20731_s23 + $0x178] sm:$0xff] }
 0xa3d   :  { %1519 = vadd.xlane.f32.xlu0 %v1518_v1  ;;  %v18402_v1 = vpack.c.bf16 %v1583_v57, %v1567_v56  ;;  %v1605_v57 = vld [vmem:[%s20731_s23 + $0x160] sm:$0xff] }
 0xac9   :  { %v1523_v2 = vpop.xlane.xlu1 %1522 }
 0xaca   :  { %v1526_v3 = vmul.f32 0.03125, %v1523_v2  ;;  %v1520_v4 = vpop.xlane.xlu0 %1519  ;;  %v1597_v2 = vld [vmem:[%s20731_s23 + $0x120] sm:$0xff] }
 0xacb   :  { %v1525_v5 = vmul.f32 0.03125, %v1520_v4 }
 0xacc   :  { %v20718_v6 = vsub.f32 %v1517_v62, %v1526_v3  ;;  %v1616_v62 = vld [vmem:[%s20731_s23 + $0x1b8] sm:$0xff] }
 0xacd   :  { %v20720_v7 = vsub.f32 %v1516_v63, %v1525_v5  ;;  %v1613_v5 = vld [vmem:[%s20731_s23 + $0x1a0] sm:$0xff] }
 0xace   :  { %v1530_v20 = vmul.f32 %v20718_v6, %v20718_v6  ;;  %v18398_v13 = vpack.c.bf16 %v1613_v5, %v1597_v2  ;;  %v1627_v5 = vld [vmem:[%s20817_s21] sm:$0xff] }
 0xacf   :  { %v1529_v8 = vmul.f32 %v20720_v7, %v20720_v7 }
 0xad0   :  { %v1534_v9 = vsel %vm279_vm1, %v1530_v20, 0.0  ;;  %v18404_v20 = vpack.c.bf16 %v1616_v62, %v1600_v61  ;;  %v1643_v62 = vld [vmem:[%s20817_s21 + $0x80] sm:$0xff] }
 0xad1   :  { %v1531_v21 = vsel %vm279_vm1, %v1529_v8, 0.0  ;;  %v1615_v8 = vld [vmem:[%s20731_s23 + $0x1b0] sm:$0xff] }
 0xad2   :  { %1532 = vadd.xlane.f32.xlu0 %v1531_v21  ;;  %v18396_v21 = vpack.c.bf16 %v1614_v60, %v1598_v58  ;;  %v1607_v58 = vld [vmem:[%s20731_s23 + $0x170] sm:$0xff] }
 0xad6   :  { %1535 = vadd.xlane.f32.xlu0 %v1534_v9  ;;  %v1570_v9 = vld [vmem:[%s20731_s23 + $0x48] sm:$0xff] }
 0xad7   :  { %v18408_v22 = vpack.c.bf16 %v1586_v11, %v1570_v9  ;;  %v1660_v9 = vld [vmem:[%s20817_s21 + $0x108] sm:$0xff]  ;;  %v1646_v11 = vld [vmem:[%s20817_s21 + $0x98] sm:$0xff] }
 0xb5f   :  { %v1533_v34 = vpop.xlane.xlu0 %1532 }
 0xb60   :  { %v1537_v24 = vmul.f32 0.03125, %v1533_v34  ;;  %v1573_v34 = vld [vmem:[%s20731_s23 + $0x60] sm:$0xff] }
 0xb62   :  { %v1539_v26 = vadd.f32 1e-05, %v1537_v24  ;;  %v1589_v24 = vld [vmem:[%s20731_s23 + $0xe0] sm:$0xff] }
 0xb63   :  { %v1536_v48 = vpop.xlane.xlu0 %1535  ;;  %v18426_v55 = vpack.c.bf16 %v1589_v24, %v1573_v34  ;;  %v1633_v34 = vld [vmem:[%s20817_s21 + $0x30] sm:$0xff]  ;;  %v1634_v24 = vld [vmem:[%s20817_s21 + $0x38] sm:$0xff] }
 0xb64   :  { %20281 = vrsqrt.f32 %v1539_v26  ;;  %v1538_v49 = vmul.f32 0.03125, %v1536_v48  ;;  %v1575_v26 = vld [vmem:[%s20731_s23 + $0x70] sm:$0xff] }
 0xb65   :  { %v1591_v48 = vld [vmem:[%s20731_s23 + $0xf0] sm:$0xff] }
 0xb66   :  { %v1540_v50 = vadd.f32 1e-05, %v1538_v49  ;;  %v18424_v49 = vpack.c.bf16 %v1590_v43, %v1574_v42  ;;  %v18434_v56 = vpack.c.bf16 %v1591_v48, %v1575_v26  ;;  %v1649_v42 = vld [vmem:[%s20817_s21 + $0xb0] sm:$0xff]  ;;  %v1650_v43 = vld [vmem:[%s20817_s21 + $0xb8] sm:$0xff] }
 0xb67   :  { %v18452_v26 = vpack.c.bf16 %v1650_v43, %v1649_v42  ;;  %v1674_v42 = vld [vmem:[%s20817_s21 + $0x178] sm:$0xff] }
 0xb68   :  { %20283 = vrsqrt.f32 %v1540_v50  ;;  %v18432_v50 = vpack.c.bf16 %v1592_v37, %v1576_v44  ;;  %v1681_v44 = vld [vmem:[%s20817_s21 + $0x1b0] sm:$0xff]  ;;  %v1682_v37 = vld [vmem:[%s20817_s21 + $0x1b8] sm:$0xff] }
 0xb69   :  { %v18484_v48 = vpack.c.bf16 %v1682_v37, %v1681_v44  ;;  %v1707_v44 = vld [vmem:[%s20817_s21 + $0x280] sm:$0xff]  ;;  %v1708_v37 = vld [vmem:[%s20817_s21 + $0x288] sm:$0xff] }
 0xb6e   :  { %v20282_v51 = vpop.eup %20281 }
 0xb6f   :  { %v1543_v54 = vmul.f32 %v20282_v51, %v20720_v7  ;;  %v1599_v7 = vld [vmem:[%s20731_s23 + $0x130] sm:$0xff]  ;;  %v1606_v51 = vld [vmem:[%s20731_s23 + $0x168] sm:$0xff] }
 0xb70   :  { %v18406_v14 = vpack.c.bf16 %v1615_v8, %v1599_v7  ;;  %v1628_v7 = vld [vmem:[%s20817_s21 + $0x8] sm:$0xff] }
 0xb71   :  { %v1551_v59 = vmul.f32 %v15256_v52, %v1543_v54  ;;  %v1624_v54 = vld [vmem:[%s20731_s23 + $0x1f8] sm:$0xff] }
 0xb72   :  { %v20284_v63 = vpop.eup %20283  ;;  %v18436_v61 = vpack.c.bf16 %v1624_v54, %v1608_v53  ;;  %v1683_v53 = vld [vmem:[%s20817_s21 + $0x1c0] sm:$0xff]  ;;  %v1684_v54 = vld [vmem:[%s20817_s21 + $0x1c8] sm:$0xff] }
 0xb73   :  { %v20777_v3 = vadd.f32 %v15257_v27, %v1551_v59  ;;  %v1544_v4 = vmul.f32 %v20284_v63, %v20718_v6  ;;  %v1588_v6 = vld [vmem:[%s20731_s23 + $0xd8] sm:$0xff]  ;;  %v1623_v59 = vld [vmem:[%s20731_s23 + $0x1f0] sm:$0xff]  ;;  %v1644_v63 = vld [vmem:[%s20817_s21 + $0x88] sm:$0xff] }
 0xb74   :  { %v18416_v23 = vpack.c.bf16 %v1588_v6, %v1572_v12  ;;  %v18440_v8 = vpack.c.bf16 %v1644_v63, %v1643_v62  ;;  %v1677_v12 = vld [vmem:[%s20817_s21 + $0x190] sm:$0xff]  ;;  %v1678_v6 = vld [vmem:[%s20817_s21 + $0x198] sm:$0xff] }
 0xb75   :  { %v1552_v10 = vmul.f32 %v15256_v52, %v1544_v4  ;;  %15258 = vmatmul.mubr.msk.f32.vlgmr.msra.gmra.mrb[10].mxu1 %vm279_vm1, %v20777_v3  ;;  %15260 = vmatmul.mubr.msk.f32.vlgmr.msra.gmra.mrb[12].mxu0 %vm279_vm1, %v20777_v3  ;;  %v1622_v52 = vld [vmem:[%s20731_s23 + $0x1e8] sm:$0xff]  ;;  %v18438_v4 = vpack.c.bf16 %v1623_v59, %v1607_v58  ;;  %v18476_v19 = vpack.c.bf16 %v1678_v6, %v1677_v12  ;;  %v1653_v62 = vld [vmem:[%s20817_s21 + $0xd0] sm:$0xff]  ;;  %v1654_v63 = vld [vmem:[%s20817_s21 + $0xd8] sm:$0xff] }
 0xb76   :  { %18395 = vmatpush1.bf16.msra.mxu1 %v18394_v0  ;;  %18403 = vmatpush1.bf16.msra.mxu0 %v18402_v1  ;;  %v18428_v60 = vpack.c.bf16 %v1622_v52, %v1606_v51  ;;  %v1675_v0 = vld [vmem:[%s20817_s21 + $0x180] sm:$0xff]  ;;  %v1676_v1 = vld [vmem:[%s20817_s21 + $0x188] sm:$0xff]  ;;  %v18488_v59 = vpack.c.bf16 %v1684_v54, %v1683_v53 }
 0xb77   :  { %v20792_v16 = vadd.f32 %v15257_v27, %v1552_v10  ;;  %2042 = vmatprep.mubr.f32.mxu1 %v23630_v46  ;;  %2119 = vmatprep.mubr.f32.mxu0 %v23630_v46  ;;  %v1621_v27 = vld [vmem:[%s20731_s23 + $0x1e0] sm:$0xff]  ;;  %v1645_v10 = vld [vmem:[%s20817_s21 + $0x90] sm:$0xff]  ;;  %v1652_v52 = vld [vmem:[%s20817_s21 + $0xc8] sm:$0xff] }
 0xb78   :  { %18397 = vmatprep.subr.bf16.mxu1 %v18396_v21  ;;  %18405 = vmatprep.subr.bf16.mxu0 %v18404_v20  ;;  %v18430_v2 = vpack.c.bf16 %v1621_v27, %v1605_v57  ;;  %v18472_v21 = vpack.c.bf16 %v1676_v1, %v1675_v0  ;;  %v1659_v20 = vld [vmem:[%s20817_s21 + $0x100] sm:$0xff]  ;;  %v18444_v18 = vpack.c.bf16 %v1646_v11, %v1645_v10  ;;  %v1636_v27 = vld [vmem:[%s20817_s21 + $0x48] sm:$0xff]  ;;  %v1685_v0 = vld [vmem:[%s20817_s21 + $0x1d0] sm:$0xff] }
 0xb79   :  { %15259 = vmatmul.mubr.msk.f32.gmra.mrb[12].mxu1 %vm279_vm1, %v20792_v16  ;;  %15261 = vmatmul.mubr.msk.f32.gmra.mrb[14].mxu0 %vm279_vm1, %v20792_v16  ;;  %v1651_v51 = vld [vmem:[%s20817_s21 + $0xc0] sm:$0xff]  ;;  %v1686_v1 = vld [vmem:[%s20817_s21 + $0x1d8] sm:$0xff]  ;;  %v1656_v11 = vld [vmem:[%s20817_s21 + $0xe8] sm:$0xff] }
 0xb7a   :  { %18399 = vmatpush1.bf16.msra.mxu1 %v18398_v13  ;;  %18407 = vmatpush1.bf16.msra.mxu0 %v18406_v14  ;;  %v18442_v13 = vpack.c.bf16 %v1628_v7, %v1627_v5  ;;  %v18474_v14 = vpack.c.bf16 %v1660_v9, %v1659_v20  ;;  %v1635_v57 = vld [vmem:[%s20817_s21 + $0x40] sm:$0xff]  ;;  %v18456_v58 = vpack.c.bf16 %v1652_v52, %v1651_v51  ;;  %v1637_v5 = vld [vmem:[%s20817_s21 + $0x50] sm:$0xff]  ;;  %v1638_v7 = vld [vmem:[%s20817_s21 + $0x58] sm:$0xff] }
 0xb7b   :  { %2190 = vmatprep.mubr.f32.mxu1 %v23630_v46  ;;  %2267 = vmatprep.mubr.f32.mxu0 %v23630_v46  ;;  %v1669_v20 = vld [vmem:[%s20817_s21 + $0x150] sm:$0xff]  ;;  %v1670_v9 = vld [vmem:[%s20817_s21 + $0x158] sm:$0xff]  ;;  %v1655_v10 = vld [vmem:[%s20817_s21 + $0xe0] sm:$0xff] }
 0xb7c   :  { %18409 = vmatprep.subr.bf16.mxu1 %v18408_v22  ;;  %18417 = vmatprep.subr.bf16.mxu0 %v18416_v23  ;;  %v1661_v22 = vld [vmem:[%s20817_s21 + $0x110] sm:$0xff]  ;;  %v1662_v23 = vld [vmem:[%s20817_s21 + $0x118] sm:$0xff]  ;;  %v1687_v12 = vld [vmem:[%s20817_s21 + $0x1e0] sm:$0xff] }
 0xb7d   :  { %15262 = vmatmul.mubr.msk.f32.vlgmr.msra.gmra.mrb[14].mxu1 %vm279_vm1, %v20777_v3  ;;  %15264 = vmatmul.mubr.msk.f32.vlgmr.msra.gmra.mrb[16].mxu0 %vm279_vm1, %v20777_v3  ;;  %v1688_v6 = vld [vmem:[%s20817_s21 + $0x1e8] sm:$0xff]  ;;  %v20950_v51 = vld [vmem:[%s20939_s28] sm:$0xff] }
 0xb7e   :  { %18411 = vmatpush1.bf16.msra.mxu1 %v18410_v32  ;;  %18419 = vmatpush1.bf16.msra.mxu0 %v18418_v33  ;;  %v18446_v32 = vpack.c.bf16 %v1630_v17, %v1629_v15  ;;  %v18478_v33 = vpack.c.bf16 %v1662_v23, %v1661_v22  ;;  %v1639_v15 = vld [vmem:[%s20817_s21 + $0x60] sm:$0xff]  ;;  %v18464_v17 = vpack.c.bf16 %v1656_v11, %v1655_v10  ;;  %v1672_v23 = vld [vmem:[%s20817_s21 + $0x168] sm:$0xff] }
 0xb7f   :  { %2196 = vmatprep.mubr.f32.mxu1 %v23630_v46  ;;  %2273 = vmatprep.mubr.f32.mxu0 %v23630_v46  ;;  %v1671_v22 = vld [vmem:[%s20817_s21 + $0x160] sm:$0xff] }
 0xb80   :  { %18413 = vmatprep.subr.bf16.mxu1 %v18412_v40  ;;  %18421 = vmatprep.subr.bf16.mxu0 %v18420_v41  ;;  %v1663_v40 = vld [vmem:[%s20817_s21 + $0x120] sm:$0xff]  ;;  %v1664_v41 = vld [vmem:[%s20817_s21 + $0x128] sm:$0xff]  ;;  %v18498_v28 = vpack.c.bf16 %v1672_v23, %v1671_v22  ;;  %v1694_v23 = vld [vmem:[%s20817_s21 + $0x218] sm:$0xff] }
 0xb81   :  { %15263 = vmatmul.mubr.msk.f32.gmra.mrb[16].mxu1 %vm279_vm1, %v20792_v16  ;;  %15265 = vmatmul.mubr.msk.f32.gmra.mrb[18].mxu0 %vm279_vm1, %v20792_v16 }
 0xb82   :  { %18415 = vmatpush1.bf16.msra.mxu1 %v18414_v45  ;;  %18423 = vmatpush1.bf16.msra.mxu0 %v18422_v47  ;;  %v18450_v45 = vpack.c.bf16 %v1632_v36, %v1631_v35  ;;  %v18482_v47 = vpack.c.bf16 %v1664_v41, %v1663_v40  ;;  %v1690_v35 = vld [vmem:[%s20817_s21 + $0x1f8] sm:$0xff]  ;;  %v1641_v36 = vld [vmem:[%s20817_s21 + $0x70] sm:$0xff] }
 0xb83   :  { %2344 = vmatprep.mubr.f32.mxu1 %v23630_v46  ;;  %2421 = vmatprep.mubr.f32.mxu0 %v23630_v46  ;;  %v1673_v41 = vld [vmem:[%s20817_s21 + $0x170] sm:$0xff] }
 0xb84   :  { %18425 = vmatprep.subr.bf16.mxu1 %v18424_v49  ;;  %18433 = vmatprep.subr.bf16.mxu0 %v18432_v50  ;;  %v1665_v49 = vld [vmem:[%s20817_s21 + $0x130] sm:$0xff]  ;;  %v1666_v50 = vld [vmem:[%s20817_s21 + $0x138] sm:$0xff]  ;;  %v18502_v43 = vpack.c.bf16 %v1674_v42, %v1673_v41  ;;  %v1712_v42 = vld [vmem:[%s20817_s21 + $0x2a8] sm:$0xff] }
 0xb85   :  { %15266 = vmatmul.mubr.msk.f32.vlgmr.msra.gmra.mrb[18].mxu1 %vm279_vm1, %v20777_v3  ;;  %15268 = vmatmul.mubr.msk.f32.vlgmr.msra.gmra.mrb[20].mxu0 %vm279_vm1, %v20777_v3 }
 0xb86   :  { %18427 = vmatpush1.bf16.msra.mxu1 %v18426_v55  ;;  %18435 = vmatpush1.bf16.msra.mxu0 %v18434_v56  ;;  %v18454_v55 = vpack.c.bf16 %v1634_v24, %v1633_v34  ;;  %v18486_v56 = vpack.c.bf16 %v1666_v50, %v1665_v49  ;;  %v1740_v34 = vld [vmem:[%s20817_s21 + $0x388] sm:$0xff] }
 0xb87   :  { %2350 = vmatprep.mubr.f32.mxu1 %v23630_v46  ;;  %2427 = vmatprep.mubr.f32.mxu0 %v23630_v46 }
 0xb88   :  { %18429 = vmatprep.subr.bf16.mxu1 %v18428_v60  ;;  %18437 = vmatprep.subr.bf16.mxu0 %v18436_v61  ;;  %v1667_v60 = vld [vmem:[%s20817_s21 + $0x140] sm:$0xff]  ;;  %v1668_v61 = vld [vmem:[%s20817_s21 + $0x148] sm:$0xff] }
 0xb89   :  { %15267 = vmatmul.mubr.msk.f32.gmra.mrb[20].mxu1 %vm279_vm1, %v20792_v16  ;;  %15269 = vmatmul.mubr.msk.f32.gmra.mrb[22].mxu0 %vm279_vm1, %v20792_v16 }
 0xb8a   :  { %18431 = vmatpush1.bf16.msra.mxu1 %v18430_v2  ;;  %18439 = vmatpush1.bf16.msra.mxu0 %v18438_v4  ;;  %v18458_v2 = vpack.c.bf16 %v1636_v27, %v1635_v57  ;;  %v18490_v4 = vpack.c.bf16 %v1668_v61, %v1667_v60  ;;  %v1691_v27 = vld [vmem:[%s20817_s21 + $0x200] sm:$0xff] }
 0xb8b   :  { %2498 = vmatprep.mubr.f32.mxu1 %v23630_v46  ;;  %2575 = vmatprep.mubr.f32.mxu0 %v23630_v46 }
 0xb8c   :  { %18441 = vmatprep.subr.bf16.mxu1 %v18440_v8  ;;  %18473 = vmatprep.subr.bf16.mxu0 %v18472_v21  ;;  %v18460_v8 = vpack.c.bf16 %v1654_v63, %v1653_v62  ;;  %v18492_v21 = vpack.c.bf16 %v1686_v1, %v1685_v0  ;;  %v1723_v62 = vld [vmem:[%s20817_s21 + $0x300] sm:$0xff]  ;;  %v1724_v63 = vld [vmem:[%s20817_s21 + $0x308] sm:$0xff]  ;;  %v1709_v0 = vld [vmem:[%s20817_s21 + $0x290] sm:$0xff] }
 0xb8d   :  { %15270 = vmatmul.mubr.msk.f32.vlgmr.msra.gmra.mrb[22].mxu1 %vm279_vm1, %v20777_v3  ;;  %15272 = vmatmul.mubr.msk.f32.vlgmr.msra.gmra.mrb[24].mxu0 %vm279_vm1, %v20777_v3 }
 0xb8e   :  { %2504 = vmatprep.mubr.f32.mxu1 %v23630_v46  ;;  %2581 = vmatprep.mubr.f32.mxu0 %v23630_v46  ;;  %v1806_v46 = vld [vmem:[%s20817_s21 + $0x598] sm:$0xff] }
 0xb8f   :  { %18443 = vmatpush3.bf16.msra.mxu1 %v18442_v13  ;;  %18475 = vmatpush3.bf16.msra.mxu0 %v18474_v14  ;;  %v18462_v13 = vpack.c.bf16 %v1638_v7, %v1637_v5  ;;  %v18494_v14 = vpack.c.bf16 %v1670_v9, %v1669_v20  ;;  %v1710_v7 = vld [vmem:[%s20817_s21 + $0x298] sm:$0xff] }
 0xb90   :  { %18445 = vmatprep.subr.bf16.mxu1 %v18444_v18  ;;  %18477 = vmatprep.subr.bf16.mxu0 %v18476_v19  ;;  %v18496_v18 = vpack.c.bf16 %v1688_v6, %v1687_v12  ;;  %v1640_v19 = vld [vmem:[%s20817_s21 + $0x68] sm:$0xff]  ;;  %v18538_v12 = vpack.c.bf16 %v1724_v63, %v1723_v62 }
 0xb91   :  { %15271 = vmatmul.mubr.msk.f32.gmra.mrb[24].mxu1 %vm279_vm1, %v20792_v16  ;;  %15273 = vmatmul.mubr.msk.f32.gmra.mrb[26].mxu0 %vm279_vm1, %v20792_v16  ;;  %v18466_v25 = vpack.c.bf16 %v1640_v19, %v1639_v15  ;;  %v18508_v19 = vpack.c.bf16 %v1710_v7, %v1709_v0  ;;  %v1728_v63 = vld [vmem:[%s20817_s21 + $0x328] sm:$0xff]  ;;  %v1713_v0 = vld [vmem:[%s20817_s21 + $0x2b0] sm:$0xff]  ;;  %v1746_v7 = vld [vmem:[%s20817_s21 + $0x3b8] sm:$0xff] }
 0xb93   :  { %18447 = vmatpush3.bf16.msra.mxu1 %v18446_v32  ;;  %18479 = vmatpush3.bf16.msra.mxu0 %v18478_v33  ;;  %v1689_v32 = vld [vmem:[%s20817_s21 + $0x1f0] sm:$0xff]  ;;  %v18468_v33 = vpack.c.bf16 %v1658_v30, %v1657_v29 }
 0xb94   :  { %18449 = vmatprep.subr.bf16.mxu1 %v18448_v38  ;;  %18481 = vmatprep.subr.bf16.mxu0 %v18480_v39  ;;  %v1642_v38 = vld [vmem:[%s20817_s21 + $0x78] sm:$0xff]  ;;  %v18500_v39 = vpack.c.bf16 %v1690_v35, %v1689_v32 }
 0xb95   :  { %v18470_v40 = vpack.c.bf16 %v1642_v38, %v1641_v36  ;;  %v1726_v36 = vld [vmem:[%s20817_s21 + $0x318] sm:$0xff]  ;;  %v1711_v38 = vld [vmem:[%s20817_s21 + $0x2a0] sm:$0xff] }
 0xb97   :  { %18451 = vmatpush3.bf16.msra.mxu1 %v18450_v45  ;;  %18483 = vmatpush3.bf16.msra.mxu0 %v18482_v47  ;;  %v1739_v45 = vld [vmem:[%s20817_s21 + $0x380] sm:$0xff]  ;;  %v18504_v47 = vpack.c.bf16 %v1708_v37, %v1707_v44  ;;  %v1744_v44 = vld [vmem:[%s20817_s21 + $0x3a8] sm:$0xff] }
 0xb98   :  { %18453 = vmatprep.subr.bf16.mxu1 %v18452_v26  ;;  %18485 = vmatprep.subr.bf16.mxu0 %v18484_v48  ;;  %v18536_v24 = vpack.c.bf16 %v1740_v34, %v1739_v45  ;;  %v1886_v26 = vlaneseq  ;;  %v1695_v37 = vld [vmem:[%s20817_s21 + $0x220] sm:$0xff] }
 0xb9a   :  { %v20941_v48 = vshrl.u32 %v1886_v26, 7 }
 0xb9b   :  { %18455 = vmatpush3.bf16.msra.mxu1 %v18454_v55  ;;  %18487 = vmatpush3.bf16.msra.mxu0 %v18486_v56 }
 0xb9c   :  { %18457 = vmatprep.subr.bf16.mxu1 %v18456_v58  ;;  %18489 = vmatprep.subr.bf16.mxu0 %v18488_v59  ;;  %v20944_v49 = vsub.s32 0, %v20941_v48  ;;  %v20947_v50 = vsub.s32 2, %v20941_v48  ;;  %v20953_v52 = vsub.s32 1, %v20941_v48  ;;  %v20956_v53 = vsub.s32 3, %v20941_v48  ;;  %v1692_v58 = vld [vmem:[%s20817_s21 + $0x208] sm:$0xff] }
 0xb9d   :  { %v20969_v59 = vsub.s32 5, %v20941_v48  ;;  %v20978_v10 = vsub.s32 7, %v20941_v48  ;;  %v18506_v11 = vpack.c.bf16 %v1692_v58, %v1691_v27 }
 0xb9e   :  { %v1889_v54 = vrot.slane %v20950_v51, %v20944_v49  ;;  %v1897_v55 = vrot.slane %v20950_v51, %v20947_v50  ;;  %v1893_v56 = vrot.slane %v20950_v51, %v20953_v52  ;;  %v1901_v57 = vrot.slane %v20950_v51, %v20956_v53 }
 0xb9f   :  { %18459 = vmatpush3.bf16.msra.mxu1 %v18458_v2  ;;  %18491 = vmatpush3.bf16.msra.mxu0 %v18490_v4  ;;  %v20982_v6 = vrot.slane %v20950_v51, %v20969_v59  ;;  %v20991_v41 = vrot.slane %v20950_v51, %v20978_v10 }
 0xba0   :  { %18461 = vmatprep.subr.bf16.mxu1 %v18460_v8  ;;  %18493 = vmatprep.subr.bf16.mxu0 %v18492_v21  ;;  %v1741_v8 = vld [vmem:[%s20817_s21 + $0x390] sm:$0xff]  ;;  %v1742_v21 = vld [vmem:[%s20817_s21 + $0x398] sm:$0xff] }
 0xba1   :  { %v18540_v22 = vpack.c.bf16 %v1742_v21, %v1741_v8 }
 0xba3   :  { %18463 = vmatpush3.bf16.msra.mxu1 %v18462_v13  ;;  %18495 = vmatpush3.bf16.msra.mxu0 %v18494_v14  ;;  %v1693_v13 = vld [vmem:[%s20817_s21 + $0x210] sm:$0xff] }
 0xba4   :  { %18465 = vmatprep.subr.bf16.mxu1 %v18464_v17  ;;  %18497 = vmatprep.subr.bf16.mxu0 %v18496_v18  ;;  %v18510_v26 = vpack.c.bf16 %v1694_v23, %v1693_v13  ;;  %v1697_v13 = vld [vmem:[%s20817_s21 + $0x230] sm:$0xff]  ;;  %v1730_v23 = vld [vmem:[%s20817_s21 + $0x338] sm:$0xff] }
 0xba7   :  { %18467 = vmatpush3.bf16.msra.mxu1 %v18466_v25  ;;  %18499 = vmatpush3.bf16.msra.mxu0 %v18498_v28  ;;  %v1725_v25 = vld [vmem:[%s20817_s21 + $0x310] sm:$0xff] }
 0xba8   :  { %18469 = vmatprep.subr.bf16.mxu1 %v18468_v33  ;;  %18501 = vmatprep.subr.bf16.mxu0 %v18500_v39 }
 0xbab   :  { %18471 = vmatpush3.bf16.msra.mxu1 %v18470_v40  ;;  %18503 = vmatpush3.bf16.msra.mxu0 %v18502_v43  ;;  %v1743_v43 = vld [vmem:[%s20817_s21 + $0x3a0] sm:$0xff] }
 0xbac   :  { %18505 = vmatprep.subr.bf16.mxu1 %v18504_v47  ;;  %18537 = vmatprep.subr.bf16.mxu0 %v18536_v24  ;;  %v18544_v62 = vpack.c.bf16 %v1744_v44, %v1743_v43 }
 0xc48   :  { %v2038_v60 = vpop.f32.mrb[10].mxu1  ;;  %v2115_v61 = vpop.f32.mrb[12].mxu0 }
 0xc49   :  { %v2039_v1 = vadd.f32 %v2038_v60, %v1889_v54  ;;  %v2116_v2 = vadd.f32 %v2115_v61, %v1897_v55  ;;  %v2040_v4 = vpop.f32.mrb[11].mxu1  ;;  %v2117_v5 = vpop.f32.mrb[13].mxu0  ;;  %v18512_v61 = vpack.c.bf16 %v1712_v42, %v1711_v38  ;;  %v1699_v38 = vld [vmem:[%s20817_s21 + $0x240] sm:$0xff] }
 0xc4a   :  { %v2041_v20 = vadd.f32 %v2040_v4, %v1893_v56  ;;  %v2118_v9 = vadd.f32 %v2117_v5, %v1901_v57  ;;  %v1714_v4 = vld [vmem:[%s20817_s21 + $0x2b8] sm:$0xff]  ;;  %v1745_v5 = vld [vmem:[%s20817_s21 + $0x3b0] sm:$0xff] }
 0xc4b   :  { %v2588_v28 = vmax.f32 %v2039_v1, 0.0  ;;  %v2590_v29 = vmax.f32 %v2116_v2, 0.0 }
 0xc4c   :  { %v2589_v14 = vmax.f32 %v2041_v20, 0.0  ;;  %v2591_v15 = vmax.f32 %v2118_v9, 0.0  ;;  %v2044_v17 = vpop.f32.mrb[12].mxu1  ;;  %v2121_v18 = vpop.f32.mrb[14].mxu0 }
 0xc4d   :  { %v2045_v30 = vadd.f32 %v2044_v17, %v1889_v54  ;;  %v2122_v32 = vadd.f32 %v2121_v18, %v1897_v55  ;;  %v2046_v33 = vpop.f32.mrb[13].mxu1  ;;  %v2123_v35 = vpop.f32.mrb[15].mxu0  ;;  %v18542_v54 = vpack.c.bf16 %v1726_v36, %v1725_v25  ;;  %v1696_v55 = vld [vmem:[%s20817_s21 + $0x228] sm:$0xff]  ;;  %v18516_v18 = vpack.c.bf16 %v1714_v4, %v1713_v0  ;;  %v1715_v25 = vld [vmem:[%s20817_s21 + $0x2c0] sm:$0xff]  ;;  %v1734_v4 = vld [vmem:[%s20817_s21 + $0x358] sm:$0xff] }
 0xc4e   :  { %v2047_v39 = vadd.f32 %v2046_v33, %v1893_v56  ;;  %v2124_v40 = vadd.f32 %v2123_v35, %v1901_v57  ;;  %2690 = vmatprep.mubr.f32.mxu1 %v2589_v14  ;;  %2765 = vmatprep.mubr.f32.mxu0 %v2591_v15  ;;  %v1727_v56 = vld [vmem:[%s20817_s21 + $0x320] sm:$0xff]  ;;  %v1698_v14 = vld [vmem:[%s20817_s21 + $0x238] sm:$0xff] }
 0xc4f   :  { %2691 = vmatmul.mubr.f32.vlgmr.msra.gmra.mrb[26].mxu1 %v2588_v28  ;;  %2766 = vmatmul.mubr.f32.vlgmr.msra.gmra.mrb[28].mxu0 %v2590_v29  ;;  %v2604_v57 = vmax.f32 %v2045_v30, 0.0  ;;  %v2606_v27 = vmax.f32 %v2122_v32, 0.0  ;;  %v1716_v28 = vld [vmem:[%s20817_s21 + $0x2c8] sm:$0xff]  ;;  %v1747_v29 = vld [vmem:[%s20817_s21 + $0x3c0] sm:$0xff]  ;;  %v18518_v35 = vpack.c.bf16 %v1698_v14, %v1697_v13 }
 0xc50   :  { %v2605_v45 = vmax.f32 %v2047_v39, 0.0  ;;  %v2607_v47 = vmax.f32 %v2124_v40, 0.0  ;;  %18507 = vmatpush3.bf16.msra.mxu1 %v18506_v11  ;;  %18539 = vmatpush3.bf16.msra.mxu0 %v18538_v12  ;;  %v20997_v34 = vpop.f32.mrb[14].mxu1  ;;  %v20999_v24 = vpop.f32.mrb[16].mxu0  ;;  %v18514_v11 = vpack.c.bf16 %v1696_v55, %v1695_v37  ;;  %v18546_v12 = vpack.c.bf16 %v1728_v63, %v1727_v56  ;;  %v1748_v30 = vld [vmem:[%s20817_s21 + $0x3c8] sm:$0xff]  ;;  %v1731_v37 = vld [vmem:[%s20817_s21 + $0x340] sm:$0xff] }
 0xc51   :  { %v2194_v58 = vpop.f32.mrb[15].mxu1  ;;  %v2271_v60 = vpop.f32.mrb[17].mxu0  ;;  %18509 = vmatprep.subr.bf16.mxu1 %v18508_v19  ;;  %18541 = vmatprep.subr.bf16.mxu0 %v18540_v22  ;;  %v18548_v19 = vpack.c.bf16 %v1746_v7, %v1745_v5  ;;  %v1729_v22 = vld [vmem:[%s20817_s21 + $0x330] sm:$0xff]  ;;  %v1700_v39 = vld [vmem:[%s20817_s21 + $0x248] sm:$0xff]  ;;  %v18520_v43 = vpack.c.bf16 %v1716_v28, %v1715_v25  ;;  %v18552_v44 = vpack.c.bf16 %v1748_v30, %v1747_v29  ;;  %v1750_v55 = vld [vmem:[%s20817_s21 + $0x3d8] sm:$0xff] }
 0xc52   :  { %v2195_v1 = vadd.f32 %v2194_v58, %v20982_v6  ;;  %v2272_v2 = vadd.f32 %v2271_v60, %v20991_v41  ;;  %2695 = vmatprep.mubr.f32.mxu1 %v2605_v45  ;;  %2770 = vmatprep.mubr.f32.mxu0 %v2607_v47  ;;  %v18550_v36 = vpack.c.bf16 %v1730_v23, %v1729_v22  ;;  %v1732_v45 = vld [vmem:[%s20817_s21 + $0x348] sm:$0xff]  ;;  %v1717_v47 = vld [vmem:[%s20817_s21 + $0x2d0] sm:$0xff]  ;;  %v1719_v5 = vld [vmem:[%s20817_s21 + $0x2e0] sm:$0xff]  ;;  %v21068_v23 = vsub.s32 6, %v20941_v48 }
 0xc53   :  { %2696 = vmatmul.mubr.f32.gmra.mrb[28].mxu1 %v2604_v57  ;;  %2771 = vmatmul.mubr.f32.gmra.mrb[30].mxu0 %v2606_v27  ;;  %v18522_v27 = vpack.c.bf16 %v1700_v39, %v1699_v38  ;;  %v18554_v58 = vpack.c.bf16 %v1732_v45, %v1731_v37  ;;  %v1701_v60 = vld [vmem:[%s20817_s21 + $0x250] sm:$0xff]  ;;  %v1720_v7 = vld [vmem:[%s20817_s21 + $0x2e8] sm:$0xff]  ;;  %v1722_v39 = vld [vmem:[%s20817_s21 + $0x2f8] sm:$0xff] }
 0xc54   :  { %v2593_v8 = vmax.f32 %v2195_v1, 0.0  ;;  %v2595_v21 = vmax.f32 %v2272_v2, 0.0  ;;  %18511 = vmatpush3.bf16.msra.mxu1 %v18510_v26  ;;  %18543 = vmatpush3.bf16.msra.mxu0 %v18542_v54  ;;  %v21010_v20 = vpop.f32.mrb[16].mxu1  ;;  %v21012_v9 = vpop.f32.mrb[18].mxu0  ;;  %v1718_v26 = vld [vmem:[%s20817_s21 + $0x2d8] sm:$0xff]  ;;  %v1749_v54 = vld [vmem:[%s20817_s21 + $0x3d0] sm:$0xff]  ;;  %v18528_v29 = vpack.c.bf16 %v1720_v7, %v1719_v5 }
 0xc55   :  { %v21016_v15 = vpop.f32.mrb[17].mxu1  ;;  %v21018_v17 = vpop.f32.mrb[19].mxu0  ;;  %18513 = vmatprep.subr.bf16.mxu1 %v18512_v61  ;;  %18545 = vmatprep.subr.bf16.mxu0 %v18544_v62  ;;  %v1702_v61 = vld [vmem:[%s20817_s21 + $0x258] sm:$0xff]  ;;  %v18524_v0 = vpack.c.bf16 %v1718_v26, %v1717_v47  ;;  %v18556_v1 = vpack.c.bf16 %v1750_v55, %v1749_v54  ;;  %v1733_v2 = vld [vmem:[%s20817_s21 + $0x350] sm:$0xff]  ;;  %v1704_v22 = vld [vmem:[%s20817_s21 + $0x268] sm:$0xff] }
 0xc56   :  { %2840 = vmatprep.mubr.f32.mxu1 %v2593_v8  ;;  %2915 = vmatprep.mubr.f32.mxu0 %v2595_v21  ;;  %v1751_v8 = vld [vmem:[%s20817_s21 + $0x3e0] sm:$0xff]  ;;  %v1752_v21 = vld [vmem:[%s20817_s21 + $0x3e8] sm:$0xff]  ;;  %v18526_v14 = vpack.c.bf16 %v1702_v61, %v1701_v60  ;;  %v1721_v38 = vld [vmem:[%s20817_s21 + $0x2f0] sm:$0xff] }
 0xc57   :  { %v18560_v30 = vpack.c.bf16 %v1752_v21, %v1751_v8  ;;  %v1705_v54 = vld [vmem:[%s20817_s21 + $0x270] sm:$0xff]  ;;  %v1706_v55 = vld [vmem:[%s20817_s21 + $0x278] sm:$0xff]  ;;  %v1772_v5 = vld [vmem:[%s20817_s21 + $0x488] sm:$0xff] }
 0xc58   :  { %18515 = vmatpush3.bf16.msra.mxu1 %v18514_v11  ;;  %18547 = vmatpush3.bf16.msra.mxu0 %v18546_v12  ;;  %v21026_v32 = vpop.f32.mrb[18].mxu1  ;;  %v21028_v33 = vpop.f32.mrb[20].mxu0  ;;  %v21059_v11 = vsub.s32 4, %v20941_v48  ;;  %v1803_v7 = vld [vmem:[%s20817_s21 + $0x580] sm:$0xff]  ;;  %v1804_v8 = vld [vmem:[%s20817_s21 + $0x588] sm:$0xff] }
 0xc59   :  { %v21032_v40 = vpop.f32.mrb[19].mxu1  ;;  %v21034_v42 = vpop.f32.mrb[21].mxu0  ;;  %18517 = vmatprep.subr.bf16.mxu1 %v18516_v18  ;;  %18549 = vmatprep.subr.bf16.mxu0 %v18548_v19  ;;  %v18558_v18 = vpack.c.bf16 %v1734_v4, %v1733_v2  ;;  %v1703_v19 = vld [vmem:[%s20817_s21 + $0x260] sm:$0xff]  ;;  %v1738_v2 = vld [vmem:[%s20817_s21 + $0x378] sm:$0xff]  ;;  %v21101_v21 = vld [vmem:[%s20939_s28 + $0x8] sm:$0xff] }
 0xc5a   :  { %v1905_v48 = vrot.slane %v20950_v51, %v21059_v11  ;;  %v18530_v47 = vpack.c.bf16 %v1704_v22, %v1703_v19  ;;  %v1771_v4 = vld [vmem:[%s20817_s21 + $0x480] sm:$0xff] }
 0xc5b   :  { %v18568_v22 = vpack.c.bf16 %v1772_v5, %v1771_v4 }
 0xc5c   :  { %18519 = vmatpush3.bf16.msra.mxu1 %v18518_v35  ;;  %18551 = vmatpush3.bf16.msra.mxu0 %v18550_v36  ;;  %v21042_v56 = vpop.f32.mrb[20].mxu1  ;;  %v21044_v57 = vpop.f32.mrb[22].mxu0  ;;  %v1735_v35 = vld [vmem:[%s20817_s21 + $0x360] sm:$0xff]  ;;  %v1736_v36 = vld [vmem:[%s20817_s21 + $0x368] sm:$0xff] }
 0xc5d   :  { %v21048_v62 = vpop.f32.mrb[21].mxu1  ;;  %v21050_v63 = vpop.f32.mrb[23].mxu0  ;;  %18521 = vmatprep.subr.bf16.mxu1 %v18520_v43  ;;  %18553 = vmatprep.subr.bf16.mxu0 %v18552_v44  ;;  %v1753_v43 = vld [vmem:[%s20817_s21 + $0x3f0] sm:$0xff]  ;;  %v1754_v44 = vld [vmem:[%s20817_s21 + $0x3f8] sm:$0xff]  ;;  %v18562_v26 = vpack.c.bf16 %v1736_v36, %v1735_v35  ;;  %v2193_v36 = vadd.f32 %v20997_v34, %v1905_v48  ;;  %v21123_v34 = vrot.slane %v21101_v21, %v20956_v53 }
 0xc5e   :  { %v1773_v35 = vld [vmem:[%s20817_s21 + $0x490] sm:$0xff] }
 0xc60   :  { %18523 = vmatpush3.bf16.msra.mxu1 %v18522_v27  ;;  %18555 = vmatpush3.bf16.msra.mxu0 %v18554_v58  ;;  %v21061_v12 = vpop.f32.mrb[22].mxu1  ;;  %v21063_v13 = vpop.f32.mrb[24].mxu0  ;;  %v1737_v27 = vld [vmem:[%s20817_s21 + $0x370] sm:$0xff]  ;;  %v1913_v58 = vrot.slane %v20950_v51, %v21068_v23  ;;  %v1755_v51 = vld [vmem:[%s20817_s21 + $0x400] sm:$0xff] }
 0xc61   :  { %v21070_v25 = vpop.f32.mrb[23].mxu1  ;;  %v21072_v28 = vpop.f32.mrb[25].mxu0  ;;  %18525 = vmatprep.subr.bf16.mxu1 %v18524_v0  ;;  %18557 = vmatprep.subr.bf16.mxu0 %v18556_v1  ;;  %v18532_v0 = vpack.c.bf16 %v1722_v39, %v1721_v38  ;;  %v18564_v1 = vpack.c.bf16 %v1754_v44, %v1753_v43  ;;  %v18566_v19 = vpack.c.bf16 %v1738_v2, %v1737_v27  ;;  %v1774_v43 = vld [vmem:[%s20817_s21 + $0x498] sm:$0xff]  ;;  %v1805_v44 = vld [vmem:[%s20817_s21 + $0x590] sm:$0xff]  ;;  %v2592_v27 = vmax.f32 %v2193_v36, 0.0 }
 0xc62   :  { %v2270_v38 = vadd.f32 %v20999_v24, %v1913_v58  ;;  %v18600_v39 = vpack.c.bf16 %v1804_v8, %v1803_v7  ;;  %v1758_v2 = vld [vmem:[%s20817_s21 + $0x418] sm:$0xff]  ;;  %v1789_v8 = vld [vmem:[%s20817_s21 + $0x510] sm:$0xff] }
 0xc64   :  { %18527 = vmatpush3.bf16.msra.mxu1 %v18526_v14  ;;  %18559 = vmatpush3.bf16.msra.mxu0 %v18558_v18  ;;  %v21082_v37 = vpop.f32.mrb[24].mxu1  ;;  %v21084_v45 = vpop.f32.mrb[26].mxu0  ;;  %v1756_v14 = vld [vmem:[%s20817_s21 + $0x408] sm:$0xff]  ;;  %v18534_v18 = vpack.c.bf16 %v1706_v55, %v1705_v54  ;;  %v21119_v54 = vrot.slane %v21101_v21, %v20953_v52 }
 0xc65   :  { %v21091_v60 = vpop.f32.mrb[25].mxu1  ;;  %v21093_v61 = vpop.f32.mrb[27].mxu0  ;;  %18529 = vmatprep.subr.bf16.mxu1 %v18528_v29  ;;  %18561 = vmatprep.subr.bf16.mxu0 %v18560_v30  ;;  %v1787_v29 = vld [vmem:[%s20817_s21 + $0x500] sm:$0xff]  ;;  %v1788_v30 = vld [vmem:[%s20817_s21 + $0x508] sm:$0xff]  ;;  %v18570_v24 = vpack.c.bf16 %v1756_v14, %v1755_v51  ;;  %v1790_v51 = vld [vmem:[%s20817_s21 + $0x518] sm:$0xff] }
 0xc66   :  { %v18602_v55 = vpack.c.bf16 %v1788_v30, %v1787_v29  ;;  %v2349_v7 = vadd.f32 %v21032_v40, %v21119_v54 }
 0xc68   :  { %18531 = vmatpush3.bf16.msra.mxu1 %v18530_v47  ;;  %18563 = vmatpush3.bf16.msra.mxu0 %v18562_v26  ;;  %v2201_v47 = vadd.f32 %v21016_v15, %v20982_v6  ;;  %v2278_v26 = vadd.f32 %v21018_v17, %v20991_v41  ;;  %v18572_v6 = vpack.c.bf16 %v1774_v43, %v1773_v35  ;;  %v2594_v41 = vmax.f32 %v2270_v38, 0.0  ;;  %v1791_v38 = vld [vmem:[%s20817_s21 + $0x520] sm:$0xff]  ;;  %v1777_v43 = vld [vmem:[%s20817_s21 + $0x4b0] sm:$0xff] }
 0xc69   :  { %18533 = vmatprep.subr.bf16.mxu1 %v18532_v0  ;;  %18565 = vmatprep.subr.bf16.mxu0 %v18564_v1  ;;  %v18604_v15 = vpack.c.bf16 %v1806_v46, %v1805_v44  ;;  %v2199_v17 = vadd.f32 %v21010_v20, %v1905_v48  ;;  %v2276_v0 = vadd.f32 %v21012_v9, %v1913_v58  ;;  %v1757_v1 = vld [vmem:[%s20817_s21 + $0x410] sm:$0xff]  ;;  %v1775_v20 = vld [vmem:[%s20817_s21 + $0x4a0] sm:$0xff]  ;;  %v1776_v9 = vld [vmem:[%s20817_s21 + $0x4a8] sm:$0xff]  ;;  %v2597_v29 = vmax.f32 %v2349_v7, 0.0 }
 0xc6a   :  { %v2609_v4 = vmax.f32 %v2201_v47, 0.0  ;;  %v2611_v5 = vmax.f32 %v2278_v26, 0.0  ;;  %v2426_v46 = vadd.f32 %v21034_v42, %v21123_v34  ;;  %v1807_v48 = vld [vmem:[%s20817_s21 + $0x5a0] sm:$0xff]  ;;  %v1808_v58 = vld [vmem:[%s20817_s21 + $0x5a8] sm:$0xff]  ;;  %v18574_v42 = vpack.c.bf16 %v1758_v2, %v1757_v1  ;;  %v1778_v44 = vld [vmem:[%s20817_s21 + $0x4b8] sm:$0xff] }
 0xc6b   :  { %v2608_v14 = vmax.f32 %v2199_v17, 0.0  ;;  %v2610_v40 = vmax.f32 %v2276_v0, 0.0  ;;  %v18576_v35 = vpack.c.bf16 %v1776_v9, %v1775_v20  ;;  %v18608_v36 = vpack.c.bf16 %v1808_v58, %v1807_v48  ;;  %v1809_v47 = vld [vmem:[%s20817_s21 + $0x5b0] sm:$0xff]  ;;  %v1810_v26 = vld [vmem:[%s20817_s21 + $0x5b8] sm:$0xff]  ;;  %v1779_v1 = vld [vmem:[%s20817_s21 + $0x4c0] sm:$0xff] }
 0xc6c   :  { %18535 = vmatpush3.bf16.msra.mxu1 %v18534_v18  ;;  %18567 = vmatpush3.bf16.msra.mxu0 %v18566_v19  ;;  %v18606_v18 = vpack.c.bf16 %v1790_v51, %v1789_v8  ;;  %v1759_v19 = vld [vmem:[%s20817_s21 + $0x420] sm:$0xff]  ;;  %v2599_v30 = vmax.f32 %v2426_v46, 0.0  ;;  %v1793_v17 = vld [vmem:[%s20817_s21 + $0x530] sm:$0xff]  ;;  %v1794_v0 = vld [vmem:[%s20817_s21 + $0x538] sm:$0xff] }
 0xc6d   :  { %18569 = vmatprep.subr.bf16.mxu1 %v18568_v22  ;;  %18601 = vmatprep.subr.bf16.mxu0 %v18600_v39  ;;  %v1760_v22 = vld [vmem:[%s20817_s21 + $0x428] sm:$0xff]  ;;  %v18614_v46 = vpack.c.bf16 %v1794_v0, %v1793_v17  ;;  %v1763_v8 = vld [vmem:[%s20817_s21 + $0x440] sm:$0xff] }
 0xc6e   :  { %v1792_v39 = vld [vmem:[%s20817_s21 + $0x528] sm:$0xff]  ;;  %v1795_v48 = vld [vmem:[%s20817_s21 + $0x540] sm:$0xff] }
 0xc6f   :  { %2841 = vmatmul.mubr.f32.vlgmr.msra.gmra.mrb[30].mxu1 %v2592_v27  ;;  %2916 = vmatmul.mubr.f32.vlgmr.msra.gmra.mrb[32].mxu0 %v2594_v41  ;;  %v18580_v27 = vpack.c.bf16 %v1778_v44, %v1777_v43  ;;  %v18612_v41 = vpack.c.bf16 %v1810_v26, %v1809_v47  ;;  %v1780_v2 = vld [vmem:[%s20817_s21 + $0x4c8] sm:$0xff]  ;;  %v1783_v43 = vld [vmem:[%s20817_s21 + $0x4e0] sm:$0xff] }
 0xc70   :  { %2845 = vmatprep.mubr.f32.mxu1 %v2609_v4  ;;  %2920 = vmatprep.mubr.f32.mxu0 %v2611_v5  ;;  %v1811_v4 = vld [vmem:[%s20817_s21 + $0x5c0] sm:$0xff]  ;;  %v1812_v5 = vld [vmem:[%s20817_s21 + $0x5c8] sm:$0xff]  ;;  %v18584_v20 = vpack.c.bf16 %v1780_v2, %v1779_v1  ;;  %v1785_v1 = vld [vmem:[%s20817_s21 + $0x4f0] sm:$0xff] }
 0xc71   :  { %18571 = vmatpush3.bf16.msra.mxu1 %v18570_v24  ;;  %18603 = vmatpush3.bf16.msra.mxu0 %v18602_v55  ;;  %v18578_v24 = vpack.c.bf16 %v1760_v22, %v1759_v19  ;;  %v18610_v55 = vpack.c.bf16 %v1792_v39, %v1791_v38  ;;  %v1764_v51 = vld [vmem:[%s20817_s21 + $0x448] sm:$0xff]  ;;  %v18616_v9 = vpack.c.bf16 %v1812_v5, %v1811_v4  ;;  %v1797_v38 = vld [vmem:[%s20817_s21 + $0x550] sm:$0xff]  ;;  %v1798_v39 = vld [vmem:[%s20817_s21 + $0x558] sm:$0xff] }
 0xc72   :  { %18573 = vmatprep.subr.bf16.mxu1 %v18572_v6  ;;  %18605 = vmatprep.subr.bf16.mxu0 %v18604_v15  ;;  %v1761_v6 = vld [vmem:[%s20817_s21 + $0x430] sm:$0xff]  ;;  %v1762_v15 = vld [vmem:[%s20817_s21 + $0x438] sm:$0xff]  ;;  %v1796_v58 = vld [vmem:[%s20817_s21 + $0x548] sm:$0xff]  ;;  %v18586_v19 = vpack.c.bf16 %v1764_v51, %v1763_v8 }
 0xc73   :  { %2846 = vmatmul.mubr.f32.gmra.mrb[32].mxu1 %v2608_v14  ;;  %2921 = vmatmul.mubr.f32.gmra.mrb[34].mxu0 %v2610_v40  ;;  %v18582_v7 = vpack.c.bf16 %v1762_v15, %v1761_v6  ;;  %v1781_v14 = vld [vmem:[%s20817_s21 + $0x4d0] sm:$0xff]  ;;  %v1782_v40 = vld [vmem:[%s20817_s21 + $0x4d8] sm:$0xff]  ;;  %v18618_v22 = vpack.c.bf16 %v1796_v58, %v1795_v48  ;;  %v1784_v44 = vld [vmem:[%s20817_s21 + $0x4e8] sm:$0xff]  ;;  %v1929_v48 = vrot.slane %v21101_v21, %v20947_v50 }
 0xc74   :  { %2990 = vmatprep.mubr.f32.mxu1 %v2597_v29  ;;  %3065 = vmatprep.mubr.f32.mxu0 %v2599_v30  ;;  %v1765_v29 = vld [vmem:[%s20817_s21 + $0x450] sm:$0xff]  ;;  %v1766_v30 = vld [vmem:[%s20817_s21 + $0x458] sm:$0xff]  ;;  %v1815_v47 = vld [vmem:[%s20817_s21 + $0x5e0] sm:$0xff] }
 0xc75   :  { %18575 = vmatpush3.bf16.msra.mxu1 %v18574_v42  ;;  %18607 = vmatpush3.bf16.msra.mxu0 %v18606_v18  ;;  %v1813_v42 = vld [vmem:[%s20817_s21 + $0x5d0] sm:$0xff]  ;;  %v1814_v18 = vld [vmem:[%s20817_s21 + $0x5d8] sm:$0xff]  ;;  %v1816_v26 = vld [vmem:[%s20817_s21 + $0x5e8] sm:$0xff] }
 0xc76   :  { %18577 = vmatprep.subr.bf16.mxu1 %v18576_v35  ;;  %18609 = vmatprep.subr.bf16.mxu0 %v18608_v36  ;;  %v18588_v35 = vpack.c.bf16 %v1782_v40, %v1781_v14  ;;  %v18620_v36 = vpack.c.bf16 %v1814_v18, %v1813_v42  ;;  %v1767_v6 = vld [vmem:[%s20817_s21 + $0x460] sm:$0xff]  ;;  %v1768_v15 = vld [vmem:[%s20817_s21 + $0x468] sm:$0xff]  ;;  %v1786_v2 = vld [vmem:[%s20817_s21 + $0x4f8] sm:$0xff] }
 0xc77   :  { %v1799_v17 = vld [vmem:[%s20817_s21 + $0x560] sm:$0xff]  ;;  %v1800_v0 = vld [vmem:[%s20817_s21 + $0x568] sm:$0xff]  ;;  %v1817_v4 = vld [vmem:[%s20817_s21 + $0x5f0] sm:$0xff]  ;;  %v18596_v58 = vpack.c.bf16 %v1786_v2, %v1785_v1  ;;  %v2430_v2 = vadd.f32 %v21044_v57, %v1929_v48 }
 0xc78   :  { %v1818_v5 = vld [vmem:[%s20817_s21 + $0x5f8] sm:$0xff]  ;;  %v18626_v8 = vpack.c.bf16 %v1800_v0, %v1799_v17  ;;  %v1769_v51 = vld [vmem:[%s20817_s21 + $0x470] sm:$0xff]  ;;  %v1835_v42 = vld [vmem:[%s20817_s21 + $0x680] sm:$0xff]  ;;  %v21207_v17 = vrot.slane %v21101_v21, %v20969_v59 }
 0xc79   :  { %18579 = vmatpush3.bf16.msra.mxu1 %v18578_v24  ;;  %18611 = vmatpush3.bf16.msra.mxu0 %v18610_v55  ;;  %v18590_v24 = vpack.c.bf16 %v1766_v30, %v1765_v29  ;;  %v18622_v55 = vpack.c.bf16 %v1798_v39, %v1797_v38  ;;  %v18628_v14 = vpack.c.bf16 %v1818_v5, %v1817_v4  ;;  %v1802_v40 = vld [vmem:[%s20817_s21 + $0x578] sm:$0xff]  ;;  %v1836_v18 = vld [vmem:[%s20817_s21 + $0x688] sm:$0xff]  ;;  %v1819_v29 = vld [vmem:[%s20817_s21 + $0x600] sm:$0xff] }
 0xc7a   :  { %18581 = vmatprep.subr.bf16.mxu1 %v18580_v27  ;;  %18613 = vmatprep.subr.bf16.mxu0 %v18612_v41  ;;  %v18592_v27 = vpack.c.bf16 %v1784_v44, %v1783_v43  ;;  %v18624_v41 = vpack.c.bf16 %v1816_v26, %v1815_v47  ;;  %v1820_v30 = vld [vmem:[%s20817_s21 + $0x608] sm:$0xff]  ;;  %v18632_v38 = vpack.c.bf16 %v1836_v18, %v1835_v42  ;;  %v1851_v39 = vld [vmem:[%s20817_s21 + $0x700] sm:$0xff]  ;;  %v1837_v44 = vld [vmem:[%s20817_s21 + $0x690] sm:$0xff] }
 0xc7b   :  { %v1852_v43 = vld [vmem:[%s20817_s21 + $0x708] sm:$0xff]  ;;  %v2424_v26 = vadd.f32 %v21028_v33, %v1929_v48  ;;  %v18634_v33 = vpack.c.bf16 %v1820_v30, %v1819_v29  ;;  %v1821_v4 = vld [vmem:[%s20817_s21 + $0x610] sm:$0xff]  ;;  %v1822_v5 = vld [vmem:[%s20817_s21 + $0x618] sm:$0xff] }
 0xc7c   :  { %v18666_v0 = vpack.c.bf16 %v1852_v43, %v1851_v39  ;;  %v1840_v57 = vld [vmem:[%s20817_s21 + $0x6a8] sm:$0xff]  ;;  %v1823_v42 = vld [vmem:[%s20817_s21 + $0x620] sm:$0xff]  ;;  %v1842_v39 = vld [vmem:[%s20817_s21 + $0x6b8] sm:$0xff] }
 0xc7d   :  { %18583 = vmatpush3.bf16.msra.mxu1 %v18582_v7  ;;  %18615 = vmatpush3.bf16.msra.mxu0 %v18614_v46  ;;  %v1921_v7 = vrot.slane %v21101_v21, %v20944_v49  ;;  %v18594_v46 = vpack.c.bf16 %v1768_v15, %v1767_v6  ;;  %v1869_v6 = vld [vmem:[%s20817_s21 + $0x790] sm:$0xff]  ;;  %v1870_v15 = vld [vmem:[%s20817_s21 + $0x798] sm:$0xff]  ;;  %v1872_v48 = vld [vmem:[%s20817_s21 + $0x7a8] sm:$0xff] }
 0xc7e   :  { %18585 = vmatprep.subr.bf16.mxu1 %v18584_v20  ;;  %18617 = vmatprep.subr.bf16.mxu0 %v18616_v9  ;;  %v1770_v20 = vld [vmem:[%s20817_s21 + $0x478] sm:$0xff]  ;;  %v1801_v9 = vld [vmem:[%s20817_s21 + $0x570] sm:$0xff]  ;;  %v1824_v18 = vld [vmem:[%s20817_s21 + $0x628] sm:$0xff] }
 0xc7f   :  { %v2347_v47 = vadd.f32 %v21026_v32, %v1921_v7  ;;  %v21211_v32 = vrot.slane %v21101_v21, %v20978_v10  ;;  %v1873_v43 = vld [vmem:[%s20817_s21 + $0x7b0] sm:$0xff] }
 0xc81   :  { %18587 = vmatpush3.bf16.msra.mxu1 %v18586_v19  ;;  %18619 = vmatpush3.bf16.msra.mxu0 %v18618_v22  ;;  %v1867_v19 = vld [vmem:[%s20817_s21 + $0x780] sm:$0xff]  ;;  %v1868_v22 = vld [vmem:[%s20817_s21 + $0x788] sm:$0xff]  ;;  %v2596_v1 = vmax.f32 %v2347_v47, 0.0  ;;  %v18642_v47 = vpack.c.bf16 %v1824_v18, %v1823_v42 }
 0xc82   :  { %18589 = vmatprep.subr.bf16.mxu1 %v18588_v35  ;;  %18621 = vmatprep.subr.bf16.mxu0 %v18620_v36  ;;  %v18598_v35 = vpack.c.bf16 %v1770_v20, %v1769_v51  ;;  %v18630_v36 = vpack.c.bf16 %v1802_v40, %v1801_v9  ;;  %v2503_v51 = vadd.f32 %v21070_v25, %v21207_v17  ;;  %v1853_v9 = vld [vmem:[%s20817_s21 + $0x710] sm:$0xff]  ;;  %v2614_v25 = vmax.f32 %v2430_v2, 0.0  ;;  %v1828_v2 = vld [vmem:[%s20817_s21 + $0x648] sm:$0xff]  ;;  %v1847_v42 = vld [vmem:[%s20817_s21 + $0x6e0] sm:$0xff] }
 0xc83   :  { %v2580_v20 = vadd.f32 %v21072_v28, %v21211_v32  ;;  %v18638_v28 = vpack.c.bf16 %v1822_v5, %v1821_v4  ;;  %v1848_v18 = vld [vmem:[%s20817_s21 + $0x6e8] sm:$0xff] }
 0xc85   :  { %18591 = vmatpush3.bf16.msra.mxu1 %v18590_v24  ;;  %18623 = vmatpush3.bf16.msra.mxu0 %v18622_v55  ;;  %v18664_v24 = vpack.c.bf16 %v1868_v22, %v1867_v19  ;;  %v1838_v55 = vld [vmem:[%s20817_s21 + $0x698] sm:$0xff]  ;;  %v2601_v19 = vmax.f32 %v2503_v51, 0.0  ;;  %v2603_v22 = vmax.f32 %v2580_v20, 0.0  ;;  %v1845_v51 = vld [vmem:[%s20817_s21 + $0x6d0] sm:$0xff] }
 0xc86   :  { %18593 = vmatprep.subr.bf16.mxu1 %v18592_v27  ;;  %18625 = vmatprep.subr.bf16.mxu0 %v18624_v41  ;;  %v2355_v27 = vadd.f32 %v21048_v62, %v21119_v54  ;;  %v2432_v41 = vadd.f32 %v21050_v63, %v21123_v34  ;;  %v18636_v62 = vpack.c.bf16 %v1838_v55, %v1837_v44  ;;  %v2598_v63 = vmax.f32 %v2424_v26, 0.0  ;;  %v1874_v44 = vld [vmem:[%s20817_s21 + $0x7b8] sm:$0xff] }
 0xc87   :  { %v18668_v54 = vpack.c.bf16 %v1870_v15, %v1869_v6  ;;  %v2353_v34 = vadd.f32 %v21042_v56, %v1921_v7  ;;  %v1839_v56 = vld [vmem:[%s20817_s21 + $0x6a0] sm:$0xff]  ;;  %v1826_v55 = vld [vmem:[%s20817_s21 + $0x638] sm:$0xff]  ;;  %v18676_v15 = vpack.c.bf16 %v1874_v44, %v1873_v43  ;;  %v1864_v44 = vld [vmem:[%s20817_s21 + $0x768] sm:$0xff] }
 0xc88   :  { %v1871_v7 = vld [vmem:[%s20817_s21 + $0x7a0] sm:$0xff]  ;;  %v18640_v29 = vpack.c.bf16 %v1840_v57, %v1839_v56  ;;  %v1846_v20 = vld [vmem:[%s20817_s21 + $0x6d8] sm:$0xff] }
 0xc89   :  { %18595 = vmatpush3.bf16.msra.mxu1 %v18594_v46  ;;  %18627 = vmatpush3.bf16.msra.mxu0 %v18626_v8  ;;  %v2613_v46 = vmax.f32 %v2355_v27, 0.0  ;;  %v2615_v8 = vmax.f32 %v2432_v41, 0.0  ;;  %v18672_v30 = vpack.c.bf16 %v1872_v48, %v1871_v7  ;;  %v1857_v27 = vld [vmem:[%s20817_s21 + $0x730] sm:$0xff]  ;;  %v1858_v41 = vld [vmem:[%s20817_s21 + $0x738] sm:$0xff]  ;;  %v1863_v43 = vld [vmem:[%s20817_s21 + $0x760] sm:$0xff] }
 0xc8a   :  { %18597 = vmatprep.subr.bf16.mxu1 %v18596_v58  ;;  %18629 = vmatprep.subr.bf16.mxu0 %v18628_v14  ;;  %v1854_v58 = vld [vmem:[%s20817_s21 + $0x718] sm:$0xff]  ;;  %v2612_v14 = vmax.f32 %v2353_v34, 0.0  ;;  %v1827_v34 = vld [vmem:[%s20817_s21 + $0x640] sm:$0xff]  ;;  %v1829_v7 = vld [vmem:[%s20817_s21 + $0x650] sm:$0xff] }
 0xc8b   :  { %v18670_v40 = vpack.c.bf16 %v1854_v58, %v1853_v9  ;;  %v1877_v9 = vld [vmem:[%s20817_s21 + $0x7d0] sm:$0xff]  ;;  %v1878_v58 = vld [vmem:[%s20817_s21 + $0x7d8] sm:$0xff]  ;;  %v18650_v56 = vpack.c.bf16 %v1828_v2, %v1827_v34 }
 0xc8c   :  { %v1830_v48 = vld [vmem:[%s20817_s21 + $0x658] sm:$0xff] }
 0xc8d   :  { %18599 = vmatpush3.bf16.msra.mxu1 %v18598_v35  ;;  %18631 = vmatpush3.bf16.msra.mxu0 %v18630_v36  ;;  %v1855_v35 = vld [vmem:[%s20817_s21 + $0x720] sm:$0xff]  ;;  %v1856_v36 = vld [vmem:[%s20817_s21 + $0x728] sm:$0xff] }
 0xc8e   :  { %18633 = vmatprep.subr.bf16.mxu1 %v18632_v38  ;;  %18665 = vmatprep.subr.bf16.mxu0 %v18664_v24  ;;  %v1841_v38 = vld [vmem:[%s20817_s21 + $0x6b0] sm:$0xff]  ;;  %v18674_v26 = vpack.c.bf16 %v1856_v36, %v1855_v35  ;;  %v1831_v35 = vld [vmem:[%s20817_s21 + $0x660] sm:$0xff]  ;;  %v1832_v36 = vld [vmem:[%s20817_s21 + $0x668] sm:$0xff] }
 0xc8f   :  { %v1825_v24 = vld [vmem:[%s20817_s21 + $0x630] sm:$0xff]  ;;  %v18644_v6 = vpack.c.bf16 %v1842_v39, %v1841_v38  ;;  %v18656_v38 = vpack.c.bf16 %v1848_v18, %v1847_v42 }
 0xc90   :  { %2991 = vmatmul.mubr.f32.vlgmr.msra.gmra.mrb[34].mxu1 %v2596_v1  ;;  %3066 = vmatmul.mubr.f32.vlgmr.msra.gmra.mrb[36].mxu0 %v2598_v63  ;;  %v18646_v1 = vpack.c.bf16 %v1826_v55, %v1825_v24  ;;  %v18678_v63 = vpack.c.bf16 %v1858_v41, %v1857_v27  ;;  %v1881_v24 = vld [vmem:[%s20817_s21 + $0x7f0] sm:$0xff]  ;;  %v1882_v55 = vld [vmem:[%s20817_s21 + $0x7f8] sm:$0xff]  ;;  %v18690_v27 = vpack.c.bf16 %v1864_v44, %v1863_v43 }
 0xc91   :  { %2995 = vmatprep.mubr.f32.mxu1 %v2613_v46  ;;  %3070 = vmatprep.mubr.f32.mxu0 %v2615_v8  ;;  %v1859_v46 = vld [vmem:[%s20817_s21 + $0x740] sm:$0xff]  ;;  %v1860_v8 = vld [vmem:[%s20817_s21 + $0x748] sm:$0xff]  ;;  %v1833_v41 = vld [vmem:[%s20817_s21 + $0x670] sm:$0xff] }
 0xc92   :  { %18635 = vmatpush3.bf16.msra.mxu1 %v18634_v33  ;;  %18667 = vmatpush3.bf16.msra.mxu0 %v18666_v0  ;;  %v1843_v33 = vld [vmem:[%s20817_s21 + $0x6c0] sm:$0xff]  ;;  %v1844_v0 = vld [vmem:[%s20817_s21 + $0x6c8] sm:$0xff]  ;;  %v18682_v57 = vpack.c.bf16 %v1860_v8, %v1859_v46  ;;  %v2586_v46 = vadd.f32 %v21093_v61, %v21211_v32 }
 0xc93   :  { %18637 = vmatprep.subr.bf16.mxu1 %v18636_v62  ;;  %18669 = vmatprep.subr.bf16.mxu0 %v18668_v54  ;;  %v1875_v62 = vld [vmem:[%s20817_s21 + $0x7c0] sm:$0xff]  ;;  %v1876_v54 = vld [vmem:[%s20817_s21 + $0x7c8] sm:$0xff]  ;;  %v18648_v4 = vpack.c.bf16 %v1844_v0, %v1843_v33  ;;  %v1945_v33 = vrot.slane %v21101_v21, %v21068_v23 }
 0xc94   :  { %2996 = vmatmul.mubr.f32.gmra.mrb[36].mxu1 %v2612_v14  ;;  %3071 = vmatmul.mubr.f32.gmra.mrb[38].mxu0 %v2614_v25  ;;  %v18680_v5 = vpack.c.bf16 %v1876_v54, %v1875_v62  ;;  %v18652_v14 = vpack.c.bf16 %v1846_v20, %v1845_v51  ;;  %v18684_v25 = vpack.c.bf16 %v1878_v58, %v1877_v9  ;;  %v1834_v54 = vld [vmem:[%s20817_s21 + $0x678] sm:$0xff] }
 0xc95   :  { %3140 = vmatprep.mubr.f32.mxu1 %v2601_v19  ;;  %3215 = vmatprep.mubr.f32.mxu0 %v2603_v22  ;;  %v1879_v19 = vld [vmem:[%s20817_s21 + $0x7e0] sm:$0xff]  ;;  %v1880_v22 = vld [vmem:[%s20817_s21 + $0x7e8] sm:$0xff]  ;;  %v18692_v62 = vpack.c.bf16 %v1882_v55, %v1881_v24  ;;  %v18662_v34 = vpack.c.bf16 %v1834_v54, %v1833_v41  ;;  %v2584_v9 = vadd.f32 %v21084_v45, %v1945_v33 }
 0xc96   :  { %18639 = vmatpush3.bf16.msra.mxu1 %v18638_v28  ;;  %18671 = vmatpush3.bf16.msra.mxu0 %v18670_v40  ;;  %v1861_v28 = vld [vmem:[%s20817_s21 + $0x750] sm:$0xff]  ;;  %v1862_v40 = vld [vmem:[%s20817_s21 + $0x758] sm:$0xff]  ;;  %v18688_v39 = vpack.c.bf16 %v1880_v22, %v1879_v19  ;;  %v15274_v45 = vld [vmem:[%s21286_s17] ss:$0 sm:$0xff] }
 0xc97   :  { %18641 = vmatprep.subr.bf16.mxu1 %v18640_v29  ;;  %18673 = vmatprep.subr.bf16.mxu0 %v18672_v30  ;;  %v18654_v29 = vpack.c.bf16 %v1830_v48, %v1829_v7  ;;  %v18686_v30 = vpack.c.bf16 %v1862_v40, %v1861_v28 }
 0xc9a   :  { %18643 = vmatpush3.bf16.msra.mxu1 %v18642_v47  ;;  %18675 = vmatpush3.bf16.msra.mxu0 %v18674_v26  ;;  %v1849_v47 = vld [vmem:[%s20817_s21 + $0x6f0] sm:$0xff]  ;;  %v1850_v26 = vld [vmem:[%s20817_s21 + $0x6f8] sm:$0xff] }
 0xc9b   :  { %18645 = vmatprep.subr.bf16.mxu1 %v18644_v6  ;;  %18677 = vmatprep.subr.bf16.mxu0 %v18676_v15  ;;  %v1937_v6 = vrot.slane %v21101_v21, %v21059_v11  ;;  %v18658_v15 = vpack.c.bf16 %v1832_v36, %v1831_v35  ;;  %v18660_v0 = vpack.c.bf16 %v1850_v26, %v1849_v47 }
 0xc9c   :  { %v2509_v21 = vadd.f32 %v21091_v60, %v21207_v17 }
 0xc9d   :  { %v2507_v20 = vadd.f32 %v21082_v37, %v1937_v6 }
 0xc9e   :  { %18647 = vmatpush3.bf16.msra.mxu1 %v18646_v1  ;;  %18679 = vmatpush3.bf16.msra.mxu0 %v18678_v63  ;;  %v1865_v1 = vld [vmem:[%s20817_s21 + $0x770] sm:$0xff]  ;;  %v1866_v63 = vld [vmem:[%s20817_s21 + $0x778] sm:$0xff]  ;;  %v2617_v58 = vmax.f32 %v2509_v21, 0.0 }
 0xc9f   :  { %18649 = vmatprep.subr.bf16.mxu1 %v18648_v4  ;;  %18681 = vmatprep.subr.bf16.mxu0 %v18680_v5  ;;  %v18694_v2 = vpack.c.bf16 %v1866_v63, %v1865_v1  ;;  %v2501_v4 = vadd.f32 %v21061_v12, %v1937_v6  ;;  %v2578_v5 = vadd.f32 %v21063_v13, %v1945_v33  ;;  %v2619_v12 = vmax.f32 %v2586_v46, 0.0 }
 0xca0   :  { %v2616_v13 = vmax.f32 %v2507_v20, 0.0 }
 0xca1   :  { %v2600_v8 = vmax.f32 %v2501_v4, 0.0  ;;  %v2602_v51 = vmax.f32 %v2578_v5, 0.0 }
 0xca2   :  { %18651 = vmatpush3.bf16.msra.mxu1 %v18650_v56  ;;  %18683 = vmatpush3.bf16.msra.mxu0 %v18682_v57  ;;  %v2618_v56 = vmax.f32 %v2584_v9, 0.0 }
 0xca3   :  { %18653 = vmatprep.subr.bf16.mxu1 %v18652_v14  ;;  %18685 = vmatprep.subr.bf16.mxu0 %v18684_v25 }
 0xca6   :  { %18655 = vmatpush3.bf16.msra.mxu1 %v18654_v29  ;;  %18687 = vmatpush3.bf16.msra.mxu0 %v18686_v30 }
 0xca7   :  { %18657 = vmatprep.subr.bf16.mxu1 %v18656_v38  ;;  %18689 = vmatprep.subr.bf16.mxu0 %v18688_v39 }
 0xcaa   :  { %18659 = vmatpush3.bf16.msra.mxu1 %v18658_v15  ;;  %18691 = vmatpush3.bf16.msra.mxu0 %v18690_v27 }
 0xcab   :  { %18661 = vmatprep.subr.bf16.mxu1 %v18660_v0  ;;  %18693 = vmatprep.subr.bf16.mxu0 %v18692_v62 }
 0xcae   :  { %18663 = vmatpush3.bf16.msra.mxu1 %v18662_v34  ;;  %18695 = vmatpush3.bf16.msra.mxu0 %v18694_v2 }
 0xcb1   :  { %3141 = vmatmul.mubr.f32.vlgmr.msra.gmra.mrb[38].mxu1 %v2600_v8  ;;  %3216 = vmatmul.mubr.f32.vlgmr.msra.gmra.mrb[40].mxu0 %v2602_v51 }
 0xcb2   :  { %3145 = vmatprep.mubr.f32.mxu1 %v2617_v58  ;;  %3220 = vmatprep.mubr.f32.mxu0 %v2619_v12 }
 0xcb5   :  { %3146 = vmatmul.mubr.f32.gmra.mrb[40].mxu1 %v2616_v13  ;;  %3221 = vmatmul.mubr.f32.gmra.mrb[42].mxu0 %v2618_v56 }
 0xd22   :  { %v16310_v37 = vpop.f32.mrb[26].mxu1  ;;  %v16348_v60 = vpop.f32.mrb[28].mxu0 }
 0xd23   :  { %v16311_v61 = vpop.f32.mrb[27].mxu1  ;;  %v16349_v17 = vpop.f32.mrb[29].mxu0 }
 0xd24   :  { %v16312_v32 = vadd.f32 %v16311_v61, %v16310_v37  ;;  %v16350_v57 = vadd.f32 %v16349_v17, %v16348_v60 }
 0xd26   :  { %v2693_v7 = vadd.f32 %v16312_v32, %v15274_v45  ;;  %v16313_v48 = vpop.f32.mrb[28].mxu1  ;;  %v16351_v14 = vpop.f32.mrb[30].mxu0 }
 0xd27   :  { %v16314_v25 = vpop.f32.mrb[29].mxu1  ;;  %v16352_v28 = vpop.f32.mrb[31].mxu0 }
 0xd28   :  { %v2768_v40 = vadd.f32 %v16350_v57, %v2693_v7  ;;  %v16315_v42 = vadd.f32 %v16314_v25, %v16313_v48  ;;  %v16353_v18 = vadd.f32 %v16352_v28, %v16351_v14 }
 0xd2a   :  { %v2698_v19 = vadd.f32 %v16315_v42, %v15274_v45 }
 0xd2c   :  { %v2773_v22 = vadd.f32 %v16353_v18, %v2698_v19 }
 0xd42   :  { %v16386_v29 = vpop.f32.mrb[30].mxu1  ;;  %v16424_v30 = vpop.f32.mrb[32].mxu0 }
 0xd43   :  { %v16387_v35 = vpop.f32.mrb[31].mxu1  ;;  %v16425_v36 = vpop.f32.mrb[33].mxu0 }
 0xd44   :  { %v16388_v38 = vadd.f32 %v16387_v35, %v16386_v29  ;;  %v16426_v39 = vadd.f32 %v16425_v36, %v16424_v30 }
 0xd46   :  { %v2843_v43 = vadd.f32 %v16388_v38, %v2768_v40  ;;  %v16389_v44 = vpop.f32.mrb[32].mxu1  ;;  %v16427_v47 = vpop.f32.mrb[34].mxu0 }
 0xd47   :  { %v16390_v26 = vpop.f32.mrb[33].mxu1  ;;  %v16428_v24 = vpop.f32.mrb[35].mxu0 }
 0xd48   :  { %v2918_v55 = vadd.f32 %v16426_v39, %v2843_v43  ;;  %v16391_v6 = vadd.f32 %v16390_v26, %v16389_v44  ;;  %v16429_v15 = vadd.f32 %v16428_v24, %v16427_v47  ;;  %v15278_v47 = vld [vmem:[%s20554_s13 + $0x28] sm:$0xff]  ;;  %v15279_v26 = vld [vmem:[%s20554_s13 + $0x30] sm:$0xff] }
 0xd4a   :  { %v2848_v27 = vadd.f32 %v16391_v6, %v2773_v22 }
 0xd4c   :  { %v2923_v41 = vadd.f32 %v16429_v15, %v2848_v27 }
 0xd63   :  { %v16462_v33 = vpop.f32.mrb[34].mxu1  ;;  %v16500_v0 = vpop.f32.mrb[36].mxu0 }
 0xd64   :  { %v16463_v62 = vpop.f32.mrb[35].mxu1  ;;  %v16501_v54 = vpop.f32.mrb[37].mxu0 }
 0xd65   :  { %v16464_v1 = vadd.f32 %v16463_v62, %v16462_v33  ;;  %v16502_v63 = vadd.f32 %v16501_v54, %v16500_v0 }
 0xd67   :  { %v2993_v34 = vadd.f32 %v16464_v1, %v2918_v55  ;;  %v16465_v2 = vpop.f32.mrb[36].mxu1  ;;  %v16503_v4 = vpop.f32.mrb[38].mxu0  ;;  %v15280_v55 = vld [vmem:[%s20554_s13 + $0x38] sm:$0xff]  ;;  %v15275_v1 = vld [vmem:[%s21302_s24] ss:$0 sm:$0xff] }
 0xd68   :  { %v16466_v5 = vpop.f32.mrb[37].mxu1  ;;  %v16504_v21 = vpop.f32.mrb[39].mxu0  ;;  %v18700_v6 = vpack.c.bf16 %v15280_v55, %v15279_v26 }
 0xd69   :  { %v3068_v46 = vadd.f32 %v16502_v63, %v2993_v34  ;;  %v16467_v8 = vadd.f32 %v16466_v5, %v16465_v2  ;;  %v16505_v51 = vadd.f32 %v16504_v21, %v16503_v4 }
 0xd6b   :  { %v2998_v20 = vadd.f32 %v16467_v8, %v2923_v41 }
 0xd6d   :  { %v3073_v9 = vadd.f32 %v16505_v51, %v2998_v20  ;;  %v15287_v51 = vld [vmem:[%s20577_s25 + $0x1] ss:$0 sm:$0xff]  ;;  %s20515_s25 = smov 17  }
 0xd84   :  { %v16538_v58 = vpop.f32.mrb[38].mxu1  ;;  %v16576_v12 = vpop.f32.mrb[40].mxu0 }
 0xd85   :  { %v16539_v13 = vpop.f32.mrb[39].mxu1  ;;  %v16577_v56 = vpop.f32.mrb[41].mxu0 }
 0xd86   :  { %v16540_v37 = vadd.f32 %v16539_v13, %v16538_v58  ;;  %v16578_v60 = vadd.f32 %v16577_v56, %v16576_v12 }
 0xd88   :  { %v3143_v45 = vadd.f32 %v16540_v37, %v3068_v46  ;;  %v16541_v61 = vpop.f32.mrb[40].mxu1  ;;  %v16579_v17 = vpop.f32.mrb[42].mxu0 }
 0xd89   :  { %v16542_v32 = vpop.f32.mrb[41].mxu1  ;;  %v16580_v57 = vpop.f32.mrb[43].mxu0 }
 0xd8a   :  { %v3218_v7 = vadd.f32 %v16578_v60, %v3143_v45  ;;  %v16543_v48 = vadd.f32 %v16542_v32, %v16541_v61  ;;  %v16581_v14 = vadd.f32 %v16580_v57, %v16579_v17 }
 0xd8c   :  { %v3148_v25 = vadd.f32 %v16543_v48, %v3073_v9  ;;  %v3228_v28 = vadd.f32 %v3218_v7, %v20777_v3  ;;  %v21339_v7 = vld [vmem:[%s20607_s30] sm:$0xff] }
 0xd8e   :  { %v3223_v40 = vadd.f32 %v16581_v14, %v3148_v25  ;;  %v3230_v42 = vsel %vm279_vm1, %v3228_v28, 0.0  ;;  %v21344_v25 = vld [vmem:[%s20607_s30 + $0x8] sm:$0xff] }
 0xd8f   :  { %3231 = vadd.xlane.f32.xlu0 %v3230_v42 }
 0xd90   :  { %v3229_v18 = vadd.f32 %v3223_v40, %v20792_v16  ;;  %v15277_v16 = vld [vmem:[%s20554_s13 + $0x20] sm:$0xff]  ;;  %s20514_s13 = smov 16  }
 0xd91   :  { %v18696_v24 = vpack.c.bf16 %v15278_v47, %v15277_v16  ;;  %s21307_s7 = sld [smem:[%s23629_s0 + %s20514_s13]]   ;;  %s20525_s13 = smov 27  }
 0xd92   :  { %v3233_v19 = vsel %vm279_vm1, %v3229_v18, 0.0 }
 0xd93   :  { %3234 = vadd.xlane.f32.xlu0 %v3233_v19  ;;  %18697 = vmatprep.subr.bf16.mxu1 %v18696_v24 }
 0xd94   :  { %18699 = vmatpush3.bf16.msra.mxu1 %v18696_v24 }
 0xd95   :  { %18701 = vmatprep.subr.bf16.mxu1 %v18700_v6 }
 0xd97   :  { %v15276_v34 = vld [vmem:[%s21307_s7] ss:$0 sm:$0xff] }
 0xd98   :  { %18703 = vmatpush3.bf16.msra.mxu1 %v18700_v6 }
 0xe1c   :  { %v3232_v22 = vpop.xlane.xlu0 %3231 }
 0xe1d   :  { %v3236_v29 = vmul.f32 0.03125, %v3232_v22 }
 0xe1f   :  { %v3238_v30 = vsub.f32 %v3228_v28, %v3236_v29 }
 0xe20   :  { %v3235_v35 = vpop.xlane.xlu0 %3234 }
 0xe21   :  { %v3237_v36 = vmul.f32 0.03125, %v3235_v35  ;;  %v3240_v38 = vmul.f32 %v3238_v30, %v3238_v30 }
 0xe23   :  { %v3239_v3 = vsub.f32 %v3229_v18, %v3237_v36  ;;  %v3242_v39 = vsel %vm279_vm1, %v3240_v38, 0.0 }
 0xe24   :  { %3243 = vadd.xlane.f32.xlu0 %v3242_v39 }
 0xe25   :  { %v3241_v43 = vmul.f32 %v3239_v3, %v3239_v3 }
 0xe27   :  { %v3245_v44 = vsel %vm279_vm1, %v3241_v43, 0.0 }
 0xe28   :  { %3246 = vadd.xlane.f32.xlu0 %v3245_v44 }
 0xeb1   :  { %v3244_v15 = vpop.xlane.xlu0 %3243 }
 0xeb2   :  { %v3248_v27 = vmul.f32 0.03125, %v3244_v15 }
 0xeb4   :  { %v3250_v41 = vadd.f32 1e-05, %v3248_v27 }
 0xeb5   :  { %v3247_v33 = vpop.xlane.xlu0 %3246 }
 0xeb6   :  { %20285 = vrsqrt.f32 %v3250_v41  ;;  %v3249_v0 = vmul.f32 0.03125, %v3247_v33 }
 0xeb8   :  { %v3251_v62 = vadd.f32 1e-05, %v3249_v0 }
 0xeba   :  { %20287 = vrsqrt.f32 %v3251_v62 }
 0xec0   :  { %v20286_v54 = vpop.eup %20285 }
 0xec1   :  { %v3254_v63 = vmul.f32 %v20286_v54, %v3238_v30 }
 0xec3   :  { %v3262_v2 = vmul.f32 %v15275_v1, %v3254_v63 }
 0xec4   :  { %v20288_v4 = vpop.eup %20287 }
 0xec5   :  { %v3255_v5 = vmul.f32 %v20288_v4, %v3239_v3  ;;  %v21311_v21 = vadd.f32 %v15276_v34, %v3262_v2 }
 0xec7   :  { %v3263_v46 = vmul.f32 %v15275_v1, %v3255_v5  ;;  %17864 = vmatprep.mubr.msk.f32.mxu1 %vm279_vm1, %v21311_v21 }
 0xec9   :  { %v21315_v8 = vadd.f32 %v15276_v34, %v3263_v46  ;;  %v15282_v46 = vld [vmem:[%s20652_s9 + $0x20] sm:$0xff] }
 0xecb   :  { %17865 = vmatmul.mubr.msk.f32.vlgmr.msra.gmra.mrb[42].mxu1 %vm279_vm1, %v21315_v8 }
 0xf9e   :  { %v17866_v20 = vpop.f32.mrb[42].mxu1 }
 0xf9f   :  { %v21320_v9 = vadd.f32 %v17866_v20, %v15287_v51  ;;  %v3364_v58 = vpop.f32.mrb[43].mxu1 }
 0xfa0   :  { %v21322_v12 = vadd.f32 %v15287_v51, %v3364_v58 }
 0xfa2   :  { %17871 = vmatprep.mubr.msk.f32.mxu0 %vm367_vm2, %v21322_v12  ;;  %v21328_v13 = vpack.i.bf16 %v21320_v9, %v21322_v12 }
 0xfa4   :  { %20060 = vrot.lane.b32.xlu0 %v21328_v13, %s20492_s26 }
0x1016   :  { %v20061_v56 = vpop.permute.xlu0 %20060 }
0x1017   :  { %v20063_v37 = vunpack.i.h.bf16 %v20061_v56  ;;  %v20062_v60 = vunpack.i.l.bf16 %v20061_v56 }
0x1019   :  { %v18704_v45 = vpack.c.bf16 %v20063_v37, %v20062_v60 }
0x101b   :  { %18706 = vmatprep.subr.msk.bf16.mxu0 %vm20594_vm3, %v18704_v45 }
0x101c   :  { %18709 = vmatpush3.bf16.xpose.msk.msra.mxu0 %vm20594_vm3, %v18704_v45 }
0x101d   :  { %17881 = vmatprep.subr.mxu0 %v15282_v46 }
0x1023   :  { %17872 = vmatmul.mubr.msk.f32.vlgmr.msra.gmra.mrb[44].mxu0 %vm367_vm2, %v21320_v9 }
0x1024   :  { %17882 = vmatpush3.msra.mxu0 %v15282_v46  ;;  %v23648_v46 = vmov 0.0  }
0x10f6   :  { %v17873_v61 = vpop.f32.mrb[44].mxu0 }
0x10f7   :  { %v3453_v17 = vpop.f32.mrb[45].mxu0  ;;  %v3463_v32 = vmul.f32 0.35355338, %v17873_v61 }
0x10f8   :  { %v3462_v57 = vmul.f32 0.35355338, %v3453_v17 }
0x10f9   :  { %v3465_v28 = vadd.f32 %v21344_v25, %v3463_v32 }
0x10fa   :  { %v3464_v48 = vadd.f32 %v21339_v7, %v3462_v57 }
0x10fb   :  { %v3469_v40 = vsel %vm175_vm0, %v3465_v28, -inf }
0x10fc   :  { %v3466_v14 = vsel %vm175_vm0, %v3464_v48, -inf }
0x10fd   :  { %3467 = vmax.xlane.f32.xlu1 %v3466_v14 }
0x1101   :  { %3470 = vmax.xlane.f32.xlu1 %v3469_v40 }
0x1112   :  { %20065 = vrot.lane.b32.xlu1 %v21328_v13, %s23643_s1 }
0x1116   :  { %20070 = vrot.lane.b32.xlu1 %v21328_v13, %s20495_s2 }
0x111a   :  { %3664 = vrot.lane.b32.xlu1 %v21322_v12, %s20496_s3 }
0x118a   :  { %v3468_v42 = vpop.xlane.xlu1 %3467 }
0x118b   :  { %v3472_v18 = vsub.f32 %v3464_v48, %v3468_v42 }
0x118d   :  { %v3474_v19 = vmul.f32 1.442695, %v3472_v18 }
0x118e   :  { %v3471_v22 = vpop.xlane.xlu1 %3470 }
0x118f   :  { %20289 = vpow2.f32 %v3474_v19  ;;  %v3473_v29 = vsub.f32 %v3465_v28, %v3471_v22 }
0x1191   :  { %v3476_v30 = vmul.f32 1.442695, %v3473_v29 }
0x1192   :  { %v20066_v35 = vpop.permute.xlu1 %20065 }
0x1193   :  { %20291 = vpow2.f32 %v3476_v30  ;;  %v20068_v36 = vunpack.i.h.bf16 %v20066_v35  ;;  %v20067_v38 = vunpack.i.l.bf16 %v20066_v35 }
0x1195   :  { %v18710_v3 = vpack.c.bf16 %v20068_v36, %v20067_v38 }
0x1196   :  { %v20071_v39 = vpop.permute.xlu1 %20070 }
0x1197   :  { %v20073_v43 = vunpack.i.h.bf16 %v20071_v39  ;;  %v20072_v44 = vunpack.i.l.bf16 %v20071_v39  ;;  %18711 = vmatprep.subr.bf16.mxu1 %v18710_v3 }
0x1198   :  { %18713 = vmatpush3.bf16.msra.mxu1 %v18710_v3 }
0x1199   :  { %v20290_v16 = vpop.eup %20289  ;;  %v18714_v47 = vpack.c.bf16 %v20073_v43, %v20072_v44 }
0x119a   :  { %v3478_v26 = vsel %vm175_vm0, %v20290_v16, 0.0  ;;  %v3665_v6 = vpop.permute.xlu1 %3664 }
0x119b   :  { %3479 = vadd.xlane.f32.xlu1 %v3478_v26  ;;  %18716 = vmatprep.subr.msk.bf16.mxu1 %vm20594_vm3, %v18714_v47 }
0x119d   :  { %v20292_v24 = vpop.eup %20291 }
0x119e   :  { %v3481_v55 = vsel %vm175_vm0, %v20292_v24, 0.0 }
0x119f   :  { %3482 = vadd.xlane.f32.xlu0 %v3481_v55 }
0x11ac   :  { %3666 = vrot.lane.b32.xlu1 %v21320_v9, %s20496_s3 }
0x11b0   :  { %20075 = vrot.lane.b32.xlu1 %v21328_v13, %s20497_s4 }
0x11b4   :  { %3953 = vrot.lane.b32.xlu1 %v21320_v9, %s23644_s5 }
0x11b5   :  { %3951 = vrot.lane.b32.xlu0 %v21322_v12, %s23644_s5 }
0x1228   :  { %v3480_v15 = vpop.xlane.xlu1 %3479 }
0x1229   :  { %20293 = vrcp.f32 %v3480_v15 }
0x122c   :  { %v3483_v27 = vpop.xlane.xlu0 %3482  ;;  %v3667_v41 = vpop.permute.xlu1 %3666 }
0x122d   :  { %20295 = vrcp.f32 %v3483_v27 }
0x1230   :  { %v20076_v0 = vpop.permute.xlu1 %20075  ;;  %v3952_v4 = vpop.permute.xlu0 %3951 }
0x1231   :  { %v20078_v54 = vunpack.i.h.bf16 %v20076_v0  ;;  %v20077_v1 = vunpack.i.l.bf16 %v20076_v0 }
0x1233   :  { %v20294_v33 = vpop.eup %20293  ;;  %v18724_v2 = vpack.c.bf16 %v20078_v54, %v20077_v1 }
0x1234   :  { %v3485_v62 = vmul.f32 %v20294_v33, %v20290_v16  ;;  %v3954_v5 = vpop.permute.xlu1 %3953 }
0x1236   :  { %17878 = vmatprep.mubr.msk.f32.mxu1 %vm175_vm0, %v3485_v62 }
0x1237   :  { %v20296_v63 = vpop.eup %20295 }
0x1238   :  { %v3487_v34 = vmul.f32 %v20296_v63, %v20292_v24  ;;  %v15283_v63 = vld [vmem:[%s20652_s9 + $0x28] sm:$0xff] }
0x123a   :  { %17879 = vmatmul.mubr.msk.f32.vlgmr.msra.gmra.mrb[44].mxu1 %vm175_vm0, %v3487_v34 }
0x123b   :  { %18719 = vmatpush3.bf16.xpose.msk.msra.mxu1 %vm20594_vm3, %v18714_v47  ;;  %17890 = vmatprep.mubr.msk.f32.mxu1 %vm367_vm2, %v3665_v6 }
0x123c   :  { %18726 = vmatprep.subr.msk.bf16.mxu1 %vm20594_vm3, %v18724_v2 }
0x1242   :  { %17891 = vmatmul.mubr.msk.f32.vlgmr.msra.gmra.mrb[46].mxu1 %vm367_vm2, %v3667_v41 }
0x1243   :  { %18729 = vmatpush3.bf16.xpose.msk.msra.mxu1 %vm20594_vm3, %v18724_v2  ;;  %17909 = vmatprep.mubr.msk.f32.mxu1 %vm367_vm2, %v3952_v4 }
0x124a   :  { %17910 = vmatmul.mubr.msk.f32.vlgmr.msra.gmra.mrb[48].mxu1 %vm367_vm2, %v3954_v5 }
0x130d   :  { %v17880_v51 = vpop.f32.mrb[44].mxu1 }
0x130e   :  { %v3566_v20 = vpop.f32.mrb[45].mxu1 }
0x130f   :  { %17883 = vmatprep.mubr.msk.f32.mxu0 %vm367_vm2, %v3566_v20 }
0x1310   :  { %17884 = vmatmul.mubr.msk.f32.vlgmr.msra.gmra.mrb[46].mxu0 %vm367_vm2, %v17880_v51 }
0x1315   :  { %v17892_v58 = vpop.f32.mrb[46].mxu1 }
0x1316   :  { %v3756_v56 = vmul.f32 0.35355338, %v17892_v58  ;;  %v3746_v37 = vpop.f32.mrb[47].mxu1 }
0x1317   :  { %v3755_v60 = vmul.f32 0.35355338, %v3746_v37 }
0x1318   :  { %v3758_v45 = vadd.f32 %v21344_v25, %v3756_v56 }
0x1319   :  { %v3757_v61 = vadd.f32 %v21339_v7, %v3755_v60 }
0x131a   :  { %v3762_v17 = vsel %vm175_vm0, %v3758_v45, -inf }
0x131b   :  { %3763 = vmax.xlane.f32.xlu0 %v3762_v17  ;;  %v3759_v32 = vsel %vm175_vm0, %v3757_v61, -inf }
0x131c   :  { %3760 = vmax.xlane.f32.xlu1 %v3759_v32 }
0x131d   :  { %v17911_v57 = vpop.f32.mrb[48].mxu1 }
0x131e   :  { %v4033_v48 = vpop.f32.mrb[49].mxu1  ;;  %v4043_v15 = vmul.f32 0.35355338, %v17911_v57 }
0x131f   :  { %v4042_v14 = vmul.f32 0.35355338, %v4033_v48 }
0x1320   :  { %v4045_v27 = vadd.f32 %v21344_v25, %v4043_v15 }
0x1321   :  { %v4044_v28 = vadd.f32 %v21339_v7, %v4042_v14 }
0x1322   :  { %v4049_v41 = vsel %vm175_vm0, %v4045_v27, -inf }
0x1323   :  { %v4046_v40 = vsel %vm175_vm0, %v4044_v28, -inf }
0x1331   :  { %20085 = vrot.lane.b32.xlu0 %v21328_v13, %s23641_s11 }
0x1350   :  { %4047 = vmax.xlane.f32.xlu0 %v4046_v40 }
0x13a8   :  { %v3764_v42 = vpop.xlane.xlu0 %3763 }
0x13a9   :  { %v3766_v18 = vsub.f32 %v3758_v45, %v3764_v42  ;;  %v3761_v19 = vpop.xlane.xlu1 %3760 }
0x13aa   :  { %v3765_v22 = vsub.f32 %v3757_v61, %v3761_v19 }
0x13ab   :  { %v3769_v29 = vmul.f32 1.442695, %v3766_v18 }
0x13ac   :  { %v3767_v30 = vmul.f32 1.442695, %v3765_v22  ;;  %v20086_v35 = vpop.permute.xlu0 %20085 }
0x13ad   :  { %20297 = vpow2.f32 %v3769_v29  ;;  %v20088_v36 = vunpack.i.h.bf16 %v20086_v35  ;;  %v20087_v38 = vunpack.i.l.bf16 %v20086_v35  ;;  %v15284_v35 = vld [vmem:[%s20652_s9 + $0x30] sm:$0xff] }
0x13ae   :  { %20299 = vpow2.f32 %v3767_v30 }
0x13af   :  { %v18734_v3 = vpack.c.bf16 %v20088_v36, %v20087_v38 }
0x13b1   :  { %18736 = vmatprep.subr.msk.bf16.mxu1 %vm20594_vm3, %v18734_v3 }
0x13b2   :  { %18739 = vmatpush3.bf16.xpose.msk.msra.mxu1 %vm20594_vm3, %v18734_v3 }
0x13b7   :  { %v20298_v39 = vpop.eup %20297 }
0x13b8   :  { %v3774_v43 = vsel %vm175_vm0, %v20298_v39, 0.0  ;;  %v20300_v44 = vpop.eup %20299 }
0x13b9   :  { %3775 = vadd.xlane.f32.xlu1 %v3774_v43  ;;  %v3771_v16 = vsel %vm175_vm0, %v20300_v44, 0.0 }
0x13bd   :  { %3772 = vadd.xlane.f32.xlu1 %v3771_v16 }
0x13ce   :  { %20080 = vrot.lane.b32.xlu1 %v21328_v13, %s23635_s10 }
0x13d2   :  { %4238 = vrot.lane.b32.xlu1 %v21322_v12, %s23639_s12 }
0x13d6   :  { %4240 = vrot.lane.b32.xlu1 %v21320_v9, %s23639_s12 }
0x13dd   :  { %v4048_v47 = vpop.xlane.xlu0 %4047 }
0x13de   :  { %v4052_v26 = vsub.f32 %v4044_v28, %v4048_v47 }
0x13e0   :  { %v4054_v24 = vmul.f32 1.442695, %v4052_v26 }
0x13e2   :  { %20301 = vpow2.f32 %v4054_v24 }
0x13ec   :  { %v20302_v55 = vpop.eup %20301 }
0x13ed   :  { %v4058_v6 = vsel %vm175_vm0, %v20302_v55, 0.0 }
0x13ee   :  { %4059 = vadd.xlane.f32.xlu0 %v4058_v6 }
0x13fa   :  { %4050 = vmax.xlane.f32.xlu1 %v4049_v41 }
0x140b   :  { %20090 = vrot.lane.b32.xlu1 %v21328_v13, %s23634_s14 }
0x140f   :  { %20095 = vrot.lane.b32.xlu1 %v21328_v13, %s23633_s15 }
0x1446   :  { %v3776_v9 = vpop.xlane.xlu1 %3775 }
0x1447   :  { %20303 = vrcp.f32 %v3776_v9 }
0x144a   :  { %v3773_v12 = vpop.xlane.xlu1 %3772 }
0x144b   :  { %20305 = vrcp.f32 %v3773_v12 }
0x144e   :  { %v20081_v33 = vpop.permute.xlu1 %20080 }
0x144f   :  { %v20083_v0 = vunpack.i.h.bf16 %v20081_v33  ;;  %v20082_v62 = vunpack.i.l.bf16 %v20081_v33 }
0x1451   :  { %v18720_v54 = vpack.c.bf16 %v20083_v0, %v20082_v62  ;;  %v20304_v34 = vpop.eup %20303  ;;  %v15285_v0 = vld [vmem:[%s20652_s9 + $0x38] sm:$0xff]  ;;  %s22111_s9 = sld [smem:[%s23629_s0 + %s20519_s6]]  }
0x1452   :  { %v4239_v1 = vpop.permute.xlu1 %4238  ;;  %v3780_v13 = vmul.f32 %v20304_v34, %v20298_v39 }
0x1453   :  { %18721 = vmatprep.subr.bf16.mxu0 %v18720_v54  ;;  %17928 = vmatprep.mubr.msk.f32.mxu1 %vm367_vm2, %v4239_v1 }
0x1454   :  { %18723 = vmatpush3.bf16.msra.mxu0 %v18720_v54 }
0x1455   :  { %v20306_v2 = vpop.eup %20305  ;;  %17900 = vmatprep.subr.mxu0 %v15283_v63 }
0x1456   :  { %v4241_v4 = vpop.permute.xlu1 %4240  ;;  %v3778_v5 = vmul.f32 %v20306_v2, %v20300_v44 }
0x1457   :  { %17929 = vmatmul.mubr.msk.f32.vlgmr.msra.gmra.mrb[50].mxu1 %vm367_vm2, %v4241_v4 }
0x1458   :  { %17897 = vmatprep.mubr.msk.f32.mxu0 %vm175_vm0, %v3778_v5  ;;  %5052 = vmatprep.mubr.f32.mxu1 %v23648_v46 }
0x1459   :  { %17898 = vmatmul.mubr.msk.f32.vlgmr.msra.gmra.mrb[48].mxu0 %vm175_vm0, %v3780_v13  ;;  %v15298_v13 = vld [vmem:[%s20711_s19 + $0x1] ss:$0 sm:$0xff]  ;;  %s20520_s19 = smov 20  }
0x145a   :  { %17901 = vmatpush3.msra.mxu0 %v15283_v63 }
0x147b   :  { %v4060_v32 = vpop.xlane.xlu0 %4059 }
0x1487   :  { %v4051_v51 = vpop.xlane.xlu1 %4050 }
0x1488   :  { %v4053_v20 = vsub.f32 %v4045_v27, %v4051_v51 }
0x148a   :  { %v4056_v58 = vmul.f32 1.442695, %v4053_v20 }
0x148b   :  { %v20091_v56 = vpop.permute.xlu1 %20090 }
0x148c   :  { %20307 = vpow2.f32 %v4056_v58  ;;  %v20093_v37 = vunpack.i.h.bf16 %v20091_v56  ;;  %v20092_v60 = vunpack.i.l.bf16 %v20091_v56 }
0x148d   :  { %20309 = vrcp.f32 %v4060_v32 }
0x148e   :  { %v18730_v45 = vpack.c.bf16 %v20093_v37, %v20092_v60 }
0x148f   :  { %v20096_v40 = vpop.permute.xlu1 %20095 }
0x1490   :  { %18731 = vmatprep.subr.bf16.mxu0 %v18730_v45  ;;  %v20098_v36 = vunpack.i.h.bf16 %v20096_v40  ;;  %v20097_v38 = vunpack.i.l.bf16 %v20096_v40 }
0x1492   :  { %v18740_v16 = vpack.c.bf16 %v20098_v36, %v20097_v38  ;;  %v15343_v36 = vld [vmem:[%s20731_s23 + $0x280] sm:$0xff] }
0x1496   :  { %v20308_v61 = vpop.eup %20307 }
0x1497   :  { %v4061_v17 = vsel %vm175_vm0, %v20308_v61, 0.0  ;;  %v20310_v14 = vpop.eup %20309 }
0x1498   :  { %4062 = vadd.xlane.f32.xlu0 %v4061_v17  ;;  %v4065_v29 = vmul.f32 %v20310_v14, %v20302_v55 }
0x1525   :  { %v4063_v57 = vpop.xlane.xlu0 %4062 }
0x1526   :  { %20311 = vrcp.f32 %v4063_v57 }
0x152a   :  { %v17930_v48 = vpop.f32.mrb[50].mxu1 }
0x152b   :  { %v4320_v28 = vpop.f32.mrb[51].mxu1  ;;  %v4330_v42 = vmul.f32 0.35355338, %v17930_v48 }
0x152c   :  { %v4329_v18 = vmul.f32 0.35355338, %v4320_v28  ;;  %v17899_v19 = vpop.f32.mrb[48].mxu0 }
0x152d   :  { %v3859_v22 = vpop.f32.mrb[49].mxu0  ;;  %v4332_v43 = vadd.f32 %v21344_v25, %v4330_v42 }
0x152e   :  { %17902 = vmatprep.mubr.msk.f32.mxu0 %vm367_vm2, %v3859_v22  ;;  %v4331_v30 = vadd.f32 %v21339_v7, %v4329_v18  ;;  %v15328_v18 = vld [vmem:[%s20731_s23 + $0x208] sm:$0xff]  ;;  %v15330_v22 = vld [vmem:[%s20731_s23 + $0x218] sm:$0xff] }
0x152f   :  { %17903 = vmatmul.mubr.msk.f32.vlgmr.msra.gmra.mrb[46].mxu0 %vm367_vm2, %v17899_v19  ;;  %v4336_v7 = vsel %vm175_vm0, %v4332_v43, -inf  ;;  %v15344_v19 = vld [vmem:[%s20731_s23 + $0x288] sm:$0xff] }
0x1530   :  { %v20312_v3 = vpop.eup %20311  ;;  %18733 = vmatpush3.bf16.msra.mxu0 %v18730_v45  ;;  %17916 = vmatprep.mubr.msk.f32.mxu0 %vm175_vm0, %v4065_v29  ;;  %v4333_v39 = vsel %vm175_vm0, %v4331_v30, -inf  ;;  %v18744_v29 = vpack.c.bf16 %v15344_v19, %v15328_v18 }
0x1531   :  { %4334 = vmax.xlane.f32.xlu0 %v4333_v39  ;;  %17919 = vmatprep.subr.mxu0 %v15284_v35  ;;  %v4067_v44 = vmul.f32 %v20312_v3, %v20308_v61  ;;  %v15329_v39 = vld [vmem:[%s20731_s23 + $0x210] sm:$0xff] }
0x1532   :  { %18745 = vmatprep.subr.bf16.mxu1 %v18744_v29  ;;  %v15365_v29 = vld [vmem:[%s20731_s23 + $0x330] sm:$0xff] }
0x1533   :  { %17917 = vmatmul.mubr.msk.f32.vlgmr.msra.gmra.mrb[50].mxu0 %vm175_vm0, %v4067_v44 }
0x1534   :  { %17920 = vmatpush3.msra.mxu0 %v15284_v35  ;;  %v15327_v35 = vld [vmem:[%s20731_s23 + $0x200] sm:$0xff] }
0x1535   :  { %18741 = vmatprep.subr.bf16.mxu0 %v18740_v16  ;;  %4337 = vmax.xlane.f32.xlu0 %v4336_v7  ;;  %v18746_v3 = vpack.c.bf16 %v15343_v36, %v15327_v35  ;;  %v15376_v7 = vld [vmem:[%s20731_s23 + $0x388] sm:$0xff] }
0x1537   :  { %18747 = vmatpush1.bf16.msra.mxu1 %v18746_v3 }
0x15be   :  { %v4335_v47 = vpop.xlane.xlu0 %4334 }
0x15bf   :  { %v4339_v26 = vsub.f32 %v4331_v30, %v4335_v47  ;;  %v15346_v30 = vld [vmem:[%s20731_s23 + $0x298] sm:$0xff] }
0x15c0   :  { %v18752_v38 = vpack.c.bf16 %v15346_v30, %v15330_v22  ;;  %v15362_v47 = vld [vmem:[%s20731_s23 + $0x318] sm:$0xff]  ;;  %v15379_v22 = vld [vmem:[%s20731_s23 + $0x3a0] sm:$0xff]  ;;  %v15381_v30 = vld [vmem:[%s20731_s23 + $0x3b0] sm:$0xff] }
0x15c1   :  { %v4341_v24 = vmul.f32 1.442695, %v4339_v26 }
0x15c2   :  { %v4338_v55 = vpop.xlane.xlu0 %4337 }
0x15c3   :  { %20313 = vpow2.f32 %v4341_v24  ;;  %v4340_v6 = vsub.f32 %v4332_v43, %v4338_v55  ;;  %v15345_v43 = vld [vmem:[%s20731_s23 + $0x290] sm:$0xff]  ;;  %v15378_v24 = vld [vmem:[%s20731_s23 + $0x398] sm:$0xff]  ;;  %v15359_v55 = vld [vmem:[%s20731_s23 + $0x300] sm:$0xff] }
0x15c4   :  { %v18754_v44 = vpack.c.bf16 %v15345_v43, %v15329_v39  ;;  %v15352_v39 = vld [vmem:[%s20731_s23 + $0x2c8] sm:$0xff]  ;;  %v15338_v43 = vld [vmem:[%s20731_s23 + $0x258] sm:$0xff] }
0x15c5   :  { %v4343_v15 = vmul.f32 1.442695, %v4340_v6  ;;  %v15375_v6 = vld [vmem:[%s20731_s23 + $0x380] sm:$0xff] }
0x15c7   :  { %20315 = vpow2.f32 %v4343_v15  ;;  %v18756_v15 = vpack.c.bf16 %v15378_v24, %v15362_v47  ;;  %v15337_v24 = vld [vmem:[%s20731_s23 + $0x250] sm:$0xff] }
0x15cd   :  { %v20314_v25 = vpop.eup %20313 }
0x15ce   :  { %v4345_v27 = vsel %vm175_vm0, %v20314_v25, 0.0 }
0x15cf   :  { %4346 = vadd.xlane.f32.xlu0 %v4345_v27  ;;  %v15361_v27 = vld [vmem:[%s20731_s23 + $0x310] sm:$0xff] }
0x15d1   :  { %v20316_v41 = vpop.eup %20315 }
0x15d2   :  { %v4348_v9 = vsel %vm175_vm0, %v20316_v41, 0.0 }
0x15d3   :  { %4349 = vadd.xlane.f32.xlu0 %v4348_v9 }
0x1606   :  { %v17918_v12 = vpop.f32.mrb[50].mxu0 }
0x1607   :  { %v4146_v33 = vpop.f32.mrb[51].mxu0 }
0x1608   :  { %17921 = vmatprep.mubr.msk.f32.mxu0 %vm367_vm2, %v4146_v33  ;;  %v15348_v33 = vld [vmem:[%s20731_s23 + $0x2a8] sm:$0xff] }
0x1609   :  { %17922 = vmatmul.mubr.msk.f32.vlgmr.msra.gmra.mrb[46].mxu0 %vm367_vm2, %v17918_v12  ;;  %v15332_v12 = vld [vmem:[%s20731_s23 + $0x228] sm:$0xff] }
0x160a   :  { %18743 = vmatpush3.bf16.msra.mxu0 %v18740_v16  ;;  %v15360_v16 = vld [vmem:[%s20731_s23 + $0x308] sm:$0xff] }
0x160b   :  { %17938 = vmatprep.subr.mxu0 %v15285_v0  ;;  %v18748_v26 = vpack.c.bf16 %v15376_v7, %v15360_v16  ;;  %v18774_v16 = vpack.c.bf16 %v15381_v30, %v15365_v29  ;;  %v15335_v7 = vld [vmem:[%s20731_s23 + $0x240] sm:$0xff] }
0x160c   :  { %v15409_v30 = vld [vmem:[%s20817_s21 + $0x880] sm:$0xff] }
0x160d   :  { %18749 = vmatprep.subr.bf16.mxu1 %v18748_v26  ;;  %v15351_v26 = vld [vmem:[%s20731_s23 + $0x2c0] sm:$0xff] }
0x165c   :  { %v4347_v62 = vpop.xlane.xlu0 %4346 }
0x165d   :  { %20317 = vrcp.f32 %v4347_v62  ;;  %v18760_v62 = vpack.c.bf16 %v15348_v33, %v15332_v12  ;;  %v18778_v12 = vpack.c.bf16 %v15351_v26, %v15335_v7  ;;  %v15425_v7 = vld [vmem:[%s20817_s21 + $0x900] sm:$0xff]  ;;  %v15426_v26 = vld [vmem:[%s20817_s21 + $0x908] sm:$0xff] }
0x1660   :  { %v4350_v54 = vpop.xlane.xlu0 %4349 }
0x1661   :  { %20319 = vrcp.f32 %v4350_v54  ;;  %v15350_v54 = vld [vmem:[%s20731_s23 + $0x2b8] sm:$0xff] }
0x1667   :  { %v20318_v1 = vpop.eup %20317 }
0x1668   :  { %v4352_v63 = vmul.f32 %v20318_v1, %v20314_v25  ;;  %v18750_v25 = vpack.c.bf16 %v15375_v6, %v15359_v55  ;;  %v15353_v55 = vld [vmem:[%s20731_s23 + $0x2d0] sm:$0xff] }
0x1669   :  { %v18786_v33 = vpack.c.bf16 %v15353_v55, %v15337_v24  ;;  %v15411_v24 = vld [vmem:[%s20817_s21 + $0x890] sm:$0xff]  ;;  %v15412_v55 = vld [vmem:[%s20817_s21 + $0x898] sm:$0xff] }
0x166a   :  { %17935 = vmatprep.mubr.msk.f32.mxu0 %vm175_vm0, %v4352_v63  ;;  %18751 = vmatpush1.bf16.msra.mxu1 %v18750_v25  ;;  %v15368_v25 = vld [vmem:[%s20731_s23 + $0x348] sm:$0xff] }
0x166b   :  { %v20320_v34 = vpop.eup %20319  ;;  %18761 = vmatprep.subr.bf16.mxu1 %v18760_v62  ;;  %v15383_v62 = vld [vmem:[%s20731_s23 + $0x3c0] sm:$0xff] }
0x166c   :  { %v4354_v2 = vmul.f32 %v20320_v34, %v20316_v41  ;;  %v15377_v41 = vld [vmem:[%s20731_s23 + $0x390] sm:$0xff] }
0x166d   :  { %v18758_v9 = vpack.c.bf16 %v15377_v41, %v15361_v27  ;;  %v15384_v27 = vld [vmem:[%s20731_s23 + $0x3c8] sm:$0xff]  ;;  %v15370_v41 = vld [vmem:[%s20731_s23 + $0x358] sm:$0xff] }
0x166e   :  { %17936 = vmatmul.mubr.msk.f32.vlgmr.msra.gmra.mrb[52].mxu0 %vm175_vm0, %v4354_v2 }
0x166f   :  { %17939 = vmatpush3.msra.mxu0 %v15285_v0  ;;  %v15334_v0 = vld [vmem:[%s20731_s23 + $0x238] sm:$0xff] }
0x1670   :  { %18753 = vmatprep.subr.bf16.mxu0 %v18752_v38  ;;  %v18768_v1 = vpack.c.bf16 %v15350_v54, %v15334_v0  ;;  %v15336_v38 = vld [vmem:[%s20731_s23 + $0x248] sm:$0xff]  ;;  %v15367_v0 = vld [vmem:[%s20731_s23 + $0x340] sm:$0xff]  ;;  %v15369_v54 = vld [vmem:[%s20731_s23 + $0x350] sm:$0xff] }
0x1671   :  { %v18776_v6 = vpack.c.bf16 %v15352_v39, %v15336_v38  ;;  %v15442_v38 = vld [vmem:[%s20817_s21 + $0x988] sm:$0xff] }
0x1741   :  { %v17937_v4 = vpop.f32.mrb[52].mxu0 }
0x1742   :  { %v4433_v5 = vpop.f32.mrb[53].mxu0 }
0x1743   :  { %17940 = vmatprep.mubr.msk.f32.mxu0 %vm367_vm2, %v4433_v5 }
0x1744   :  { %17941 = vmatmul.mubr.msk.f32.vlgmr.msra.gmra.mrb[46].mxu0 %vm367_vm2, %v17937_v4 }
0x1745   :  { %5129 = vmatprep.mubr.f32.mxu0 %v23648_v46  ;;  %18755 = vmatpush1.bf16.msra.mxu0 %v18754_v44 }
0x1746   :  { %18757 = vmatprep.subr.bf16.mxu0 %v18756_v15 }
0x1749   :  { %18759 = vmatpush1.bf16.msra.mxu0 %v18758_v9  ;;  %v15386_v9 = vld [vmem:[%s20731_s23 + $0x3d8] sm:$0xff] }
0x174a   :  { %18769 = vmatprep.subr.bf16.mxu0 %v18768_v1  ;;  %v15385_v1 = vld [vmem:[%s20731_s23 + $0x3d0] sm:$0xff] }
0x1817   :  { %v17942_v51 = vpop.f32.mrb[46].mxu0 }
0x1818   :  { %v19922_v20 = vadd.f32 %v17942_v51, %v15298_v13  ;;  %v4514_v58 = vpop.f32.mrb[47].mxu0 }
0x1819   :  { %v19923_v56 = vadd.f32 %v15298_v13, %v4514_v58  ;;  %v15331_v58 = vld [vmem:[%s20731_s23 + $0x220] sm:$0xff] }
0x181a   :  { %v4530_v37 = vadd.f32 %v19922_v20, %v21315_v8  ;;  %v15325_v20 = vld [vmem:[%s20758_s29 + $0x1] ss:$0 sm:$0xff]  ;;  %s20516_s29 = smov 18  }
0x181b   :  { %v4529_v60 = vadd.f32 %v19923_v56, %v21311_v21 }
0x181c   :  { %v4534_v45 = vsel %vm279_vm1, %v4530_v37, 0.0 }
0x181d   :  { %4535 = vadd.xlane.f32.xlu1 %v4534_v45  ;;  %v4531_v61 = vsel %vm279_vm1, %v4529_v60, 0.0  ;;  %v15349_v45 = vld [vmem:[%s20731_s23 + $0x2b0] sm:$0xff] }
0x181e   :  { %4532 = vadd.xlane.f32.xlu0 %v4531_v61  ;;  %v15326_v61 = vld [vmem:[%s20763_s16 + $0x1] ss:$0 sm:$0xff] }
0x18aa   :  { %v4536_v17 = vpop.xlane.xlu1 %4535 }
0x18ab   :  { %v4538_v32 = vmul.f32 0.03125, %v4536_v17  ;;  %v4533_v57 = vpop.xlane.xlu0 %4532  ;;  %v15364_v17 = vld [vmem:[%s20731_s23 + $0x328] sm:$0xff] }
0x18ac   :  { %v4537_v48 = vmul.f32 0.03125, %v4533_v57  ;;  %v15380_v57 = vld [vmem:[%s20731_s23 + $0x3a8] sm:$0xff] }
0x18ad   :  { %v21439_v14 = vsub.f32 %v4530_v37, %v4538_v32  ;;  %v15347_v37 = vld [vmem:[%s20731_s23 + $0x2a0] sm:$0xff]  ;;  %v18764_v35 = vpack.c.bf16 %v15380_v57, %v15364_v17  ;;  %v15372_v17 = vld [vmem:[%s20731_s23 + $0x368] sm:$0xff]  ;;  %v15374_v57 = vld [vmem:[%s20731_s23 + $0x378] sm:$0xff] }
0x18ae   :  { %v4539_v8 = vsub.f32 %v4529_v60, %v4537_v48  ;;  %v15333_v60 = vld [vmem:[%s20731_s23 + $0x230] sm:$0xff]  ;;  %v15366_v48 = vld [vmem:[%s20731_s23 + $0x338] sm:$0xff] }
0x18af   :  { %v4542_v40 = vmul.f32 %v21439_v14, %v21439_v14 }
0x18b0   :  { %v4541_v21 = vmul.f32 %v4539_v8, %v4539_v8 }
0x18b1   :  { %v4546_v42 = vsel %vm279_vm1, %v4542_v40, 0.0  ;;  %v18762_v40 = vpack.c.bf16 %v15347_v37, %v15331_v58  ;;  %v15339_v58 = vld [vmem:[%s20731_s23 + $0x260] sm:$0xff]  ;;  %v15341_v37 = vld [vmem:[%s20731_s23 + $0x270] sm:$0xff] }
0x18b2   :  { %v4543_v28 = vsel %vm279_vm1, %v4541_v21, 0.0  ;;  %v15382_v21 = vld [vmem:[%s20731_s23 + $0x3b8] sm:$0xff] }
0x18b3   :  { %4544 = vadd.xlane.f32.xlu0 %v4543_v28  ;;  %v18772_v36 = vpack.c.bf16 %v15382_v21, %v15366_v48  ;;  %v15390_v48 = vld [vmem:[%s20731_s23 + $0x3f8] sm:$0xff] }
0x18b4   :  { %v18804_v29 = vpack.c.bf16 %v15390_v48, %v15374_v57  ;;  %v15399_v57 = vld [vmem:[%s20817_s21 + $0x830] sm:$0xff]  ;;  %v15400_v48 = vld [vmem:[%s20817_s21 + $0x838] sm:$0xff] }
0x18b7   :  { %4547 = vadd.xlane.f32.xlu0 %v4546_v42  ;;  %v18770_v42 = vpack.c.bf16 %v15349_v45, %v15333_v60  ;;  %v15357_v60 = vld [vmem:[%s20731_s23 + $0x2f0] sm:$0xff] }
0x1940   :  { %v4545_v63 = vpop.xlane.xlu0 %4544 }
0x1941   :  { %v4549_v34 = vmul.f32 0.03125, %v4545_v63  ;;  %v18780_v63 = vpack.c.bf16 %v15384_v27, %v15368_v25  ;;  %v18842_v27 = vpack.c.bf16 %v15426_v26, %v15425_v7  ;;  %v15451_v7 = vld [vmem:[%s20817_s21 + $0x9d0] sm:$0xff]  ;;  %v15452_v26 = vld [vmem:[%s20817_s21 + $0x9d8] sm:$0xff] }
0x1943   :  { %v4551_v2 = vadd.f32 1e-05, %v4549_v34  ;;  %v18788_v34 = vpack.c.bf16 %v15386_v9, %v15370_v41  ;;  %v15395_v41 = vld [vmem:[%s20817_s21 + $0x810] sm:$0xff]  ;;  %v15396_v9 = vld [vmem:[%s20817_s21 + $0x818] sm:$0xff] }
0x1944   :  { %v4548_v4 = vpop.xlane.xlu0 %4547 }
0x1945   :  { %20321 = vrsqrt.f32 %v4551_v2  ;;  %v4550_v5 = vmul.f32 0.03125, %v4548_v4  ;;  %v15340_v2 = vld [vmem:[%s20731_s23 + $0x268] sm:$0xff] }
0x1946   :  { %v15356_v4 = vld [vmem:[%s20731_s23 + $0x2e8] sm:$0xff] }
0x1947   :  { %v4552_v13 = vadd.f32 1e-05, %v4550_v5  ;;  %v15342_v5 = vld [vmem:[%s20731_s23 + $0x278] sm:$0xff]  ;;  %v18792_v45 = vpack.c.bf16 %v15356_v4, %v15340_v2  ;;  %v18814_v2 = vpack.c.bf16 %v15396_v9, %v15395_v41  ;;  %v15435_v41 = vld [vmem:[%s20817_s21 + $0x950] sm:$0xff] }
0x1948   :  { %v15436_v9 = vld [vmem:[%s20817_s21 + $0x958] sm:$0xff] }
0x1949   :  { %20323 = vrsqrt.f32 %v4552_v13  ;;  %v15358_v13 = vld [vmem:[%s20731_s23 + $0x2f8] sm:$0xff] }
0x194f   :  { %v20322_v51 = vpop.eup %20321 }
0x1950   :  { %v4555_v56 = vmul.f32 %v20322_v51, %v4539_v8  ;;  %v15363_v8 = vld [vmem:[%s20731_s23 + $0x320] sm:$0xff]  ;;  %v18782_v51 = vpack.c.bf16 %v15383_v62, %v15367_v0  ;;  %v15427_v0 = vld [vmem:[%s20817_s21 + $0x910] sm:$0xff]  ;;  %v15428_v62 = vld [vmem:[%s20817_s21 + $0x918] sm:$0xff] }
0x1951   :  { %v18766_v44 = vpack.c.bf16 %v15379_v22, %v15363_v8  ;;  %v15373_v8 = vld [vmem:[%s20731_s23 + $0x370] sm:$0xff]  ;;  %v18846_v4 = vpack.c.bf16 %v15428_v62, %v15427_v0  ;;  %v15453_v0 = vld [vmem:[%s20817_s21 + $0x9e0] sm:$0xff]  ;;  %v15454_v62 = vld [vmem:[%s20817_s21 + $0x9e8] sm:$0xff] }
0x1952   :  { %v4563_v32 = vmul.f32 %v15325_v20, %v4555_v56  ;;  %v15355_v56 = vld [vmem:[%s20731_s23 + $0x2e0] sm:$0xff] }
0x1953   :  { %v20324_v28 = vpop.eup %20323  ;;  %v18794_v21 = vpack.c.bf16 %v15355_v56, %v15339_v58  ;;  %v15429_v58 = vld [vmem:[%s20817_s21 + $0x920] sm:$0xff]  ;;  %v15430_v56 = vld [vmem:[%s20817_s21 + $0x928] sm:$0xff] }
0x1954   :  { %v21476_v18 = vadd.f32 %v15326_v61, %v4563_v32  ;;  %v4556_v19 = vmul.f32 %v20324_v28, %v21439_v14  ;;  %v15354_v14 = vld [vmem:[%s20731_s23 + $0x2d8] sm:$0xff]  ;;  %v15388_v32 = vld [vmem:[%s20731_s23 + $0x3e8] sm:$0xff]  ;;  %v18802_v28 = vpack.c.bf16 %v15357_v60, %v15341_v37  ;;  %v15415_v37 = vld [vmem:[%s20817_s21 + $0x8b0] sm:$0xff] }
0x1955   :  { %v18784_v15 = vpack.c.bf16 %v15354_v14, %v15338_v43  ;;  %v18796_v22 = vpack.c.bf16 %v15388_v32, %v15372_v17  ;;  %v15393_v43 = vld [vmem:[%s20817_s21 + $0x800] sm:$0xff]  ;;  %v15394_v14 = vld [vmem:[%s20817_s21 + $0x808] sm:$0xff]  ;;  %v15416_v60 = vld [vmem:[%s20817_s21 + $0x8b8] sm:$0xff]  ;;  %v18850_v32 = vpack.c.bf16 %v15430_v56, %v15429_v58 }
0x1956   :  { %v4564_v3 = vmul.f32 %v15325_v20, %v4556_v19  ;;  %15650 = vmatmul.mubr.msk.f32.vlgmr.msra.gmra.mrb[52].mxu1 %vm279_vm1, %v21476_v18  ;;  %15652 = vmatmul.mubr.msk.f32.vlgmr.msra.gmra.mrb[54].mxu0 %vm279_vm1, %v21476_v18  ;;  %v18790_v20 = vpack.c.bf16 %v15385_v1, %v15369_v54  ;;  %v15389_v19 = vld [vmem:[%s20731_s23 + $0x3f0] sm:$0xff]  ;;  %v18810_v25 = vpack.c.bf16 %v15394_v14, %v15393_v43  ;;  %v15413_v54 = vld [vmem:[%s20817_s21 + $0x8a0] sm:$0xff]  ;;  %v15414_v1 = vld [vmem:[%s20817_s21 + $0x8a8] sm:$0xff] }
0x1957   :  { %18763 = vmatpush1.bf16.msra.mxu1 %v18762_v40  ;;  %18771 = vmatpush1.bf16.msra.mxu0 %v18770_v42  ;;  %v15371_v40 = vld [vmem:[%s20731_s23 + $0x360] sm:$0xff]  ;;  %v18806_v39 = vpack.c.bf16 %v15389_v19, %v15373_v8  ;;  %v15418_v19 = vld [vmem:[%s20817_s21 + $0x8c8] sm:$0xff]  ;;  %v15423_v58 = vld [vmem:[%s20817_s21 + $0x8f0] sm:$0xff] }
0x1958   :  { %v21491_v47 = vadd.f32 %v15326_v61, %v4564_v3  ;;  %5058 = vmatprep.mubr.f32.mxu1 %v23648_v46  ;;  %5135 = vmatprep.mubr.f32.mxu0 %v23648_v46  ;;  %v18800_v61 = vpack.c.bf16 %v15358_v13, %v15342_v5  ;;  %v15387_v42 = vld [vmem:[%s20731_s23 + $0x3e0] sm:$0xff]  ;;  %v15398_v13 = vld [vmem:[%s20817_s21 + $0x828] sm:$0xff]  ;;  %v15424_v56 = vld [vmem:[%s20817_s21 + $0x8f8] sm:$0xff]  ;;  %s21956_s23 = sld [smem:[%s23629_s0 + %s20515_s25]]   ;;  %s20523_s25 = smov 22  }
0x1959   :  { %18765 = vmatprep.subr.bf16.mxu1 %v18764_v35  ;;  %18773 = vmatprep.subr.bf16.mxu0 %v18772_v36  ;;  %v15410_v35 = vld [vmem:[%s20817_s21 + $0x888] sm:$0xff]  ;;  %v15441_v36 = vld [vmem:[%s20817_s21 + $0x980] sm:$0xff]  ;;  %v18798_v3 = vpack.c.bf16 %v15387_v42, %v15371_v40  ;;  %v15431_v40 = vld [vmem:[%s20817_s21 + $0x930] sm:$0xff]  ;;  %s22149_s16 = sld [smem:[%s23629_s0 + %s20523_s25]]   ;;  %s20529_s25 = smov 30  }
0x195a   :  { %15651 = vmatmul.mubr.msk.f32.gmra.mrb[54].mxu1 %vm279_vm1, %v21491_v47  ;;  %15653 = vmatmul.mubr.msk.f32.gmra.mrb[56].mxu0 %vm279_vm1, %v21491_v47  ;;  %v15397_v5 = vld [vmem:[%s20817_s21 + $0x820] sm:$0xff]  ;;  %v15432_v42 = vld [vmem:[%s20817_s21 + $0x938] sm:$0xff]  ;;  %v15434_v14 = vld [vmem:[%s20817_s21 + $0x948] sm:$0xff] }
0x195b   :  { %18767 = vmatpush1.bf16.msra.mxu1 %v18766_v44  ;;  %18775 = vmatpush1.bf16.msra.mxu0 %v18774_v16  ;;  %v18808_v44 = vpack.c.bf16 %v15410_v35, %v15409_v30  ;;  %v18840_v16 = vpack.c.bf16 %v15442_v38, %v15441_v36  ;;  %v18818_v17 = vpack.c.bf16 %v15398_v13, %v15397_v5  ;;  %v15417_v8 = vld [vmem:[%s20817_s21 + $0x8c0] sm:$0xff]  ;;  %v15402_v38 = vld [vmem:[%s20817_s21 + $0x848] sm:$0xff] }
0x195c   :  { %5206 = vmatprep.mubr.f32.mxu1 %v23648_v46  ;;  %5283 = vmatprep.mubr.f32.mxu0 %v23648_v46  ;;  %v18822_v30 = vpack.c.bf16 %v15400_v48, %v15399_v57  ;;  %v18854_v35 = vpack.c.bf16 %v15432_v42, %v15431_v40  ;;  %v15401_v36 = vld [vmem:[%s20817_s21 + $0x840] sm:$0xff]  ;;  %v15438_v13 = vld [vmem:[%s20817_s21 + $0x968] sm:$0xff]  ;;  %v15439_v48 = vld [vmem:[%s20817_s21 + $0x970] sm:$0xff] }
0x195d   :  { %18777 = vmatprep.subr.bf16.mxu1 %v18776_v6  ;;  %18785 = vmatprep.subr.bf16.mxu0 %v18784_v15  ;;  %v15443_v6 = vld [vmem:[%s20817_s21 + $0x990] sm:$0xff]  ;;  %v15444_v15 = vld [vmem:[%s20817_s21 + $0x998] sm:$0xff]  ;;  %v15433_v43 = vld [vmem:[%s20817_s21 + $0x940] sm:$0xff] }
0x195e   :  { %15654 = vmatmul.mubr.msk.f32.vlgmr.msra.gmra.mrb[56].mxu1 %vm279_vm1, %v21476_v18  ;;  %15656 = vmatmul.mubr.msk.f32.vlgmr.msra.gmra.mrb[58].mxu0 %vm279_vm1, %v21476_v18  ;;  %v15437_v5 = vld [vmem:[%s20817_s21 + $0x960] sm:$0xff]  ;;  %v15474_v42 = vld [vmem:[%s20817_s21 + $0xa88] sm:$0xff] }
0x195f   :  { %18779 = vmatpush1.bf16.msra.mxu1 %v18778_v12  ;;  %18787 = vmatpush1.bf16.msra.mxu0 %v18786_v33  ;;  %v18812_v12 = vpack.c.bf16 %v15412_v55, %v15411_v24  ;;  %v18844_v33 = vpack.c.bf16 %v15444_v15, %v15443_v6  ;;  %v18826_v24 = vpack.c.bf16 %v15402_v38, %v15401_v36  ;;  %v15403_v6 = vld [vmem:[%s20817_s21 + $0x850] sm:$0xff]  ;;  %v15404_v15 = vld [vmem:[%s20817_s21 + $0x858] sm:$0xff]  ;;  %v15473_v40 = vld [vmem:[%s20817_s21 + $0xa80] sm:$0xff] }
0x1960   :  { %5212 = vmatprep.mubr.f32.mxu1 %v23648_v46  ;;  %5289 = vmatprep.mubr.f32.mxu0 %v23648_v46  ;;  %v18858_v55 = vpack.c.bf16 %v15434_v14, %v15433_v43  ;;  %v15458_v43 = vld [vmem:[%s20817_s21 + $0xa08] sm:$0xff] }
0x1961   :  { %18781 = vmatprep.subr.bf16.mxu1 %v18780_v63  ;;  %18789 = vmatprep.subr.bf16.mxu0 %v18788_v34  ;;  %v15445_v63 = vld [vmem:[%s20817_s21 + $0x9a0] sm:$0xff]  ;;  %v15446_v34 = vld [vmem:[%s20817_s21 + $0x9a8] sm:$0xff] }
0x1962   :  { %15655 = vmatmul.mubr.msk.f32.gmra.mrb[58].mxu1 %vm279_vm1, %v21491_v47  ;;  %15657 = vmatmul.mubr.msk.f32.gmra.mrb[60].mxu0 %vm279_vm1, %v21491_v47 }
0x1963   :  { %18783 = vmatpush1.bf16.msra.mxu1 %v18782_v51  ;;  %18791 = vmatpush1.bf16.msra.mxu0 %v18790_v20  ;;  %v18816_v51 = vpack.c.bf16 %v15414_v1, %v15413_v54  ;;  %v18848_v20 = vpack.c.bf16 %v15446_v34, %v15445_v63  ;;  %v18830_v54 = vpack.c.bf16 %v15404_v15, %v15403_v6  ;;  %v15405_v63 = vld [vmem:[%s20817_s21 + $0x860] sm:$0xff] }
0x1964   :  { %5360 = vmatprep.mubr.f32.mxu1 %v23648_v46  ;;  %5437 = vmatprep.mubr.f32.mxu0 %v23648_v46  ;;  %v18862_v1 = vpack.c.bf16 %v15436_v9, %v15435_v41  ;;  %v15508_v41 = vld [vmem:[%s20817_s21 + $0xb98] sm:$0xff] }
0x1965   :  { %18793 = vmatprep.subr.bf16.mxu1 %v18792_v45  ;;  %18801 = vmatprep.subr.bf16.mxu0 %v18800_v61  ;;  %v15447_v45 = vld [vmem:[%s20817_s21 + $0x9b0] sm:$0xff]  ;;  %v15448_v61 = vld [vmem:[%s20817_s21 + $0x9b8] sm:$0xff] }
0x1966   :  { %15658 = vmatmul.mubr.msk.f32.vlgmr.msra.gmra.mrb[60].mxu1 %vm279_vm1, %v21476_v18  ;;  %15660 = vmatmul.mubr.msk.f32.vlgmr.msra.gmra.mrb[62].mxu0 %vm279_vm1, %v21476_v18 }
0x1967   :  { %18795 = vmatpush1.bf16.msra.mxu1 %v18794_v21  ;;  %18803 = vmatpush1.bf16.msra.mxu0 %v18802_v28  ;;  %v18820_v21 = vpack.c.bf16 %v15416_v60, %v15415_v37  ;;  %v18852_v28 = vpack.c.bf16 %v15448_v61, %v15447_v45  ;;  %v15455_v37 = vld [vmem:[%s20817_s21 + $0x9f0] sm:$0xff]  ;;  %v18836_v60 = vpack.c.bf16 %v15424_v56, %v15423_v58  ;;  %v15456_v45 = vld [vmem:[%s20817_s21 + $0x9f8] sm:$0xff] }
0x1968   :  { %5366 = vmatprep.mubr.f32.mxu1 %v23648_v46  ;;  %5443 = vmatprep.mubr.f32.mxu0 %v23648_v46  ;;  %v15407_v61 = vld [vmem:[%s20817_s21 + $0x870] sm:$0xff] }
0x1969   :  { %18797 = vmatprep.subr.bf16.mxu1 %v18796_v22  ;;  %18805 = vmatprep.subr.bf16.mxu0 %v18804_v29  ;;  %v15449_v22 = vld [vmem:[%s20817_s21 + $0x9c0] sm:$0xff]  ;;  %v15450_v29 = vld [vmem:[%s20817_s21 + $0x9c8] sm:$0xff] }
0x196a   :  { %15659 = vmatmul.mubr.msk.f32.gmra.mrb[62].mxu1 %vm279_vm1, %v21491_v47  ;;  %15661 = vmatmul.mubr.msk.f32.gmra.mrb[64].mxu0 %vm279_vm1, %v21491_v47 }
0x196b   :  { %18799 = vmatpush1.bf16.msra.mxu1 %v18798_v3  ;;  %18807 = vmatpush1.bf16.msra.mxu0 %v18806_v39  ;;  %v18824_v3 = vpack.c.bf16 %v15418_v19, %v15417_v8  ;;  %v18856_v39 = vpack.c.bf16 %v15450_v29, %v15449_v22  ;;  %v15505_v8 = vld [vmem:[%s20817_s21 + $0xb80] sm:$0xff]  ;;  %v18872_v19 = vpack.c.bf16 %v15474_v42, %v15473_v40  ;;  %v15506_v22 = vld [vmem:[%s20817_s21 + $0xb88] sm:$0xff] }
0x196c   :  { %5514 = vmatprep.mubr.f32.mxu1 %v23648_v46  ;;  %5591 = vmatprep.mubr.f32.mxu0 %v23648_v46  ;;  %v18904_v29 = vpack.c.bf16 %v15506_v22, %v15505_v8  ;;  %v15510_v40 = vld [vmem:[%s20817_s21 + $0xba8] sm:$0xff]  ;;  %v15461_v42 = vld [vmem:[%s20817_s21 + $0xa20] sm:$0xff] }
0x196d   :  { %18809 = vmatprep.subr.bf16.mxu1 %v18808_v44  ;;  %18841 = vmatprep.subr.bf16.mxu0 %v18840_v16  ;;  %v15419_v44 = vld [vmem:[%s20817_s21 + $0x8d0] sm:$0xff]  ;;  %v15420_v16 = vld [vmem:[%s20817_s21 + $0x8d8] sm:$0xff] }
0x196e   :  { %15662 = vmatmul.mubr.msk.f32.vlgmr.msra.gmra.mrb[64].mxu1 %vm279_vm1, %v21476_v18  ;;  %15664 = vmatmul.mubr.msk.f32.vlgmr.msra.gmra.mrb[66].mxu0 %vm279_vm1, %v21476_v18 }
0x196f   :  { %5520 = vmatprep.mubr.f32.mxu1 %v23648_v46  ;;  %5597 = vmatprep.mubr.f32.mxu0 %v23648_v46  ;;  %v15572_v46 = vld [vmem:[%s20817_s21 + $0xd98] sm:$0xff] }
0x1970   :  { %18811 = vmatpush3.bf16.msra.mxu1 %v18810_v25  ;;  %18843 = vmatpush3.bf16.msra.mxu0 %v18842_v27  ;;  %v18828_v25 = vpack.c.bf16 %v15420_v16, %v15419_v44  ;;  %v18860_v27 = vpack.c.bf16 %v15452_v26, %v15451_v7  ;;  %v15489_v16 = vld [vmem:[%s20817_s21 + $0xb00] sm:$0xff]  ;;  %v15490_v7 = vld [vmem:[%s20817_s21 + $0xb08] sm:$0xff]  ;;  %v15475_v26 = vld [vmem:[%s20817_s21 + $0xa90] sm:$0xff] }
0x1971   :  { %18813 = vmatprep.subr.bf16.mxu1 %v18812_v12  ;;  %18845 = vmatprep.subr.bf16.mxu0 %v18844_v33  ;;  %v15421_v12 = vld [vmem:[%s20817_s21 + $0x8e0] sm:$0xff]  ;;  %v15422_v33 = vld [vmem:[%s20817_s21 + $0x8e8] sm:$0xff] }
0x1972   :  { %15663 = vmatmul.mubr.msk.f32.gmra.mrb[66].mxu1 %vm279_vm1, %v21491_v47  ;;  %15665 = vmatmul.mubr.msk.f32.gmra.mrb[68].mxu0 %vm279_vm1, %v21491_v47  ;;  %v18832_v34 = vpack.c.bf16 %v15422_v33, %v15421_v12 }
0x1974   :  { %18815 = vmatpush3.bf16.msra.mxu1 %v18814_v2  ;;  %18847 = vmatpush3.bf16.msra.mxu0 %v18846_v4  ;;  %v18864_v2 = vpack.c.bf16 %v15454_v62, %v15453_v0  ;;  %v15406_v4 = vld [vmem:[%s20817_s21 + $0x868] sm:$0xff]  ;;  %v18906_v0 = vpack.c.bf16 %v15490_v7, %v15489_v16 }
0x1975   :  { %18817 = vmatprep.subr.bf16.mxu1 %v18816_v51  ;;  %18849 = vmatprep.subr.bf16.mxu0 %v18848_v20  ;;  %v18834_v51 = vpack.c.bf16 %v15406_v4, %v15405_v63  ;;  %v18866_v20 = vpack.c.bf16 %v15438_v13, %v15437_v5  ;;  %v15460_v13 = vld [vmem:[%s20817_s21 + $0xa18] sm:$0xff] }
0x1978   :  { %18819 = vmatpush3.bf16.msra.mxu1 %v18818_v17  ;;  %18851 = vmatpush3.bf16.msra.mxu0 %v18850_v32  ;;  %v15408_v17 = vld [vmem:[%s20817_s21 + $0x878] sm:$0xff]  ;;  %v18868_v32 = vpack.c.bf16 %v15456_v45, %v15455_v37 }
0x1979   :  { %18821 = vmatprep.subr.bf16.mxu1 %v18820_v21  ;;  %18853 = vmatprep.subr.bf16.mxu0 %v18852_v28  ;;  %v18838_v57 = vpack.c.bf16 %v15408_v17, %v15407_v61  ;;  %v15440_v21 = vld [vmem:[%s20817_s21 + $0x978] sm:$0xff]  ;;  %v15477_v17 = vld [vmem:[%s20817_s21 + $0xaa0] sm:$0xff] }
0x197a   :  { %v18870_v28 = vpack.c.bf16 %v15440_v21, %v15439_v48  ;;  %v15492_v61 = vld [vmem:[%s20817_s21 + $0xb18] sm:$0xff]  ;;  %v15478_v21 = vld [vmem:[%s20817_s21 + $0xaa8] sm:$0xff] }
0x197b   :  { %v18880_v16 = vpack.c.bf16 %v15478_v21, %v15477_v17 }
0x197c   :  { %18823 = vmatpush3.bf16.msra.mxu1 %v18822_v30  ;;  %18855 = vmatpush3.bf16.msra.mxu0 %v18854_v35  ;;  %v21631_v30 = vld [vmem:[%s20939_s28 + $0x10] sm:$0xff] }
0x197d   :  { %18825 = vmatprep.subr.bf16.mxu1 %v18824_v3  ;;  %18857 = vmatprep.subr.bf16.mxu0 %v18856_v39  ;;  %v4905_v35 = vrot.slane %v21631_v30, %v20944_v49  ;;  %v4913_v36 = vrot.slane %v21631_v30, %v20947_v50  ;;  %v4909_v38 = vrot.slane %v21631_v30, %v20953_v52  ;;  %v15457_v39 = vld [vmem:[%s20817_s21 + $0xa00] sm:$0xff] }
0x197e   :  { %v4917_v3 = vrot.slane %v21631_v30, %v20956_v53  ;;  %v18874_v33 = vpack.c.bf16 %v15458_v43, %v15457_v39  ;;  %v21651_v62 = vrot.slane %v21631_v30, %v20969_v59  ;;  %v21660_v48 = vrot.slane %v21631_v30, %v20978_v10 }
0x1980   :  { %18827 = vmatpush3.bf16.msra.mxu1 %v18826_v24  ;;  %18859 = vmatpush3.bf16.msra.mxu0 %v18858_v55 }
0x1981   :  { %18829 = vmatprep.subr.bf16.mxu1 %v18828_v25  ;;  %18861 = vmatprep.subr.bf16.mxu0 %v18860_v27  ;;  %v15476_v25 = vld [vmem:[%s20817_s21 + $0xa98] sm:$0xff]  ;;  %v15507_v27 = vld [vmem:[%s20817_s21 + $0xb90] sm:$0xff] }
0x1982   :  { %v18876_v4 = vpack.c.bf16 %v15476_v25, %v15475_v26  ;;  %v18908_v5 = vpack.c.bf16 %v15508_v41, %v15507_v27  ;;  %v15494_v26 = vld [vmem:[%s20817_s21 + $0xb28] sm:$0xff]  ;;  %v15511_v25 = vld [vmem:[%s20817_s21 + $0xbb0] sm:$0xff]  ;;  %v15512_v27 = vld [vmem:[%s20817_s21 + $0xbb8] sm:$0xff] }
0x1984   :  { %18831 = vmatpush3.bf16.msra.mxu1 %v18830_v54  ;;  %18863 = vmatpush3.bf16.msra.mxu0 %v18862_v1  ;;  %v15459_v54 = vld [vmem:[%s20817_s21 + $0xa10] sm:$0xff] }
0x1985   :  { %18833 = vmatprep.subr.bf16.mxu1 %v18832_v34  ;;  %18865 = vmatprep.subr.bf16.mxu0 %v18864_v2 }
0x1988   :  { %18835 = vmatpush3.bf16.msra.mxu1 %v18834_v51  ;;  %18867 = vmatpush3.bf16.msra.mxu0 %v18866_v20  ;;  %v15491_v51 = vld [vmem:[%s20817_s21 + $0xb10] sm:$0xff] }
0x1989   :  { %18837 = vmatprep.subr.bf16.mxu1 %v18836_v60  ;;  %18869 = vmatprep.subr.bf16.mxu0 %v18868_v32 }
0x198c   :  { %18839 = vmatpush3.bf16.msra.mxu1 %v18838_v57  ;;  %18871 = vmatpush3.bf16.msra.mxu0 %v18870_v28  ;;  %v15509_v28 = vld [vmem:[%s20817_s21 + $0xba0] sm:$0xff] }
0x198d   :  { %18873 = vmatprep.subr.bf16.mxu1 %v18872_v19  ;;  %18905 = vmatprep.subr.bf16.mxu0 %v18904_v29  ;;  %v18912_v7 = vpack.c.bf16 %v15510_v40, %v15509_v28 }
0x1a29   :  { %v5054_v14 = vpop.f32.mrb[52].mxu1  ;;  %v5131_v44 = vpop.f32.mrb[54].mxu0 }
0x1a2a   :  { %v5055_v24 = vadd.f32 %v5054_v14, %v4905_v35  ;;  %v5132_v55 = vadd.f32 %v5131_v44, %v4913_v36  ;;  %v5056_v6 = vpop.f32.mrb[53].mxu1  ;;  %v5133_v15 = vpop.f32.mrb[55].mxu0 }
0x1a2b   :  { %v5057_v9 = vadd.f32 %v5056_v6, %v4909_v38  ;;  %v5134_v12 = vadd.f32 %v5133_v15, %v4917_v3  ;;  %v15480_v15 = vld [vmem:[%s20817_s21 + $0xab8] sm:$0xff] }
0x1a2c   :  { %v5604_v20 = vmax.f32 %v5055_v24, 0.0  ;;  %v5606_v58 = vmax.f32 %v5132_v55, 0.0  ;;  %v15479_v24 = vld [vmem:[%s20817_s21 + $0xab0] sm:$0xff] }
0x1a2d   :  { %v5605_v1 = vmax.f32 %v5057_v9, 0.0  ;;  %v5607_v63 = vmax.f32 %v5134_v12, 0.0  ;;  %v5060_v34 = vpop.f32.mrb[54].mxu1  ;;  %v5137_v2 = vpop.f32.mrb[56].mxu0 }
0x1a2e   :  { %v5061_v56 = vadd.f32 %v5060_v34, %v4905_v35  ;;  %v5138_v37 = vadd.f32 %v5137_v2, %v4913_v36  ;;  %v5062_v60 = vpop.f32.mrb[55].mxu1  ;;  %v5139_v45 = vpop.f32.mrb[57].mxu0  ;;  %v18878_v35 = vpack.c.bf16 %v15460_v13, %v15459_v54  ;;  %v18910_v36 = vpack.c.bf16 %v15492_v61, %v15491_v51  ;;  %v15495_v13 = vld [vmem:[%s20817_s21 + $0xb30] sm:$0xff]  ;;  %v15496_v51 = vld [vmem:[%s20817_s21 + $0xb38] sm:$0xff] }
0x1a2f   :  { %v5063_v32 = vadd.f32 %v5062_v60, %v4909_v38  ;;  %v5140_v57 = vadd.f32 %v5139_v45, %v4917_v3  ;;  %5706 = vmatprep.mubr.f32.mxu1 %v5605_v1  ;;  %5781 = vmatprep.mubr.f32.mxu0 %v5607_v63  ;;  %v15462_v38 = vld [vmem:[%s20817_s21 + $0xa28] sm:$0xff]  ;;  %v15493_v3 = vld [vmem:[%s20817_s21 + $0xb20] sm:$0xff]  ;;  %v15463_v1 = vld [vmem:[%s20817_s21 + $0xa30] sm:$0xff]  ;;  %v18918_v17 = vpack.c.bf16 %v15496_v51, %v15495_v13 }
0x1a30   :  { %5707 = vmatmul.mubr.f32.vlgmr.msra.gmra.mrb[68].mxu1 %v5604_v20  ;;  %5782 = vmatmul.mubr.f32.vlgmr.msra.gmra.mrb[70].mxu0 %v5606_v58  ;;  %v5620_v39 = vmax.f32 %v5061_v56, 0.0  ;;  %v5622_v43 = vmax.f32 %v5138_v37, 0.0  ;;  %v18914_v54 = vpack.c.bf16 %v15494_v26, %v15493_v3  ;;  %v15464_v63 = vld [vmem:[%s20817_s21 + $0xa38] sm:$0xff]  ;;  %v15481_v20 = vld [vmem:[%s20817_s21 + $0xac0] sm:$0xff]  ;;  %v15482_v58 = vld [vmem:[%s20817_s21 + $0xac8] sm:$0xff] }
0x1a31   :  { %v5621_v8 = vmax.f32 %v5063_v32, 0.0  ;;  %v5623_v19 = vmax.f32 %v5140_v57, 0.0  ;;  %18875 = vmatpush3.bf16.msra.mxu1 %v18874_v33  ;;  %18907 = vmatpush3.bf16.msra.mxu0 %v18906_v0  ;;  %v21666_v22 = vpop.f32.mrb[56].mxu1  ;;  %v21668_v29 = vpop.f32.mrb[58].mxu0  ;;  %v18882_v0 = vpack.c.bf16 %v15462_v38, %v15461_v42  ;;  %v15513_v56 = vld [vmem:[%s20817_s21 + $0xbc0] sm:$0xff]  ;;  %v15514_v37 = vld [vmem:[%s20817_s21 + $0xbc8] sm:$0xff]  ;;  %v18886_v61 = vpack.c.bf16 %v15464_v63, %v15463_v1 }
0x1a32   :  { %v5210_v14 = vpop.f32.mrb[57].mxu1  ;;  %v5287_v44 = vpop.f32.mrb[59].mxu0  ;;  %18877 = vmatprep.subr.bf16.mxu1 %v18876_v4  ;;  %18909 = vmatprep.subr.bf16.mxu0 %v18908_v5  ;;  %v18884_v4 = vpack.c.bf16 %v15480_v15, %v15479_v24  ;;  %v18916_v5 = vpack.c.bf16 %v15512_v27, %v15511_v25  ;;  %v15465_v32 = vld [vmem:[%s20817_s21 + $0xa40] sm:$0xff]  ;;  %v15466_v57 = vld [vmem:[%s20817_s21 + $0xa48] sm:$0xff]  ;;  %v18888_v40 = vpack.c.bf16 %v15482_v58, %v15481_v20  ;;  %v15515_v38 = vld [vmem:[%s20817_s21 + $0xbd0] sm:$0xff] }
0x1a33   :  { %v5211_v55 = vadd.f32 %v5210_v14, %v21651_v62  ;;  %v5288_v6 = vadd.f32 %v5287_v44, %v21660_v48  ;;  %5711 = vmatprep.mubr.f32.mxu1 %v5621_v8  ;;  %5786 = vmatprep.mubr.f32.mxu0 %v5623_v19  ;;  %v18920_v42 = vpack.c.bf16 %v15514_v37, %v15513_v56  ;;  %v15497_v8 = vld [vmem:[%s20817_s21 + $0xb40] sm:$0xff]  ;;  %v15498_v19 = vld [vmem:[%s20817_s21 + $0xb48] sm:$0xff]  ;;  %v15516_v3 = vld [vmem:[%s20817_s21 + $0xbd8] sm:$0xff] }
0x1a34   :  { %5712 = vmatmul.mubr.f32.gmra.mrb[70].mxu1 %v5620_v39  ;;  %5787 = vmatmul.mubr.f32.gmra.mrb[72].mxu0 %v5622_v43  ;;  %v18890_v14 = vpack.c.bf16 %v15466_v57, %v15465_v32  ;;  %v18922_v44 = vpack.c.bf16 %v15498_v19, %v15497_v8  ;;  %v15499_v15 = vld [vmem:[%s20817_s21 + $0xb50] sm:$0xff]  ;;  %v15500_v25 = vld [vmem:[%s20817_s21 + $0xb58] sm:$0xff]  ;;  %v15485_v27 = vld [vmem:[%s20817_s21 + $0xae0] sm:$0xff] }
0x1a35   :  { %v5609_v41 = vmax.f32 %v5211_v55, 0.0  ;;  %v5611_v9 = vmax.f32 %v5288_v6, 0.0  ;;  %18879 = vmatpush3.bf16.msra.mxu1 %v18878_v35  ;;  %18911 = vmatpush3.bf16.msra.mxu0 %v18910_v36  ;;  %v21679_v12 = vpop.f32.mrb[58].mxu1  ;;  %v21681_v33 = vpop.f32.mrb[60].mxu0  ;;  %v15483_v35 = vld [vmem:[%s20817_s21 + $0xad0] sm:$0xff]  ;;  %v15484_v36 = vld [vmem:[%s20817_s21 + $0xad8] sm:$0xff]  ;;  %v18924_v6 = vpack.c.bf16 %v15516_v3, %v15515_v38 }
0x1a36   :  { %v21685_v34 = vpop.f32.mrb[59].mxu1  ;;  %v21687_v2 = vpop.f32.mrb[61].mxu0  ;;  %18881 = vmatprep.subr.bf16.mxu1 %v18880_v16  ;;  %18913 = vmatprep.subr.bf16.mxu0 %v18912_v7  ;;  %v15467_v16 = vld [vmem:[%s20817_s21 + $0xa50] sm:$0xff]  ;;  %v15468_v7 = vld [vmem:[%s20817_s21 + $0xa58] sm:$0xff]  ;;  %v18892_v55 = vpack.c.bf16 %v15484_v36, %v15483_v35  ;;  %v15470_v13 = vld [vmem:[%s20817_s21 + $0xa68] sm:$0xff] }
0x1a37   :  { %5856 = vmatprep.mubr.f32.mxu1 %v5609_v41  ;;  %5931 = vmatprep.mubr.f32.mxu0 %v5611_v9  ;;  %v15486_v41 = vld [vmem:[%s20817_s21 + $0xae8] sm:$0xff]  ;;  %v15517_v9 = vld [vmem:[%s20817_s21 + $0xbe0] sm:$0xff]  ;;  %v18894_v63 = vpack.c.bf16 %v15468_v7, %v15467_v16  ;;  %v15488_v32 = vld [vmem:[%s20817_s21 + $0xaf8] sm:$0xff] }
0x1a38   :  { %v18896_v58 = vpack.c.bf16 %v15486_v41, %v15485_v27  ;;  %v15501_v37 = vld [vmem:[%s20817_s21 + $0xb60] sm:$0xff]  ;;  %v15519_v57 = vld [vmem:[%s20817_s21 + $0xbf0] sm:$0xff]  ;;  %v15472_v3 = vld [vmem:[%s20817_s21 + $0xa78] sm:$0xff] }
0x1a39   :  { %18883 = vmatpush3.bf16.msra.mxu1 %v18882_v0  ;;  %18915 = vmatpush3.bf16.msra.mxu0 %v18914_v54  ;;  %v21695_v60 = vpop.f32.mrb[60].mxu1  ;;  %v21697_v45 = vpop.f32.mrb[62].mxu0  ;;  %v15518_v0 = vld [vmem:[%s20817_s21 + $0xbe8] sm:$0xff]  ;;  %v15471_v38 = vld [vmem:[%s20817_s21 + $0xa70] sm:$0xff]  ;;  %v15569_v41 = vld [vmem:[%s20817_s21 + $0xd80] sm:$0xff] }
0x1a3a   :  { %v21701_v21 = vpop.f32.mrb[61].mxu1  ;;  %v21703_v28 = vpop.f32.mrb[63].mxu0  ;;  %18885 = vmatprep.subr.bf16.mxu1 %v18884_v4  ;;  %18917 = vmatprep.subr.bf16.mxu0 %v18916_v5  ;;  %v18926_v4 = vpack.c.bf16 %v15500_v25, %v15499_v15  ;;  %v15469_v5 = vld [vmem:[%s20817_s21 + $0xa60] sm:$0xff]  ;;  %v18928_v56 = vpack.c.bf16 %v15518_v0, %v15517_v9  ;;  %v15504_v15 = vld [vmem:[%s20817_s21 + $0xb78] sm:$0xff]  ;;  %v15538_v27 = vld [vmem:[%s20817_s21 + $0xc88] sm:$0xff] }
0x1a3b   :  { %v18898_v35 = vpack.c.bf16 %v15470_v13, %v15469_v5  ;;  %v15537_v25 = vld [vmem:[%s20817_s21 + $0xc80] sm:$0xff]  ;;  %v15570_v9 = vld [vmem:[%s20817_s21 + $0xd88] sm:$0xff]  ;;  %v21764_v0 = vld [vmem:[%s20939_s28 + $0x18] sm:$0xff]  ;;  %s21975_s28 = sld [smem:[%s23629_s0 + %s20516_s29]]   ;;  %s20526_s29 = smov 28  }
0x1a3c   :  { %v18936_v13 = vpack.c.bf16 %v15538_v27, %v15537_v25  ;;  %s22277_s18 = sld [smem:[%s23629_s0 + %s20526_s29]]  }
0x1a3d   :  { %18887 = vmatpush3.bf16.msra.mxu1 %v18886_v61  ;;  %18919 = vmatpush3.bf16.msra.mxu0 %v18918_v17  ;;  %v21711_v39 = vpop.f32.mrb[62].mxu1  ;;  %v21713_v43 = vpop.f32.mrb[64].mxu0  ;;  %v15502_v61 = vld [vmem:[%s20817_s21 + $0xb68] sm:$0xff]  ;;  %v15487_v17 = vld [vmem:[%s20817_s21 + $0xaf0] sm:$0xff] }
0x1a3e   :  { %v21717_v26 = vpop.f32.mrb[63].mxu1  ;;  %v21719_v24 = vpop.f32.mrb[65].mxu0  ;;  %18889 = vmatprep.subr.bf16.mxu1 %v18888_v40  ;;  %18921 = vmatprep.subr.bf16.mxu0 %v18920_v42  ;;  %v15520_v40 = vld [vmem:[%s20817_s21 + $0xbf8] sm:$0xff]  ;;  %v4921_v42 = vrot.slane %v21631_v30, %v21059_v11  ;;  %v18930_v36 = vpack.c.bf16 %v15502_v61, %v15501_v37  ;;  %v15539_v37 = vld [vmem:[%s20817_s21 + $0xc90] sm:$0xff] }
0x1a40   :  { %v5209_v61 = vadd.f32 %v21666_v22, %v4921_v42  ;;  %v21786_v22 = vrot.slane %v21764_v0, %v20956_v53 }
0x1a41   :  { %18891 = vmatpush3.bf16.msra.mxu1 %v18890_v14  ;;  %18923 = vmatpush3.bf16.msra.mxu0 %v18922_v44  ;;  %v21727_v54 = vpop.f32.mrb[64].mxu1  ;;  %v21729_v1 = vpop.f32.mrb[66].mxu0  ;;  %v15503_v14 = vld [vmem:[%s20817_s21 + $0xb70] sm:$0xff]  ;;  %v4929_v44 = vrot.slane %v21631_v30, %v21068_v23  ;;  %v15521_v30 = vld [vmem:[%s20817_s21 + $0xc00] sm:$0xff] }
0x1a42   :  { %v21733_v51 = vpop.f32.mrb[65].mxu1  ;;  %v21735_v20 = vpop.f32.mrb[67].mxu0  ;;  %18893 = vmatprep.subr.bf16.mxu1 %v18892_v55  ;;  %18925 = vmatprep.subr.bf16.mxu0 %v18924_v6  ;;  %v18900_v55 = vpack.c.bf16 %v15488_v32, %v15487_v17  ;;  %v18932_v6 = vpack.c.bf16 %v15520_v40, %v15519_v57  ;;  %v18934_v5 = vpack.c.bf16 %v15504_v15, %v15503_v14  ;;  %v15540_v57 = vld [vmem:[%s20817_s21 + $0xc98] sm:$0xff]  ;;  %v15571_v40 = vld [vmem:[%s20817_s21 + $0xd90] sm:$0xff]  ;;  %v5608_v14 = vmax.f32 %v5209_v61, 0.0 }
0x1a43   :  { %v5286_v17 = vadd.f32 %v21668_v29, %v4929_v44  ;;  %v18968_v32 = vpack.c.bf16 %v15570_v9, %v15569_v41  ;;  %v15524_v15 = vld [vmem:[%s20817_s21 + $0xc18] sm:$0xff]  ;;  %v15555_v9 = vld [vmem:[%s20817_s21 + $0xd10] sm:$0xff] }
0x1a45   :  { %18895 = vmatpush3.bf16.msra.mxu1 %v18894_v63  ;;  %18927 = vmatpush3.bf16.msra.mxu0 %v18926_v4  ;;  %v21745_v8 = vpop.f32.mrb[66].mxu1  ;;  %v21747_v19 = vpop.f32.mrb[68].mxu0  ;;  %v15522_v63 = vld [vmem:[%s20817_s21 + $0xc08] sm:$0xff]  ;;  %v18902_v4 = vpack.c.bf16 %v15472_v3, %v15471_v38  ;;  %v21782_v38 = vrot.slane %v21764_v0, %v20953_v52 }
0x1a46   :  { %v21754_v16 = vpop.f32.mrb[67].mxu1  ;;  %v21756_v7 = vpop.f32.mrb[69].mxu0  ;;  %18897 = vmatprep.subr.bf16.mxu1 %v18896_v58  ;;  %18929 = vmatprep.subr.bf16.mxu0 %v18928_v56  ;;  %v15553_v58 = vld [vmem:[%s20817_s21 + $0xd00] sm:$0xff]  ;;  %v15554_v56 = vld [vmem:[%s20817_s21 + $0xd08] sm:$0xff]  ;;  %v18938_v29 = vpack.c.bf16 %v15522_v63, %v15521_v30  ;;  %v15556_v30 = vld [vmem:[%s20817_s21 + $0xd18] sm:$0xff] }
0x1a47   :  { %v18970_v3 = vpack.c.bf16 %v15554_v56, %v15553_v58  ;;  %v5365_v41 = vadd.f32 %v21701_v21, %v21782_v38 }
0x1a49   :  { %18899 = vmatpush3.bf16.msra.mxu1 %v18898_v35  ;;  %18931 = vmatpush3.bf16.msra.mxu0 %v18930_v36  ;;  %v5217_v35 = vadd.f32 %v21685_v34, %v21651_v62  ;;  %v5294_v36 = vadd.f32 %v21687_v2, %v21660_v48  ;;  %v18940_v62 = vpack.c.bf16 %v15540_v57, %v15539_v37  ;;  %v5610_v48 = vmax.f32 %v5286_v17, 0.0  ;;  %v15557_v17 = vld [vmem:[%s20817_s21 + $0xd20] sm:$0xff]  ;;  %v15543_v57 = vld [vmem:[%s20817_s21 + $0xcb0] sm:$0xff] }
0x1a4a   :  { %18901 = vmatprep.subr.bf16.mxu1 %v18900_v55  ;;  %18933 = vmatprep.subr.bf16.mxu0 %v18932_v6  ;;  %v18972_v34 = vpack.c.bf16 %v15572_v46, %v15571_v40  ;;  %v5215_v2 = vadd.f32 %v21679_v12, %v4921_v42  ;;  %v5292_v55 = vadd.f32 %v21681_v33, %v4929_v44  ;;  %v15523_v6 = vld [vmem:[%s20817_s21 + $0xc10] sm:$0xff]  ;;  %v15541_v12 = vld [vmem:[%s20817_s21 + $0xca0] sm:$0xff]  ;;  %v15542_v33 = vld [vmem:[%s20817_s21 + $0xca8] sm:$0xff]  ;;  %v5613_v58 = vmax.f32 %v5365_v41, 0.0 }
0x1a4b   :  { %v5625_v25 = vmax.f32 %v5217_v35, 0.0  ;;  %v5627_v27 = vmax.f32 %v5294_v36, 0.0  ;;  %v5442_v46 = vadd.f32 %v21703_v28, %v21786_v22  ;;  %v15573_v42 = vld [vmem:[%s20817_s21 + $0xda0] sm:$0xff]  ;;  %v15574_v44 = vld [vmem:[%s20817_s21 + $0xda8] sm:$0xff]  ;;  %v18942_v28 = vpack.c.bf16 %v15524_v15, %v15523_v6  ;;  %v15544_v40 = vld [vmem:[%s20817_s21 + $0xcb8] sm:$0xff] }
0x1a4c   :  { %v5624_v63 = vmax.f32 %v5215_v2, 0.0  ;;  %v5626_v21 = vmax.f32 %v5292_v55, 0.0  ;;  %v18944_v37 = vpack.c.bf16 %v15542_v33, %v15541_v12  ;;  %v18976_v61 = vpack.c.bf16 %v15574_v44, %v15573_v42  ;;  %v15575_v35 = vld [vmem:[%s20817_s21 + $0xdb0] sm:$0xff]  ;;  %v15576_v36 = vld [vmem:[%s20817_s21 + $0xdb8] sm:$0xff]  ;;  %v15545_v6 = vld [vmem:[%s20817_s21 + $0xcc0] sm:$0xff] }
0x1a4d   :  { %18903 = vmatpush3.bf16.msra.mxu1 %v18902_v4  ;;  %18935 = vmatpush3.bf16.msra.mxu0 %v18934_v5  ;;  %v18974_v4 = vpack.c.bf16 %v15556_v30, %v15555_v9  ;;  %v15525_v5 = vld [vmem:[%s20817_s21 + $0xc20] sm:$0xff]  ;;  %v5615_v56 = vmax.f32 %v5442_v46, 0.0  ;;  %v15559_v2 = vld [vmem:[%s20817_s21 + $0xd30] sm:$0xff]  ;;  %v15560_v55 = vld [vmem:[%s20817_s21 + $0xd38] sm:$0xff] }
0x1a4e   :  { %18937 = vmatprep.subr.bf16.mxu1 %v18936_v13  ;;  %18969 = vmatprep.subr.bf16.mxu0 %v18968_v32  ;;  %v15526_v13 = vld [vmem:[%s20817_s21 + $0xc28] sm:$0xff]  ;;  %v18982_v46 = vpack.c.bf16 %v15560_v55, %v15559_v2  ;;  %v15529_v9 = vld [vmem:[%s20817_s21 + $0xc40] sm:$0xff] }
0x1a4f   :  { %v15558_v32 = vld [vmem:[%s20817_s21 + $0xd28] sm:$0xff]  ;;  %v15561_v42 = vld [vmem:[%s20817_s21 + $0xd40] sm:$0xff] }
0x1a50   :  { %5857 = vmatmul.mubr.f32.vlgmr.msra.gmra.mrb[72].mxu1 %v5608_v14  ;;  %5932 = vmatmul.mubr.f32.vlgmr.msra.gmra.mrb[74].mxu0 %v5610_v48  ;;  %v18948_v14 = vpack.c.bf16 %v15544_v40, %v15543_v57  ;;  %v18980_v48 = vpack.c.bf16 %v15576_v36, %v15575_v35  ;;  %v15546_v15 = vld [vmem:[%s20817_s21 + $0xcc8] sm:$0xff]  ;;  %v15549_v57 = vld [vmem:[%s20817_s21 + $0xce0] sm:$0xff] }
0x1a51   :  { %5861 = vmatprep.mubr.f32.mxu1 %v5625_v25  ;;  %5936 = vmatprep.mubr.f32.mxu0 %v5627_v27  ;;  %v15577_v25 = vld [vmem:[%s20817_s21 + $0xdc0] sm:$0xff]  ;;  %v15578_v27 = vld [vmem:[%s20817_s21 + $0xdc8] sm:$0xff]  ;;  %v18952_v12 = vpack.c.bf16 %v15546_v15, %v15545_v6  ;;  %v15551_v6 = vld [vmem:[%s20817_s21 + $0xcf0] sm:$0xff] }
0x1a52   :  { %18939 = vmatpush3.bf16.msra.mxu1 %v18938_v29  ;;  %18971 = vmatpush3.bf16.msra.mxu0 %v18970_v3  ;;  %v18946_v29 = vpack.c.bf16 %v15526_v13, %v15525_v5  ;;  %v18978_v3 = vpack.c.bf16 %v15558_v32, %v15557_v17  ;;  %v15530_v30 = vld [vmem:[%s20817_s21 + $0xc48] sm:$0xff]  ;;  %v18984_v33 = vpack.c.bf16 %v15578_v27, %v15577_v25  ;;  %v15563_v17 = vld [vmem:[%s20817_s21 + $0xd50] sm:$0xff]  ;;  %v15564_v32 = vld [vmem:[%s20817_s21 + $0xd58] sm:$0xff] }
0x1a53   :  { %18941 = vmatprep.subr.bf16.mxu1 %v18940_v62  ;;  %18973 = vmatprep.subr.bf16.mxu0 %v18972_v34  ;;  %v15527_v62 = vld [vmem:[%s20817_s21 + $0xc30] sm:$0xff]  ;;  %v15528_v34 = vld [vmem:[%s20817_s21 + $0xc38] sm:$0xff]  ;;  %v15562_v44 = vld [vmem:[%s20817_s21 + $0xd48] sm:$0xff]  ;;  %v18954_v5 = vpack.c.bf16 %v15530_v30, %v15529_v9 }
0x1a54   :  { %5862 = vmatmul.mubr.f32.gmra.mrb[74].mxu1 %v5624_v63  ;;  %5937 = vmatmul.mubr.f32.gmra.mrb[76].mxu0 %v5626_v21  ;;  %v18950_v41 = vpack.c.bf16 %v15528_v34, %v15527_v62  ;;  %v15547_v63 = vld [vmem:[%s20817_s21 + $0xcd0] sm:$0xff]  ;;  %v15548_v21 = vld [vmem:[%s20817_s21 + $0xcd8] sm:$0xff]  ;;  %v18986_v13 = vpack.c.bf16 %v15562_v44, %v15561_v42  ;;  %v15550_v40 = vld [vmem:[%s20817_s21 + $0xce8] sm:$0xff]  ;;  %v4945_v42 = vrot.slane %v21764_v0, %v20947_v50 }
0x1a55   :  { %6006 = vmatprep.mubr.f32.mxu1 %v5613_v58  ;;  %6081 = vmatprep.mubr.f32.mxu0 %v5615_v56  ;;  %v15531_v58 = vld [vmem:[%s20817_s21 + $0xc50] sm:$0xff]  ;;  %v15532_v56 = vld [vmem:[%s20817_s21 + $0xc58] sm:$0xff]  ;;  %v15581_v35 = vld [vmem:[%s20817_s21 + $0xde0] sm:$0xff] }
0x1a56   :  { %18943 = vmatpush3.bf16.msra.mxu1 %v18942_v28  ;;  %18975 = vmatpush3.bf16.msra.mxu0 %v18974_v4  ;;  %v15579_v28 = vld [vmem:[%s20817_s21 + $0xdd0] sm:$0xff]  ;;  %v15580_v4 = vld [vmem:[%s20817_s21 + $0xdd8] sm:$0xff]  ;;  %v15582_v36 = vld [vmem:[%s20817_s21 + $0xde8] sm:$0xff] }
0x1a57   :  { %18945 = vmatprep.subr.bf16.mxu1 %v18944_v37  ;;  %18977 = vmatprep.subr.bf16.mxu0 %v18976_v61  ;;  %v18956_v37 = vpack.c.bf16 %v15548_v21, %v15547_v63  ;;  %v18988_v61 = vpack.c.bf16 %v15580_v4, %v15579_v28  ;;  %v15533_v62 = vld [vmem:[%s20817_s21 + $0xc60] sm:$0xff]  ;;  %v15534_v34 = vld [vmem:[%s20817_s21 + $0xc68] sm:$0xff]  ;;  %v15552_v15 = vld [vmem:[%s20817_s21 + $0xcf8] sm:$0xff] }
0x1a58   :  { %v15565_v2 = vld [vmem:[%s20817_s21 + $0xd60] sm:$0xff]  ;;  %v15566_v55 = vld [vmem:[%s20817_s21 + $0xd68] sm:$0xff]  ;;  %v15583_v25 = vld [vmem:[%s20817_s21 + $0xdf0] sm:$0xff]  ;;  %v18964_v44 = vpack.c.bf16 %v15552_v15, %v15551_v6  ;;  %v5446_v15 = vadd.f32 %v21713_v43, %v4945_v42 }
0x1a59   :  { %v15584_v27 = vld [vmem:[%s20817_s21 + $0xdf8] sm:$0xff]  ;;  %v18994_v9 = vpack.c.bf16 %v15566_v55, %v15565_v2  ;;  %v15535_v30 = vld [vmem:[%s20817_s21 + $0xc70] sm:$0xff]  ;;  %v15601_v28 = vld [vmem:[%s20817_s21 + $0xe80] sm:$0xff]  ;;  %v21870_v2 = vrot.slane %v21764_v0, %v20969_v59 }
0x1a5a   :  { %18947 = vmatpush3.bf16.msra.mxu1 %v18946_v29  ;;  %18979 = vmatpush3.bf16.msra.mxu0 %v18978_v3  ;;  %v18958_v29 = vpack.c.bf16 %v15532_v56, %v15531_v58  ;;  %v18990_v3 = vpack.c.bf16 %v15564_v32, %v15563_v17  ;;  %v18996_v63 = vpack.c.bf16 %v15584_v27, %v15583_v25  ;;  %v15568_v21 = vld [vmem:[%s20817_s21 + $0xd78] sm:$0xff]  ;;  %v15602_v4 = vld [vmem:[%s20817_s21 + $0xe88] sm:$0xff]  ;;  %v15585_v58 = vld [vmem:[%s20817_s21 + $0xe00] sm:$0xff] }
0x1a5b   :  { %18949 = vmatprep.subr.bf16.mxu1 %v18948_v14  ;;  %18981 = vmatprep.subr.bf16.mxu0 %v18980_v48  ;;  %v18960_v14 = vpack.c.bf16 %v15550_v40, %v15549_v57  ;;  %v18992_v48 = vpack.c.bf16 %v15582_v36, %v15581_v35  ;;  %v15586_v56 = vld [vmem:[%s20817_s21 + $0xe08] sm:$0xff]  ;;  %v19000_v17 = vpack.c.bf16 %v15602_v4, %v15601_v28  ;;  %v15617_v32 = vld [vmem:[%s20817_s21 + $0xf00] sm:$0xff]  ;;  %v15603_v40 = vld [vmem:[%s20817_s21 + $0xe90] sm:$0xff] }
0x1a5c   :  { %v15618_v57 = vld [vmem:[%s20817_s21 + $0xf08] sm:$0xff]  ;;  %v5440_v36 = vadd.f32 %v21697_v45, %v4945_v42  ;;  %v19002_v45 = vpack.c.bf16 %v15586_v56, %v15585_v58  ;;  %v15587_v25 = vld [vmem:[%s20817_s21 + $0xe10] sm:$0xff]  ;;  %v15588_v27 = vld [vmem:[%s20817_s21 + $0xe18] sm:$0xff] }
0x1a5d   :  { %v19034_v55 = vpack.c.bf16 %v15618_v57, %v15617_v32  ;;  %v15606_v43 = vld [vmem:[%s20817_s21 + $0xea8] sm:$0xff]  ;;  %v15589_v28 = vld [vmem:[%s20817_s21 + $0xe20] sm:$0xff]  ;;  %v15608_v32 = vld [vmem:[%s20817_s21 + $0xeb8] sm:$0xff] }
0x1a5e   :  { %18951 = vmatpush3.bf16.msra.mxu1 %v18950_v41  ;;  %18983 = vmatpush3.bf16.msra.mxu0 %v18982_v46  ;;  %v4937_v41 = vrot.slane %v21764_v0, %v20944_v49  ;;  %v18962_v46 = vpack.c.bf16 %v15534_v34, %v15533_v62  ;;  %v15635_v62 = vld [vmem:[%s20817_s21 + $0xf90] sm:$0xff]  ;;  %v15636_v34 = vld [vmem:[%s20817_s21 + $0xf98] sm:$0xff]  ;;  %v15638_v42 = vld [vmem:[%s20817_s21 + $0xfa8] sm:$0xff] }
0x1a5f   :  { %18953 = vmatprep.subr.bf16.mxu1 %v18952_v12  ;;  %18985 = vmatprep.subr.bf16.mxu0 %v18984_v33  ;;  %v15536_v12 = vld [vmem:[%s20817_s21 + $0xc78] sm:$0xff]  ;;  %v15567_v33 = vld [vmem:[%s20817_s21 + $0xd70] sm:$0xff]  ;;  %v15590_v4 = vld [vmem:[%s20817_s21 + $0xe28] sm:$0xff] }
0x1a60   :  { %v5363_v35 = vadd.f32 %v21695_v60, %v4937_v41  ;;  %v21874_v60 = vrot.slane %v21764_v0, %v20978_v10  ;;  %v15639_v57 = vld [vmem:[%s20817_s21 + $0xfb0] sm:$0xff] }
0x1a62   :  { %18955 = vmatpush3.bf16.msra.mxu1 %v18954_v5  ;;  %18987 = vmatpush3.bf16.msra.mxu0 %v18986_v13  ;;  %v15633_v5 = vld [vmem:[%s20817_s21 + $0xf80] sm:$0xff]  ;;  %v15634_v13 = vld [vmem:[%s20817_s21 + $0xf88] sm:$0xff]  ;;  %v5612_v6 = vmax.f32 %v5363_v35, 0.0  ;;  %v19010_v35 = vpack.c.bf16 %v15590_v4, %v15589_v28 }
0x1a63   :  { %18957 = vmatprep.subr.bf16.mxu1 %v18956_v37  ;;  %18989 = vmatprep.subr.bf16.mxu0 %v18988_v61  ;;  %v18966_v37 = vpack.c.bf16 %v15536_v12, %v15535_v30  ;;  %v18998_v61 = vpack.c.bf16 %v15568_v21, %v15567_v33  ;;  %v5519_v30 = vadd.f32 %v21733_v51, %v21870_v2  ;;  %v15619_v33 = vld [vmem:[%s20817_s21 + $0xf10] sm:$0xff]  ;;  %v5630_v51 = vmax.f32 %v5446_v15, 0.0  ;;  %v15594_v15 = vld [vmem:[%s20817_s21 + $0xe48] sm:$0xff]  ;;  %v15613_v28 = vld [vmem:[%s20817_s21 + $0xee0] sm:$0xff] }
0x1a64   :  { %v5596_v12 = vadd.f32 %v21735_v20, %v21874_v60  ;;  %v19006_v20 = vpack.c.bf16 %v15588_v27, %v15587_v25  ;;  %v15614_v4 = vld [vmem:[%s20817_s21 + $0xee8] sm:$0xff] }
0x1a66   :  { %18959 = vmatpush3.bf16.msra.mxu1 %v18958_v29  ;;  %18991 = vmatpush3.bf16.msra.mxu0 %v18990_v3  ;;  %v19032_v29 = vpack.c.bf16 %v15634_v13, %v15633_v5  ;;  %v15604_v3 = vld [vmem:[%s20817_s21 + $0xe98] sm:$0xff]  ;;  %v5617_v5 = vmax.f32 %v5519_v30, 0.0  ;;  %v5619_v13 = vmax.f32 %v5596_v12, 0.0  ;;  %v15611_v30 = vld [vmem:[%s20817_s21 + $0xed0] sm:$0xff] }
0x1a67   :  { %18961 = vmatprep.subr.bf16.mxu1 %v18960_v14  ;;  %18993 = vmatprep.subr.bf16.mxu0 %v18992_v48  ;;  %v5371_v14 = vadd.f32 %v21717_v26, %v21782_v38  ;;  %v5448_v48 = vadd.f32 %v21719_v24, %v21786_v22  ;;  %v19004_v26 = vpack.c.bf16 %v15604_v3, %v15603_v40  ;;  %v5614_v24 = vmax.f32 %v5440_v36, 0.0  ;;  %v15640_v40 = vld [vmem:[%s20817_s21 + $0xfb8] sm:$0xff] }
0x1a68   :  { %v19036_v38 = vpack.c.bf16 %v15636_v34, %v15635_v62  ;;  %v5369_v22 = vadd.f32 %v21711_v39, %v4937_v41  ;;  %v15605_v39 = vld [vmem:[%s20817_s21 + $0xea0] sm:$0xff]  ;;  %v15592_v3 = vld [vmem:[%s20817_s21 + $0xe38] sm:$0xff]  ;;  %v19044_v34 = vpack.c.bf16 %v15640_v40, %v15639_v57  ;;  %v15630_v40 = vld [vmem:[%s20817_s21 + $0xf68] sm:$0xff] }
0x1a69   :  { %v15637_v41 = vld [vmem:[%s20817_s21 + $0xfa0] sm:$0xff]  ;;  %v19008_v58 = vpack.c.bf16 %v15606_v43, %v15605_v39  ;;  %v15612_v12 = vld [vmem:[%s20817_s21 + $0xed8] sm:$0xff] }
0x1a6a   :  { %18963 = vmatpush3.bf16.msra.mxu1 %v18962_v46  ;;  %18995 = vmatpush3.bf16.msra.mxu0 %v18994_v9  ;;  %v5629_v46 = vmax.f32 %v5371_v14, 0.0  ;;  %v5631_v9 = vmax.f32 %v5448_v48, 0.0  ;;  %v19040_v56 = vpack.c.bf16 %v15638_v42, %v15637_v41  ;;  %v15623_v14 = vld [vmem:[%s20817_s21 + $0xf30] sm:$0xff]  ;;  %v15624_v48 = vld [vmem:[%s20817_s21 + $0xf38] sm:$0xff]  ;;  %v15629_v57 = vld [vmem:[%s20817_s21 + $0xf60] sm:$0xff] }
0x1a6b   :  { %18965 = vmatprep.subr.bf16.mxu1 %v18964_v44  ;;  %18997 = vmatprep.subr.bf16.mxu0 %v18996_v63  ;;  %v15620_v44 = vld [vmem:[%s20817_s21 + $0xf18] sm:$0xff]  ;;  %v5628_v63 = vmax.f32 %v5369_v22, 0.0  ;;  %v15593_v22 = vld [vmem:[%s20817_s21 + $0xe40] sm:$0xff]  ;;  %v15595_v41 = vld [vmem:[%s20817_s21 + $0xe50] sm:$0xff] }
0x1a6c   :  { %v19038_v21 = vpack.c.bf16 %v15620_v44, %v15619_v33  ;;  %v15643_v33 = vld [vmem:[%s20817_s21 + $0xfd0] sm:$0xff]  ;;  %v15644_v44 = vld [vmem:[%s20817_s21 + $0xfd8] sm:$0xff]  ;;  %v19018_v39 = vpack.c.bf16 %v15594_v15, %v15593_v22 }
0x1a6d   :  { %v15596_v42 = vld [vmem:[%s20817_s21 + $0xe58] sm:$0xff] }
0x1a6e   :  { %18967 = vmatpush3.bf16.msra.mxu1 %v18966_v37  ;;  %18999 = vmatpush3.bf16.msra.mxu0 %v18998_v61  ;;  %v15621_v37 = vld [vmem:[%s20817_s21 + $0xf20] sm:$0xff]  ;;  %v15622_v61 = vld [vmem:[%s20817_s21 + $0xf28] sm:$0xff] }
0x1a6f   :  { %19001 = vmatprep.subr.bf16.mxu1 %v19000_v17  ;;  %19033 = vmatprep.subr.bf16.mxu0 %v19032_v29  ;;  %v15607_v17 = vld [vmem:[%s20817_s21 + $0xeb0] sm:$0xff]  ;;  %v19042_v36 = vpack.c.bf16 %v15622_v61, %v15621_v37  ;;  %v15597_v37 = vld [vmem:[%s20817_s21 + $0xe60] sm:$0xff]  ;;  %v15598_v61 = vld [vmem:[%s20817_s21 + $0xe68] sm:$0xff] }
0x1a70   :  { %v15591_v29 = vld [vmem:[%s20817_s21 + $0xe30] sm:$0xff]  ;;  %v19012_v62 = vpack.c.bf16 %v15608_v32, %v15607_v17  ;;  %v19024_v17 = vpack.c.bf16 %v15614_v4, %v15613_v28 }
0x1a71   :  { %6007 = vmatmul.mubr.f32.vlgmr.msra.gmra.mrb[76].mxu1 %v5612_v6  ;;  %6082 = vmatmul.mubr.f32.vlgmr.msra.gmra.mrb[78].mxu0 %v5614_v24  ;;  %v19014_v6 = vpack.c.bf16 %v15592_v3, %v15591_v29  ;;  %v19046_v24 = vpack.c.bf16 %v15624_v48, %v15623_v14  ;;  %v15647_v29 = vld [vmem:[%s20817_s21 + $0xff0] sm:$0xff]  ;;  %v15648_v3 = vld [vmem:[%s20817_s21 + $0xff8] sm:$0xff]  ;;  %v19058_v14 = vpack.c.bf16 %v15630_v40, %v15629_v57 }
0x1a72   :  { %6011 = vmatprep.mubr.f32.mxu1 %v5629_v46  ;;  %6086 = vmatprep.mubr.f32.mxu0 %v5631_v9  ;;  %v15625_v46 = vld [vmem:[%s20817_s21 + $0xf40] sm:$0xff]  ;;  %v15626_v9 = vld [vmem:[%s20817_s21 + $0xf48] sm:$0xff]  ;;  %v15599_v48 = vld [vmem:[%s20817_s21 + $0xe70] sm:$0xff] }
0x1a73   :  { %19003 = vmatpush3.bf16.msra.mxu1 %v19002_v45  ;;  %19035 = vmatpush3.bf16.msra.mxu0 %v19034_v55  ;;  %v15609_v45 = vld [vmem:[%s20817_s21 + $0xec0] sm:$0xff]  ;;  %v15610_v55 = vld [vmem:[%s20817_s21 + $0xec8] sm:$0xff]  ;;  %v19050_v43 = vpack.c.bf16 %v15626_v9, %v15625_v46  ;;  %v5602_v46 = vadd.f32 %v21756_v7, %v21874_v60 }
0x1a74   :  { %19005 = vmatprep.subr.bf16.mxu1 %v19004_v26  ;;  %19037 = vmatprep.subr.bf16.mxu0 %v19036_v38  ;;  %v15641_v26 = vld [vmem:[%s20817_s21 + $0xfc0] sm:$0xff]  ;;  %v15642_v38 = vld [vmem:[%s20817_s21 + $0xfc8] sm:$0xff]  ;;  %v19016_v25 = vpack.c.bf16 %v15610_v55, %v15609_v45  ;;  %v4961_v45 = vrot.slane %v21764_v0, %v21068_v23 }
0x1a75   :  { %6012 = vmatmul.mubr.f32.gmra.mrb[78].mxu1 %v5628_v63  ;;  %6087 = vmatmul.mubr.f32.gmra.mrb[80].mxu0 %v5630_v51  ;;  %v19048_v27 = vpack.c.bf16 %v15642_v38, %v15641_v26  ;;  %v19020_v63 = vpack.c.bf16 %v15612_v12, %v15611_v30  ;;  %v19052_v51 = vpack.c.bf16 %v15644_v44, %v15643_v33  ;;  %v15600_v38 = vld [vmem:[%s20817_s21 + $0xe78] sm:$0xff]  ;;  %v5635_v44 = vmax.f32 %v5602_v46, 0.0  ;;  %v15666_v60 = vld [vmem:[%s21286_s17 + $0x1] ss:$0 sm:$0xff] }
0x1a76   :  { %6156 = vmatprep.mubr.f32.mxu1 %v5617_v5  ;;  %6231 = vmatprep.mubr.f32.mxu0 %v5619_v13  ;;  %v15645_v5 = vld [vmem:[%s20817_s21 + $0xfe0] sm:$0xff]  ;;  %v15646_v13 = vld [vmem:[%s20817_s21 + $0xfe8] sm:$0xff]  ;;  %v19060_v26 = vpack.c.bf16 %v15648_v3, %v15647_v29  ;;  %v19030_v22 = vpack.c.bf16 %v15600_v38, %v15599_v48  ;;  %v5600_v33 = vadd.f32 %v21747_v19, %v4961_v45 }
0x1a77   :  { %19007 = vmatpush3.bf16.msra.mxu1 %v19006_v20  ;;  %19039 = vmatpush3.bf16.msra.mxu0 %v19038_v21  ;;  %v15627_v20 = vld [vmem:[%s20817_s21 + $0xf50] sm:$0xff]  ;;  %v15628_v21 = vld [vmem:[%s20817_s21 + $0xf58] sm:$0xff]  ;;  %v19056_v32 = vpack.c.bf16 %v15646_v13, %v15645_v5 }
0x1a78   :  { %19009 = vmatprep.subr.bf16.mxu1 %v19008_v58  ;;  %19041 = vmatprep.subr.bf16.mxu0 %v19040_v56  ;;  %v19022_v58 = vpack.c.bf16 %v15596_v42, %v15595_v41  ;;  %v19054_v56 = vpack.c.bf16 %v15628_v21, %v15627_v20 }
0x1a7b   :  { %19011 = vmatpush3.bf16.msra.mxu1 %v19010_v35  ;;  %19043 = vmatpush3.bf16.msra.mxu0 %v19042_v36  ;;  %v15615_v35 = vld [vmem:[%s20817_s21 + $0xef0] sm:$0xff]  ;;  %v15616_v36 = vld [vmem:[%s20817_s21 + $0xef8] sm:$0xff] }
0x1a7c   :  { %19013 = vmatprep.subr.bf16.mxu1 %v19012_v62  ;;  %19045 = vmatprep.subr.bf16.mxu0 %v19044_v34  ;;  %v4953_v62 = vrot.slane %v21764_v0, %v21059_v11  ;;  %v19026_v34 = vpack.c.bf16 %v15598_v61, %v15597_v37  ;;  %v19028_v55 = vpack.c.bf16 %v15616_v36, %v15615_v35 }
0x1a7d   :  { %v5525_v0 = vadd.f32 %v21754_v16, %v21870_v2  ;;  %v5634_v16 = vmax.f32 %v5600_v33, 0.0 }
0x1a7e   :  { %v5523_v12 = vadd.f32 %v21745_v8, %v4953_v62 }
0x1a7f   :  { %19015 = vmatpush3.bf16.msra.mxu1 %v19014_v6  ;;  %19047 = vmatpush3.bf16.msra.mxu0 %v19046_v24  ;;  %v15631_v6 = vld [vmem:[%s20817_s21 + $0xf70] sm:$0xff]  ;;  %v15632_v24 = vld [vmem:[%s20817_s21 + $0xf78] sm:$0xff]  ;;  %s22120_s21 = sld [smem:[%s23629_s0 + %s20520_s19]]  }
0x1a80   :  { %19017 = vmatprep.subr.bf16.mxu1 %v19016_v25  ;;  %19049 = vmatprep.subr.bf16.mxu0 %v19048_v27  ;;  %v19062_v15 = vpack.c.bf16 %v15632_v24, %v15631_v6  ;;  %v5517_v25 = vadd.f32 %v21727_v54, %v4953_v62  ;;  %v5594_v27 = vadd.f32 %v21729_v1, %v4961_v45  ;;  %v5633_v54 = vmax.f32 %v5525_v0, 0.0  ;;  %s22227_s19 = sld [smem:[%s23629_s0 + %s20525_s13]]   ;;  %s20527_s13 = smov 31  }
0x1a81   :  { %v5632_v1 = vmax.f32 %v5523_v12, 0.0  ;;  %s22297_s29 = sld [smem:[%s23629_s0 + %s20527_s13]]   ;;  %s20531_s13 = smov 32  }
0x1a82   :  { %v5616_v9 = vmax.f32 %v5517_v25, 0.0  ;;  %v5618_v30 = vmax.f32 %v5594_v27, 0.0 }
0x1a83   :  { %19019 = vmatpush3.bf16.msra.mxu1 %v19018_v39  ;;  %19051 = vmatpush3.bf16.msra.mxu0 %v19050_v43 }
0x1a84   :  { %19021 = vmatprep.subr.bf16.mxu1 %v19020_v63  ;;  %19053 = vmatprep.subr.bf16.mxu0 %v19052_v51 }
0x1a87   :  { %19023 = vmatpush3.bf16.msra.mxu1 %v19022_v58  ;;  %19055 = vmatpush3.bf16.msra.mxu0 %v19054_v56 }
0x1a88   :  { %19025 = vmatprep.subr.bf16.mxu1 %v19024_v17  ;;  %19057 = vmatprep.subr.bf16.mxu0 %v19056_v32 }
0x1a8b   :  { %19027 = vmatpush3.bf16.msra.mxu1 %v19026_v34  ;;  %19059 = vmatpush3.bf16.msra.mxu0 %v19058_v14 }
0x1a8c   :  { %19029 = vmatprep.subr.bf16.mxu1 %v19028_v55  ;;  %19061 = vmatprep.subr.bf16.mxu0 %v19060_v26 }
0x1a8f   :  { %19031 = vmatpush3.bf16.msra.mxu1 %v19030_v22  ;;  %19063 = vmatpush3.bf16.msra.mxu0 %v19062_v15 }
0x1a92   :  { %6157 = vmatmul.mubr.f32.vlgmr.msra.gmra.mrb[80].mxu1 %v5616_v9  ;;  %6232 = vmatmul.mubr.f32.vlgmr.msra.gmra.mrb[82].mxu0 %v5618_v30 }
0x1a93   :  { %6161 = vmatprep.mubr.f32.mxu1 %v5633_v54  ;;  %6236 = vmatprep.mubr.f32.mxu0 %v5635_v44 }
0x1a96   :  { %6162 = vmatmul.mubr.f32.gmra.mrb[82].mxu1 %v5632_v1  ;;  %6237 = vmatmul.mubr.f32.gmra.mrb[84].mxu0 %v5634_v16 }
0x1b03   :  { %v16664_v7 = vpop.f32.mrb[68].mxu1  ;;  %v16702_v2 = vpop.f32.mrb[70].mxu0 }
0x1b04   :  { %v16665_v39 = vpop.f32.mrb[69].mxu1  ;;  %v16703_v43 = vpop.f32.mrb[71].mxu0 }
0x1b05   :  { %v16666_v41 = vadd.f32 %v16665_v39, %v16664_v7  ;;  %v16704_v42 = vadd.f32 %v16703_v43, %v16702_v2 }
0x1b07   :  { %v5709_v8 = vadd.f32 %v16666_v41, %v15666_v60  ;;  %v16667_v63 = vpop.f32.mrb[70].mxu1  ;;  %v16705_v19 = vpop.f32.mrb[72].mxu0 }
0x1b08   :  { %v16668_v51 = vpop.f32.mrb[71].mxu1  ;;  %v16706_v20 = vpop.f32.mrb[73].mxu0 }
0x1b09   :  { %v5784_v21 = vadd.f32 %v16704_v42, %v5709_v8  ;;  %v16669_v28 = vadd.f32 %v16668_v51, %v16667_v63  ;;  %v16707_v4 = vadd.f32 %v16706_v20, %v16705_v19 }
0x1b0b   :  { %v5714_v5 = vadd.f32 %v16669_v28, %v15666_v60 }
0x1b0d   :  { %v5789_v13 = vadd.f32 %v16707_v4, %v5714_v5 }
0x1b23   :  { %v16740_v58 = vpop.f32.mrb[72].mxu1  ;;  %v16778_v56 = vpop.f32.mrb[74].mxu0 }
0x1b24   :  { %v16741_v37 = vpop.f32.mrb[73].mxu1  ;;  %v16779_v61 = vpop.f32.mrb[75].mxu0 }
0x1b25   :  { %v16742_v17 = vadd.f32 %v16741_v37, %v16740_v58  ;;  %v16780_v32 = vadd.f32 %v16779_v61, %v16778_v56 }
0x1b27   :  { %v5859_v57 = vadd.f32 %v16742_v17, %v5784_v21  ;;  %v16743_v40 = vpop.f32.mrb[74].mxu1  ;;  %v16781_v35 = vpop.f32.mrb[76].mxu0 }
0x1b28   :  { %v16744_v36 = vpop.f32.mrb[75].mxu1  ;;  %v16782_v29 = vpop.f32.mrb[77].mxu0 }
0x1b29   :  { %v5934_v3 = vadd.f32 %v16780_v32, %v5859_v57  ;;  %v16745_v62 = vadd.f32 %v16744_v36, %v16743_v40  ;;  %v16783_v34 = vadd.f32 %v16782_v29, %v16781_v35  ;;  %v6291_v35 = vld [vmem:[%s21956_s23 + $0x8] sm:$0xff]  ;;  %v6292_v36 = vld [vmem:[%s21956_s23 + $0x10] sm:$0xff] }
0x1b2b   :  { %v5864_v14 = vadd.f32 %v16745_v62, %v5789_v13 }
0x1b2d   :  { %v5939_v48 = vadd.f32 %v16783_v34, %v5864_v14 }
0x1b44   :  { %v16816_v45 = vpop.f32.mrb[76].mxu1  ;;  %v16854_v55 = vpop.f32.mrb[78].mxu0 }
0x1b45   :  { %v16817_v26 = vpop.f32.mrb[77].mxu1  ;;  %v16855_v38 = vpop.f32.mrb[79].mxu0 }
0x1b46   :  { %v16818_v6 = vadd.f32 %v16817_v26, %v16816_v45  ;;  %v16856_v24 = vadd.f32 %v16855_v38, %v16854_v55 }
0x1b48   :  { %v6009_v22 = vadd.f32 %v16818_v6, %v5934_v3  ;;  %v16819_v15 = vpop.f32.mrb[78].mxu1  ;;  %v16857_v25 = vpop.f32.mrb[80].mxu0  ;;  %v6293_v3 = vld [vmem:[%s21956_s23 + $0x18] sm:$0xff]  ;;  %v15669_v6 = vld [vmem:[%s21302_s24 + $0x1] ss:$0 sm:$0xff]  ;;  %s20522_s24 = smov 21  }
0x1b49   :  { %v16820_v27 = vpop.f32.mrb[79].mxu1  ;;  %v16858_v0 = vpop.f32.mrb[81].mxu0  ;;  %v19068_v62 = vpack.c.bf16 %v6293_v3, %v6292_v36 }
0x1b4a   :  { %v6084_v46 = vadd.f32 %v16856_v24, %v6009_v22  ;;  %v16821_v9 = vadd.f32 %v16820_v27, %v16819_v15  ;;  %v16859_v30 = vadd.f32 %v16858_v0, %v16857_v25  ;;  %v15670_v22 = vld [vmem:[%s21307_s7 + $0x1] ss:$0 sm:$0xff]  ;;  %s22144_s7 = sld [smem:[%s23629_s0 + %s20522_s24]]  }
0x1b4b   :  { %s22168_s24 = sld [smem:[%s23629_s0 + %s20524_s8]]   ;;  %s20528_s8 = smov 29  }
0x1b4c   :  { %v6014_v12 = vadd.f32 %v16821_v9, %v5939_v48  ;;  %s22322_s6 = sld [smem:[%s23629_s0 + %s20528_s8]]   ;;  %s20532_s8 = smov 34  }
0x1b4e   :  { %v6089_v33 = vadd.f32 %v16859_v30, %v6014_v12  ;;  %v15671_v30 = vld [vmem:[%s21975_s28] ss:$0 sm:$0xff] }
0x1b65   :  { %v16892_v54 = vpop.f32.mrb[80].mxu1  ;;  %v16930_v44 = vpop.f32.mrb[82].mxu0 }
0x1b66   :  { %v16893_v1 = vpop.f32.mrb[81].mxu1  ;;  %v16931_v16 = vpop.f32.mrb[83].mxu0 }
0x1b67   :  { %v16894_v7 = vadd.f32 %v16893_v1, %v16892_v54  ;;  %v16932_v2 = vadd.f32 %v16931_v16, %v16930_v44 }
0x1b69   :  { %v6159_v60 = vadd.f32 %v16894_v7, %v6084_v46  ;;  %v16895_v39 = vpop.f32.mrb[82].mxu1  ;;  %v16933_v43 = vpop.f32.mrb[84].mxu0 }
0x1b6a   :  { %v16896_v41 = vpop.f32.mrb[83].mxu1  ;;  %v16934_v42 = vpop.f32.mrb[85].mxu0 }
0x1b6b   :  { %v6234_v8 = vadd.f32 %v16932_v2, %v6159_v60  ;;  %v16897_v63 = vadd.f32 %v16896_v41, %v16895_v39  ;;  %v16935_v19 = vadd.f32 %v16934_v42, %v16933_v43 }
0x1b6d   :  { %v6164_v51 = vadd.f32 %v16897_v63, %v6089_v33  ;;  %v6246_v20 = vadd.f32 %v6234_v8, %v21476_v18  ;;  %v21997_v8 = vld [vmem:[%s20607_s30] sm:$0xff] }
0x1b6f   :  { %v6239_v21 = vadd.f32 %v16935_v19, %v6164_v51  ;;  %v6248_v28 = vsel %vm279_vm1, %v6246_v20, 0.0  ;;  %v22002_v51 = vld [vmem:[%s20607_s30 + $0x8] sm:$0xff] }
0x1b70   :  { %6249 = vadd.xlane.f32.xlu0 %v6248_v28 }
0x1b71   :  { %v6247_v4 = vadd.f32 %v6239_v21, %v21491_v47  ;;  %v6290_v47 = vld [vmem:[%s21956_s23] sm:$0xff] }
0x1b72   :  { %v19064_v29 = vpack.c.bf16 %v6291_v35, %v6290_v47 }
0x1b73   :  { %v6251_v5 = vsel %vm279_vm1, %v6247_v4, 0.0 }
0x1b74   :  { %6252 = vadd.xlane.f32.xlu0 %v6251_v5  ;;  %19065 = vmatprep.subr.bf16.mxu1 %v19064_v29 }
0x1b75   :  { %19067 = vmatpush3.bf16.msra.mxu1 %v19064_v29 }
0x1b76   :  { %19069 = vmatprep.subr.bf16.mxu1 %v19068_v62 }
0x1b79   :  { %19071 = vmatpush3.bf16.msra.mxu1 %v19068_v62 }
0x1bfd   :  { %v6250_v13 = vpop.xlane.xlu0 %6249 }
0x1bfe   :  { %v6254_v58 = vmul.f32 0.03125, %v6250_v13 }
0x1c00   :  { %v6256_v56 = vsub.f32 %v6246_v20, %v6254_v58 }
0x1c01   :  { %v6253_v37 = vpop.xlane.xlu0 %6252 }
0x1c02   :  { %v6255_v61 = vmul.f32 0.03125, %v6253_v37  ;;  %v6258_v17 = vmul.f32 %v6256_v56, %v6256_v56 }
0x1c04   :  { %v6257_v32 = vsub.f32 %v6247_v4, %v6255_v61  ;;  %v6260_v57 = vsel %vm279_vm1, %v6258_v17, 0.0 }
0x1c05   :  { %6261 = vadd.xlane.f32.xlu0 %v6260_v57 }
0x1c06   :  { %v6259_v18 = vmul.f32 %v6257_v32, %v6257_v32 }
0x1c08   :  { %v6263_v40 = vsel %vm279_vm1, %v6259_v18, 0.0 }
0x1c09   :  { %6264 = vadd.xlane.f32.xlu0 %v6263_v40 }
0x1c92   :  { %v6262_v34 = vpop.xlane.xlu0 %6261 }
0x1c93   :  { %v6266_v14 = vmul.f32 0.03125, %v6262_v34 }
0x1c95   :  { %v6268_v48 = vadd.f32 1e-05, %v6266_v14 }
0x1c96   :  { %v6265_v45 = vpop.xlane.xlu0 %6264 }
0x1c97   :  { %20325 = vrsqrt.f32 %v6268_v48  ;;  %v6267_v55 = vmul.f32 0.03125, %v6265_v45 }
0x1c99   :  { %v6269_v26 = vadd.f32 1e-05, %v6267_v55 }
0x1c9b   :  { %20327 = vrsqrt.f32 %v6269_v26 }
0x1ca1   :  { %v20326_v38 = vpop.eup %20325 }
0x1ca2   :  { %v6272_v24 = vmul.f32 %v20326_v38, %v6256_v56 }
0x1ca4   :  { %v6280_v15 = vmul.f32 %v15669_v6, %v6272_v24 }
0x1ca5   :  { %v20328_v25 = vpop.eup %20327 }
0x1ca6   :  { %v6273_v27 = vmul.f32 %v20328_v25, %v6257_v32  ;;  %v21964_v0 = vadd.f32 %v15670_v22, %v6280_v15 }
0x1ca8   :  { %23649 = vst [vmem:[#allocation2_spill] sm:$0xff] %v21964_v0  ;;  %v6281_v46 = vmul.f32 %v15669_v6, %v6273_v27  ;;  %17951 = vmatprep.mubr.msk.f32.mxu1 %vm279_vm1, %v21964_v0 }
0x1caa   :  { %v21968_v9 = vadd.f32 %v15670_v22, %v6281_v46  ;;  %v6295_v46 = vld [vmem:[%s22039_s20] sm:$0xff] }
0x1cac   :  { %23650 = vst [vmem:[#allocation3_spill] sm:$0xff] %v21968_v9  ;;  %17952 = vmatmul.mubr.msk.f32.vlgmr.msra.gmra.mrb[84].mxu1 %vm279_vm1, %v21968_v9 }
0x1d7f   :  { %v17953_v12 = vpop.f32.mrb[84].mxu1 }
0x1d80   :  { %v21978_v33 = vadd.f32 %v17953_v12, %v15671_v30  ;;  %v6378_v54 = vpop.f32.mrb[85].mxu1 }
0x1d81   :  { %v21980_v44 = vadd.f32 %v15671_v30, %v6378_v54 }
0x1d83   :  { %17958 = vmatprep.mubr.msk.f32.mxu0 %vm367_vm2, %v21980_v44  ;;  %v21986_v1 = vpack.i.bf16 %v21978_v33, %v21980_v44 }
0x1d85   :  { %20100 = vrot.lane.b32.xlu0 %v21986_v1, %s20492_s26 }
0x1df7   :  { %v20101_v16 = vpop.permute.xlu0 %20100 }
0x1df8   :  { %v20103_v7 = vunpack.i.h.bf16 %v20101_v16  ;;  %v20102_v2 = vunpack.i.l.bf16 %v20101_v16 }
0x1dfa   :  { %v19072_v60 = vpack.c.bf16 %v20103_v7, %v20102_v2 }
0x1dfc   :  { %19074 = vmatprep.subr.msk.bf16.mxu0 %vm20594_vm3, %v19072_v60 }
0x1dfd   :  { %19077 = vmatpush3.bf16.xpose.msk.msra.mxu0 %vm20594_vm3, %v19072_v60 }
0x1dfe   :  { %17968 = vmatprep.subr.mxu0 %v6295_v46 }
0x1e04   :  { %17959 = vmatmul.mubr.msk.f32.vlgmr.msra.gmra.mrb[86].mxu0 %vm367_vm2, %v21978_v33 }
0x1e05   :  { %17969 = vmatpush3.msra.mxu0 %v6295_v46 }
0x1ed7   :  { %v17960_v39 = vpop.f32.mrb[86].mxu0 }
0x1ed8   :  { %v6467_v43 = vpop.f32.mrb[87].mxu0  ;;  %v6477_v41 = vmul.f32 0.35355338, %v17960_v39 }
0x1ed9   :  { %v6476_v42 = vmul.f32 0.35355338, %v6467_v43 }
0x1eda   :  { %v6479_v20 = vadd.f32 %v22002_v51, %v6477_v41 }
0x1edb   :  { %v6478_v63 = vadd.f32 %v21997_v8, %v6476_v42 }
0x1edc   :  { %v6483_v21 = vsel %vm175_vm0, %v6479_v20, -inf }
0x1edd   :  { %v6480_v19 = vsel %vm175_vm0, %v6478_v63, -inf }
0x1ede   :  { %6481 = vmax.xlane.f32.xlu1 %v6480_v19 }
0x1ee2   :  { %6484 = vmax.xlane.f32.xlu1 %v6483_v21 }
0x1ef3   :  { %20105 = vrot.lane.b32.xlu1 %v21986_v1, %s23643_s1  ;;  %s23652_s1 = smov 112  }
0x1ef7   :  { %20110 = vrot.lane.b32.xlu1 %v21986_v1, %s20495_s2 }
0x1efb   :  { %6678 = vrot.lane.b32.xlu1 %v21980_v44, %s20496_s3 }
0x1f6b   :  { %v6482_v28 = vpop.xlane.xlu1 %6481 }
0x1f6c   :  { %v6486_v4 = vsub.f32 %v6478_v63, %v6482_v28 }
0x1f6e   :  { %v6488_v5 = vmul.f32 1.442695, %v6486_v4 }
0x1f6f   :  { %v6485_v13 = vpop.xlane.xlu1 %6484 }
0x1f70   :  { %20329 = vpow2.f32 %v6488_v5  ;;  %v6487_v58 = vsub.f32 %v6479_v20, %v6485_v13 }
0x1f72   :  { %v6490_v56 = vmul.f32 1.442695, %v6487_v58 }
0x1f73   :  { %v20106_v37 = vpop.permute.xlu1 %20105 }
0x1f74   :  { %20331 = vpow2.f32 %v6490_v56  ;;  %v20108_v61 = vunpack.i.h.bf16 %v20106_v37  ;;  %v20107_v17 = vunpack.i.l.bf16 %v20106_v37 }
0x1f76   :  { %v19078_v32 = vpack.c.bf16 %v20108_v61, %v20107_v17 }
0x1f77   :  { %v20111_v57 = vpop.permute.xlu1 %20110 }
0x1f78   :  { %v20113_v18 = vunpack.i.h.bf16 %v20111_v57  ;;  %v20112_v40 = vunpack.i.l.bf16 %v20111_v57  ;;  %19079 = vmatprep.subr.bf16.mxu1 %v19078_v32 }
0x1f79   :  { %19081 = vmatpush3.bf16.msra.mxu1 %v19078_v32 }
0x1f7a   :  { %v20330_v47 = vpop.eup %20329  ;;  %v19082_v35 = vpack.c.bf16 %v20113_v18, %v20112_v40 }
0x1f7b   :  { %v6492_v36 = vsel %vm175_vm0, %v20330_v47, 0.0  ;;  %v6679_v62 = vpop.permute.xlu1 %6678 }
0x1f7c   :  { %6493 = vadd.xlane.f32.xlu1 %v6492_v36  ;;  %19084 = vmatprep.subr.msk.bf16.mxu1 %vm20594_vm3, %v19082_v35 }
0x1f7e   :  { %v20332_v29 = vpop.eup %20331 }
0x1f7f   :  { %v6495_v3 = vsel %vm175_vm0, %v20332_v29, 0.0 }
0x1f80   :  { %6496 = vadd.xlane.f32.xlu0 %v6495_v3 }
0x1f8d   :  { %6680 = vrot.lane.b32.xlu1 %v21978_v33, %s20496_s3 }
0x1f91   :  { %20115 = vrot.lane.b32.xlu1 %v21986_v1, %s20497_s4 }
0x1f95   :  { %6967 = vrot.lane.b32.xlu1 %v21978_v33, %s23644_s5 }
0x1f96   :  { %6965 = vrot.lane.b32.xlu0 %v21980_v44, %s23644_s5 }
0x2009   :  { %v6494_v34 = vpop.xlane.xlu1 %6493 }
0x200a   :  { %20333 = vrcp.f32 %v6494_v34 }
0x200d   :  { %v6497_v14 = vpop.xlane.xlu0 %6496  ;;  %v6681_v48 = vpop.permute.xlu1 %6680 }
0x200e   :  { %20335 = vrcp.f32 %v6497_v14 }
0x2011   :  { %v20116_v55 = vpop.permute.xlu1 %20115  ;;  %v6966_v25 = vpop.permute.xlu0 %6965 }
0x2012   :  { %v20118_v38 = vunpack.i.h.bf16 %v20116_v55  ;;  %v20117_v6 = vunpack.i.l.bf16 %v20116_v55 }
0x2014   :  { %v20334_v45 = vpop.eup %20333  ;;  %v19092_v15 = vpack.c.bf16 %v20118_v38, %v20117_v6 }
0x2015   :  { %v6499_v26 = vmul.f32 %v20334_v45, %v20330_v47  ;;  %v6968_v27 = vpop.permute.xlu1 %6967 }
0x2017   :  { %17965 = vmatprep.mubr.msk.f32.mxu1 %vm175_vm0, %v6499_v26 }
0x2018   :  { %v20336_v24 = vpop.eup %20335 }
0x2019   :  { %v6501_v22 = vmul.f32 %v20336_v24, %v20332_v29  ;;  %v6296_v24 = vld [vmem:[%s22039_s20 + $0x8] sm:$0xff] }
0x201b   :  { %17966 = vmatmul.mubr.msk.f32.vlgmr.msra.gmra.mrb[86].mxu1 %vm175_vm0, %v6501_v22 }
0x201c   :  { %19087 = vmatpush3.bf16.xpose.msk.msra.mxu1 %vm20594_vm3, %v19082_v35  ;;  %17977 = vmatprep.mubr.msk.f32.mxu1 %vm367_vm2, %v6679_v62 }
0x201d   :  { %19094 = vmatprep.subr.msk.bf16.mxu1 %vm20594_vm3, %v19092_v15 }
0x2023   :  { %17978 = vmatmul.mubr.msk.f32.vlgmr.msra.gmra.mrb[88].mxu1 %vm367_vm2, %v6681_v48 }
0x2024   :  { %19097 = vmatpush3.bf16.xpose.msk.msra.mxu1 %vm20594_vm3, %v19092_v15  ;;  %17996 = vmatprep.mubr.msk.f32.mxu1 %vm367_vm2, %v6966_v25 }
0x202b   :  { %17997 = vmatmul.mubr.msk.f32.vlgmr.msra.gmra.mrb[90].mxu1 %vm367_vm2, %v6968_v27 }
0x20ee   :  { %v17967_v30 = vpop.f32.mrb[86].mxu1 }
0x20ef   :  { %v6580_v12 = vpop.f32.mrb[87].mxu1 }
0x20f0   :  { %17970 = vmatprep.mubr.msk.f32.mxu0 %vm367_vm2, %v6580_v12 }
0x20f1   :  { %17971 = vmatmul.mubr.msk.f32.vlgmr.msra.gmra.mrb[88].mxu0 %vm367_vm2, %v17967_v30 }
0x20f6   :  { %v17979_v54 = vpop.f32.mrb[88].mxu1 }
0x20f7   :  { %v6770_v16 = vmul.f32 0.35355338, %v17979_v54  ;;  %v6760_v7 = vpop.f32.mrb[89].mxu1 }
0x20f8   :  { %v6769_v2 = vmul.f32 0.35355338, %v6760_v7 }
0x20f9   :  { %v6772_v60 = vadd.f32 %v22002_v51, %v6770_v16 }
0x20fa   :  { %v6771_v39 = vadd.f32 %v21997_v8, %v6769_v2 }
0x20fb   :  { %v6776_v43 = vsel %vm175_vm0, %v6772_v60, -inf }
0x20fc   :  { %6777 = vmax.xlane.f32.xlu0 %v6776_v43  ;;  %v6773_v41 = vsel %vm175_vm0, %v6771_v39, -inf }
0x20fd   :  { %6774 = vmax.xlane.f32.xlu1 %v6773_v41 }
0x20fe   :  { %v17998_v42 = vpop.f32.mrb[90].mxu1 }
0x20ff   :  { %v7047_v63 = vpop.f32.mrb[91].mxu1  ;;  %v7057_v34 = vmul.f32 0.35355338, %v17998_v42 }
0x2100   :  { %v7056_v19 = vmul.f32 0.35355338, %v7047_v63 }
0x2101   :  { %v7059_v14 = vadd.f32 %v22002_v51, %v7057_v34 }
0x2102   :  { %v7058_v20 = vadd.f32 %v21997_v8, %v7056_v19 }
0x2103   :  { %v7063_v48 = vsel %vm175_vm0, %v7059_v14, -inf }
0x2104   :  { %v7060_v21 = vsel %vm175_vm0, %v7058_v20, -inf }
0x2112   :  { %20125 = vrot.lane.b32.xlu0 %v21986_v1, %s23641_s11 }
0x2131   :  { %7061 = vmax.xlane.f32.xlu0 %v7060_v21 }
0x2189   :  { %v6778_v28 = vpop.xlane.xlu0 %6777 }
0x218a   :  { %v6780_v4 = vsub.f32 %v6772_v60, %v6778_v28  ;;  %v6775_v5 = vpop.xlane.xlu1 %6774 }
0x218b   :  { %v6779_v13 = vsub.f32 %v6771_v39, %v6775_v5 }
0x218c   :  { %v6783_v58 = vmul.f32 1.442695, %v6780_v4 }
0x218d   :  { %v6781_v56 = vmul.f32 1.442695, %v6779_v13  ;;  %v20126_v37 = vpop.permute.xlu0 %20125 }
0x218e   :  { %20337 = vpow2.f32 %v6783_v58  ;;  %v20128_v61 = vunpack.i.h.bf16 %v20126_v37  ;;  %v20127_v17 = vunpack.i.l.bf16 %v20126_v37 }
0x218f   :  { %20339 = vpow2.f32 %v6781_v56  ;;  %v6297_v56 = vld [vmem:[%s22039_s20 + $0x10] sm:$0xff] }
0x2190   :  { %v19102_v32 = vpack.c.bf16 %v20128_v61, %v20127_v17 }
0x2192   :  { %19104 = vmatprep.subr.msk.bf16.mxu1 %vm20594_vm3, %v19102_v32 }
0x2193   :  { %19107 = vmatpush3.bf16.xpose.msk.msra.mxu1 %vm20594_vm3, %v19102_v32 }
0x2198   :  { %v20338_v57 = vpop.eup %20337 }
0x2199   :  { %v6788_v18 = vsel %vm175_vm0, %v20338_v57, 0.0  ;;  %v20340_v40 = vpop.eup %20339 }
0x219a   :  { %6789 = vadd.xlane.f32.xlu1 %v6788_v18  ;;  %v6785_v47 = vsel %vm175_vm0, %v20340_v40, 0.0 }
0x219e   :  { %6786 = vadd.xlane.f32.xlu1 %v6785_v47 }
0x21af   :  { %20120 = vrot.lane.b32.xlu1 %v21986_v1, %s23635_s10  ;;  %s22327_s10 = sld [smem:[%s23629_s0 + %s20529_s25]]   ;;  %s23658_s25 = smov 40  }
0x21b3   :  { %7252 = vrot.lane.b32.xlu1 %v21980_v44, %s23639_s12 }
0x21b7   :  { %7254 = vrot.lane.b32.xlu1 %v21978_v33, %s23639_s12 }
0x21be   :  { %v7062_v35 = vpop.xlane.xlu0 %7061 }
0x21bf   :  { %v7066_v36 = vsub.f32 %v7058_v20, %v7062_v35 }
0x21c1   :  { %v7068_v29 = vmul.f32 1.442695, %v7066_v36 }
0x21c3   :  { %20341 = vpow2.f32 %v7068_v29 }
0x21cd   :  { %v20342_v3 = vpop.eup %20341 }
0x21ce   :  { %v7072_v62 = vsel %vm175_vm0, %v20342_v3, 0.0 }
0x21cf   :  { %7073 = vadd.xlane.f32.xlu0 %v7072_v62 }
0x21db   :  { %7064 = vmax.xlane.f32.xlu1 %v7063_v48 }
0x21ec   :  { %20130 = vrot.lane.b32.xlu1 %v21986_v1, %s23634_s14  ;;  %s20530_s14 = smov 33  }
0x21ed   :  { %s22381_s17 = sld [smem:[%s23629_s0 + %s20530_s14]]  }
0x21ee   :  { %s22824_s14 = sld [smem:[%s23629_s0 + %s20532_s8]]   ;;  %s20533_s8 = smov 35  }
0x21f0   :  { %20135 = vrot.lane.b32.xlu1 %v21986_v1, %s23633_s15  ;;  %s22503_s15 = sld [smem:[%s23629_s0 + %s20531_s13]]   ;;  %s23657_s13 = smov 48  }
0x2227   :  { %v6790_v33 = vpop.xlane.xlu1 %6789 }
0x2228   :  { %20343 = vrcp.f32 %v6790_v33 }
0x222b   :  { %v6787_v44 = vpop.xlane.xlu1 %6786 }
0x222c   :  { %20345 = vrcp.f32 %v6787_v44 }
0x222f   :  { %v20121_v45 = vpop.permute.xlu1 %20120 }
0x2230   :  { %v20123_v55 = vunpack.i.h.bf16 %v20121_v45  ;;  %v20122_v26 = vunpack.i.l.bf16 %v20121_v45 }
0x2232   :  { %v19088_v38 = vpack.c.bf16 %v20123_v55, %v20122_v26  ;;  %v20344_v22 = vpop.eup %20343  ;;  %v6298_v26 = vld [vmem:[%s22039_s20 + $0x18] sm:$0xff] }
0x2233   :  { %v7253_v6 = vpop.permute.xlu1 %7252  ;;  %v6794_v1 = vmul.f32 %v20344_v22, %v20338_v57 }
0x2234   :  { %19089 = vmatprep.subr.bf16.mxu0 %v19088_v38  ;;  %18015 = vmatprep.mubr.msk.f32.mxu1 %vm367_vm2, %v7253_v6 }
0x2235   :  { %19091 = vmatpush3.bf16.msra.mxu0 %v19088_v38 }
0x2236   :  { %v20346_v15 = vpop.eup %20345  ;;  %17987 = vmatprep.subr.mxu0 %v6296_v24 }
0x2237   :  { %v7255_v25 = vpop.permute.xlu1 %7254  ;;  %v6792_v27 = vmul.f32 %v20346_v15, %v20340_v40 }
0x2238   :  { %18016 = vmatmul.mubr.msk.f32.vlgmr.msra.gmra.mrb[92].mxu1 %vm367_vm2, %v7255_v25 }
0x2239   :  { %17984 = vmatprep.mubr.msk.f32.mxu0 %vm175_vm0, %v6792_v27  ;;  %v7590_v27 = vld [vmem:[%s22096_s27] sm:$0xff] }
0x223a   :  { %17985 = vmatmul.mubr.msk.f32.vlgmr.msra.gmra.mrb[90].mxu0 %vm175_vm0, %v6794_v1  ;;  %v7591_v1 = vld [vmem:[%s22096_s27 + $0x8] sm:$0xff] }
0x223b   :  { %17988 = vmatpush3.msra.mxu0 %v6296_v24 }
0x225c   :  { %v7074_v43 = vpop.xlane.xlu0 %7073 }
0x2268   :  { %v7065_v46 = vpop.xlane.xlu1 %7064 }
0x2269   :  { %v7067_v30 = vsub.f32 %v7059_v14, %v7065_v46  ;;  %v19120_v46 = vpack.c.bf16 %v7591_v1, %v7590_v27 }
0x226b   :  { %v7070_v12 = vmul.f32 1.442695, %v7067_v30  ;;  %v7592_v30 = vld [vmem:[%s22096_s27 + $0x10] sm:$0xff] }
0x226c   :  { %v20131_v54 = vpop.permute.xlu1 %20130 }
0x226d   :  { %20347 = vpow2.f32 %v7070_v12  ;;  %v20133_v16 = vunpack.i.h.bf16 %v20131_v54  ;;  %v20132_v7 = vunpack.i.l.bf16 %v20131_v54  ;;  %v7593_v12 = vld [vmem:[%s22096_s27 + $0x18] sm:$0xff] }
0x226e   :  { %20349 = vrcp.f32 %v7074_v43  ;;  %v7587_v43 = vld [vmem:[%s22111_s9 + $0x10] sm:$0xff] }
0x226f   :  { %v19098_v2 = vpack.c.bf16 %v20133_v16, %v20132_v7  ;;  %v19124_v7 = vpack.c.bf16 %v7593_v12, %v7592_v30 }
0x2270   :  { %v20136_v20 = vpop.permute.xlu1 %20135 }
0x2271   :  { %19099 = vmatprep.subr.bf16.mxu0 %v19098_v2  ;;  %v20138_v37 = vunpack.i.h.bf16 %v20136_v20  ;;  %v20137_v61 = vunpack.i.l.bf16 %v20136_v20 }
0x2273   :  { %v19108_v40 = vpack.c.bf16 %v20138_v37, %v20137_v61 }
0x2277   :  { %v20348_v60 = vpop.eup %20347 }
0x2278   :  { %v7075_v39 = vsel %vm175_vm0, %v20348_v60, 0.0  ;;  %v20350_v63 = vpop.eup %20349 }
0x2279   :  { %7076 = vadd.xlane.f32.xlu0 %v7075_v39  ;;  %v7079_v13 = vmul.f32 %v20350_v63, %v20342_v3  ;;  %v15682_v63 = vld [vmem:[%s22120_s21] ss:$0 sm:$0xff] }
0x2306   :  { %v7077_v41 = vpop.xlane.xlu0 %7076 }
0x2307   :  { %20351 = vrcp.f32 %v7077_v41  ;;  %v7588_v41 = vld [vmem:[%s22111_s9 + $0x18] sm:$0xff] }
0x230b   :  { %v18017_v42 = vpop.f32.mrb[92].mxu1 }
0x230c   :  { %v7334_v19 = vpop.f32.mrb[93].mxu1  ;;  %v7344_v21 = vmul.f32 0.35355338, %v18017_v42  ;;  %v19116_v42 = vpack.c.bf16 %v7588_v41, %v7587_v43 }
0x230d   :  { %v7343_v28 = vmul.f32 0.35355338, %v7334_v19  ;;  %v17986_v4 = vpop.f32.mrb[90].mxu0 }
0x230e   :  { %v6873_v5 = vpop.f32.mrb[91].mxu0  ;;  %v7346_v57 = vadd.f32 %v22002_v51, %v7344_v21 }
0x230f   :  { %17989 = vmatprep.mubr.msk.f32.mxu0 %vm367_vm2, %v6873_v5  ;;  %v7345_v58 = vadd.f32 %v21997_v8, %v7343_v28 }
0x2310   :  { %17990 = vmatmul.mubr.msk.f32.vlgmr.msra.gmra.mrb[88].mxu0 %vm367_vm2, %v17986_v4  ;;  %v7350_v47 = vsel %vm175_vm0, %v7346_v57, -inf }
0x2311   :  { %v20352_v17 = vpop.eup %20351  ;;  %19101 = vmatpush3.bf16.msra.mxu0 %v19098_v2  ;;  %18003 = vmatprep.mubr.msk.f32.mxu0 %vm175_vm0, %v7079_v13  ;;  %v7347_v32 = vsel %vm175_vm0, %v7345_v58, -inf  ;;  %v7585_v2 = vld [vmem:[%s22111_s9] sm:$0xff] }
0x2312   :  { %7348 = vmax.xlane.f32.xlu0 %v7347_v32  ;;  %18006 = vmatprep.subr.mxu0 %v6297_v56  ;;  %v7081_v18 = vmul.f32 %v20352_v17, %v20348_v60  ;;  %v7586_v60 = vld [vmem:[%s22111_s9 + $0x8] sm:$0xff] }
0x2313   :  { %v19112_v39 = vpack.c.bf16 %v7586_v60, %v7585_v2  ;;  %v15709_v60 = vld [vmem:[%s22168_s24] ss:$0 sm:$0xff] }
0x2314   :  { %18004 = vmatmul.mubr.msk.f32.vlgmr.msra.gmra.mrb[92].mxu0 %vm175_vm0, %v7081_v18 }
0x2315   :  { %18007 = vmatpush3.msra.mxu0 %v6297_v56  ;;  %19113 = vmatprep.subr.bf16.mxu1 %v19112_v39 }
0x2316   :  { %19109 = vmatprep.subr.bf16.mxu0 %v19108_v40  ;;  %7351 = vmax.xlane.f32.xlu0 %v7350_v47 }
0x2317   :  { %19115 = vmatpush3.bf16.msra.mxu1 %v19112_v39 }
0x2318   :  { %19117 = vmatprep.subr.bf16.mxu1 %v19116_v42 }
0x231b   :  { %19119 = vmatpush3.bf16.msra.mxu1 %v19116_v42 }
0x239f   :  { %v7349_v35 = vpop.xlane.xlu0 %7348 }
0x23a0   :  { %v7353_v36 = vsub.f32 %v7345_v58, %v7349_v35  ;;  %v15712_v58 = vld [vmem:[%s22126_s22] ss:$0 sm:$0xff] }
0x23a2   :  { %v7355_v29 = vmul.f32 1.442695, %v7353_v36 }
0x23a3   :  { %v7352_v3 = vpop.xlane.xlu0 %7351 }
0x23a4   :  { %20353 = vpow2.f32 %v7355_v29  ;;  %v7354_v62 = vsub.f32 %v7346_v57, %v7352_v3 }
0x23a6   :  { %v7357_v34 = vmul.f32 1.442695, %v7354_v62 }
0x23a8   :  { %20355 = vpow2.f32 %v7357_v34 }
0x23ae   :  { %v20354_v14 = vpop.eup %20353 }
0x23af   :  { %v7359_v48 = vsel %vm175_vm0, %v20354_v14, 0.0 }
0x23b0   :  { %7360 = vadd.xlane.f32.xlu0 %v7359_v48 }
0x23b2   :  { %v20356_v33 = vpop.eup %20355 }
0x23b3   :  { %v7362_v44 = vsel %vm175_vm0, %v20356_v33, 0.0 }
0x23b4   :  { %7363 = vadd.xlane.f32.xlu0 %v7362_v44 }
0x23e7   :  { %v18005_v45 = vpop.f32.mrb[92].mxu0 }
0x23e8   :  { %v7160_v55 = vpop.f32.mrb[93].mxu0 }
0x23e9   :  { %18008 = vmatprep.mubr.msk.f32.mxu0 %vm367_vm2, %v7160_v55 }
0x23ea   :  { %18009 = vmatmul.mubr.msk.f32.vlgmr.msra.gmra.mrb[88].mxu0 %vm367_vm2, %v18005_v45 }
0x23eb   :  { %19111 = vmatpush3.bf16.msra.mxu0 %v19108_v40 }
0x23ec   :  { %18025 = vmatprep.subr.mxu0 %v6298_v26 }
0x243d   :  { %v7361_v38 = vpop.xlane.xlu0 %7360 }
0x243e   :  { %20357 = vrcp.f32 %v7361_v38 }
0x2441   :  { %v7364_v6 = vpop.xlane.xlu0 %7363 }
0x2442   :  { %20359 = vrcp.f32 %v7364_v6 }
0x2448   :  { %v20358_v24 = vpop.eup %20357 }
0x2449   :  { %v7366_v22 = vmul.f32 %v20358_v24, %v20354_v14  ;;  %v15707_v24 = vld [vmem:[%s22144_s7] ss:$0 sm:$0xff] }
0x244b   :  { %18022 = vmatprep.mubr.msk.f32.mxu0 %vm175_vm0, %v7366_v22 }
0x244c   :  { %v20360_v15 = vpop.eup %20359 }
0x244d   :  { %v7368_v25 = vmul.f32 %v20360_v15, %v20356_v33  ;;  %v15708_v15 = vld [vmem:[%s22149_s16] ss:$0 sm:$0xff] }
0x244f   :  { %18023 = vmatmul.mubr.msk.f32.vlgmr.msra.gmra.mrb[94].mxu0 %vm175_vm0, %v7368_v25 }
0x2450   :  { %18026 = vmatpush3.msra.mxu0 %v6298_v26 }
0x2451   :  { %19121 = vmatprep.subr.bf16.mxu0 %v19120_v46 }
0x2522   :  { %v18024_v54 = vpop.f32.mrb[94].mxu0 }
0x2523   :  { %v7447_v16 = vpop.f32.mrb[95].mxu0 }
0x2524   :  { %18027 = vmatprep.mubr.msk.f32.mxu0 %vm367_vm2, %v7447_v16 }
0x2525   :  { %18028 = vmatmul.mubr.msk.f32.vlgmr.msra.gmra.mrb[88].mxu0 %vm367_vm2, %v18024_v54 }
0x2526   :  { %19123 = vmatpush3.bf16.msra.mxu0 %v19120_v46  ;;  %18049 = vmatprep.mubr.msk.f32.mxu0 %vm279_vm1, %v21964_v0 }
0x2527   :  { %19125 = vmatprep.subr.bf16.mxu0 %v19124_v7 }
0x252a   :  { %19127 = vmatpush3.bf16.msra.mxu0 %v19124_v7 }
0x252d   :  { %18050 = vmatmul.mubr.msk.f32.vlgmr.msra.gmra.mrb[96].mxu0 %vm279_vm1, %v21968_v9 }
0x25f8   :  { %v18029_v19 = vpop.f32.mrb[88].mxu0 }
0x25f9   :  { %v19924_v20 = vadd.f32 %v18029_v19, %v15682_v63  ;;  %v7528_v21 = vpop.f32.mrb[89].mxu0 }
0x25fa   :  { %v19925_v28 = vadd.f32 %v15682_v63, %v7528_v21 }
0x25fb   :  { %v7542_v4 = vadd.f32 %v19924_v20, %v21968_v9  ;;  %v9208_v9 = vld [vmem:[%s22381_s17 + $0x590] sm:$0xff] }
0x25fc   :  { %v7541_v5 = vadd.f32 %v19925_v28, %v21964_v0  ;;  %v9209_v0 = vld [vmem:[%s22381_s17 + $0x598] sm:$0xff] }
0x25fd   :  { %v7546_v13 = vsel %vm279_vm1, %v7542_v4, 0.0 }
0x25fe   :  { %7547 = vadd.xlane.f32.xlu1 %v7546_v13  ;;  %v7543_v56 = vsel %vm279_vm1, %v7541_v5, 0.0 }
0x25ff   :  { %7544 = vadd.xlane.f32.xlu0 %v7543_v56 }
0x2600   :  { %v18051_v37 = vpop.f32.mrb[96].mxu0 }
0x2601   :  { %v7765_v61 = vadd.f32 %v18051_v37, %v15712_v58  ;;  %v7759_v17 = vpop.f32.mrb[97].mxu0 }
0x2602   :  { %v7760_v32 = vadd.f32 %v15712_v58, %v7759_v17 }
0x2604   :  { %v19128_v57 = vpack.c.bf16 %v7765_v61, %v7760_v32  ;;  %v22133_v18 = vpack.i.bf16 %v7765_v61, %v7760_v32 }
0x2606   :  { %19130 = vmatprep.subr.msk.bf16.mxu1 %vm20594_vm3, %v19128_v57 }
0x268b   :  { %v7548_v40 = vpop.xlane.xlu1 %7547 }
0x268c   :  { %v7550_v47 = vmul.f32 0.03125, %v7548_v40  ;;  %v7545_v35 = vpop.xlane.xlu0 %7544 }
0x268d   :  { %v7549_v36 = vmul.f32 0.03125, %v7545_v35 }
0x268e   :  { %v7552_v29 = vsub.f32 %v7542_v4, %v7550_v47 }
0x268f   :  { %v7551_v3 = vsub.f32 %v7541_v5, %v7549_v36 }
0x2690   :  { %v7554_v14 = vmul.f32 %v7552_v29, %v7552_v29 }
0x2691   :  { %v7553_v62 = vmul.f32 %v7551_v3, %v7551_v3 }
0x2692   :  { %v7558_v48 = vsel %vm279_vm1, %v7554_v14, 0.0 }
0x2693   :  { %v7555_v34 = vsel %vm279_vm1, %v7553_v62, 0.0 }
0x2694   :  { %7556 = vadd.xlane.f32.xlu0 %v7555_v34 }
0x2698   :  { %7559 = vadd.xlane.f32.xlu0 %v7558_v48 }
0x26ae   :  { %20140 = vrot.lane.b32.xlu0 %v22133_v18, %s20496_s3 }
0x2721   :  { %v7557_v33 = vpop.xlane.xlu0 %7556 }
0x2722   :  { %v7561_v44 = vmul.f32 0.03125, %v7557_v33 }
0x2724   :  { %v7563_v45 = vadd.f32 1e-05, %v7561_v44 }
0x2725   :  { %v7560_v55 = vpop.xlane.xlu0 %7559 }
0x2726   :  { %20361 = vrsqrt.f32 %v7563_v45  ;;  %v7562_v26 = vmul.f32 0.03125, %v7560_v55 }
0x2728   :  { %v7564_v38 = vadd.f32 1e-05, %v7562_v26 }
0x2729   :  { %v20141_v1 = vpop.permute.xlu0 %20140 }
0x272a   :  { %20363 = vrsqrt.f32 %v7564_v38  ;;  %v20143_v12 = vunpack.i.h.bf16 %v20141_v1  ;;  %v20142_v54 = vunpack.i.l.bf16 %v20141_v1 }
0x272c   :  { %v19138_v2 = vpack.c.bf16 %v20143_v12, %v20142_v54 }
0x2730   :  { %v20362_v6 = vpop.eup %20361 }
0x2731   :  { %v7567_v22 = vmul.f32 %v20362_v6, %v7551_v3 }
0x2733   :  { %v7575_v25 = vmul.f32 %v15707_v24, %v7567_v22 }
0x2734   :  { %v20364_v27 = vpop.eup %20363 }
0x2735   :  { %v7568_v46 = vmul.f32 %v20364_v27, %v7552_v29  ;;  %v22153_v30 = vadd.f32 %v15708_v15, %v7575_v25 }
0x2737   :  { %v7576_v16 = vmul.f32 %v15707_v24, %v7568_v46  ;;  %18038 = vmatprep.mubr.msk.f32.mxu1 %vm279_vm1, %v22153_v30 }
0x2739   :  { %v22157_v7 = vadd.f32 %v15708_v15, %v7576_v16 }
0x273b   :  { %18039 = vmatmul.mubr.msk.f32.vlgmr.msra.gmra.mrb[94].mxu1 %vm279_vm1, %v22157_v7 }
0x273c   :  { %19133 = vmatpush3.bf16.xpose.msk.msra.mxu1 %vm20594_vm3, %v19128_v57 }
0x273d   :  { %19140 = vmatprep.subr.msk.bf16.mxu1 %vm20594_vm3, %v19138_v2 }
0x280e   :  { %v18040_v39 = vpop.f32.mrb[94].mxu1 }
0x280f   :  { %v7678_v43 = vpop.f32.mrb[95].mxu1  ;;  %v22173_v42 = vadd.f32 %v18040_v39, %v15709_v60 }
0x2810   :  { %v22171_v41 = vadd.f32 %v15709_v60, %v7678_v43 }
0x2812   :  { %8057 = vrot.lane.b32.xlu0 %v22171_v41, %s20496_s3  ;;  %18056 = vmatprep.mubr.msk.f32.mxu1 %vm367_vm2, %v22171_v41 }
0x2813   :  { %18057 = vmatmul.mubr.msk.f32.vlgmr.msra.gmra.mrb[96].mxu1 %vm367_vm2, %v22173_v42 }
0x2814   :  { %19143 = vmatpush3.bf16.xpose.msk.msra.mxu1 %vm20594_vm3, %v19138_v2 }
0x2816   :  { %8059 = vrot.lane.b32.xlu0 %v22173_v42, %s20496_s3 }
0x2884   :  { %v8058_v63 = vpop.permute.xlu0 %8057 }
0x2885   :  { %18075 = vmatprep.mubr.msk.f32.mxu1 %vm367_vm2, %v8058_v63 }
0x2888   :  { %v8060_v19 = vpop.permute.xlu0 %8059 }
0x2889   :  { %18076 = vmatmul.mubr.msk.f32.vlgmr.msra.gmra.mrb[98].mxu1 %vm367_vm2, %v8060_v19 }
0x28e6   :  { %v18058_v20 = vpop.f32.mrb[96].mxu1 }
0x28e7   :  { %v7856_v21 = vmul.f32 0.35355338, %v18058_v20  ;;  %v7846_v28 = vpop.f32.mrb[97].mxu1 }
0x28e8   :  { %v7855_v4 = vmul.f32 0.35355338, %v7846_v28 }
0x28e9   :  { %v7858_v5 = vadd.f32 %v22002_v51, %v7856_v21 }
0x28ea   :  { %v7857_v13 = vadd.f32 %v21997_v8, %v7855_v4 }
0x28eb   :  { %v7862_v58 = vsel %vm175_vm0, %v7858_v5, -inf }
0x28ec   :  { %7863 = vmax.xlane.f32.xlu0 %v7862_v58  ;;  %v7859_v56 = vsel %vm175_vm0, %v7857_v13, -inf }
0x28ed   :  { %7860 = vmax.xlane.f32.xlu1 %v7859_v56 }
0x2902   :  { %8346 = vrot.lane.b32.xlu0 %v22173_v42, %s23644_s5 }
0x295c   :  { %v18077_v37 = vpop.f32.mrb[98].mxu1 }
0x295d   :  { %v8149_v61 = vmul.f32 0.35355338, %v18077_v37  ;;  %v8139_v17 = vpop.f32.mrb[99].mxu1 }
0x295e   :  { %v8148_v33 = vmul.f32 0.35355338, %v8139_v17  ;;  %v7595_v17 = vld [vmem:[%s22227_s19] sm:$0xff] }
0x295f   :  { %v8151_v32 = vadd.f32 %v22002_v51, %v8149_v61 }
0x2960   :  { %v8150_v44 = vadd.f32 %v21997_v8, %v8148_v33 }
0x2961   :  { %v8155_v57 = vsel %vm175_vm0, %v8151_v32, -inf }
0x2962   :  { %8156 = vmax.xlane.f32.xlu0 %v8155_v57  ;;  %v8152_v45 = vsel %vm175_vm0, %v8150_v44, -inf }
0x2978   :  { %20160 = vrot.lane.b32.xlu0 %v22133_v18, %s23639_s12 }
0x2979   :  { %v7864_v40 = vpop.xlane.xlu0 %7863 }
0x297a   :  { %v7866_v47 = vsub.f32 %v7858_v5, %v7864_v40  ;;  %v7861_v35 = vpop.xlane.xlu1 %7860 }
0x297b   :  { %v7865_v36 = vsub.f32 %v7857_v13, %v7861_v35 }
0x297c   :  { %v7869_v29 = vmul.f32 1.442695, %v7866_v47 }
0x297d   :  { %v7867_v3 = vmul.f32 1.442695, %v7865_v36  ;;  %v8347_v55 = vpop.permute.xlu0 %8346 }
0x297e   :  { %20365 = vpow2.f32 %v7869_v29 }
0x297f   :  { %20367 = vpow2.f32 %v7867_v3 }
0x2988   :  { %v20366_v62 = vpop.eup %20365 }
0x2989   :  { %v7874_v34 = vsel %vm175_vm0, %v20366_v62, 0.0  ;;  %v20368_v14 = vpop.eup %20367 }
0x298a   :  { %7875 = vadd.xlane.f32.xlu1 %v7874_v34  ;;  %v7871_v48 = vsel %vm175_vm0, %v20368_v14, 0.0 }
0x298e   :  { %7872 = vadd.xlane.f32.xlu1 %v7871_v48 }
0x299f   :  { %20145 = vrot.lane.b32.xlu1 %v22133_v18, %s20492_s26 }
0x29a3   :  { %20150 = vrot.lane.b32.xlu1 %v22133_v18, %s23644_s5 }
0x29a7   :  { %8344 = vrot.lane.b32.xlu1 %v22171_v41, %s23644_s5 }
0x29cb   :  { %8153 = vmax.xlane.f32.xlu1 %v8152_v45 }
0x29ef   :  { %v8157_v26 = vpop.xlane.xlu0 %8156 }
0x29f0   :  { %v8159_v38 = vsub.f32 %v8151_v32, %v8157_v26 }
0x29f2   :  { %v8162_v6 = vmul.f32 1.442695, %v8159_v38 }
0x29f3   :  { %v20161_v12 = vpop.permute.xlu0 %20160 }
0x29f4   :  { %20369 = vpow2.f32 %v8162_v6  ;;  %v20163_v2 = vunpack.i.h.bf16 %v20161_v12  ;;  %v20162_v60 = vunpack.i.l.bf16 %v20161_v12 }
0x29f6   :  { %v19158_v4 = vpack.c.bf16 %v20163_v2, %v20162_v60 }
0x29fe   :  { %v22207_v24 = vpop.eup %20369 }
0x29ff   :  { %v8167_v22 = vsel %vm175_vm0, %v22207_v24, 0.0 }
0x2a00   :  { %8168 = vadd.xlane.f32.xlu1 %v8167_v22 }
0x2a17   :  { %v7876_v15 = vpop.xlane.xlu1 %7875 }
0x2a18   :  { %20371 = vrcp.f32 %v7876_v15  ;;  %v7596_v15 = vld [vmem:[%s22227_s19 + $0x8] sm:$0xff] }
0x2a1b   :  { %v7873_v25 = vpop.xlane.xlu1 %7872 }
0x2a1c   :  { %20373 = vrcp.f32 %v7873_v25 }
0x2a1f   :  { %v20146_v27 = vpop.permute.xlu1 %20145 }
0x2a20   :  { %v20148_v1 = vunpack.i.h.bf16 %v20146_v27  ;;  %v20147_v46 = vunpack.i.l.bf16 %v20146_v27 }
0x2a22   :  { %v19134_v54 = vpack.c.bf16 %v20148_v1, %v20147_v46  ;;  %v20372_v63 = vpop.eup %20371 }
0x2a23   :  { %v20151_v16 = vpop.permute.xlu1 %20150  ;;  %v7880_v5 = vmul.f32 %v20372_v63, %v20366_v62 }
0x2a24   :  { %v20153_v39 = vunpack.i.h.bf16 %v20151_v16  ;;  %v20152_v43 = vunpack.i.l.bf16 %v20151_v16  ;;  %19135 = vmatprep.subr.bf16.mxu0 %v19134_v54 }
0x2a25   :  { %19137 = vmatpush3.bf16.msra.mxu0 %v19134_v54 }
0x2a26   :  { %v20374_v19 = vpop.eup %20373  ;;  %v19148_v20 = vpack.c.bf16 %v20153_v39, %v20152_v43  ;;  %18066 = vmatprep.subr.mxu0 %v7595_v17 }
0x2a27   :  { %v8345_v21 = vpop.permute.xlu1 %8344  ;;  %v7878_v28 = vmul.f32 %v20374_v19, %v20368_v14 }
0x2a28   :  { %19150 = vmatprep.subr.msk.bf16.mxu1 %vm20594_vm3, %v19148_v20  ;;  %18094 = vmatprep.mubr.msk.f32.mxu1 %vm367_vm2, %v8345_v21 }
0x2a29   :  { %18063 = vmatprep.mubr.msk.f32.mxu0 %vm175_vm0, %v7878_v28  ;;  %19153 = vmatpush3.bf16.xpose.msk.msra.mxu1 %vm20594_vm3, %v19148_v20 }
0x2a2a   :  { %18064 = vmatmul.mubr.msk.f32.vlgmr.msra.gmra.mrb[98].mxu0 %vm175_vm0, %v7880_v5  ;;  %19160 = vmatprep.subr.msk.bf16.mxu1 %vm20594_vm3, %v19158_v4 }
0x2a2b   :  { %18067 = vmatpush3.msra.mxu0 %v7595_v17 }
0x2a30   :  { %18095 = vmatmul.mubr.msk.f32.vlgmr.msra.gmra.mrb[100].mxu1 %vm367_vm2, %v8347_v55  ;;  %v23651_v55 = vmov 0.0  }
0x2a31   :  { %19163 = vmatpush3.bf16.xpose.msk.msra.mxu1 %vm20594_vm3, %v19158_v4 }
0x2a58   :  { %v8154_v13 = vpop.xlane.xlu1 %8153 }
0x2a59   :  { %v8158_v58 = vsub.f32 %v8150_v44, %v8154_v13 }
0x2a5b   :  { %v8160_v56 = vmul.f32 1.442695, %v8158_v58 }
0x2a5d   :  { %20375 = vpow2.f32 %v8160_v56 }
0x2a67   :  { %v20376_v37 = vpop.eup %20375 }
0x2a68   :  { %v8164_v61 = vsel %vm175_vm0, %v20376_v37, 0.0 }
0x2a69   :  { %8165 = vadd.xlane.f32.xlu1 %v8164_v61 }
0x2a7a   :  { %20155 = vrot.lane.b32.xlu1 %v22133_v18, %s20495_s2 }
0x2a7e   :  { %8631 = vrot.lane.b32.xlu1 %v22171_v41, %s23639_s12 }
0x2a82   :  { %8633 = vrot.lane.b32.xlu1 %v22173_v42, %s23639_s12  ;;  %s22840_s12 = sld [smem:[%s23629_s0 + %s20533_s8]]   ;;  %s23656_s8 = smov 56  }
0x2a8d   :  { %v8169_v32 = vpop.xlane.xlu1 %8168 }
0x2a8e   :  { %20377 = vrcp.f32 %v8169_v32 }
0x2a98   :  { %v20378_v41 = vpop.eup %20377 }
0x2a99   :  { %v8173_v48 = vmul.f32 %v20378_v41, %v22207_v24 }
0x2af6   :  { %v8166_v57 = vpop.xlane.xlu1 %8165 }
0x2af7   :  { %20379 = vrcp.f32 %v8166_v57 }
0x2afa   :  { %v20156_v40 = vpop.permute.xlu1 %20155 }
0x2afb   :  { %v20158_v47 = vunpack.i.h.bf16 %v20156_v40  ;;  %v20157_v35 = vunpack.i.l.bf16 %v20156_v40 }
0x2afd   :  { %v19144_v36 = vpack.c.bf16 %v20158_v47, %v20157_v35  ;;  %v18065_v29 = vpop.f32.mrb[98].mxu0 }
0x2afe   :  { %v7959_v3 = vpop.f32.mrb[99].mxu0  ;;  %v8632_v62 = vpop.permute.xlu1 %8631 }
0x2aff   :  { %18068 = vmatprep.mubr.msk.f32.mxu0 %vm367_vm2, %v7959_v3  ;;  %19145 = vmatprep.subr.bf16.mxu0 %v19144_v36 }
0x2b00   :  { %18113 = vmatprep.mubr.msk.f32.mxu1 %vm367_vm2, %v8632_v62  ;;  %18069 = vmatmul.mubr.msk.f32.vlgmr.msra.gmra.mrb[100].mxu0 %vm367_vm2, %v18065_v29 }
0x2b01   :  { %v20380_v42 = vpop.eup %20379  ;;  %19147 = vmatpush3.bf16.msra.mxu0 %v19144_v36 }
0x2b02   :  { %v8634_v34 = vpop.permute.xlu1 %8633  ;;  %v8171_v14 = vmul.f32 %v20380_v42, %v20376_v37  ;;  %18085 = vmatprep.subr.mxu0 %v7596_v15 }
0x2b03   :  { %v18096_v33 = vpop.f32.mrb[100].mxu1  ;;  %18114 = vmatmul.mubr.msk.f32.vlgmr.msra.gmra.mrb[102].mxu1 %vm367_vm2, %v8634_v34 }
0x2b04   :  { %v8436_v44 = vmul.f32 0.35355338, %v18096_v33  ;;  %18082 = vmatprep.mubr.msk.f32.mxu0 %vm175_vm0, %v8171_v14  ;;  %v8426_v45 = vpop.f32.mrb[101].mxu1  ;;  %9439 = vmatprep.mubr.f32.mxu1 %v23651_v55  ;;  %v7597_v33 = vld [vmem:[%s22227_s19 + $0x10] sm:$0xff] }
0x2b05   :  { %v8435_v26 = vmul.f32 0.35355338, %v8426_v45  ;;  %18083 = vmatmul.mubr.msk.f32.vlgmr.msra.gmra.mrb[102].mxu0 %vm175_vm0, %v8173_v48 }
0x2b06   :  { %v8438_v38 = vadd.f32 %v22002_v51, %v8436_v44  ;;  %18086 = vmatpush3.msra.mxu0 %v7596_v15 }
0x2b07   :  { %v8437_v6 = vadd.f32 %v21997_v8, %v8435_v26 }
0x2b08   :  { %v8442_v22 = vsel %vm175_vm0, %v8438_v38, -inf }
0x2b09   :  { %8443 = vmax.xlane.f32.xlu0 %v8442_v22  ;;  %v8439_v24 = vsel %vm175_vm0, %v8437_v6, -inf }
0x2b0a   :  { %8440 = vmax.xlane.f32.xlu1 %v8439_v24 }
0x2b96   :  { %v8444_v25 = vpop.xlane.xlu0 %8443 }
0x2b97   :  { %v8446_v27 = vsub.f32 %v8438_v38, %v8444_v25  ;;  %v8441_v1 = vpop.xlane.xlu1 %8440  ;;  %v7598_v25 = vld [vmem:[%s22227_s19 + $0x18] sm:$0xff] }
0x2b98   :  { %v8445_v46 = vsub.f32 %v8437_v6, %v8441_v1 }
0x2b99   :  { %v8449_v12 = vmul.f32 1.442695, %v8446_v27 }
0x2b9a   :  { %v8447_v54 = vmul.f32 1.442695, %v8445_v46 }
0x2b9b   :  { %20381 = vpow2.f32 %v8449_v12 }
0x2b9c   :  { %20383 = vpow2.f32 %v8447_v54 }
0x2ba5   :  { %v20382_v16 = vpop.eup %20381 }
0x2ba6   :  { %v20384_v2 = vpop.eup %20383  ;;  %v8454_v60 = vsel %vm175_vm0, %v20382_v16, 0.0 }
0x2ba7   :  { %8455 = vadd.xlane.f32.xlu1 %v8454_v60  ;;  %v8451_v39 = vsel %vm175_vm0, %v20384_v2, 0.0 }
0x2ba8   :  { %8452 = vadd.xlane.f32.xlu0 %v8451_v39 }
0x2bbe   :  { %20165 = vrot.lane.b32.xlu0 %v22133_v18, %s20497_s4 }
0x2bd6   :  { %v18115_v43 = vpop.f32.mrb[102].mxu1 }
0x2bd7   :  { %v8713_v63 = vpop.f32.mrb[103].mxu1  ;;  %v8723_v19 = vmul.f32 0.35355338, %v18115_v43 }
0x2bd8   :  { %v8722_v20 = vmul.f32 0.35355338, %v8713_v63  ;;  %v18084_v21 = vpop.f32.mrb[102].mxu0 }
0x2bd9   :  { %v8252_v28 = vpop.f32.mrb[103].mxu0  ;;  %v8725_v5 = vadd.f32 %v22002_v51, %v8723_v19 }
0x2bda   :  { %v8724_v4 = vadd.f32 %v21997_v8, %v8722_v20  ;;  %18087 = vmatprep.mubr.msk.f32.mxu0 %vm367_vm2, %v8252_v28 }
0x2bdb   :  { %18088 = vmatmul.mubr.msk.f32.vlgmr.msra.gmra.mrb[100].mxu0 %vm367_vm2, %v18084_v21  ;;  %v8729_v58 = vsel %vm175_vm0, %v8725_v5, -inf }
0x2bdc   :  { %v8726_v13 = vsel %vm175_vm0, %v8724_v4, -inf }
0x2bdd   :  { %8727 = vmax.xlane.f32.xlu1 %v8726_v13 }
0x2be1   :  { %8730 = vmax.xlane.f32.xlu1 %v8729_v58 }
0x2c34   :  { %v8456_v56 = vpop.xlane.xlu1 %8455 }
0x2c35   :  { %20385 = vrcp.f32 %v8456_v56  ;;  %v8453_v37 = vpop.xlane.xlu0 %8452 }
0x2c36   :  { %20387 = vrcp.f32 %v8453_v37 }
0x2c39   :  { %v20166_v61 = vpop.permute.xlu0 %20165 }
0x2c3a   :  { %v20168_v17 = vunpack.i.h.bf16 %v20166_v61  ;;  %v20167_v32 = vunpack.i.l.bf16 %v20166_v61 }
0x2c3c   :  { %v19154_v8 = vpack.c.bf16 %v20168_v17, %v20167_v32  ;;  %v8965_v17 = vld [vmem:[%s22297_s29 + $0x8] sm:$0xff] }
0x2c3d   :  { %v8981_v32 = vld [vmem:[%s22297_s29 + $0x88] sm:$0xff] }
0x2c3e   :  { %19155 = vmatprep.subr.bf16.mxu0 %v19154_v8 }
0x2c3f   :  { %v20386_v57 = vpop.eup %20385  ;;  %19157 = vmatpush3.bf16.msra.mxu0 %v19154_v8  ;;  %v8967_v8 = vld [vmem:[%s22297_s29 + $0x18] sm:$0xff] }
0x2c40   :  { %v20388_v40 = vpop.eup %20387  ;;  %v8460_v51 = vmul.f32 %v20386_v57, %v20382_v16  ;;  %18104 = vmatprep.subr.mxu0 %v7597_v33  ;;  %v15723_v16 = vld [vmem:[%s22277_s18] ss:$0 sm:$0xff]  ;;  %v19168_v57 = vpack.c.bf16 %v8981_v32, %v8965_v17 }
0x2c41   :  { %v8458_v47 = vmul.f32 %v20388_v40, %v20384_v2  ;;  %v8983_v40 = vld [vmem:[%s22297_s29 + $0x98] sm:$0xff] }
0x2c42   :  { %19169 = vmatprep.subr.bf16.mxu1 %v19168_v57 }
0x2c43   :  { %18101 = vmatprep.mubr.msk.f32.mxu0 %vm175_vm0, %v8458_v47  ;;  %v8964_v47 = vld [vmem:[%s22297_s29] sm:$0xff] }
0x2c44   :  { %18102 = vmatmul.mubr.msk.f32.vlgmr.msra.gmra.mrb[104].mxu0 %vm175_vm0, %v8460_v51  ;;  %v8980_v51 = vld [vmem:[%s22297_s29 + $0x80] sm:$0xff] }
0x2c45   :  { %18105 = vmatpush3.msra.mxu0 %v7597_v33  ;;  %v8996_v33 = vld [vmem:[%s22297_s29 + $0x100] sm:$0xff] }
0x2c6a   :  { %v8728_v35 = vpop.xlane.xlu1 %8727 }
0x2c6b   :  { %v8732_v36 = vsub.f32 %v8724_v4, %v8728_v35  ;;  %v19176_v35 = vpack.c.bf16 %v8983_v40, %v8967_v8  ;;  %v9016_v40 = vld [vmem:[%s22297_s29 + $0x1a0] sm:$0xff] }
0x2c6d   :  { %v8734_v62 = vmul.f32 1.442695, %v8732_v36  ;;  %v19170_v36 = vpack.c.bf16 %v8980_v51, %v8964_v47  ;;  %v9002_v47 = vld [vmem:[%s22297_s29 + $0x130] sm:$0xff] }
0x2c6e   :  { %v8731_v29 = vpop.xlane.xlu1 %8730  ;;  %v9018_v51 = vld [vmem:[%s22297_s29 + $0x1b0] sm:$0xff] }
0x2c6f   :  { %v8733_v3 = vsub.f32 %v8725_v5, %v8731_v29  ;;  %v8966_v29 = vld [vmem:[%s22297_s29 + $0x10] sm:$0xff]  ;;  %19171 = vmatpush1.bf16.msra.mxu1 %v19170_v36 }
0x2c71   :  { %v8736_v41 = vmul.f32 1.442695, %v8733_v3  ;;  %v8982_v3 = vld [vmem:[%s22297_s29 + $0x90] sm:$0xff] }
0x2c73   :  { %20389 = vpow2.f32 %v8736_v41  ;;  %v8997_v41 = vld [vmem:[%s22297_s29 + $0x108] sm:$0xff] }
0x2c74   :  { %20391 = vpow2.f32 %v8734_v62  ;;  %v19178_v62 = vpack.c.bf16 %v8982_v3, %v8966_v29  ;;  %v8973_v29 = vld [vmem:[%s22297_s29 + $0x48] sm:$0xff] }
0x2c7d   :  { %v20390_v42 = vpop.eup %20389 }
0x2c7e   :  { %v8741_v34 = vsel %vm175_vm0, %v20390_v42, 0.0  ;;  %v20392_v14 = vpop.eup %20391 }
0x2c7f   :  { %8742 = vadd.xlane.f32.xlu1 %v8741_v34  ;;  %v8738_v48 = vsel %vm175_vm0, %v20392_v14, 0.0  ;;  %v8999_v34 = vld [vmem:[%s22297_s29 + $0x118] sm:$0xff] }
0x2c83   :  { %8739 = vadd.xlane.f32.xlu1 %v8738_v48  ;;  %v9015_v48 = vld [vmem:[%s22297_s29 + $0x198] sm:$0xff] }
0x2c94   :  { %20170 = vrot.lane.b32.xlu1 %v22133_v18, %s23641_s11  ;;  %s23654_s11 = smov 72  }
0x2d0c   :  { %v8743_v44 = vpop.xlane.xlu1 %8742 }
0x2d0d   :  { %20393 = vrcp.f32 %v8743_v44  ;;  %v9012_v44 = vld [vmem:[%s22297_s29 + $0x180] sm:$0xff] }
0x2d10   :  { %v8740_v45 = vpop.xlane.xlu1 %8739 }
0x2d11   :  { %20395 = vrcp.f32 %v8740_v45  ;;  %v19180_v45 = vpack.c.bf16 %v9015_v48, %v8999_v34  ;;  %v19198_v34 = vpack.c.bf16 %v9018_v51, %v9002_v47  ;;  %v9026_v47 = vld [vmem:[%s22297_s29 + $0x1f0] sm:$0xff] }
0x2d14   :  { %v20171_v26 = vpop.permute.xlu1 %20170 }
0x2d15   :  { %v20173_v38 = vunpack.i.h.bf16 %v20171_v26  ;;  %v20172_v6 = vunpack.i.l.bf16 %v20171_v26  ;;  %v19174_v26 = vpack.c.bf16 %v9012_v44, %v8996_v33  ;;  %v8988_v33 = vld [vmem:[%s22297_s29 + $0xc0] sm:$0xff]  ;;  %v8974_v44 = vld [vmem:[%s22297_s29 + $0x50] sm:$0xff] }
0x2d17   :  { %v19164_v22 = vpack.c.bf16 %v20173_v38, %v20172_v6  ;;  %v18103_v24 = vpop.f32.mrb[104].mxu0  ;;  %v20394_v27 = vpop.eup %20393  ;;  %v8998_v38 = vld [vmem:[%s22297_s29 + $0x110] sm:$0xff] }
0x2d18   :  { %v8539_v15 = vpop.f32.mrb[105].mxu0  ;;  %v8747_v46 = vmul.f32 %v20394_v27, %v20390_v42  ;;  %v9013_v42 = vld [vmem:[%s22297_s29 + $0x188] sm:$0xff]  ;;  %v9014_v6 = vld [vmem:[%s22297_s29 + $0x190] sm:$0xff] }
0x2d19   :  { %18106 = vmatprep.mubr.msk.f32.mxu0 %vm367_vm2, %v8539_v15  ;;  %19165 = vmatprep.subr.bf16.mxu0 %v19164_v22  ;;  %v8985_v15 = vld [vmem:[%s22297_s29 + $0xa8] sm:$0xff] }
0x2d1a   :  { %18107 = vmatmul.mubr.msk.f32.vlgmr.msra.gmra.mrb[100].mxu0 %vm367_vm2, %v18103_v24  ;;  %v8969_v24 = vld [vmem:[%s22297_s29 + $0x28] sm:$0xff] }
0x2d1b   :  { %v20396_v18 = vpop.eup %20395  ;;  %19167 = vmatpush3.bf16.msra.mxu0 %v19164_v22  ;;  %v19182_v22 = vpack.c.bf16 %v9014_v6, %v8998_v38  ;;  %v19184_v27 = vpack.c.bf16 %v8985_v15, %v8969_v24  ;;  %v9005_v6 = vld [vmem:[%s22297_s29 + $0x148] sm:$0xff]  ;;  %v9007_v24 = vld [vmem:[%s22297_s29 + $0x158] sm:$0xff] }
0x2d1c   :  { %v8745_v1 = vmul.f32 %v20396_v18, %v20392_v14  ;;  %18123 = vmatprep.subr.mxu0 %v7598_v25  ;;  %v19172_v14 = vpack.c.bf16 %v9013_v42, %v8997_v41  ;;  %v8987_v18 = vld [vmem:[%s22297_s29 + $0xb8] sm:$0xff] }
0x2d1d   :  { %v8975_v41 = vld [vmem:[%s22297_s29 + $0x58] sm:$0xff] }
0x2d1e   :  { %18120 = vmatprep.mubr.msk.f32.mxu0 %vm175_vm0, %v8745_v1  ;;  %19173 = vmatprep.subr.bf16.mxu1 %v19172_v14  ;;  %v8972_v14 = vld [vmem:[%s22297_s29 + $0x40] sm:$0xff]  ;;  %v9023_v15 = vld [vmem:[%s22297_s29 + $0x1d8] sm:$0xff] }
0x2d1f   :  { %18121 = vmatmul.mubr.msk.f32.vlgmr.msra.gmra.mrb[106].mxu0 %vm175_vm0, %v8747_v46  ;;  %19175 = vmatpush1.bf16.msra.mxu1 %v19174_v26 }
0x2d20   :  { %18124 = vmatpush3.msra.mxu0 %v7598_v25  ;;  %v8971_v25 = vld [vmem:[%s22297_s29 + $0x38] sm:$0xff]  ;;  %19185 = vmatprep.subr.bf16.mxu1 %v19184_v27 }
0x2d21   :  { %19177 = vmatprep.subr.bf16.mxu0 %v19176_v35  ;;  %v19192_v1 = vpack.c.bf16 %v8987_v18, %v8971_v25  ;;  %v19202_v25 = vpack.c.bf16 %v8988_v33, %v8972_v14  ;;  %v9004_v18 = vld [vmem:[%s22297_s29 + $0x140] sm:$0xff] }
0x2df2   :  { %v18122_v12 = vpop.f32.mrb[106].mxu0 }
0x2df3   :  { %v8826_v54 = vpop.f32.mrb[107].mxu0 }
0x2df4   :  { %18125 = vmatprep.mubr.msk.f32.mxu0 %vm367_vm2, %v8826_v54 }
0x2df5   :  { %18126 = vmatmul.mubr.msk.f32.vlgmr.msra.gmra.mrb[100].mxu0 %vm367_vm2, %v18122_v12 }
0x2df6   :  { %9516 = vmatprep.mubr.f32.mxu0 %v23651_v55  ;;  %19179 = vmatpush1.bf16.msra.mxu0 %v19178_v62  ;;  %v8989_v62 = vld [vmem:[%s22297_s29 + $0xc8] sm:$0xff] }
0x2df7   :  { %19181 = vmatprep.subr.bf16.mxu0 %v19180_v45  ;;  %v8990_v45 = vld [vmem:[%s22297_s29 + $0xd0] sm:$0xff]  ;;  %v19200_v26 = vpack.c.bf16 %v8989_v62, %v8973_v29  ;;  %v9047_v29 = vld [vmem:[%s22381_s17 + $0x88] sm:$0xff] }
0x2df8   :  { %v19210_v27 = vpack.c.bf16 %v8990_v45, %v8974_v44  ;;  %v9079_v62 = vld [vmem:[%s22381_s17 + $0x188] sm:$0xff]  ;;  %v9062_v44 = vld [vmem:[%s22381_s17 + $0x100] sm:$0xff] }
0x2df9   :  { %v9063_v45 = vld [vmem:[%s22381_s17 + $0x108] sm:$0xff] }
0x2dfa   :  { %19183 = vmatpush1.bf16.msra.mxu0 %v19182_v22  ;;  %v9021_v22 = vld [vmem:[%s22297_s29 + $0x1c8] sm:$0xff] }
0x2dfb   :  { %19193 = vmatprep.subr.bf16.mxu0 %v19192_v1  ;;  %v9020_v1 = vld [vmem:[%s22297_s29 + $0x1c0] sm:$0xff] }
0x2ec8   :  { %v18127_v2 = vpop.f32.mrb[100].mxu0 }
0x2ec9   :  { %v19926_v60 = vadd.f32 %v18127_v2, %v15723_v16  ;;  %v8907_v39 = vpop.f32.mrb[101].mxu0 }
0x2eca   :  { %v19927_v43 = vadd.f32 %v15723_v16, %v8907_v39 }
0x2ecb   :  { %v8921_v63 = vadd.f32 %v19926_v60, %v22157_v7 }
0x2ecc   :  { %v8920_v19 = vadd.f32 %v19927_v43, %v22153_v30  ;;  %v15748_v43 = vld [vmem:[%s22322_s6] ss:$0 sm:$0xff] }
0x2ecd   :  { %v8925_v20 = vsel %vm279_vm1, %v8921_v63, 0.0 }
0x2ece   :  { %8926 = vadd.xlane.f32.xlu1 %v8925_v20  ;;  %v8922_v21 = vsel %vm279_vm1, %v8920_v19, 0.0  ;;  %v8984_v20 = vld [vmem:[%s22297_s29 + $0xa0] sm:$0xff] }
0x2ecf   :  { %8923 = vadd.xlane.f32.xlu0 %v8922_v21  ;;  %v8970_v21 = vld [vmem:[%s22297_s29 + $0x30] sm:$0xff] }
0x2f5b   :  { %v8927_v28 = vpop.xlane.xlu1 %8926 }
0x2f5c   :  { %v8929_v4 = vmul.f32 0.03125, %v8927_v28  ;;  %v8924_v5 = vpop.xlane.xlu0 %8923  ;;  %v8986_v28 = vld [vmem:[%s22297_s29 + $0xb0] sm:$0xff] }
0x2f5d   :  { %v8928_v13 = vmul.f32 0.03125, %v8924_v5  ;;  %v9001_v5 = vld [vmem:[%s22297_s29 + $0x128] sm:$0xff]  ;;  %v19194_v32 = vpack.c.bf16 %v8986_v28, %v8970_v21  ;;  %v8992_v21 = vld [vmem:[%s22297_s29 + $0xe0] sm:$0xff]  ;;  %v8978_v28 = vld [vmem:[%s22297_s29 + $0x70] sm:$0xff] }
0x2f5e   :  { %v22284_v58 = vsub.f32 %v8921_v63, %v8929_v4  ;;  %v8968_v63 = vld [vmem:[%s22297_s29 + $0x20] sm:$0xff] }
0x2f5f   :  { %v22286_v56 = vsub.f32 %v8920_v19, %v8928_v13  ;;  %v15749_v4 = vld [vmem:[%s22327_s10] ss:$0 sm:$0xff]  ;;  %v19186_v17 = vpack.c.bf16 %v8984_v20, %v8968_v63  ;;  %v19206_v63 = vpack.c.bf16 %v9020_v1, %v9004_v18 }
0x2f60   :  { %v8933_v30 = vmul.f32 %v22284_v58, %v22284_v58  ;;  %v8976_v20 = vld [vmem:[%s22297_s29 + $0x60] sm:$0xff] }
0x2f61   :  { %v8932_v37 = vmul.f32 %v22286_v56, %v22286_v56 }
0x2f62   :  { %v8937_v61 = vsel %vm279_vm1, %v8933_v30, 0.0  ;;  %v9019_v30 = vld [vmem:[%s22297_s29 + $0x1b8] sm:$0xff] }
0x2f63   :  { %v8934_v7 = vsel %vm279_vm1, %v8932_v37, 0.0  ;;  %v9017_v37 = vld [vmem:[%s22297_s29 + $0x1a8] sm:$0xff] }
0x2f64   :  { %8935 = vadd.xlane.f32.xlu0 %v8934_v7  ;;  %v9003_v7 = vld [vmem:[%s22297_s29 + $0x138] sm:$0xff]  ;;  %v19188_v35 = vpack.c.bf16 %v9017_v37, %v9001_v5  ;;  %v9009_v37 = vld [vmem:[%s22297_s29 + $0x168] sm:$0xff] }
0x2f65   :  { %v19196_v36 = vpack.c.bf16 %v9019_v30, %v9003_v7  ;;  %v9025_v7 = vld [vmem:[%s22297_s29 + $0x1e8] sm:$0xff]  ;;  %v9011_v30 = vld [vmem:[%s22297_s29 + $0x178] sm:$0xff] }
0x2f66   :  { %v19220_v51 = vpack.c.bf16 %v9025_v7, %v9009_v37  ;;  %v9084_v37 = vld [vmem:[%s22381_s17 + $0x1b0] sm:$0xff]  ;;  %v9085_v7 = vld [vmem:[%s22381_s17 + $0x1b8] sm:$0xff] }
0x2f68   :  { %8938 = vadd.xlane.f32.xlu0 %v8937_v61 }
0x2ff1   :  { %v8936_v46 = vpop.xlane.xlu0 %8935 }
0x2ff2   :  { %v8940_v12 = vmul.f32 0.03125, %v8936_v46  ;;  %v9006_v46 = vld [vmem:[%s22297_s29 + $0x150] sm:$0xff] }
0x2ff4   :  { %v8942_v54 = vadd.f32 1e-05, %v8940_v12  ;;  %v9022_v12 = vld [vmem:[%s22297_s29 + $0x1d0] sm:$0xff] }
0x2ff5   :  { %v8939_v16 = vpop.xlane.xlu0 %8938 }
0x2ff6   :  { %20397 = vrsqrt.f32 %v8942_v54  ;;  %v8941_v2 = vmul.f32 0.03125, %v8939_v16  ;;  %v19204_v54 = vpack.c.bf16 %v9021_v22, %v9005_v6  ;;  %v19212_v16 = vpack.c.bf16 %v9023_v15, %v9007_v24  ;;  %v9080_v6 = vld [vmem:[%s22381_s17 + $0x190] sm:$0xff]  ;;  %v9081_v22 = vld [vmem:[%s22381_s17 + $0x198] sm:$0xff] }
0x2ff7   :  { %v19266_v15 = vpack.c.bf16 %v9063_v45, %v9062_v44  ;;  %v19268_v1 = vpack.c.bf16 %v9081_v22, %v9080_v6  ;;  %v9056_v44 = vld [vmem:[%s22381_s17 + $0xd0] sm:$0xff]  ;;  %v9057_v45 = vld [vmem:[%s22381_s17 + $0xd8] sm:$0xff] }
0x2ff8   :  { %v8943_v60 = vadd.f32 1e-05, %v8941_v2  ;;  %v8977_v2 = vld [vmem:[%s22297_s29 + $0x68] sm:$0xff] }
0x2ffa   :  { %20399 = vrsqrt.f32 %v8943_v60  ;;  %v8993_v60 = vld [vmem:[%s22297_s29 + $0xe8] sm:$0xff] }
0x2ffb   :  { %v19216_v5 = vpack.c.bf16 %v8993_v60, %v8977_v2  ;;  %v9082_v2 = vld [vmem:[%s22381_s17 + $0x1a0] sm:$0xff]  ;;  %v9083_v60 = vld [vmem:[%s22381_s17 + $0x1a8] sm:$0xff] }
0x3000   :  { %v20398_v39 = vpop.eup %20397 }
0x3001   :  { %v8946_v19 = vmul.f32 %v20398_v39, %v22286_v56  ;;  %v9000_v56 = vld [vmem:[%s22297_s29 + $0x120] sm:$0xff]  ;;  %v8979_v39 = vld [vmem:[%s22297_s29 + $0x78] sm:$0xff] }
0x3002   :  { %v19190_v42 = vpack.c.bf16 %v9016_v40, %v9000_v56  ;;  %v9008_v56 = vld [vmem:[%s22297_s29 + $0x160] sm:$0xff]  ;;  %v9010_v40 = vld [vmem:[%s22297_s29 + $0x170] sm:$0xff] }
0x3003   :  { %v8954_v13 = vmul.f32 %v15748_v43, %v8946_v19  ;;  %v19214_v19 = vpack.c.bf16 %v9022_v12, %v9006_v46  ;;  %v9064_v46 = vld [vmem:[%s22381_s17 + $0x110] sm:$0xff]  ;;  %v9065_v12 = vld [vmem:[%s22381_s17 + $0x118] sm:$0xff] }
0x3004   :  { %v20400_v61 = vpop.eup %20399 }
0x3005   :  { %v22341_v8 = vadd.f32 %v15749_v4, %v8954_v13  ;;  %v8947_v57 = vmul.f32 %v20400_v61, %v22284_v58  ;;  %v8991_v58 = vld [vmem:[%s22297_s29 + $0xd8] sm:$0xff] }
0x3006   :  { %v19208_v38 = vpack.c.bf16 %v8991_v58, %v8975_v41  ;;  %v9027_v61 = vld [vmem:[%s22297_s29 + $0x1f8] sm:$0xff]  ;;  %v19230_v58 = vpack.c.bf16 %v9026_v47, %v9010_v40  ;;  %v9068_v40 = vld [vmem:[%s22381_s17 + $0x130] sm:$0xff] }
0x3007   :  { %v8955_v3 = vmul.f32 %v15748_v43, %v8947_v57  ;;  %15750 = vmatmul.mubr.msk.f32.vlgmr.msra.gmra.mrb[104].mxu1 %vm279_vm1, %v22341_v8  ;;  %15752 = vmatmul.mubr.msk.f32.vlgmr.msra.gmra.mrb[108].mxu0 %vm279_vm1, %v22341_v8  ;;  %v8995_v43 = vld [vmem:[%s22297_s29 + $0xf8] sm:$0xff]  ;;  %v9024_v57 = vld [vmem:[%s22297_s29 + $0x1e0] sm:$0xff] }
0x3008   :  { %19187 = vmatpush1.bf16.msra.mxu1 %v19186_v17  ;;  %19195 = vmatpush1.bf16.msra.mxu0 %v19194_v32  ;;  %v19224_v13 = vpack.c.bf16 %v8995_v43, %v8979_v39  ;;  %v19218_v17 = vpack.c.bf16 %v8992_v21, %v8976_v20  ;;  %v19222_v41 = vpack.c.bf16 %v9024_v57, %v9008_v56  ;;  %v9069_v47 = vld [vmem:[%s22381_s17 + $0x138] sm:$0xff] }
0x3009   :  { %v22356_v48 = vadd.f32 %v15749_v4, %v8955_v3  ;;  %9445 = vmatprep.mubr.f32.mxu1 %v23651_v55  ;;  %9522 = vmatprep.mubr.f32.mxu0 %v23651_v55  ;;  %v8994_v4 = vld [vmem:[%s22297_s29 + $0xf0] sm:$0xff]  ;;  %v9078_v3 = vld [vmem:[%s22381_s17 + $0x180] sm:$0xff]  ;;  %v19270_v43 = vpack.c.bf16 %v9065_v12, %v9064_v46  ;;  %v19272_v21 = vpack.c.bf16 %v9083_v60, %v9082_v2  ;;  %v9059_v12 = vld [vmem:[%s22381_s17 + $0xe8] sm:$0xff] }
0x300a   :  { %19189 = vmatprep.subr.bf16.mxu1 %v19188_v35  ;;  %19197 = vmatprep.subr.bf16.mxu0 %v19196_v36  ;;  %v19226_v32 = vpack.c.bf16 %v8994_v4, %v8978_v28  ;;  %v19228_v35 = vpack.c.bf16 %v9027_v61, %v9011_v30  ;;  %v9046_v36 = vld [vmem:[%s22381_s17 + $0x80] sm:$0xff]  ;;  %v19264_v33 = vpack.c.bf16 %v9079_v62, %v9078_v3  ;;  %v9067_v4 = vld [vmem:[%s22381_s17 + $0x128] sm:$0xff] }
0x300b   :  { %15751 = vmatmul.mubr.msk.f32.gmra.mrb[106].mxu1 %vm279_vm1, %v22356_v48  ;;  %15753 = vmatmul.mubr.msk.f32.gmra.mrb[110].mxu0 %vm279_vm1, %v22356_v48  ;;  %v19232_v14 = vpack.c.bf16 %v9047_v29, %v9046_v36  ;;  %v9066_v28 = vld [vmem:[%s22381_s17 + $0x120] sm:$0xff]  ;;  %v19276_v57 = vpack.c.bf16 %v9085_v7, %v9084_v37  ;;  %v9087_v29 = vld [vmem:[%s22381_s17 + $0x1c8] sm:$0xff]  ;;  %v19278_v62 = vpack.c.bf16 %v9069_v47, %v9068_v40  ;;  %v9092_v37 = vld [vmem:[%s22381_s17 + $0x1f0] sm:$0xff] }
0x300c   :  { %19191 = vmatpush1.bf16.msra.mxu1 %v19190_v42  ;;  %19199 = vmatpush1.bf16.msra.mxu0 %v19198_v34  ;;  %v9030_v42 = vld [vmem:[%s22381_s17] sm:$0xff]  ;;  %v9031_v34 = vld [vmem:[%s22381_s17 + $0x8] sm:$0xff]  ;;  %v19274_v61 = vpack.c.bf16 %v9067_v4, %v9066_v28  ;;  %v9077_v40 = vld [vmem:[%s22381_s17 + $0x178] sm:$0xff] }
0x300d   :  { %9593 = vmatprep.mubr.f32.mxu1 %v23651_v55  ;;  %9670 = vmatprep.mubr.f32.mxu0 %v23651_v55  ;;  %v19234_v24 = vpack.c.bf16 %v9031_v34, %v9030_v42  ;;  %v9086_v36 = vld [vmem:[%s22381_s17 + $0x1c0] sm:$0xff] }
0x300e   :  { %19201 = vmatprep.subr.bf16.mxu1 %v19200_v26  ;;  %19209 = vmatprep.subr.bf16.mxu0 %v19208_v38  ;;  %v9048_v26 = vld [vmem:[%s22381_s17 + $0x90] sm:$0xff]  ;;  %v9049_v38 = vld [vmem:[%s22381_s17 + $0x98] sm:$0xff]  ;;  %v19280_v34 = vpack.c.bf16 %v9087_v29, %v9086_v36  ;;  %v9058_v46 = vld [vmem:[%s22381_s17 + $0xe0] sm:$0xff] }
0x300f   :  { %15754 = vmatmul.mubr.msk.f32.vlgmr.msra.gmra.mrb[108].mxu1 %vm279_vm1, %v22341_v8  ;;  %15756 = vmatmul.mubr.msk.f32.vlgmr.msra.gmra.mrb[112].mxu0 %vm279_vm1, %v22341_v8  ;;  %v19236_v18 = vpack.c.bf16 %v9049_v38, %v9048_v26  ;;  %v9088_v26 = vld [vmem:[%s22381_s17 + $0x1d0] sm:$0xff]  ;;  %v9089_v38 = vld [vmem:[%s22381_s17 + $0x1d8] sm:$0xff]  ;;  %v9142_v36 = vld [vmem:[%s22381_s17 + $0x380] sm:$0xff] }
0x3010   :  { %19203 = vmatpush1.bf16.msra.mxu1 %v19202_v25  ;;  %19211 = vmatpush1.bf16.msra.mxu0 %v19210_v27  ;;  %v9032_v25 = vld [vmem:[%s22381_s17 + $0x10] sm:$0xff]  ;;  %v9033_v27 = vld [vmem:[%s22381_s17 + $0x18] sm:$0xff] }
0x3011   :  { %9599 = vmatprep.mubr.f32.mxu1 %v23651_v55  ;;  %9676 = vmatprep.mubr.f32.mxu0 %v23651_v55  ;;  %v19238_v39 = vpack.c.bf16 %v9033_v27, %v9032_v25  ;;  %v19252_v25 = vpack.c.bf16 %v9057_v45, %v9056_v44  ;;  %v19284_v27 = vpack.c.bf16 %v9089_v38, %v9088_v26  ;;  %v9095_v44 = vld [vmem:[%s22381_s17 + $0x208] sm:$0xff]  ;;  %v9126_v38 = vld [vmem:[%s22381_s17 + $0x300] sm:$0xff] }
0x3012   :  { %19205 = vmatprep.subr.bf16.mxu1 %v19204_v54  ;;  %19213 = vmatprep.subr.bf16.mxu0 %v19212_v16  ;;  %v9050_v54 = vld [vmem:[%s22381_s17 + $0xa0] sm:$0xff]  ;;  %v9051_v16 = vld [vmem:[%s22381_s17 + $0xa8] sm:$0xff] }
0x3013   :  { %15755 = vmatmul.mubr.msk.f32.gmra.mrb[110].mxu1 %vm279_vm1, %v22356_v48  ;;  %15757 = vmatmul.mubr.msk.f32.gmra.mrb[114].mxu0 %vm279_vm1, %v22356_v48  ;;  %v19240_v20 = vpack.c.bf16 %v9051_v16, %v9050_v54  ;;  %v9090_v54 = vld [vmem:[%s22381_s17 + $0x1e0] sm:$0xff]  ;;  %v9091_v16 = vld [vmem:[%s22381_s17 + $0x1e8] sm:$0xff] }
0x3014   :  { %19207 = vmatpush1.bf16.msra.mxu1 %v19206_v63  ;;  %19215 = vmatpush1.bf16.msra.mxu0 %v19214_v19  ;;  %v9034_v63 = vld [vmem:[%s22381_s17 + $0x20] sm:$0xff]  ;;  %v9035_v19 = vld [vmem:[%s22381_s17 + $0x28] sm:$0xff] }
0x3015   :  { %9747 = vmatprep.mubr.f32.mxu1 %v23651_v55  ;;  %9824 = vmatprep.mubr.f32.mxu0 %v23651_v55  ;;  %v19242_v30 = vpack.c.bf16 %v9035_v19, %v9034_v63  ;;  %v19288_v63 = vpack.c.bf16 %v9091_v16, %v9090_v54  ;;  %v9043_v19 = vld [vmem:[%s22381_s17 + $0x68] sm:$0xff] }
0x3016   :  { %19217 = vmatprep.subr.bf16.mxu1 %v19216_v5  ;;  %19225 = vmatprep.subr.bf16.mxu0 %v19224_v13  ;;  %v9052_v5 = vld [vmem:[%s22381_s17 + $0xb0] sm:$0xff]  ;;  %v9053_v13 = vld [vmem:[%s22381_s17 + $0xb8] sm:$0xff] }
0x3017   :  { %15758 = vmatmul.mubr.msk.f32.vlgmr.msra.gmra.mrb[112].mxu1 %vm279_vm1, %v22341_v8  ;;  %15760 = vmatmul.mubr.msk.f32.vlgmr.msra.gmra.mrb[116].mxu0 %vm279_vm1, %v22341_v8  ;;  %v19244_v56 = vpack.c.bf16 %v9053_v13, %v9052_v5  ;;  %v9060_v5 = vld [vmem:[%s22381_s17 + $0xf0] sm:$0xff]  ;;  %v9061_v13 = vld [vmem:[%s22381_s17 + $0xf8] sm:$0xff] }
0x3018   :  { %19219 = vmatpush1.bf16.msra.mxu1 %v19218_v17  ;;  %19227 = vmatpush1.bf16.msra.mxu0 %v19226_v32  ;;  %v9036_v17 = vld [vmem:[%s22381_s17 + $0x30] sm:$0xff]  ;;  %v9037_v32 = vld [vmem:[%s22381_s17 + $0x38] sm:$0xff]  ;;  %v19260_v7 = vpack.c.bf16 %v9061_v13, %v9060_v5 }
0x3019   :  { %9753 = vmatprep.mubr.f32.mxu1 %v23651_v55  ;;  %9830 = vmatprep.mubr.f32.mxu0 %v23651_v55  ;;  %v19246_v3 = vpack.c.bf16 %v9037_v32, %v9036_v17  ;;  %v9045_v17 = vld [vmem:[%s22381_s17 + $0x78] sm:$0xff]  ;;  %v9128_v5 = vld [vmem:[%s22381_s17 + $0x310] sm:$0xff] }
0x301a   :  { %19221 = vmatprep.subr.bf16.mxu1 %v19220_v51  ;;  %19229 = vmatprep.subr.bf16.mxu0 %v19228_v35  ;;  %v9054_v51 = vld [vmem:[%s22381_s17 + $0xc0] sm:$0xff]  ;;  %v9055_v35 = vld [vmem:[%s22381_s17 + $0xc8] sm:$0xff] }
0x301b   :  { %15759 = vmatmul.mubr.msk.f32.gmra.mrb[114].mxu1 %vm279_vm1, %v22356_v48  ;;  %15761 = vmatmul.mubr.msk.f32.gmra.mrb[118].mxu0 %vm279_vm1, %v22356_v48  ;;  %v19248_v42 = vpack.c.bf16 %v9055_v35, %v9054_v51  ;;  %v9110_v51 = vld [vmem:[%s22381_s17 + $0x280] sm:$0xff]  ;;  %v9111_v35 = vld [vmem:[%s22381_s17 + $0x288] sm:$0xff] }
0x301c   :  { %19223 = vmatpush1.bf16.msra.mxu1 %v19222_v41  ;;  %19231 = vmatpush1.bf16.msra.mxu0 %v19230_v58  ;;  %v9038_v41 = vld [vmem:[%s22381_s17 + $0x40] sm:$0xff]  ;;  %v9039_v58 = vld [vmem:[%s22381_s17 + $0x48] sm:$0xff]  ;;  %v19296_v29 = vpack.c.bf16 %v9111_v35, %v9110_v51 }
0x301d   :  { %9901 = vmatprep.mubr.f32.mxu1 %v23651_v55  ;;  %9978 = vmatprep.mubr.f32.mxu0 %v23651_v55  ;;  %v19250_v6 = vpack.c.bf16 %v9039_v58, %v9038_v41  ;;  %v22506_v41 = vld [vmem:[%s22503_s15] sm:$0xff]  ;;  %v9115_v51 = vld [vmem:[%s22381_s17 + $0x2a8] sm:$0xff] }
0x301e   :  { %19233 = vmatprep.subr.bf16.mxu1 %v19232_v14  ;;  %19265 = vmatprep.subr.bf16.mxu0 %v19264_v33  ;;  %v9070_v14 = vld [vmem:[%s22381_s17 + $0x140] sm:$0xff]  ;;  %v9071_v33 = vld [vmem:[%s22381_s17 + $0x148] sm:$0xff]  ;;  %v9292_v58 = vrot.slane %v22506_v41, %v20944_v49 }
0x301f   :  { %15762 = vmatmul.mubr.msk.f32.vlgmr.msra.gmra.mrb[116].mxu1 %vm279_vm1, %v22341_v8  ;;  %15764 = vmatmul.mubr.msk.f32.vlgmr.msra.gmra.mrb[120].mxu0 %vm279_vm1, %v22341_v8  ;;  %v19282_v22 = vpack.c.bf16 %v9071_v33, %v9070_v14  ;;  %v9304_v14 = vrot.slane %v22506_v41, %v20956_v53  ;;  %v9094_v33 = vld [vmem:[%s22381_s17 + $0x200] sm:$0xff] }
0x3020   :  { %9907 = vmatprep.mubr.f32.mxu1 %v23651_v55  ;;  %9984 = vmatprep.mubr.f32.mxu0 %v23651_v55  ;;  %v19298_v16 = vpack.c.bf16 %v9095_v44, %v9094_v33  ;;  %v9146_v35 = vld [vmem:[%s22381_s17 + $0x3a0] sm:$0xff]  ;;  %v9099_v33 = vld [vmem:[%s22381_s17 + $0x228] sm:$0xff]  ;;  %v9177_v55 = vld [vmem:[%s22381_s17 + $0x498] sm:$0xff] }
0x3021   :  { %19235 = vmatpush3.bf16.msra.mxu1 %v19234_v24  ;;  %19267 = vmatpush3.bf16.msra.mxu0 %v19266_v15  ;;  %v9040_v24 = vld [vmem:[%s22381_s17 + $0x50] sm:$0xff]  ;;  %v9041_v15 = vld [vmem:[%s22381_s17 + $0x58] sm:$0xff]  ;;  %v9130_v44 = vld [vmem:[%s22381_s17 + $0x320] sm:$0xff] }
0x3022   :  { %19237 = vmatprep.subr.bf16.mxu1 %v19236_v18  ;;  %19269 = vmatprep.subr.bf16.mxu0 %v19268_v1  ;;  %v9072_v18 = vld [vmem:[%s22381_s17 + $0x150] sm:$0xff]  ;;  %v9073_v1 = vld [vmem:[%s22381_s17 + $0x158] sm:$0xff]  ;;  %v19254_v2 = vpack.c.bf16 %v9041_v15, %v9040_v24 }
0x3023   :  { %15763 = vmatmul.mubr.msk.f32.gmra.mrb[118].mxu1 %vm279_vm1, %v22356_v48  ;;  %15765 = vmatmul.mubr.msk.f32.gmra.mrb[122].mxu0 %vm279_vm1, %v22356_v48  ;;  %v19286_v60 = vpack.c.bf16 %v9073_v1, %v9072_v18  ;;  %v9113_v18 = vld [vmem:[%s22381_s17 + $0x298] sm:$0xff]  ;;  %v9144_v1 = vld [vmem:[%s22381_s17 + $0x390] sm:$0xff] }
0x3025   :  { %19239 = vmatpush3.bf16.msra.mxu1 %v19238_v39  ;;  %19271 = vmatpush3.bf16.msra.mxu0 %v19270_v43  ;;  %v9042_v39 = vld [vmem:[%s22381_s17 + $0x60] sm:$0xff]  ;;  %v19256_v43 = vpack.c.bf16 %v9059_v12, %v9058_v46  ;;  %v9145_v46 = vld [vmem:[%s22381_s17 + $0x398] sm:$0xff] }
0x3026   :  { %19241 = vmatprep.subr.bf16.mxu1 %v19240_v20  ;;  %19273 = vmatprep.subr.bf16.mxu0 %v19272_v21  ;;  %v9074_v20 = vld [vmem:[%s22381_s17 + $0x160] sm:$0xff]  ;;  %v9075_v21 = vld [vmem:[%s22381_s17 + $0x168] sm:$0xff]  ;;  %v19258_v28 = vpack.c.bf16 %v9043_v19, %v9042_v39  ;;  %v9096_v39 = vld [vmem:[%s22381_s17 + $0x210] sm:$0xff] }
0x3027   :  { %v19290_v4 = vpack.c.bf16 %v9075_v21, %v9074_v20 }
0x3029   :  { %19243 = vmatpush3.bf16.msra.mxu1 %v19242_v30  ;;  %19275 = vmatpush3.bf16.msra.mxu0 %v19274_v61  ;;  %v9093_v30 = vld [vmem:[%s22381_s17 + $0x1f8] sm:$0xff]  ;;  %v9044_v61 = vld [vmem:[%s22381_s17 + $0x70] sm:$0xff] }
0x302a   :  { %19245 = vmatprep.subr.bf16.mxu1 %v19244_v56  ;;  %19277 = vmatprep.subr.bf16.mxu0 %v19276_v57  ;;  %v19292_v32 = vpack.c.bf16 %v9093_v30, %v9092_v37  ;;  %v19262_v56 = vpack.c.bf16 %v9045_v17, %v9044_v61  ;;  %v9076_v57 = vld [vmem:[%s22381_s17 + $0x170] sm:$0xff] }
0x302b   :  { %v19294_v47 = vpack.c.bf16 %v9077_v40, %v9076_v57 }
0x302d   :  { %19247 = vmatpush3.bf16.msra.mxu1 %v19246_v3  ;;  %19279 = vmatpush3.bf16.msra.mxu0 %v19278_v62  ;;  %v9143_v3 = vld [vmem:[%s22381_s17 + $0x388] sm:$0xff] }
0x302e   :  { %19249 = vmatprep.subr.bf16.mxu1 %v19248_v42  ;;  %19281 = vmatprep.subr.bf16.mxu0 %v19280_v34  ;;  %v19328_v62 = vpack.c.bf16 %v9143_v3, %v9142_v36  ;;  %v9300_v42 = vrot.slane %v22506_v41, %v20947_v50  ;;  %v9296_v34 = vrot.slane %v22506_v41, %v20953_v52  ;;  %v9147_v36 = vld [vmem:[%s22381_s17 + $0x3a8] sm:$0xff] }
0x3031   :  { %19251 = vmatpush3.bf16.msra.mxu1 %v19250_v6  ;;  %19283 = vmatpush3.bf16.msra.mxu0 %v19282_v22  ;;  %v9127_v6 = vld [vmem:[%s22381_s17 + $0x308] sm:$0xff]  ;;  %v9112_v22 = vld [vmem:[%s22381_s17 + $0x290] sm:$0xff] }
0x3032   :  { %19253 = vmatprep.subr.bf16.mxu1 %v19252_v25  ;;  %19285 = vmatprep.subr.bf16.mxu0 %v19284_v27  ;;  %v19300_v21 = vpack.c.bf16 %v9113_v18, %v9112_v22 }
0x3035   :  { %19255 = vmatpush3.bf16.msra.mxu1 %v19254_v2  ;;  %19287 = vmatpush3.bf16.msra.mxu0 %v19286_v60  ;;  %v19330_v2 = vpack.c.bf16 %v9127_v6, %v9126_v38  ;;  %v22526_v60 = vrot.slane %v22506_v41, %v20969_v59 }
0x3036   :  { %19257 = vmatprep.subr.bf16.mxu1 %v19256_v43  ;;  %19289 = vmatprep.subr.bf16.mxu0 %v19288_v63 }
0x3039   :  { %19259 = vmatpush3.bf16.msra.mxu1 %v19258_v28  ;;  %19291 = vmatpush3.bf16.msra.mxu0 %v19290_v4  ;;  %v19332_v28 = vpack.c.bf16 %v9145_v46, %v9144_v1  ;;  %v9097_v4 = vld [vmem:[%s22381_s17 + $0x218] sm:$0xff]  ;;  %v9148_v46 = vld [vmem:[%s22381_s17 + $0x3b0] sm:$0xff] }
0x303a   :  { %19261 = vmatprep.subr.bf16.mxu1 %v19260_v7  ;;  %19293 = vmatprep.subr.bf16.mxu0 %v19292_v32  ;;  %v9129_v32 = vld [vmem:[%s22381_s17 + $0x318] sm:$0xff] }
0x303b   :  { %v9117_v1 = vld [vmem:[%s22381_s17 + $0x2b8] sm:$0xff] }
0x303d   :  { %19263 = vmatpush3.bf16.msra.mxu1 %v19262_v56  ;;  %19295 = vmatpush3.bf16.msra.mxu0 %v19294_v47  ;;  %v9114_v56 = vld [vmem:[%s22381_s17 + $0x2a0] sm:$0xff]  ;;  %v22535_v47 = vrot.slane %v22506_v41, %v20978_v10 }
0x303e   :  { %19297 = vmatprep.subr.bf16.mxu1 %v19296_v29  ;;  %19329 = vmatprep.subr.bf16.mxu0 %v19328_v62  ;;  %v9098_v29 = vld [vmem:[%s22381_s17 + $0x220] sm:$0xff]  ;;  %v19304_v22 = vpack.c.bf16 %v9115_v51, %v9114_v56 }
0x303f   :  { %v9102_v51 = vld [vmem:[%s22381_s17 + $0x240] sm:$0xff] }
0x30da   :  { %v9441_v45 = vpop.f32.mrb[104].mxu1  ;;  %v9518_v26 = vpop.f32.mrb[108].mxu0 }
0x30db   :  { %v9442_v24 = vadd.f32 %v9441_v45, %v9292_v58  ;;  %v9519_v15 = vadd.f32 %v9518_v26, %v9300_v42  ;;  %v9443_v25 = vpop.f32.mrb[105].mxu1  ;;  %v9520_v27 = vpop.f32.mrb[109].mxu0 }
0x30dc   :  { %v9444_v12 = vadd.f32 %v9443_v25, %v9296_v34  ;;  %v9521_v54 = vadd.f32 %v9520_v27, %v9304_v14  ;;  %v9116_v25 = vld [vmem:[%s22381_s17 + $0x2b0] sm:$0xff] }
0x30dd   :  { %v9991_v13 = vmax.f32 %v9442_v24, 0.0  ;;  %v9993_v37 = vmax.f32 %v9519_v15, 0.0  ;;  %v19336_v24 = vpack.c.bf16 %v9147_v36, %v9146_v35  ;;  %v9131_v15 = vld [vmem:[%s22381_s17 + $0x328] sm:$0xff] }
0x30de   :  { %v9992_v43 = vmax.f32 %v9444_v12, 0.0  ;;  %v9994_v63 = vmax.f32 %v9521_v54, 0.0  ;;  %v9447_v19 = vpop.f32.mrb[106].mxu1  ;;  %v9524_v20 = vpop.f32.mrb[110].mxu0  ;;  %v9149_v12 = vld [vmem:[%s22381_s17 + $0x3b8] sm:$0xff]  ;;  %v9103_v35 = vld [vmem:[%s22381_s17 + $0x248] sm:$0xff] }
0x30df   :  { %v9448_v7 = vadd.f32 %v9447_v19, %v9292_v58  ;;  %v9525_v30 = vadd.f32 %v9524_v20, %v9300_v42  ;;  %v9449_v61 = vpop.f32.mrb[107].mxu1  ;;  %v9526_v17 = vpop.f32.mrb[111].mxu0  ;;  %v9100_v19 = vld [vmem:[%s22381_s17 + $0x230] sm:$0xff]  ;;  %v9101_v20 = vld [vmem:[%s22381_s17 + $0x238] sm:$0xff] }
0x30e0   :  { %v9450_v57 = vadd.f32 %v9449_v61, %v9296_v34  ;;  %v9527_v40 = vadd.f32 %v9526_v17, %v9304_v14  ;;  %10093 = vmatprep.mubr.f32.mxu1 %v9992_v43  ;;  %10168 = vmatprep.mubr.f32.mxu0 %v9994_v63  ;;  %v19302_v34 = vpack.c.bf16 %v9097_v4, %v9096_v39  ;;  %v9150_v61 = vld [vmem:[%s22381_s17 + $0x3c0] sm:$0xff]  ;;  %v9151_v17 = vld [vmem:[%s22381_s17 + $0x3c8] sm:$0xff] }
0x30e1   :  { %10094 = vmatmul.mubr.f32.vlgmr.msra.gmra.mrb[120].mxu1 %v9991_v13  ;;  %10169 = vmatmul.mubr.f32.vlgmr.msra.gmra.mrb[124].mxu0 %v9993_v37  ;;  %v19334_v14 = vpack.c.bf16 %v9129_v32, %v9128_v5  ;;  %v10007_v45 = vmax.f32 %v9448_v7, 0.0  ;;  %v10009_v26 = vmax.f32 %v9525_v30, 0.0  ;;  %v19306_v43 = vpack.c.bf16 %v9099_v33, %v9098_v29  ;;  %v9132_v13 = vld [vmem:[%s22381_s17 + $0x330] sm:$0xff]  ;;  %v9133_v37 = vld [vmem:[%s22381_s17 + $0x338] sm:$0xff]  ;;  %v9118_v7 = vld [vmem:[%s22381_s17 + $0x2c0] sm:$0xff] }
0x30e2   :  { %v10008_v3 = vmax.f32 %v9450_v57, 0.0  ;;  %v10010_v62 = vmax.f32 %v9527_v40, 0.0  ;;  %19299 = vmatpush3.bf16.msra.mxu1 %v19298_v16  ;;  %19331 = vmatpush3.bf16.msra.mxu0 %v19330_v2  ;;  %v22541_v58 = vpop.f32.mrb[108].mxu1  ;;  %v22543_v42 = vpop.f32.mrb[112].mxu0  ;;  %v19338_v63 = vpack.c.bf16 %v9131_v15, %v9130_v44  ;;  %v19308_v4 = vpack.c.bf16 %v9117_v1, %v9116_v25  ;;  %v9119_v30 = vld [vmem:[%s22381_s17 + $0x2c8] sm:$0xff]  ;;  %v9120_v33 = vld [vmem:[%s22381_s17 + $0x2d0] sm:$0xff] }
0x30e3   :  { %v9597_v38 = vpop.f32.mrb[109].mxu1  ;;  %v9674_v6 = vpop.f32.mrb[113].mxu0  ;;  %19301 = vmatprep.subr.bf16.mxu1 %v19300_v21  ;;  %19333 = vmatprep.subr.bf16.mxu0 %v19332_v28  ;;  %v19340_v5 = vpack.c.bf16 %v9149_v12, %v9148_v46  ;;  %v19310_v57 = vpack.c.bf16 %v9101_v20, %v9100_v19  ;;  %v19342_v40 = vpack.c.bf16 %v9133_v37, %v9132_v13  ;;  %v9121_v44 = vld [vmem:[%s22381_s17 + $0x2d8] sm:$0xff]  ;;  %v9104_v15 = vld [vmem:[%s22381_s17 + $0x250] sm:$0xff]  ;;  %v9155_v19 = vld [vmem:[%s22381_s17 + $0x3e8] sm:$0xff] }
0x30e4   :  { %v9598_v27 = vadd.f32 %v9597_v38, %v22526_v60  ;;  %v9675_v18 = vadd.f32 %v9674_v6, %v22535_v47  ;;  %10098 = vmatprep.mubr.f32.mxu1 %v10008_v3  ;;  %10173 = vmatprep.mubr.f32.mxu0 %v10010_v62  ;;  %v19312_v3 = vpack.c.bf16 %v9119_v30, %v9118_v7  ;;  %v9105_v25 = vld [vmem:[%s22381_s17 + $0x258] sm:$0xff]  ;;  %v9136_v12 = vld [vmem:[%s22381_s17 + $0x350] sm:$0xff]  ;;  %v9106_v37 = vld [vmem:[%s22381_s17 + $0x260] sm:$0xff] }
0x30e5   :  { %10099 = vmatmul.mubr.f32.gmra.mrb[122].mxu1 %v10007_v45  ;;  %10174 = vmatmul.mubr.f32.gmra.mrb[126].mxu0 %v10009_v26  ;;  %v19344_v62 = vpack.c.bf16 %v9151_v17, %v9150_v61  ;;  %v9152_v45 = vld [vmem:[%s22381_s17 + $0x3d0] sm:$0xff]  ;;  %v9153_v26 = vld [vmem:[%s22381_s17 + $0x3d8] sm:$0xff]  ;;  %v19316_v1 = vpack.c.bf16 %v9121_v44, %v9120_v33  ;;  %v9107_v7 = vld [vmem:[%s22381_s17 + $0x268] sm:$0xff] }
0x30e6   :  { %v9996_v54 = vmax.f32 %v9598_v27, 0.0  ;;  %v9998_v16 = vmax.f32 %v9675_v18, 0.0  ;;  %19303 = vmatpush3.bf16.msra.mxu1 %v19302_v34  ;;  %19335 = vmatpush3.bf16.msra.mxu0 %v19334_v14  ;;  %v22554_v2 = vpop.f32.mrb[110].mxu1  ;;  %v22556_v39 = vpop.f32.mrb[114].mxu0  ;;  %v9134_v34 = vld [vmem:[%s22381_s17 + $0x340] sm:$0xff]  ;;  %v9135_v14 = vld [vmem:[%s22381_s17 + $0x348] sm:$0xff]  ;;  %v19348_v46 = vpack.c.bf16 %v9153_v26, %v9152_v45  ;;  %v19322_v45 = vpack.c.bf16 %v9107_v7, %v9106_v37 }
0x30e7   :  { %v22560_v21 = vpop.f32.mrb[111].mxu1  ;;  %v22562_v28 = vpop.f32.mrb[115].mxu0  ;;  %19305 = vmatprep.subr.bf16.mxu1 %v19304_v22  ;;  %19337 = vmatprep.subr.bf16.mxu0 %v19336_v24  ;;  %v19314_v22 = vpack.c.bf16 %v9103_v35, %v9102_v51  ;;  %v19346_v24 = vpack.c.bf16 %v9135_v14, %v9134_v34  ;;  %v9139_v51 = vld [vmem:[%s22381_s17 + $0x368] sm:$0xff]  ;;  %v9124_v35 = vld [vmem:[%s22381_s17 + $0x2f0] sm:$0xff]  ;;  %v9157_v34 = vld [vmem:[%s22381_s17 + $0x3f8] sm:$0xff]  ;;  %v9308_v14 = vrot.slane %v22506_v41, %v21059_v11 }
0x30e8   :  { %10243 = vmatprep.mubr.f32.mxu1 %v9996_v54  ;;  %10318 = vmatprep.mubr.f32.mxu0 %v9998_v16  ;;  %v9137_v54 = vld [vmem:[%s22381_s17 + $0x358] sm:$0xff]  ;;  %v9122_v16 = vld [vmem:[%s22381_s17 + $0x2e0] sm:$0xff]  ;;  %v9159_v37 = vld [vmem:[%s22381_s17 + $0x408] sm:$0xff] }
0x30e9   :  { %v19350_v13 = vpack.c.bf16 %v9137_v54, %v9136_v12 }
0x30ea   :  { %19307 = vmatpush3.bf16.msra.mxu1 %v19306_v43  ;;  %19339 = vmatpush3.bf16.msra.mxu0 %v19338_v63  ;;  %v22570_v32 = vpop.f32.mrb[112].mxu1  ;;  %v22572_v56 = vpop.f32.mrb[116].mxu0  ;;  %v9123_v43 = vld [vmem:[%s22381_s17 + $0x2e8] sm:$0xff]  ;;  %v9154_v63 = vld [vmem:[%s22381_s17 + $0x3e0] sm:$0xff] }
0x30eb   :  { %v22576_v36 = vpop.f32.mrb[113].mxu1  ;;  %v22578_v29 = vpop.f32.mrb[117].mxu0  ;;  %19309 = vmatprep.subr.bf16.mxu1 %v19308_v4  ;;  %19341 = vmatprep.subr.bf16.mxu0 %v19340_v5  ;;  %v19318_v5 = vpack.c.bf16 %v9105_v25, %v9104_v15  ;;  %v19320_v17 = vpack.c.bf16 %v9123_v43, %v9122_v16  ;;  %v9140_v15 = vld [vmem:[%s22381_s17 + $0x370] sm:$0xff]  ;;  %v9316_v25 = vrot.slane %v22506_v41, %v21068_v23  ;;  %v9141_v16 = vld [vmem:[%s22381_s17 + $0x378] sm:$0xff]  ;;  %v9174_v43 = vld [vmem:[%s22381_s17 + $0x480] sm:$0xff] }
0x30ec   :  { %v9158_v41 = vld [vmem:[%s22381_s17 + $0x400] sm:$0xff] }
0x30ee   :  { %19311 = vmatpush3.bf16.msra.mxu1 %v19310_v57  ;;  %19343 = vmatpush3.bf16.msra.mxu0 %v19342_v40  ;;  %v22586_v38 = vpop.f32.mrb[114].mxu1  ;;  %v22588_v6 = vpop.f32.mrb[118].mxu0  ;;  %v19352_v57 = vpack.c.bf16 %v9155_v19, %v9154_v63  ;;  %v9138_v40 = vld [vmem:[%s22381_s17 + $0x360] sm:$0xff]  ;;  %v9175_v63 = vld [vmem:[%s22381_s17 + $0x488] sm:$0xff] }
0x30ef   :  { %v22592_v27 = vpop.f32.mrb[115].mxu1  ;;  %v22594_v18 = vpop.f32.mrb[119].mxu0  ;;  %19313 = vmatprep.subr.bf16.mxu1 %v19312_v3  ;;  %19345 = vmatprep.subr.bf16.mxu0 %v19344_v62  ;;  %v9125_v3 = vld [vmem:[%s22381_s17 + $0x2f8] sm:$0xff]  ;;  %v9156_v62 = vld [vmem:[%s22381_s17 + $0x3f0] sm:$0xff]  ;;  %v19354_v26 = vpack.c.bf16 %v9139_v51, %v9138_v40  ;;  %v9206_v19 = vld [vmem:[%s22381_s17 + $0x580] sm:$0xff] }
0x30f0   :  { %v19324_v12 = vpack.c.bf16 %v9125_v3, %v9124_v35  ;;  %v19356_v54 = vpack.c.bf16 %v9157_v34, %v9156_v62  ;;  %v9190_v40 = vld [vmem:[%s22381_s17 + $0x500] sm:$0xff]  ;;  %v9191_v51 = vld [vmem:[%s22381_s17 + $0x508] sm:$0xff]  ;;  %v9176_v35 = vld [vmem:[%s22381_s17 + $0x490] sm:$0xff]  ;;  %v9596_v3 = vadd.f32 %v22541_v58, %v9308_v14  ;;  %v9673_v62 = vadd.f32 %v22543_v42, %v9316_v25 }
0x30f1   :  { %v19362_v42 = vpack.c.bf16 %v9159_v37, %v9158_v41  ;;  %v9162_v37 = vld [vmem:[%s22381_s17 + $0x420] sm:$0xff] }
0x30f2   :  { %19315 = vmatpush3.bf16.msra.mxu1 %v19314_v22  ;;  %19347 = vmatpush3.bf16.msra.mxu0 %v19346_v24  ;;  %v22602_v20 = vpop.f32.mrb[116].mxu1  ;;  %v22604_v4 = vpop.f32.mrb[120].mxu0  ;;  %v9108_v22 = vld [vmem:[%s22381_s17 + $0x270] sm:$0xff]  ;;  %v9109_v24 = vld [vmem:[%s22381_s17 + $0x278] sm:$0xff] }
0x30f3   :  { %v22608_v30 = vpop.f32.mrb[117].mxu1  ;;  %v22610_v61 = vpop.f32.mrb[121].mxu0  ;;  %19317 = vmatprep.subr.bf16.mxu1 %v19316_v1  ;;  %19349 = vmatprep.subr.bf16.mxu0 %v19348_v46  ;;  %v19326_v7 = vpack.c.bf16 %v9109_v24, %v9108_v22  ;;  %v19394_v24 = vpack.c.bf16 %v9191_v51, %v9190_v40 }
0x30f6   :  { %19319 = vmatpush3.bf16.msra.mxu1 %v19318_v5  ;;  %19351 = vmatpush3.bf16.msra.mxu0 %v19350_v13  ;;  %v22620_v33 = vpop.f32.mrb[118].mxu1  ;;  %v22622_v44 = vpop.f32.mrb[122].mxu0  ;;  %v9207_v5 = vld [vmem:[%s22381_s17 + $0x588] sm:$0xff] }
0x30f7   :  { %v22629_v1 = vpop.f32.mrb[119].mxu1  ;;  %v22631_v46 = vpop.f32.mrb[123].mxu0  ;;  %19321 = vmatprep.subr.bf16.mxu1 %v19320_v17  ;;  %19353 = vmatprep.subr.bf16.mxu0 %v19352_v57  ;;  %v22639_v13 = vld [vmem:[%s22503_s15 + $0x8] sm:$0xff]  ;;  %v19358_v17 = vpack.c.bf16 %v9141_v16, %v9140_v15  ;;  %v19360_v57 = vpack.c.bf16 %v9175_v63, %v9174_v43  ;;  %v19392_v34 = vpack.c.bf16 %v9207_v5, %v9206_v19  ;;  %v9995_v15 = vmax.f32 %v9596_v3, 0.0  ;;  %v9161_v16 = vld [vmem:[%s22381_s17 + $0x418] sm:$0xff] }
0x30f8   :  { %v22657_v22 = vrot.slane %v22639_v13, %v20953_v52  ;;  %v22661_v58 = vrot.slane %v22639_v13, %v20956_v53  ;;  %v9193_v19 = vld [vmem:[%s22381_s17 + $0x518] sm:$0xff]  ;;  %v9195_v3 = vld [vmem:[%s22381_s17 + $0x528] sm:$0xff] }
0x30fa   :  { %19323 = vmatpush3.bf16.msra.mxu1 %v19322_v45  ;;  %19355 = vmatpush3.bf16.msra.mxu0 %v19354_v26  ;;  %v9604_v45 = vadd.f32 %v22560_v21, %v22526_v60  ;;  %v9681_v26 = vadd.f32 %v22562_v28, %v22535_v47  ;;  %v19364_v60 = vpack.c.bf16 %v9177_v55, %v9176_v35  ;;  %v9997_v47 = vmax.f32 %v9673_v62, 0.0  ;;  %v9194_v35 = vld [vmem:[%s22381_s17 + $0x520] sm:$0xff]  ;;  %v9180_v62 = vld [vmem:[%s22381_s17 + $0x4b0] sm:$0xff] }
0x30fb   :  { %19325 = vmatprep.subr.bf16.mxu1 %v19324_v12  ;;  %19357 = vmatprep.subr.bf16.mxu0 %v19356_v54  ;;  %v19396_v21 = vpack.c.bf16 %v9209_v0, %v9208_v9  ;;  %v9602_v28 = vadd.f32 %v22554_v2, %v9308_v14  ;;  %v9679_v12 = vadd.f32 %v22556_v39, %v9316_v25  ;;  %v9160_v54 = vld [vmem:[%s22381_s17 + $0x410] sm:$0xff]  ;;  %v9178_v2 = vld [vmem:[%s22381_s17 + $0x4a0] sm:$0xff]  ;;  %v9179_v39 = vld [vmem:[%s22381_s17 + $0x4a8] sm:$0xff] }
0x30fc   :  { %v10012_v43 = vmax.f32 %v9604_v45, 0.0  ;;  %v10014_v63 = vmax.f32 %v9681_v26, 0.0  ;;  %v9752_v55 = vadd.f32 %v22576_v36, %v22657_v22  ;;  %v9829_v0 = vadd.f32 %v22578_v29, %v22661_v58  ;;  %v9192_v9 = vld [vmem:[%s22381_s17 + $0x510] sm:$0xff]  ;;  %v9210_v14 = vld [vmem:[%s22381_s17 + $0x5a0] sm:$0xff]  ;;  %v9211_v25 = vld [vmem:[%s22381_s17 + $0x5a8] sm:$0xff] }
0x30fd   :  { %v10011_v5 = vmax.f32 %v9602_v28, 0.0  ;;  %v10013_v36 = vmax.f32 %v9679_v12, 0.0  ;;  %v19366_v29 = vpack.c.bf16 %v9161_v16, %v9160_v54  ;;  %v19398_v41 = vpack.c.bf16 %v9193_v19, %v9192_v9  ;;  %v9212_v45 = vld [vmem:[%s22381_s17 + $0x5b0] sm:$0xff]  ;;  %v9213_v26 = vld [vmem:[%s22381_s17 + $0x5b8] sm:$0xff]  ;;  %v9182_v54 = vld [vmem:[%s22381_s17 + $0x4c0] sm:$0xff] }
0x30fe   :  { %19327 = vmatpush3.bf16.msra.mxu1 %v19326_v7  ;;  %19359 = vmatpush3.bf16.msra.mxu0 %v19358_v17  ;;  %v9163_v7 = vld [vmem:[%s22381_s17 + $0x428] sm:$0xff]  ;;  %v10000_v17 = vmax.f32 %v9752_v55, 0.0  ;;  %v19368_v40 = vpack.c.bf16 %v9179_v39, %v9178_v2  ;;  %v19400_v51 = vpack.c.bf16 %v9211_v25, %v9210_v14  ;;  %v9196_v28 = vld [vmem:[%s22381_s17 + $0x530] sm:$0xff]  ;;  %v9197_v12 = vld [vmem:[%s22381_s17 + $0x538] sm:$0xff] }
0x30ff   :  { %19361 = vmatprep.subr.bf16.mxu1 %v19360_v57  ;;  %19393 = vmatprep.subr.bf16.mxu0 %v19392_v34  ;;  %v10002_v57 = vmax.f32 %v9829_v0, 0.0  ;;  %v9181_v34 = vld [vmem:[%s22381_s17 + $0x4b8] sm:$0xff]  ;;  %v9183_v16 = vld [vmem:[%s22381_s17 + $0x4c8] sm:$0xff]  ;;  %v19406_v0 = vpack.c.bf16 %v9197_v12, %v9196_v28  ;;  %v9166_v9 = vld [vmem:[%s22381_s17 + $0x440] sm:$0xff] }
0x3100   :  { %v9167_v19 = vld [vmem:[%s22381_s17 + $0x448] sm:$0xff]  ;;  %v19376_v2 = vpack.c.bf16 %v9183_v16, %v9182_v54  ;;  %v9198_v14 = vld [vmem:[%s22381_s17 + $0x540] sm:$0xff]  ;;  %v9188_v54 = vld [vmem:[%s22381_s17 + $0x4f0] sm:$0xff] }
0x3101   :  { %10244 = vmatmul.mubr.f32.vlgmr.msra.gmra.mrb[124].mxu1 %v9995_v15  ;;  %10319 = vmatmul.mubr.f32.vlgmr.msra.gmra.mrb[128].mxu0 %v9997_v47  ;;  %v19372_v15 = vpack.c.bf16 %v9181_v34, %v9180_v62  ;;  %v19404_v47 = vpack.c.bf16 %v9213_v26, %v9212_v45  ;;  %v9199_v25 = vld [vmem:[%s22381_s17 + $0x548] sm:$0xff]  ;;  %v9186_v62 = vld [vmem:[%s22381_s17 + $0x4e0] sm:$0xff]  ;;  %v9189_v16 = vld [vmem:[%s22381_s17 + $0x4f8] sm:$0xff] }
0x3102   :  { %10248 = vmatprep.mubr.f32.mxu1 %v10012_v43  ;;  %10323 = vmatprep.mubr.f32.mxu0 %v10014_v63  ;;  %v9214_v43 = vld [vmem:[%s22381_s17 + $0x5c0] sm:$0xff]  ;;  %v9215_v63 = vld [vmem:[%s22381_s17 + $0x5c8] sm:$0xff] }
0x3103   :  { %19363 = vmatpush3.bf16.msra.mxu1 %v19362_v42  ;;  %19395 = vmatpush3.bf16.msra.mxu0 %v19394_v24  ;;  %v19370_v42 = vpack.c.bf16 %v9163_v7, %v9162_v37  ;;  %v19402_v24 = vpack.c.bf16 %v9195_v3, %v9194_v35  ;;  %v19408_v39 = vpack.c.bf16 %v9215_v63, %v9214_v43  ;;  %v9200_v35 = vld [vmem:[%s22381_s17 + $0x550] sm:$0xff]  ;;  %v9201_v3 = vld [vmem:[%s22381_s17 + $0x558] sm:$0xff]  ;;  %v9187_v34 = vld [vmem:[%s22381_s17 + $0x4e8] sm:$0xff] }
0x3104   :  { %19365 = vmatprep.subr.bf16.mxu1 %v19364_v60  ;;  %19397 = vmatprep.subr.bf16.mxu0 %v19396_v21  ;;  %v9164_v60 = vld [vmem:[%s22381_s17 + $0x430] sm:$0xff]  ;;  %v9165_v21 = vld [vmem:[%s22381_s17 + $0x438] sm:$0xff]  ;;  %v19378_v37 = vpack.c.bf16 %v9167_v19, %v9166_v9  ;;  %v19410_v7 = vpack.c.bf16 %v9199_v25, %v9198_v14  ;;  %v9218_v45 = vld [vmem:[%s22381_s17 + $0x5e0] sm:$0xff]  ;;  %v9332_v14 = vrot.slane %v22639_v13, %v20947_v50 }
0x3105   :  { %10249 = vmatmul.mubr.f32.gmra.mrb[126].mxu1 %v10011_v5  ;;  %10324 = vmatmul.mubr.f32.gmra.mrb[130].mxu0 %v10013_v36  ;;  %v19374_v55 = vpack.c.bf16 %v9165_v21, %v9164_v60  ;;  %v9184_v5 = vld [vmem:[%s22381_s17 + $0x4d0] sm:$0xff]  ;;  %v9185_v36 = vld [vmem:[%s22381_s17 + $0x4d8] sm:$0xff]  ;;  %v9219_v26 = vld [vmem:[%s22381_s17 + $0x5e8] sm:$0xff]  ;;  %v19388_v25 = vpack.c.bf16 %v9189_v16, %v9188_v54 }
0x3106   :  { %10393 = vmatprep.mubr.f32.mxu1 %v10000_v17  ;;  %10468 = vmatprep.mubr.f32.mxu0 %v10002_v57  ;;  %v9168_v17 = vld [vmem:[%s22381_s17 + $0x450] sm:$0xff]  ;;  %v9169_v57 = vld [vmem:[%s22381_s17 + $0x458] sm:$0xff]  ;;  %v9170_v60 = vld [vmem:[%s22381_s17 + $0x460] sm:$0xff]  ;;  %v9833_v16 = vadd.f32 %v22588_v6, %v9332_v14 }
0x3107   :  { %19367 = vmatpush3.bf16.msra.mxu1 %v19366_v29  ;;  %19399 = vmatpush3.bf16.msra.mxu0 %v19398_v41  ;;  %v9216_v29 = vld [vmem:[%s22381_s17 + $0x5d0] sm:$0xff]  ;;  %v9217_v41 = vld [vmem:[%s22381_s17 + $0x5d8] sm:$0xff]  ;;  %v9171_v21 = vld [vmem:[%s22381_s17 + $0x468] sm:$0xff] }
0x3108   :  { %19369 = vmatprep.subr.bf16.mxu1 %v19368_v40  ;;  %19401 = vmatprep.subr.bf16.mxu0 %v19400_v51  ;;  %v19380_v40 = vpack.c.bf16 %v9185_v36, %v9184_v5  ;;  %v19412_v51 = vpack.c.bf16 %v9217_v41, %v9216_v29  ;;  %v9202_v28 = vld [vmem:[%s22381_s17 + $0x560] sm:$0xff]  ;;  %v9203_v12 = vld [vmem:[%s22381_s17 + $0x568] sm:$0xff]  ;;  %v9220_v43 = vld [vmem:[%s22381_s17 + $0x5f0] sm:$0xff] }
0x3109   :  { %v9221_v63 = vld [vmem:[%s22381_s17 + $0x5f8] sm:$0xff]  ;;  %v19418_v9 = vpack.c.bf16 %v9203_v12, %v9202_v28  ;;  %v9172_v19 = vld [vmem:[%s22381_s17 + $0x470] sm:$0xff]  ;;  %v9238_v29 = vld [vmem:[%s22381_s17 + $0x680] sm:$0xff]  ;;  %v22745_v28 = vrot.slane %v22639_v13, %v20969_v59 }
0x310a   :  { %v19420_v5 = vpack.c.bf16 %v9221_v63, %v9220_v43  ;;  %v9205_v36 = vld [vmem:[%s22381_s17 + $0x578] sm:$0xff]  ;;  %v9239_v41 = vld [vmem:[%s22381_s17 + $0x688] sm:$0xff]  ;;  %v9224_v43 = vld [vmem:[%s22381_s17 + $0x610] sm:$0xff] }
0x310b   :  { %19371 = vmatpush3.bf16.msra.mxu1 %v19370_v42  ;;  %19403 = vmatpush3.bf16.msra.mxu0 %v19402_v24  ;;  %v19382_v42 = vpack.c.bf16 %v9169_v57, %v9168_v17  ;;  %v19414_v24 = vpack.c.bf16 %v9201_v3, %v9200_v35  ;;  %v9222_v17 = vld [vmem:[%s22381_s17 + $0x600] sm:$0xff]  ;;  %v9223_v57 = vld [vmem:[%s22381_s17 + $0x608] sm:$0xff]  ;;  %v19424_v35 = vpack.c.bf16 %v9239_v41, %v9238_v29  ;;  %v9225_v63 = vld [vmem:[%s22381_s17 + $0x618] sm:$0xff] }
0x310c   :  { %19373 = vmatprep.subr.bf16.mxu1 %v19372_v15  ;;  %19405 = vmatprep.subr.bf16.mxu0 %v19404_v47  ;;  %v19384_v15 = vpack.c.bf16 %v9187_v34, %v9186_v62  ;;  %v19416_v47 = vpack.c.bf16 %v9219_v26, %v9218_v45  ;;  %v9254_v3 = vld [vmem:[%s22381_s17 + $0x700] sm:$0xff]  ;;  %v9255_v62 = vld [vmem:[%s22381_s17 + $0x708] sm:$0xff]  ;;  %v9240_v34 = vld [vmem:[%s22381_s17 + $0x690] sm:$0xff]  ;;  %v9827_v26 = vadd.f32 %v22572_v56, %v9332_v14 }
0x310d   :  { %v19426_v56 = vpack.c.bf16 %v9223_v57, %v9222_v17  ;;  %v19458_v12 = vpack.c.bf16 %v9255_v62, %v9254_v3  ;;  %v9243_v6 = vld [vmem:[%s22381_s17 + $0x6a8] sm:$0xff]  ;;  %v9226_v29 = vld [vmem:[%s22381_s17 + $0x620] sm:$0xff]  ;;  %v9245_v3 = vld [vmem:[%s22381_s17 + $0x6b8] sm:$0xff] }
0x310e   :  { %v9275_v14 = vld [vmem:[%s22381_s17 + $0x7a8] sm:$0xff]  ;;  %v9276_v62 = vld [vmem:[%s22381_s17 + $0x7b0] sm:$0xff] }
0x310f   :  { %19375 = vmatpush3.bf16.msra.mxu1 %v19374_v55  ;;  %19407 = vmatpush3.bf16.msra.mxu0 %v19406_v0  ;;  %v9324_v55 = vrot.slane %v22639_v13, %v20944_v49  ;;  %v19386_v0 = vpack.c.bf16 %v9171_v21, %v9170_v60  ;;  %v9272_v60 = vld [vmem:[%s22381_s17 + $0x790] sm:$0xff]  ;;  %v9273_v21 = vld [vmem:[%s22381_s17 + $0x798] sm:$0xff]  ;;  %v9227_v41 = vld [vmem:[%s22381_s17 + $0x628] sm:$0xff] }
0x3110   :  { %19377 = vmatprep.subr.bf16.mxu1 %v19376_v2  ;;  %19409 = vmatprep.subr.bf16.mxu0 %v19408_v39  ;;  %v9173_v2 = vld [vmem:[%s22381_s17 + $0x478] sm:$0xff]  ;;  %v9204_v39 = vld [vmem:[%s22381_s17 + $0x570] sm:$0xff] }
0x3111   :  { %v9750_v45 = vadd.f32 %v22570_v32, %v9324_v55  ;;  %v22749_v32 = vrot.slane %v22639_v13, %v20978_v10 }
0x3113   :  { %19379 = vmatpush3.bf16.msra.mxu1 %v19378_v37  ;;  %19411 = vmatpush3.bf16.msra.mxu0 %v19410_v7  ;;  %v9270_v37 = vld [vmem:[%s22381_s17 + $0x780] sm:$0xff]  ;;  %v9271_v7 = vld [vmem:[%s22381_s17 + $0x788] sm:$0xff]  ;;  %v9999_v54 = vmax.f32 %v9750_v45, 0.0  ;;  %v19434_v45 = vpack.c.bf16 %v9227_v41, %v9226_v29 }
0x3114   :  { %19381 = vmatprep.subr.bf16.mxu1 %v19380_v40  ;;  %19413 = vmatprep.subr.bf16.mxu0 %v19412_v51  ;;  %v19390_v40 = vpack.c.bf16 %v9173_v2, %v9172_v19  ;;  %v19422_v51 = vpack.c.bf16 %v9205_v36, %v9204_v39  ;;  %v9906_v19 = vadd.f32 %v22608_v30, %v22745_v28  ;;  %v9256_v39 = vld [vmem:[%s22381_s17 + $0x710] sm:$0xff]  ;;  %v10017_v30 = vmax.f32 %v9833_v16, 0.0  ;;  %v9231_v16 = vld [vmem:[%s22381_s17 + $0x648] sm:$0xff]  ;;  %v9250_v29 = vld [vmem:[%s22381_s17 + $0x6e0] sm:$0xff] }
0x3115   :  { %v9983_v2 = vadd.f32 %v22610_v61, %v22749_v32  ;;  %v19430_v61 = vpack.c.bf16 %v9225_v63, %v9224_v43  ;;  %v9251_v41 = vld [vmem:[%s22381_s17 + $0x6e8] sm:$0xff] }
0x3117   :  { %19383 = vmatpush3.bf16.msra.mxu1 %v19382_v42  ;;  %19415 = vmatpush3.bf16.msra.mxu0 %v19414_v24  ;;  %v19456_v42 = vpack.c.bf16 %v9271_v7, %v9270_v37  ;;  %v9241_v24 = vld [vmem:[%s22381_s17 + $0x698] sm:$0xff]  ;;  %v10004_v37 = vmax.f32 %v9906_v19, 0.0  ;;  %v10006_v7 = vmax.f32 %v9983_v2, 0.0  ;;  %v9248_v19 = vld [vmem:[%s22381_s17 + $0x6d0] sm:$0xff] }
0x3118   :  { %19385 = vmatprep.subr.bf16.mxu1 %v19384_v15  ;;  %19417 = vmatprep.subr.bf16.mxu0 %v19416_v47  ;;  %v9758_v15 = vadd.f32 %v22592_v27, %v22657_v22  ;;  %v9835_v47 = vadd.f32 %v22594_v18, %v22661_v58  ;;  %v19428_v27 = vpack.c.bf16 %v9241_v24, %v9240_v34  ;;  %v10001_v18 = vmax.f32 %v9827_v26, 0.0  ;;  %v9277_v34 = vld [vmem:[%s22381_s17 + $0x7b8] sm:$0xff] }
0x3119   :  { %v19460_v22 = vpack.c.bf16 %v9273_v21, %v9272_v60  ;;  %v9756_v58 = vadd.f32 %v22586_v38, %v9324_v55  ;;  %v9242_v38 = vld [vmem:[%s22381_s17 + $0x6a0] sm:$0xff]  ;;  %v9229_v24 = vld [vmem:[%s22381_s17 + $0x638] sm:$0xff]  ;;  %v19468_v21 = vpack.c.bf16 %v9277_v34, %v9276_v62  ;;  %v9267_v34 = vld [vmem:[%s22381_s17 + $0x768] sm:$0xff] }
0x311a   :  { %v9274_v55 = vld [vmem:[%s22381_s17 + $0x7a0] sm:$0xff]  ;;  %v19432_v17 = vpack.c.bf16 %v9243_v6, %v9242_v38  ;;  %v9249_v2 = vld [vmem:[%s22381_s17 + $0x6d8] sm:$0xff] }
0x311b   :  { %19387 = vmatpush3.bf16.msra.mxu1 %v19386_v0  ;;  %19419 = vmatpush3.bf16.msra.mxu0 %v19418_v9  ;;  %v10016_v0 = vmax.f32 %v9758_v15, 0.0  ;;  %v10018_v9 = vmax.f32 %v9835_v47, 0.0  ;;  %v19464_v57 = vpack.c.bf16 %v9275_v14, %v9274_v55  ;;  %v9260_v15 = vld [vmem:[%s22381_s17 + $0x730] sm:$0xff]  ;;  %v9261_v47 = vld [vmem:[%s22381_s17 + $0x738] sm:$0xff]  ;;  %v9266_v62 = vld [vmem:[%s22381_s17 + $0x760] sm:$0xff] }
0x311c   :  { %19389 = vmatprep.subr.bf16.mxu1 %v19388_v25  ;;  %19421 = vmatprep.subr.bf16.mxu0 %v19420_v5  ;;  %v9257_v25 = vld [vmem:[%s22381_s17 + $0x718] sm:$0xff]  ;;  %v10015_v5 = vmax.f32 %v9756_v58, 0.0  ;;  %v9230_v58 = vld [vmem:[%s22381_s17 + $0x640] sm:$0xff]  ;;  %v9232_v55 = vld [vmem:[%s22381_s17 + $0x650] sm:$0xff] }
0x311d   :  { %v19462_v36 = vpack.c.bf16 %v9257_v25, %v9256_v39  ;;  %v9280_v39 = vld [vmem:[%s22381_s17 + $0x7d0] sm:$0xff]  ;;  %v9281_v25 = vld [vmem:[%s22381_s17 + $0x7d8] sm:$0xff]  ;;  %v19442_v38 = vpack.c.bf16 %v9231_v16, %v9230_v58 }
0x311e   :  { %v9233_v14 = vld [vmem:[%s22381_s17 + $0x658] sm:$0xff] }
0x311f   :  { %19391 = vmatpush3.bf16.msra.mxu1 %v19390_v40  ;;  %19423 = vmatpush3.bf16.msra.mxu0 %v19422_v51  ;;  %v9258_v40 = vld [vmem:[%s22381_s17 + $0x720] sm:$0xff]  ;;  %v9259_v51 = vld [vmem:[%s22381_s17 + $0x728] sm:$0xff] }
0x3120   :  { %19425 = vmatprep.subr.bf16.mxu1 %v19424_v35  ;;  %19457 = vmatprep.subr.bf16.mxu0 %v19456_v42  ;;  %v9244_v35 = vld [vmem:[%s22381_s17 + $0x6b0] sm:$0xff]  ;;  %v19466_v26 = vpack.c.bf16 %v9259_v51, %v9258_v40  ;;  %v9234_v40 = vld [vmem:[%s22381_s17 + $0x660] sm:$0xff]  ;;  %v9235_v51 = vld [vmem:[%s22381_s17 + $0x668] sm:$0xff] }
0x3121   :  { %v9228_v42 = vld [vmem:[%s22381_s17 + $0x630] sm:$0xff]  ;;  %v19436_v60 = vpack.c.bf16 %v9245_v3, %v9244_v35  ;;  %v19448_v35 = vpack.c.bf16 %v9251_v41, %v9250_v29 }
0x3122   :  { %10394 = vmatmul.mubr.f32.vlgmr.msra.gmra.mrb[128].mxu1 %v9999_v54  ;;  %10469 = vmatmul.mubr.f32.vlgmr.msra.gmra.mrb[132].mxu0 %v10001_v18  ;;  %v19438_v54 = vpack.c.bf16 %v9229_v24, %v9228_v42  ;;  %v19470_v18 = vpack.c.bf16 %v9261_v47, %v9260_v15  ;;  %v9284_v42 = vld [vmem:[%s22381_s17 + $0x7f0] sm:$0xff]  ;;  %v9285_v24 = vld [vmem:[%s22381_s17 + $0x7f8] sm:$0xff]  ;;  %v19482_v15 = vpack.c.bf16 %v9267_v34, %v9266_v62 }
0x3123   :  { %10398 = vmatprep.mubr.f32.mxu1 %v10016_v0  ;;  %10473 = vmatprep.mubr.f32.mxu0 %v10018_v9  ;;  %v9262_v0 = vld [vmem:[%s22381_s17 + $0x740] sm:$0xff]  ;;  %v9263_v9 = vld [vmem:[%s22381_s17 + $0x748] sm:$0xff]  ;;  %v9236_v47 = vld [vmem:[%s22381_s17 + $0x670] sm:$0xff] }
0x3124   :  { %19427 = vmatpush3.bf16.msra.mxu1 %v19426_v56  ;;  %19459 = vmatpush3.bf16.msra.mxu0 %v19458_v12  ;;  %v9246_v56 = vld [vmem:[%s22381_s17 + $0x6c0] sm:$0xff]  ;;  %v9247_v12 = vld [vmem:[%s22381_s17 + $0x6c8] sm:$0xff]  ;;  %v19474_v6 = vpack.c.bf16 %v9263_v9, %v9262_v0  ;;  %v9989_v0 = vadd.f32 %v22631_v46, %v22749_v32 }
0x3125   :  { %19429 = vmatprep.subr.bf16.mxu1 %v19428_v27  ;;  %19461 = vmatprep.subr.bf16.mxu0 %v19460_v22  ;;  %v9278_v27 = vld [vmem:[%s22381_s17 + $0x7c0] sm:$0xff]  ;;  %v9279_v22 = vld [vmem:[%s22381_s17 + $0x7c8] sm:$0xff]  ;;  %v19440_v43 = vpack.c.bf16 %v9247_v12, %v9246_v56  ;;  %v9348_v56 = vrot.slane %v22639_v13, %v21068_v23 }
0x3126   :  { %10399 = vmatmul.mubr.f32.gmra.mrb[130].mxu1 %v10015_v5  ;;  %10474 = vmatmul.mubr.f32.gmra.mrb[134].mxu0 %v10017_v30  ;;  %v19472_v63 = vpack.c.bf16 %v9279_v22, %v9278_v27  ;;  %v19444_v5 = vpack.c.bf16 %v9249_v2, %v9248_v19  ;;  %v19476_v30 = vpack.c.bf16 %v9281_v25, %v9280_v39  ;;  %v9237_v22 = vld [vmem:[%s22381_s17 + $0x678] sm:$0xff] }
0x3127   :  { %10543 = vmatprep.mubr.f32.mxu1 %v10004_v37  ;;  %10618 = vmatprep.mubr.f32.mxu0 %v10006_v7  ;;  %v9282_v37 = vld [vmem:[%s22381_s17 + $0x7e0] sm:$0xff]  ;;  %v9283_v7 = vld [vmem:[%s22381_s17 + $0x7e8] sm:$0xff]  ;;  %v19484_v27 = vpack.c.bf16 %v9285_v24, %v9284_v42  ;;  %v19454_v58 = vpack.c.bf16 %v9237_v22, %v9236_v47  ;;  %v9987_v39 = vadd.f32 %v22622_v44, %v9348_v56 }
0x3128   :  { %19431 = vmatpush3.bf16.msra.mxu1 %v19430_v61  ;;  %19463 = vmatpush3.bf16.msra.mxu0 %v19462_v36  ;;  %v9264_v61 = vld [vmem:[%s22381_s17 + $0x750] sm:$0xff]  ;;  %v9265_v36 = vld [vmem:[%s22381_s17 + $0x758] sm:$0xff]  ;;  %v19480_v3 = vpack.c.bf16 %v9283_v7, %v9282_v37  ;;  %v15766_v44 = vld [vmem:[%s22824_s14] ss:$0 sm:$0xff] }
0x3129   :  { %19433 = vmatprep.subr.bf16.mxu1 %v19432_v17  ;;  %19465 = vmatprep.subr.bf16.mxu0 %v19464_v57  ;;  %v19446_v17 = vpack.c.bf16 %v9233_v14, %v9232_v55  ;;  %v19478_v57 = vpack.c.bf16 %v9265_v36, %v9264_v61 }
0x312c   :  { %19435 = vmatpush3.bf16.msra.mxu1 %v19434_v45  ;;  %19467 = vmatpush3.bf16.msra.mxu0 %v19466_v26  ;;  %v9252_v45 = vld [vmem:[%s22381_s17 + $0x6f0] sm:$0xff]  ;;  %v9253_v26 = vld [vmem:[%s22381_s17 + $0x6f8] sm:$0xff] }
0x312d   :  { %19437 = vmatprep.subr.bf16.mxu1 %v19436_v60  ;;  %19469 = vmatprep.subr.bf16.mxu0 %v19468_v21  ;;  %v9340_v60 = vrot.slane %v22639_v13, %v21059_v11  ;;  %v19450_v21 = vpack.c.bf16 %v9235_v51, %v9234_v40  ;;  %v19452_v12 = vpack.c.bf16 %v9253_v26, %v9252_v45 }
0x312e   :  { %v9912_v13 = vadd.f32 %v22629_v1, %v22745_v28 }
0x312f   :  { %v9910_v2 = vadd.f32 %v22620_v33, %v9340_v60 }
0x3130   :  { %19439 = vmatpush3.bf16.msra.mxu1 %v19438_v54  ;;  %19471 = vmatpush3.bf16.msra.mxu0 %v19470_v18  ;;  %v9268_v54 = vld [vmem:[%s22381_s17 + $0x770] sm:$0xff]  ;;  %v9269_v18 = vld [vmem:[%s22381_s17 + $0x778] sm:$0xff]  ;;  %v10020_v25 = vmax.f32 %v9912_v13, 0.0 }
0x3131   :  { %19441 = vmatprep.subr.bf16.mxu1 %v19440_v43  ;;  %19473 = vmatprep.subr.bf16.mxu0 %v19472_v63  ;;  %v19486_v16 = vpack.c.bf16 %v9269_v18, %v9268_v54  ;;  %v9904_v43 = vadd.f32 %v22602_v20, %v9340_v60  ;;  %v9981_v63 = vadd.f32 %v22604_v4, %v9348_v56  ;;  %v10022_v20 = vmax.f32 %v9989_v0, 0.0 }
0x3132   :  { %v10019_v4 = vmax.f32 %v9910_v2, 0.0 }
0x3133   :  { %v10003_v9 = vmax.f32 %v9904_v43, 0.0  ;;  %v10005_v19 = vmax.f32 %v9981_v63, 0.0 }
0x3134   :  { %19443 = vmatpush3.bf16.msra.mxu1 %v19442_v38  ;;  %19475 = vmatpush3.bf16.msra.mxu0 %v19474_v6  ;;  %v10021_v38 = vmax.f32 %v9987_v39, 0.0 }
0x3135   :  { %19445 = vmatprep.subr.bf16.mxu1 %v19444_v5  ;;  %19477 = vmatprep.subr.bf16.mxu0 %v19476_v30 }
0x3138   :  { %19447 = vmatpush3.bf16.msra.mxu1 %v19446_v17  ;;  %19479 = vmatpush3.bf16.msra.mxu0 %v19478_v57 }
0x3139   :  { %19449 = vmatprep.subr.bf16.mxu1 %v19448_v35  ;;  %19481 = vmatprep.subr.bf16.mxu0 %v19480_v3 }
0x313c   :  { %19451 = vmatpush3.bf16.msra.mxu1 %v19450_v21  ;;  %19483 = vmatpush3.bf16.msra.mxu0 %v19482_v15 }
0x313d   :  { %19453 = vmatprep.subr.bf16.mxu1 %v19452_v12  ;;  %19485 = vmatprep.subr.bf16.mxu0 %v19484_v27 }
0x3140   :  { %19455 = vmatpush3.bf16.msra.mxu1 %v19454_v58  ;;  %19487 = vmatpush3.bf16.msra.mxu0 %v19486_v16 }
0x3143   :  { %10544 = vmatmul.mubr.f32.vlgmr.msra.gmra.mrb[132].mxu1 %v10003_v9  ;;  %10619 = vmatmul.mubr.f32.vlgmr.msra.gmra.mrb[136].mxu0 %v10005_v19 }
0x3144   :  { %10548 = vmatprep.mubr.f32.mxu1 %v10020_v25  ;;  %10623 = vmatprep.mubr.f32.mxu0 %v10022_v20 }
0x3147   :  { %10549 = vmatmul.mubr.f32.gmra.mrb[134].mxu1 %v10019_v4  ;;  %10624 = vmatmul.mubr.f32.gmra.mrb[138].mxu0 %v10021_v38 }
0x31b4   :  { %v17074_v33 = vpop.f32.mrb[120].mxu1  ;;  %v17112_v1 = vpop.f32.mrb[124].mxu0 }
0x31b5   :  { %v17075_v46 = vpop.f32.mrb[121].mxu1  ;;  %v17113_v28 = vpop.f32.mrb[125].mxu0 }
0x31b6   :  { %v17076_v32 = vadd.f32 %v17075_v46, %v17074_v33  ;;  %v17114_v6 = vadd.f32 %v17113_v28, %v17112_v1 }
0x31b8   :  { %v10096_v55 = vadd.f32 %v17076_v32, %v15766_v44  ;;  %v17077_v14 = vpop.f32.mrb[122].mxu1  ;;  %v17115_v5 = vpop.f32.mrb[126].mxu0 }
0x31b9   :  { %v17078_v30 = vpop.f32.mrb[123].mxu1  ;;  %v17116_v61 = vpop.f32.mrb[127].mxu0 }
0x31ba   :  { %v10171_v36 = vadd.f32 %v17114_v6, %v10096_v55  ;;  %v17079_v29 = vadd.f32 %v17078_v30, %v17077_v14  ;;  %v17117_v41 = vadd.f32 %v17116_v61, %v17115_v5 }
0x31bc   :  { %v10101_v37 = vadd.f32 %v17079_v29, %v15766_v44 }
0x31be   :  { %v10176_v7 = vadd.f32 %v17117_v41, %v10101_v37 }
0x31d4   :  { %v17150_v17 = vpop.f32.mrb[124].mxu1  ;;  %v17188_v57 = vpop.f32.mrb[128].mxu0 }
0x31d5   :  { %v17151_v40 = vpop.f32.mrb[125].mxu1  ;;  %v17189_v51 = vpop.f32.mrb[129].mxu0 }
0x31d6   :  { %v17152_v35 = vadd.f32 %v17151_v40, %v17150_v17  ;;  %v17190_v3 = vadd.f32 %v17189_v51, %v17188_v57 }
0x31d8   :  { %v10246_v62 = vadd.f32 %v17152_v35, %v10171_v36  ;;  %v17153_v34 = vpop.f32.mrb[126].mxu1  ;;  %v17191_v45 = vpop.f32.mrb[130].mxu0 }
0x31d9   :  { %v17154_v26 = vpop.f32.mrb[127].mxu1  ;;  %v17192_v42 = vpop.f32.mrb[131].mxu0 }
0x31da   :  { %v10321_v24 = vadd.f32 %v17190_v3, %v10246_v62  ;;  %v17155_v60 = vadd.f32 %v17154_v26, %v17153_v34  ;;  %v17193_v21 = vadd.f32 %v17192_v42, %v17191_v45  ;;  %v15770_v45 = vld [vmem:[%s21956_s23 + $0x28] sm:$0xff]  ;;  %v15771_v42 = vld [vmem:[%s21956_s23 + $0x30] sm:$0xff] }
0x31dc   :  { %v10251_v15 = vadd.f32 %v17155_v60, %v10176_v7 }
0x31de   :  { %v10326_v47 = vadd.f32 %v17193_v21, %v10251_v15 }
0x31f5   :  { %v17226_v56 = vpop.f32.mrb[128].mxu1  ;;  %v17264_v12 = vpop.f32.mrb[132].mxu0 }
0x31f6   :  { %v17227_v27 = vpop.f32.mrb[129].mxu1  ;;  %v17265_v22 = vpop.f32.mrb[133].mxu0 }
0x31f7   :  { %v17228_v54 = vadd.f32 %v17227_v27, %v17226_v56  ;;  %v17266_v18 = vadd.f32 %v17265_v22, %v17264_v12 }
0x31f9   :  { %v10396_v58 = vadd.f32 %v17228_v54, %v10321_v24  ;;  %v17229_v16 = vpop.f32.mrb[130].mxu1  ;;  %v17267_v43 = vpop.f32.mrb[134].mxu0  ;;  %v15772_v24 = vld [vmem:[%s21956_s23 + $0x38] sm:$0xff]  ;;  %v15767_v54 = vld [vmem:[%s22840_s12] ss:$0 sm:$0xff] }
0x31fa   :  { %v17230_v63 = vpop.f32.mrb[131].mxu1  ;;  %v17268_v13 = vpop.f32.mrb[135].mxu0  ;;  %v19492_v60 = vpack.c.bf16 %v15772_v24, %v15771_v42 }
0x31fb   :  { %v10471_v0 = vadd.f32 %v17266_v18, %v10396_v58  ;;  %v17231_v9 = vadd.f32 %v17230_v63, %v17229_v16  ;;  %v17269_v19 = vadd.f32 %v17268_v13, %v17267_v43 }
0x31fd   :  { %v10401_v2 = vadd.f32 %v17231_v9, %v10326_v47 }
0x31ff   :  { %v10476_v39 = vadd.f32 %v17269_v19, %v10401_v2  ;;  %v15779_v19 = vld [vmem:[%s21975_s28 + $0x1] ss:$0 sm:$0xff]  ;;  %s23655_s28 = smov 104  }
0x3216   :  { %v17302_v25 = vpop.f32.mrb[132].mxu1  ;;  %v17340_v20 = vpop.f32.mrb[136].mxu0 }
0x3217   :  { %v17303_v4 = vpop.f32.mrb[133].mxu1  ;;  %v17341_v38 = vpop.f32.mrb[137].mxu0 }
0x3218   :  { %v17304_v33 = vadd.f32 %v17303_v4, %v17302_v25  ;;  %v17342_v1 = vadd.f32 %v17341_v38, %v17340_v20 }
0x321a   :  { %v10546_v44 = vadd.f32 %v17304_v33, %v10471_v0  ;;  %v17305_v46 = vpop.f32.mrb[134].mxu1  ;;  %v17343_v28 = vpop.f32.mrb[138].mxu0 }
0x321b   :  { %v17306_v32 = vpop.f32.mrb[135].mxu1  ;;  %v17344_v6 = vpop.f32.mrb[139].mxu0 }
0x321c   :  { %v10621_v55 = vadd.f32 %v17342_v1, %v10546_v44  ;;  %v17307_v14 = vadd.f32 %v17306_v32, %v17305_v46  ;;  %v17345_v5 = vadd.f32 %v17344_v6, %v17343_v28 }
0x321e   :  { %v10551_v30 = vadd.f32 %v17307_v14, %v10476_v39  ;;  %v10631_v61 = vadd.f32 %v10621_v55, %v22341_v8  ;;  %v22887_v55 = vld [vmem:[%s20607_s30] sm:$0xff] }
0x3220   :  { %v10626_v36 = vadd.f32 %v17345_v5, %v10551_v30  ;;  %v10633_v29 = vsel %vm279_vm1, %v10631_v61, 0.0  ;;  %v22891_v5 = vld [vmem:[%s20607_s30 + $0x8] sm:$0xff]  ;;  %s23653_s30 = smov 64  }
0x3221   :  { %10634 = vadd.xlane.f32.xlu0 %v10633_v29 }
0x3222   :  { %v10632_v41 = vadd.f32 %v10626_v36, %v22356_v48  ;;  %v15769_v48 = vld [vmem:[%s21956_s23 + $0x20] sm:$0xff]  ;;  %s20534_s23 = smov 36  }
0x3223   :  { %v19488_v26 = vpack.c.bf16 %v15770_v45, %v15769_v48  ;;  %s22845_s5 = sld [smem:[%s23629_s0 + %s20534_s23]]  }
0x3224   :  { %v10636_v37 = vsel %vm279_vm1, %v10632_v41, 0.0 }
0x3225   :  { %10637 = vadd.xlane.f32.xlu0 %v10636_v37  ;;  %19489 = vmatprep.subr.bf16.mxu1 %v19488_v26 }
0x3226   :  { %19491 = vmatpush3.bf16.msra.mxu1 %v19488_v26 }
0x3227   :  { %19493 = vmatprep.subr.bf16.mxu1 %v19492_v60 }
0x3229   :  { %v15768_v58 = vld [vmem:[%s22845_s5] ss:$0 sm:$0xff] }
0x322a   :  { %19495 = vmatpush3.bf16.msra.mxu1 %v19492_v60 }
0x32ae   :  { %v10635_v7 = vpop.xlane.xlu0 %10634 }
0x32af   :  { %v10639_v17 = vmul.f32 0.03125, %v10635_v7 }
0x32b1   :  { %v10641_v57 = vsub.f32 %v10631_v61, %v10639_v17 }
0x32b2   :  { %v10638_v40 = vpop.xlane.xlu0 %10637 }
0x32b3   :  { %v10640_v51 = vmul.f32 0.03125, %v10638_v40  ;;  %v10643_v35 = vmul.f32 %v10641_v57, %v10641_v57 }
0x32b5   :  { %v10642_v8 = vsub.f32 %v10632_v41, %v10640_v51  ;;  %v10645_v3 = vsel %vm279_vm1, %v10643_v35, 0.0 }
0x32b6   :  { %10646 = vadd.xlane.f32.xlu0 %v10645_v3 }
0x32b7   :  { %v10644_v62 = vmul.f32 %v10642_v8, %v10642_v8 }
0x32b9   :  { %v10648_v34 = vsel %vm279_vm1, %v10644_v62, 0.0 }
0x32ba   :  { %10649 = vadd.xlane.f32.xlu1 %v10648_v34 }
0x3343   :  { %v10647_v21 = vpop.xlane.xlu0 %10646 }
0x3344   :  { %v10651_v15 = vmul.f32 0.03125, %v10647_v21 }
0x3346   :  { %v10653_v47 = vadd.f32 1e-05, %v10651_v15 }
0x3347   :  { %v10650_v56 = vpop.xlane.xlu1 %10649 }
0x3348   :  { %20401 = vrsqrt.f32 %v10653_v47  ;;  %v10652_v12 = vmul.f32 0.03125, %v10650_v56 }
0x334a   :  { %v10654_v27 = vadd.f32 1e-05, %v10652_v12 }
0x334c   :  { %20403 = vrsqrt.f32 %v10654_v27 }
0x3352   :  { %v20402_v22 = vpop.eup %20401 }
0x3353   :  { %v10657_v18 = vmul.f32 %v20402_v22, %v10641_v57 }
0x3355   :  { %v10665_v16 = vmul.f32 %v15767_v54, %v10657_v18 }
0x3356   :  { %v20404_v43 = vpop.eup %20403 }
0x3357   :  { %v10658_v63 = vmul.f32 %v20404_v43, %v10642_v8  ;;  %v22849_v13 = vadd.f32 %v15768_v58, %v10665_v16 }
0x3359   :  { %v10666_v0 = vmul.f32 %v15767_v54, %v10658_v63  ;;  %18136 = vmatprep.mubr.msk.f32.mxu1 %vm279_vm1, %v22849_v13 }
0x335b   :  { %v22853_v9 = vadd.f32 %v15768_v58, %v10666_v0  ;;  %v15774_v0 = vld [vmem:[%s22039_s20 + $0x20] sm:$0xff] }
0x335d   :  { %18137 = vmatmul.mubr.msk.f32.vlgmr.msra.gmra.mrb[136].mxu1 %vm279_vm1, %v22853_v9 }
0x3430   :  { %v18138_v2 = vpop.f32.mrb[136].mxu1 }
0x3431   :  { %v22858_v39 = vadd.f32 %v18138_v2, %v15779_v19  ;;  %v10767_v25 = vpop.f32.mrb[137].mxu1 }
0x3432   :  { %v22860_v20 = vadd.f32 %v15779_v19, %v10767_v25 }
0x3434   :  { %18143 = vmatprep.mubr.msk.f32.mxu0 %vm367_vm2, %v22860_v20  ;;  %v22866_v4 = vpack.i.bf16 %v22858_v39, %v22860_v20 }
0x3436   :  { %20175 = vrot.lane.b32.xlu0 %v22866_v4, %s20492_s26 }
0x343a   :  { %20185 = vrot.lane.b32.xlu0 %v22866_v4, %s20495_s2 }
0x343e   :  { %11067 = vrot.lane.b32.xlu0 %v22860_v20, %s20496_s3 }
0x3442   :  { %11069 = vrot.lane.b32.xlu0 %v22858_v39, %s20496_s3 }
0x3446   :  { %20190 = vrot.lane.b32.xlu0 %v22866_v4, %s20497_s4 }
0x344a   :  { %11356 = vrot.lane.b32.xlu0 %v22858_v39, %s23652_s1 }
0x34a8   :  { %v20176_v38 = vpop.permute.xlu0 %20175 }
0x34a9   :  { %v20178_v33 = vunpack.i.h.bf16 %v20176_v38  ;;  %v20177_v1 = vunpack.i.l.bf16 %v20176_v38 }
0x34ab   :  { %v19496_v44 = vpack.c.bf16 %v20178_v33, %v20177_v1 }
0x34ac   :  { %v20186_v3 = vpop.permute.xlu0 %20185 }
0x34ad   :  { %19498 = vmatprep.subr.msk.bf16.mxu0 %vm20594_vm3, %v19496_v44  ;;  %v20188_v26 = vunpack.i.h.bf16 %v20186_v3  ;;  %v20187_v42 = vunpack.i.l.bf16 %v20186_v3 }
0x34ae   :  { %19501 = vmatpush3.bf16.xpose.msk.msra.mxu0 %vm20594_vm3, %v19496_v44 }
0x34af   :  { %v19506_v47 = vpack.c.bf16 %v20188_v26, %v20187_v42  ;;  %18153 = vmatprep.subr.mxu0 %v15774_v0 }
0x34b0   :  { %v11068_v34 = vpop.permute.xlu0 %11067 }
0x34b4   :  { %v11070_v24 = vpop.permute.xlu0 %11069 }
0x34b5   :  { %18144 = vmatmul.mubr.msk.f32.vlgmr.msra.gmra.mrb[140].mxu0 %vm367_vm2, %v22858_v39 }
0x34b6   :  { %18154 = vmatpush3.msra.mxu0 %v15774_v0 }
0x34b8   :  { %v20191_v27 = vpop.permute.xlu0 %20190 }
0x34b9   :  { %v20193_v18 = vunpack.i.h.bf16 %v20191_v27  ;;  %v20192_v58 = vunpack.i.l.bf16 %v20191_v27 }
0x34bb   :  { %v19516_v16 = vpack.c.bf16 %v20193_v18, %v20192_v58 }
0x34bc   :  { %v11357_v63 = vpop.permute.xlu0 %11356 }
0x3588   :  { %v18145_v46 = vpop.f32.mrb[140].mxu0 }
0x3589   :  { %v10856_v28 = vpop.f32.mrb[141].mxu0  ;;  %v10866_v32 = vmul.f32 0.35355338, %v18145_v46 }
0x358a   :  { %v10865_v6 = vmul.f32 0.35355338, %v10856_v28 }
0x358b   :  { %v10868_v30 = vadd.f32 %v22891_v5, %v10866_v32 }
0x358c   :  { %v10867_v14 = vadd.f32 %v22887_v55, %v10865_v6 }
0x358d   :  { %v10872_v36 = vsel %vm175_vm0, %v10868_v30, -inf }
0x358e   :  { %v10869_v61 = vsel %vm175_vm0, %v10867_v14, -inf }
0x358f   :  { %10870 = vmax.xlane.f32.xlu1 %v10869_v61 }
0x3593   :  { %10873 = vmax.xlane.f32.xlu1 %v10872_v36 }
0x361c   :  { %v10871_v29 = vpop.xlane.xlu1 %10870 }
0x361d   :  { %v10875_v41 = vsub.f32 %v10867_v14, %v10871_v29 }
0x361f   :  { %v10877_v17 = vmul.f32 1.442695, %v10875_v41 }
0x3620   :  { %v10874_v37 = vpop.xlane.xlu1 %10873 }
0x3621   :  { %v10876_v7 = vsub.f32 %v10868_v30, %v10874_v37 }
0x3623   :  { %v10879_v57 = vmul.f32 1.442695, %v10876_v7 }
0x3625   :  { %20405 = vpow2.f32 %v10879_v57 }
0x3626   :  { %20407 = vpow2.f32 %v10877_v17 }
0x362f   :  { %v20406_v40 = vpop.eup %20405 }
0x3630   :  { %v10884_v51 = vsel %vm175_vm0, %v20406_v40, 0.0  ;;  %v20408_v35 = vpop.eup %20407 }
0x3631   :  { %10885 = vadd.xlane.f32.xlu1 %v10884_v51  ;;  %v10881_v8 = vsel %vm175_vm0, %v20408_v35, 0.0 }
0x3635   :  { %10882 = vadd.xlane.f32.xlu1 %v10881_v8 }
0x3646   :  { %20180 = vrot.lane.b32.xlu1 %v22866_v4, %s23653_s30 }
0x364a   :  { %11354 = vrot.lane.b32.xlu1 %v22860_v20, %s23652_s1 }
0x36be   :  { %v10886_v62 = vpop.xlane.xlu1 %10885 }
0x36bf   :  { %20409 = vrcp.f32 %v10886_v62 }
0x36c2   :  { %v10883_v48 = vpop.xlane.xlu1 %10882 }
0x36c3   :  { %20411 = vrcp.f32 %v10883_v48 }
0x36c6   :  { %v20181_v45 = vpop.permute.xlu1 %20180 }
0x36c7   :  { %v20183_v60 = vunpack.i.h.bf16 %v20181_v45  ;;  %v20182_v21 = vunpack.i.l.bf16 %v20181_v45 }
0x36c9   :  { %v19502_v15 = vpack.c.bf16 %v20183_v60, %v20182_v21  ;;  %v20410_v56 = vpop.eup %20409 }
0x36ca   :  { %v10890_v54 = vmul.f32 %v20410_v56, %v20406_v40  ;;  %v11355_v43 = vpop.permute.xlu1 %11354 }
0x36cb   :  { %19503 = vmatprep.subr.bf16.mxu1 %v19502_v15 }
0x36cc   :  { %19505 = vmatpush3.bf16.msra.mxu1 %v19502_v15 }
0x36cd   :  { %v20412_v12 = vpop.eup %20411  ;;  %19508 = vmatprep.subr.msk.bf16.mxu1 %vm20594_vm3, %v19506_v47 }
0x36ce   :  { %v10888_v22 = vmul.f32 %v20412_v12, %v20408_v35 }
0x36d0   :  { %18150 = vmatprep.mubr.msk.f32.mxu1 %vm175_vm0, %v10888_v22 }
0x36d1   :  { %18151 = vmatmul.mubr.msk.f32.vlgmr.msra.gmra.mrb[138].mxu1 %vm175_vm0, %v10890_v54 }
0x36d2   :  { %18162 = vmatprep.mubr.msk.f32.mxu1 %vm367_vm2, %v11068_v34 }
0x36d5   :  { %19511 = vmatpush3.bf16.xpose.msk.msra.mxu1 %vm20594_vm3, %v19506_v47 }
0x36d6   :  { %19518 = vmatprep.subr.msk.bf16.mxu1 %vm20594_vm3, %v19516_v16 }
0x36dc   :  { %18163 = vmatmul.mubr.msk.f32.vlgmr.msra.gmra.mrb[140].mxu1 %vm367_vm2, %v11070_v24 }
0x36dd   :  { %19521 = vmatpush3.bf16.xpose.msk.msra.mxu1 %vm20594_vm3, %v19516_v16  ;;  %18181 = vmatprep.mubr.msk.f32.mxu1 %vm367_vm2, %v11355_v43 }
0x36e4   :  { %18182 = vmatmul.mubr.msk.f32.vlgmr.msra.gmra.mrb[142].mxu1 %vm367_vm2, %v11357_v63 }
0x37a4   :  { %v18152_v19 = vpop.f32.mrb[138].mxu1 }
0x37a5   :  { %v10969_v2 = vpop.f32.mrb[139].mxu1 }
0x37a6   :  { %18155 = vmatprep.mubr.msk.f32.mxu0 %vm367_vm2, %v10969_v2 }
0x37a7   :  { %18156 = vmatmul.mubr.msk.f32.vlgmr.msra.gmra.mrb[142].mxu0 %vm367_vm2, %v18152_v19 }
0x37af   :  { %v18164_v25 = vpop.f32.mrb[140].mxu1 }
0x37b0   :  { %v11159_v38 = vmul.f32 0.35355338, %v18164_v25  ;;  %v11149_v33 = vpop.f32.mrb[141].mxu1 }
0x37b1   :  { %v11158_v1 = vmul.f32 0.35355338, %v11149_v33  ;;  %v15775_v33 = vld [vmem:[%s22039_s20 + $0x28] sm:$0xff] }
0x37b2   :  { %v11161_v44 = vadd.f32 %v22891_v5, %v11159_v38 }
0x37b3   :  { %v11160_v46 = vadd.f32 %v22887_v55, %v11158_v1 }
0x37b4   :  { %v11165_v28 = vsel %vm175_vm0, %v11161_v44, -inf }
0x37b5   :  { %11166 = vmax.xlane.f32.xlu0 %v11165_v28  ;;  %v11162_v32 = vsel %vm175_vm0, %v11160_v46, -inf }
0x37b6   :  { %11163 = vmax.xlane.f32.xlu1 %v11162_v32 }
0x37b7   :  { %v18183_v6 = vpop.f32.mrb[142].mxu1 }
0x37b8   :  { %v11436_v14 = vpop.f32.mrb[143].mxu1  ;;  %v11446_v35 = vmul.f32 0.35355338, %v18183_v6 }
0x37b9   :  { %v11445_v51 = vmul.f32 0.35355338, %v11436_v14 }
0x37ba   :  { %v11448_v3 = vadd.f32 %v22891_v5, %v11446_v35 }
0x37bb   :  { %v11447_v8 = vadd.f32 %v22887_v55, %v11445_v51 }
0x37bc   :  { %v11452_v34 = vsel %vm175_vm0, %v11448_v3, -inf }
0x37bd   :  { %v11449_v62 = vsel %vm175_vm0, %v11447_v8, -inf }
0x3842   :  { %v11167_v30 = vpop.xlane.xlu0 %11166 }
0x3843   :  { %v11169_v61 = vsub.f32 %v11161_v44, %v11167_v30  ;;  %v11164_v36 = vpop.xlane.xlu1 %11163 }
0x3844   :  { %v11168_v29 = vsub.f32 %v11160_v46, %v11164_v36 }
0x3845   :  { %v11172_v41 = vmul.f32 1.442695, %v11169_v61 }
0x3846   :  { %v11170_v37 = vmul.f32 1.442695, %v11168_v29 }
0x3847   :  { %20413 = vpow2.f32 %v11172_v41 }
0x3848   :  { %20415 = vpow2.f32 %v11170_v37 }
0x3851   :  { %v20414_v7 = vpop.eup %20413 }
0x3852   :  { %v20416_v17 = vpop.eup %20415  ;;  %v11177_v57 = vsel %vm175_vm0, %v20414_v7, 0.0 }
0x3853   :  { %11178 = vadd.xlane.f32.xlu1 %v11177_v57  ;;  %v11174_v40 = vsel %vm175_vm0, %v20416_v17, 0.0 }
0x3854   :  { %11175 = vadd.xlane.f32.xlu0 %v11174_v40 }
0x3864   :  { %20200 = vrot.lane.b32.xlu1 %v22866_v4, %s23654_s11 }
0x3868   :  { %11641 = vrot.lane.b32.xlu1 %v22860_v20, %s23655_s28 }
0x386a   :  { %20195 = vrot.lane.b32.xlu0 %v22866_v4, %s23656_s8 }
0x386e   :  { %11643 = vrot.lane.b32.xlu0 %v22858_v39, %s23655_s28 }
0x388c   :  { %11450 = vmax.xlane.f32.xlu1 %v11449_v62 }
0x388d   :  { %11453 = vmax.xlane.f32.xlu0 %v11452_v34 }
0x38e0   :  { %v11179_v48 = vpop.xlane.xlu1 %11178 }
0x38e1   :  { %20417 = vrcp.f32 %v11179_v48  ;;  %v11176_v20 = vpop.xlane.xlu0 %11175 }
0x38e2   :  { %20419 = vrcp.f32 %v11176_v20 }
0x38e4   :  { %v20201_v45 = vpop.permute.xlu1 %20200 }
0x38e5   :  { %v20203_v26 = vunpack.i.h.bf16 %v20201_v45  ;;  %v20202_v42 = vunpack.i.l.bf16 %v20201_v45  ;;  %v20196_v39 = vpop.permute.xlu0 %20195 }
0x38e6   :  { %v20198_v24 = vunpack.i.h.bf16 %v20196_v39  ;;  %v20197_v60 = vunpack.i.l.bf16 %v20196_v39 }
0x38e7   :  { %v19526_v21 = vpack.c.bf16 %v20203_v26, %v20202_v42 }
0x38e8   :  { %v19512_v15 = vpack.c.bf16 %v20198_v24, %v20197_v60  ;;  %v11642_v47 = vpop.permute.xlu1 %11641 }
0x38e9   :  { %19528 = vmatprep.subr.msk.bf16.mxu1 %vm20594_vm3, %v19526_v21  ;;  %18200 = vmatprep.mubr.msk.f32.mxu1 %vm367_vm2, %v11642_v47  ;;  %v11644_v54 = vpop.permute.xlu0 %11643 }
0x38ea   :  { %19513 = vmatprep.subr.bf16.mxu0 %v19512_v15  ;;  %19531 = vmatpush3.bf16.xpose.msk.msra.mxu1 %vm20594_vm3, %v19526_v21 }
0x38eb   :  { %v20418_v56 = vpop.eup %20417  ;;  %19515 = vmatpush3.bf16.msra.mxu0 %v19512_v15 }
0x38ec   :  { %v20420_v12 = vpop.eup %20419  ;;  %v11183_v22 = vmul.f32 %v20418_v56, %v20414_v7  ;;  %18172 = vmatprep.subr.mxu0 %v15775_v33 }
0x38ed   :  { %v11181_v27 = vmul.f32 %v20420_v12, %v20416_v17 }
0x38ef   :  { %18169 = vmatprep.mubr.msk.f32.mxu0 %vm175_vm0, %v11181_v27 }
0x38f0   :  { %18170 = vmatmul.mubr.msk.f32.vlgmr.msra.gmra.mrb[144].mxu0 %vm175_vm0, %v11183_v22 }
0x38f1   :  { %18201 = vmatmul.mubr.msk.f32.vlgmr.msra.gmra.mrb[144].mxu1 %vm367_vm2, %v11644_v54  ;;  %18173 = vmatpush3.msra.mxu0 %v15775_v33 }
0x3919   :  { %v11451_v18 = vpop.xlane.xlu1 %11450 }
0x391a   :  { %v11455_v58 = vsub.f32 %v11447_v8, %v11451_v18  ;;  %v11454_v16 = vpop.xlane.xlu0 %11453  ;;  %v15777_v18 = vld [vmem:[%s22039_s20 + $0x38] sm:$0xff] }
0x391b   :  { %v11456_v43 = vsub.f32 %v11448_v3, %v11454_v16  ;;  %v15776_v3 = vld [vmem:[%s22039_s20 + $0x30] sm:$0xff] }
0x391c   :  { %v11457_v63 = vmul.f32 1.442695, %v11455_v58 }
0x391d   :  { %v11459_v0 = vmul.f32 1.442695, %v11456_v43 }
0x391e   :  { %20421 = vpow2.f32 %v11457_v63  ;;  %v15824_v63 = vld [vmem:[%s22096_s27 + $0x20] sm:$0xff] }
0x391f   :  { %20423 = vpow2.f32 %v11459_v0  ;;  %v15825_v0 = vld [vmem:[%s22096_s27 + $0x28] sm:$0xff] }
0x3928   :  { %v20422_v19 = vpop.eup %20421 }
0x3929   :  { %v20424_v2 = vpop.eup %20423  ;;  %v11461_v25 = vsel %vm175_vm0, %v20422_v19, 0.0 }
0x392a   :  { %11462 = vadd.xlane.f32.xlu0 %v11461_v25  ;;  %v11464_v38 = vsel %vm175_vm0, %v20424_v2, 0.0  ;;  %v15827_v25 = vld [vmem:[%s22096_s27 + $0x38] sm:$0xff] }
0x392b   :  { %11465 = vadd.xlane.f32.xlu1 %v11464_v38 }
0x3940   :  { %20205 = vrot.lane.b32.xlu0 %v22866_v4, %s23657_s13 }
0x39b7   :  { %v11463_v1 = vpop.xlane.xlu0 %11462 }
0x39b8   :  { %20425 = vrcp.f32 %v11463_v1  ;;  %v11466_v44 = vpop.xlane.xlu1 %11465 }
0x39b9   :  { %20427 = vrcp.f32 %v11466_v44  ;;  %v23659_v44 = vld [vmem:[#allocation2_spill] sm:$0xff] }
0x39bb   :  { %v20206_v46 = vpop.permute.xlu0 %20205 }
0x39bc   :  { %v20208_v28 = vunpack.i.h.bf16 %v20206_v46  ;;  %v20207_v32 = vunpack.i.l.bf16 %v20206_v46  ;;  %v23660_v46 = vld [vmem:[#allocation3_spill] sm:$0xff] }
0x39be   :  { %v19522_v6 = vpack.c.bf16 %v20208_v28, %v20207_v32  ;;  %v15819_v28 = vld [vmem:[%s22111_s9 + $0x20] sm:$0xff]  ;;  %v15820_v32 = vld [vmem:[%s22111_s9 + $0x28] sm:$0xff] }
0x39c0   :  { %19523 = vmatprep.subr.bf16.mxu0 %v19522_v6 }
0x39c2   :  { %v20426_v14 = vpop.eup %20425 }
0x39c3   :  { %v18171_v30 = vpop.f32.mrb[144].mxu0  ;;  %v20428_v29 = vpop.eup %20427  ;;  %v11468_v37 = vmul.f32 %v20426_v14, %v20422_v19  ;;  %v19544_v19 = vpack.c.bf16 %v15825_v0, %v15824_v63  ;;  %v15821_v14 = vld [vmem:[%s22111_s9 + $0x30] sm:$0xff] }
0x39c4   :  { %v11262_v61 = vpop.f32.mrb[145].mxu0  ;;  %v18202_v36 = vpop.f32.mrb[144].mxu1  ;;  %v11470_v57 = vmul.f32 %v20428_v29, %v20424_v2  ;;  %v15826_v2 = vld [vmem:[%s22096_s27 + $0x30] sm:$0xff] }
0x39c5   :  { %18174 = vmatprep.mubr.msk.f32.mxu0 %vm367_vm2, %v11262_v61  ;;  %v11723_v41 = vpop.f32.mrb[145].mxu1  ;;  %v11733_v7 = vmul.f32 0.35355338, %v18202_v36  ;;  %v19548_v1 = vpack.c.bf16 %v15827_v25, %v15826_v2  ;;  %v15790_v36 = vld [vmem:[%s22120_s21 + $0x1] ss:$0 sm:$0xff]  ;;  %s20537_s21 = smov 39  }
0x39c6   :  { %v11732_v17 = vmul.f32 0.35355338, %v11723_v41  ;;  %18175 = vmatmul.mubr.msk.f32.vlgmr.msra.gmra.mrb[142].mxu0 %vm367_vm2, %v18171_v30  ;;  %v15822_v30 = vld [vmem:[%s22111_s9 + $0x38] sm:$0xff] }
0x39c7   :  { %19525 = vmatpush3.bf16.msra.mxu0 %v19522_v6  ;;  %18188 = vmatprep.mubr.msk.f32.mxu0 %vm175_vm0, %v11468_v37  ;;  %v11735_v51 = vadd.f32 %v22891_v5, %v11733_v7  ;;  %v19536_v6 = vpack.c.bf16 %v15820_v32, %v15819_v28  ;;  %v19540_v61 = vpack.c.bf16 %v15822_v30, %v15821_v14 }
0x39c8   :  { %v11734_v40 = vadd.f32 %v22887_v55, %v11732_v17  ;;  %18191 = vmatprep.subr.mxu0 %v15776_v3 }
0x39c9   :  { %v11739_v8 = vsel %vm175_vm0, %v11735_v51, -inf  ;;  %19537 = vmatprep.subr.bf16.mxu1 %v19536_v6 }
0x39ca   :  { %18189 = vmatmul.mubr.msk.f32.vlgmr.msra.gmra.mrb[146].mxu0 %vm175_vm0, %v11470_v57  ;;  %v11736_v35 = vsel %vm175_vm0, %v11734_v40, -inf  ;;  %19539 = vmatpush3.bf16.msra.mxu1 %v19536_v6 }
0x39cb   :  { %11737 = vmax.xlane.f32.xlu1 %v11736_v35  ;;  %18192 = vmatpush3.msra.mxu0 %v15776_v3 }
0x39cc   :  { %19541 = vmatprep.subr.bf16.mxu1 %v19540_v61 }
0x39ce   :  { %19543 = vmatpush3.bf16.msra.mxu1 %v19540_v61 }
0x39cf   :  { %11740 = vmax.xlane.f32.xlu1 %v11739_v8 }
0x3a58   :  { %v11738_v62 = vpop.xlane.xlu1 %11737 }
0x3a59   :  { %v11742_v34 = vsub.f32 %v11734_v40, %v11738_v62 }
0x3a5b   :  { %v11744_v45 = vmul.f32 1.442695, %v11742_v34 }
0x3a5c   :  { %v11741_v48 = vpop.xlane.xlu1 %11740 }
0x3a5d   :  { %v11743_v20 = vsub.f32 %v11735_v51, %v11741_v48  ;;  %v15837_v51 = vld [vmem:[%s22126_s22 + $0x1] ss:$0 sm:$0xff] }
0x3a5f   :  { %v11746_v26 = vmul.f32 1.442695, %v11743_v20 }
0x3a61   :  { %20429 = vpow2.f32 %v11746_v26 }
0x3a62   :  { %20431 = vpow2.f32 %v11744_v45 }
0x3a6b   :  { %v20430_v42 = vpop.eup %20429 }
0x3a6c   :  { %v11751_v39 = vsel %vm175_vm0, %v20430_v42, 0.0  ;;  %v20432_v24 = vpop.eup %20431 }
0x3a6d   :  { %11752 = vadd.xlane.f32.xlu1 %v11751_v39  ;;  %v11748_v60 = vsel %vm175_vm0, %v20432_v24, 0.0 }
0x3a71   :  { %11749 = vadd.xlane.f32.xlu1 %v11748_v60 }
0x3a82   :  { %20210 = vrot.lane.b32.xlu1 %v22866_v4, %s23658_s25 }
0x3a9d   :  { %v18190_v21 = vpop.f32.mrb[146].mxu0 }
0x3a9e   :  { %v11549_v15 = vpop.f32.mrb[147].mxu0 }
0x3a9f   :  { %18193 = vmatprep.mubr.msk.f32.mxu0 %vm367_vm2, %v11549_v15 }
0x3aa0   :  { %18194 = vmatmul.mubr.msk.f32.vlgmr.msra.gmra.mrb[142].mxu0 %vm367_vm2, %v18190_v21 }
0x3afa   :  { %v11753_v47 = vpop.xlane.xlu1 %11752 }
0x3afb   :  { %20433 = vrcp.f32 %v11753_v47 }
0x3afe   :  { %v11750_v56 = vpop.xlane.xlu1 %11749 }
0x3aff   :  { %20435 = vrcp.f32 %v11750_v56 }
0x3b02   :  { %v20211_v12 = vpop.permute.xlu1 %20210 }
0x3b03   :  { %v20213_v27 = vunpack.i.h.bf16 %v20211_v12  ;;  %v20212_v22 = vunpack.i.l.bf16 %v20211_v12 }
0x3b05   :  { %v19532_v54 = vpack.c.bf16 %v20213_v27, %v20212_v22  ;;  %v20434_v4 = vpop.eup %20433 }
0x3b06   :  { %v11757_v43 = vmul.f32 %v20434_v4, %v20430_v42  ;;  %v15817_v4 = vld [vmem:[%s22144_s7 + $0x1] ss:$0 sm:$0xff] }
0x3b07   :  { %19533 = vmatprep.subr.bf16.mxu0 %v19532_v54 }
0x3b08   :  { %19535 = vmatpush3.bf16.msra.mxu0 %v19532_v54 }
0x3b09   :  { %v20436_v58 = vpop.eup %20435  ;;  %18210 = vmatprep.subr.mxu0 %v15777_v18 }
0x3b0a   :  { %v11755_v16 = vmul.f32 %v20436_v58, %v20432_v24 }
0x3b0c   :  { %18207 = vmatprep.mubr.msk.f32.mxu0 %vm175_vm0, %v11755_v16  ;;  %v15818_v16 = vld [vmem:[%s22149_s16 + $0x1] ss:$0 sm:$0xff] }
0x3b0d   :  { %18208 = vmatmul.mubr.msk.f32.vlgmr.msra.gmra.mrb[148].mxu0 %vm175_vm0, %v11757_v43 }
0x3b0e   :  { %18211 = vmatpush3.msra.mxu0 %v15777_v18 }
0x3b0f   :  { %19545 = vmatprep.subr.bf16.mxu0 %v19544_v19 }
0x3be0   :  { %v18209_v38 = vpop.f32.mrb[148].mxu0 }
0x3be1   :  { %v11836_v33 = vpop.f32.mrb[149].mxu0 }
0x3be2   :  { %18212 = vmatprep.mubr.msk.f32.mxu0 %vm367_vm2, %v11836_v33 }
0x3be3   :  { %18213 = vmatmul.mubr.msk.f32.vlgmr.msra.gmra.mrb[142].mxu0 %vm367_vm2, %v18209_v38 }
0x3be4   :  { %19547 = vmatpush3.bf16.msra.mxu0 %v19544_v19  ;;  %18234 = vmatprep.mubr.msk.f32.mxu0 %vm279_vm1, %v23659_v44 }
0x3be5   :  { %19549 = vmatprep.subr.bf16.mxu0 %v19548_v1 }
0x3be8   :  { %19551 = vmatpush3.bf16.msra.mxu0 %v19548_v1 }
0x3beb   :  { %18235 = vmatmul.mubr.msk.f32.vlgmr.msra.gmra.mrb[150].mxu0 %vm279_vm1, %v23660_v46  ;;  %v15834_v46 = vld [vmem:[%s22168_s24 + $0x1] ss:$0 sm:$0xff] }
0x3cb6   :  { %v18214_v29 = vpop.f32.mrb[142].mxu0 }
0x3cb7   :  { %v19928_v41 = vadd.f32 %v18214_v29, %v15790_v36  ;;  %v11917_v37 = vpop.f32.mrb[143].mxu0 }
0x3cb8   :  { %v19929_v7 = vadd.f32 %v15790_v36, %v11917_v37 }
0x3cb9   :  { %v11933_v17 = vadd.f32 %v19928_v41, %v22853_v9 }
0x3cba   :  { %v11932_v57 = vadd.f32 %v19929_v7, %v22849_v13 }
0x3cbb   :  { %v11937_v40 = vsel %vm279_vm1, %v11933_v17, 0.0 }
0x3cbc   :  { %11938 = vadd.xlane.f32.xlu1 %v11937_v40  ;;  %v11934_v35 = vsel %vm279_vm1, %v11932_v57, 0.0 }
0x3cbd   :  { %11935 = vadd.xlane.f32.xlu0 %v11934_v35 }
0x3cbe   :  { %v18236_v8 = vpop.f32.mrb[150].mxu0 }
0x3cbf   :  { %v12162_v3 = vadd.f32 %v18236_v8, %v15837_v51  ;;  %v12156_v62 = vpop.f32.mrb[151].mxu0 }
0x3cc0   :  { %v12157_v34 = vadd.f32 %v15837_v51, %v12156_v62 }
0x3cc2   :  { %v19552_v48 = vpack.c.bf16 %v12162_v3, %v12157_v34  ;;  %v22988_v20 = vpack.i.bf16 %v12162_v3, %v12157_v34 }
0x3cc4   :  { %19554 = vmatprep.subr.msk.bf16.mxu1 %vm20594_vm3, %v19552_v48 }
0x3d49   :  { %v11939_v9 = vpop.xlane.xlu1 %11938 }
0x3d4a   :  { %v11941_v45 = vmul.f32 0.03125, %v11939_v9  ;;  %v11936_v13 = vpop.xlane.xlu0 %11935 }
0x3d4b   :  { %v11940_v26 = vmul.f32 0.03125, %v11936_v13 }
0x3d4c   :  { %v11943_v42 = vsub.f32 %v11933_v17, %v11941_v45 }
0x3d4d   :  { %v11942_v39 = vsub.f32 %v11932_v57, %v11940_v26 }
0x3d4e   :  { %v11945_v21 = vmul.f32 %v11943_v42, %v11943_v42 }
0x3d4f   :  { %v11944_v24 = vmul.f32 %v11942_v39, %v11942_v39 }
0x3d50   :  { %v11949_v15 = vsel %vm279_vm1, %v11945_v21, 0.0 }
0x3d51   :  { %v11946_v60 = vsel %vm279_vm1, %v11944_v24, 0.0 }
0x3d52   :  { %11947 = vadd.xlane.f32.xlu0 %v11946_v60 }
0x3d56   :  { %11950 = vadd.xlane.f32.xlu0 %v11949_v15 }
0x3d6c   :  { %20215 = vrot.lane.b32.xlu0 %v22988_v20, %s20496_s3 }
0x3ddf   :  { %v11948_v47 = vpop.xlane.xlu0 %11947 }
0x3de0   :  { %v11952_v56 = vmul.f32 0.03125, %v11948_v47 }
0x3de2   :  { %v11954_v12 = vadd.f32 1e-05, %v11952_v56 }
0x3de3   :  { %v11951_v27 = vpop.xlane.xlu0 %11950 }
0x3de4   :  { %20437 = vrsqrt.f32 %v11954_v12  ;;  %v11953_v22 = vmul.f32 0.03125, %v11951_v27  ;;  %v15829_v27 = vld [vmem:[%s22227_s19 + $0x20] sm:$0xff] }
0x3de6   :  { %v11955_v54 = vadd.f32 1e-05, %v11953_v22 }
0x3de7   :  { %v20216_v0 = vpop.permute.xlu0 %20215 }
0x3de8   :  { %20439 = vrsqrt.f32 %v11955_v54  ;;  %v20218_v25 = vunpack.i.h.bf16 %v20216_v0  ;;  %v20217_v38 = vunpack.i.l.bf16 %v20216_v0 }
0x3dea   :  { %v19562_v44 = vpack.c.bf16 %v20218_v25, %v20217_v38 }
0x3dee   :  { %v20438_v18 = vpop.eup %20437 }
0x3def   :  { %v11958_v58 = vmul.f32 %v20438_v18, %v11942_v39 }
0x3df1   :  { %v11966_v43 = vmul.f32 %v15817_v4, %v11958_v58 }
0x3df2   :  { %v20440_v63 = vpop.eup %20439 }
0x3df3   :  { %v11959_v19 = vmul.f32 %v20440_v63, %v11943_v42  ;;  %v22998_v2 = vadd.f32 %v15818_v16, %v11966_v43 }
0x3df5   :  { %v11967_v33 = vmul.f32 %v15817_v4, %v11959_v19  ;;  %18223 = vmatprep.mubr.msk.f32.mxu1 %vm279_vm1, %v22998_v2 }
0x3df7   :  { %v23002_v1 = vadd.f32 %v15818_v16, %v11967_v33 }
0x3df9   :  { %18224 = vmatmul.mubr.msk.f32.vlgmr.msra.gmra.mrb[146].mxu1 %vm279_vm1, %v23002_v1 }
0x3dfa   :  { %19557 = vmatpush3.bf16.xpose.msk.msra.mxu1 %vm20594_vm3, %v19552_v48 }
0x3dfb   :  { %19564 = vmatprep.subr.msk.bf16.mxu1 %vm20594_vm3, %v19562_v44 }
0x3ecc   :  { %v18225_v28 = vpop.f32.mrb[146].mxu1 }
0x3ecd   :  { %v12081_v32 = vadd.f32 %v18225_v28, %v15834_v46  ;;  %v12075_v6 = vpop.f32.mrb[147].mxu1 }
0x3ece   :  { %v12076_v14 = vadd.f32 %v15834_v46, %v12075_v6 }
0x3ecf   :  { %12456 = vrot.lane.b32.xlu0 %v12081_v32, %s20496_s3 }
0x3ed0   :  { %12454 = vrot.lane.b32.xlu1 %v12076_v14, %s20496_s3  ;;  %18241 = vmatprep.mubr.msk.f32.mxu1 %vm367_vm2, %v12076_v14 }
0x3ed1   :  { %18242 = vmatmul.mubr.msk.f32.vlgmr.msra.gmra.mrb[148].mxu1 %vm367_vm2, %v12081_v32 }
0x3ed2   :  { %19567 = vmatpush3.bf16.xpose.msk.msra.mxu1 %vm20594_vm3, %v19562_v44 }
0x3f41   :  { %v12457_v61 = vpop.permute.xlu0 %12456 }
0x3f42   :  { %v12455_v30 = vpop.permute.xlu1 %12454 }
0x3f43   :  { %18260 = vmatprep.mubr.msk.f32.mxu1 %vm367_vm2, %v12455_v30 }
0x3f44   :  { %18261 = vmatmul.mubr.msk.f32.vlgmr.msra.gmra.mrb[150].mxu1 %vm367_vm2, %v12457_v61 }
0x3fa4   :  { %v18243_v36 = vpop.f32.mrb[148].mxu1 }
0x3fa5   :  { %v12253_v29 = vmul.f32 0.35355338, %v18243_v36  ;;  %v12243_v41 = vpop.f32.mrb[149].mxu1 }
0x3fa6   :  { %v12252_v37 = vmul.f32 0.35355338, %v12243_v41 }
0x3fa7   :  { %v12255_v7 = vadd.f32 %v22891_v5, %v12253_v29 }
0x3fa8   :  { %v12254_v17 = vadd.f32 %v22887_v55, %v12252_v37 }
0x3fa9   :  { %v12259_v57 = vsel %vm175_vm0, %v12255_v7, -inf }
0x3faa   :  { %12260 = vmax.xlane.f32.xlu1 %v12259_v57  ;;  %v12256_v40 = vsel %vm175_vm0, %v12254_v17, -inf }
0x3fab   :  { %12257 = vmax.xlane.f32.xlu0 %v12256_v40 }
0x3fbb   :  { %20220 = vrot.lane.b32.xlu1 %v22988_v20, %s20492_s26  ;;  %s20535_s26 = smov 37  }
0x3fbf   :  { %12741 = vrot.lane.b32.xlu1 %v12076_v14, %s23652_s1 }
0x3fc3   :  { %12743 = vrot.lane.b32.xlu1 %v12081_v32, %s23652_s1 }
0x4017   :  { %v18262_v51 = vpop.f32.mrb[150].mxu1 }
0x4018   :  { %v12546_v35 = vmul.f32 0.35355338, %v18262_v51  ;;  %v12536_v8 = vpop.f32.mrb[151].mxu1 }
0x4019   :  { %v12545_v22 = vmul.f32 0.35355338, %v12536_v8 }
0x401a   :  { %v23028_v3 = vadd.f32 %v22891_v5, %v12546_v35 }
0x401b   :  { %v12547_v54 = vadd.f32 %v22887_v55, %v12545_v22  ;;  %v15830_v22 = vld [vmem:[%s22227_s19 + $0x28] sm:$0xff] }
0x401c   :  { %v12552_v62 = vsel %vm175_vm0, %v23028_v3, -inf }
0x401d   :  { %12553 = vmax.xlane.f32.xlu1 %v12552_v62  ;;  %v12549_v18 = vsel %vm175_vm0, %v12547_v54, -inf }
0x402e   :  { %20230 = vrot.lane.b32.xlu1 %v22988_v20, %s20495_s2 }
0x4032   :  { %13028 = vrot.lane.b32.xlu1 %v12076_v14, %s23655_s28 }
0x4036   :  { %13030 = vrot.lane.b32.xlu1 %v12081_v32, %s23655_s28 }
0x4037   :  { %v12261_v34 = vpop.xlane.xlu1 %12260 }
0x4038   :  { %v12263_v48 = vsub.f32 %v12255_v7, %v12261_v34  ;;  %v12258_v9 = vpop.xlane.xlu0 %12257 }
0x4039   :  { %v12262_v45 = vsub.f32 %v12254_v17, %v12258_v9 }
0x403a   :  { %v12266_v13 = vmul.f32 1.442695, %v12263_v48 }
0x403b   :  { %v12264_v26 = vmul.f32 1.442695, %v12262_v45  ;;  %v20221_v42 = vpop.permute.xlu1 %20220 }
0x403c   :  { %v20223_v39 = vunpack.i.h.bf16 %v20221_v42  ;;  %v20222_v24 = vunpack.i.l.bf16 %v20221_v42 }
0x403d   :  { %20441 = vpow2.f32 %v12264_v26 }
0x403e   :  { %v19558_v60 = vpack.c.bf16 %v20223_v39, %v20222_v24  ;;  %20443 = vpow2.f32 %v12266_v13 }
0x403f   :  { %v12742_v21 = vpop.permute.xlu1 %12741 }
0x4040   :  { %19559 = vmatprep.subr.bf16.mxu0 %v19558_v60  ;;  %18279 = vmatprep.mubr.msk.f32.mxu1 %vm367_vm2, %v12742_v21 }
0x4041   :  { %19561 = vmatpush3.bf16.msra.mxu0 %v19558_v60 }
0x4042   :  { %18251 = vmatprep.subr.mxu0 %v15829_v27 }
0x4043   :  { %v12744_v58 = vpop.permute.xlu1 %12743 }
0x4047   :  { %v20442_v15 = vpop.eup %20441 }
0x4048   :  { %v12268_v47 = vsel %vm175_vm0, %v20442_v15, 0.0  ;;  %v20444_v56 = vpop.eup %20443 }
0x4049   :  { %12269 = vadd.xlane.f32.xlu0 %v12268_v47  ;;  %v12271_v12 = vsel %vm175_vm0, %v20444_v56, 0.0 }
0x404d   :  { %12272 = vadd.xlane.f32.xlu0 %v12271_v12  ;;  %v23661_v12 = vmov 0.0  }
0x4063   :  { %20225 = vrot.lane.b32.xlu0 %v22988_v20, %s23652_s1 }
0x4082   :  { %12550 = vmax.xlane.f32.xlu0 %v12549_v18 }
0x40aa   :  { %v12554_v43 = vpop.xlane.xlu1 %12553 }
0x40ab   :  { %v12556_v61 = vsub.f32 %v23028_v3, %v12554_v43 }
0x40ad   :  { %v12559_v41 = vmul.f32 1.442695, %v12556_v61  ;;  %v15831_v61 = vld [vmem:[%s22227_s19 + $0x30] sm:$0xff] }
0x40ae   :  { %v20231_v38 = vpop.permute.xlu1 %20230 }
0x40af   :  { %v20233_v46 = vunpack.i.h.bf16 %v20231_v38  ;;  %v20232_v28 = vunpack.i.l.bf16 %v20231_v38 }
0x40b1   :  { %v19568_v14 = vpack.c.bf16 %v20233_v46, %v20232_v28 }
0x40b2   :  { %v13029_v30 = vpop.permute.xlu1 %13028 }
0x40d6   :  { %v12270_v4 = vpop.xlane.xlu0 %12269 }
0x40d7   :  { %20445 = vrcp.f32 %v12270_v4 }
0x40da   :  { %v12273_v16 = vpop.xlane.xlu0 %12272 }
0x40db   :  { %20447 = vrcp.f32 %v12273_v16 }
0x40de   :  { %v20226_v63 = vpop.permute.xlu0 %20225 }
0x40df   :  { %v20228_v0 = vunpack.i.h.bf16 %v20226_v63  ;;  %v20227_v19 = vunpack.i.l.bf16 %v20226_v63 }
0x40e1   :  { %v20446_v25 = vpop.eup %20445  ;;  %v19572_v33 = vpack.c.bf16 %v20228_v0, %v20227_v19 }
0x40e2   :  { %v12275_v44 = vmul.f32 %v20446_v25, %v20442_v15  ;;  %v13031_v15 = vpop.permute.xlu1 %13030 }
0x40e3   :  { %19574 = vmatprep.subr.msk.bf16.mxu1 %vm20594_vm3, %v19572_v33 }
0x40e4   :  { %18248 = vmatprep.mubr.msk.f32.mxu0 %vm175_vm0, %v12275_v44  ;;  %19577 = vmatpush3.bf16.xpose.msk.msra.mxu1 %vm20594_vm3, %v19572_v33 }
0x40e5   :  { %v20448_v32 = vpop.eup %20447 }
0x40e6   :  { %v12277_v6 = vmul.f32 %v20448_v32, %v20444_v56 }
0x40e8   :  { %18249 = vmatmul.mubr.msk.f32.vlgmr.msra.gmra.mrb[152].mxu0 %vm175_vm0, %v12277_v6 }
0x40e9   :  { %18252 = vmatpush3.msra.mxu0 %v15829_v27 }
0x40ea   :  { %19569 = vmatprep.subr.bf16.mxu0 %v19568_v14 }
0x40eb   :  { %18280 = vmatmul.mubr.msk.f32.vlgmr.msra.gmra.mrb[152].mxu1 %vm367_vm2, %v12744_v58 }
0x40ec   :  { %18298 = vmatprep.mubr.msk.f32.mxu1 %vm367_vm2, %v13029_v30 }
0x410f   :  { %v12551_v36 = vpop.xlane.xlu0 %12550 }
0x4110   :  { %v12555_v29 = vsub.f32 %v12547_v54, %v12551_v36 }
0x4112   :  { %v12557_v37 = vmul.f32 1.442695, %v12555_v29 }
0x4114   :  { %20449 = vpow2.f32 %v12557_v37 }
0x4115   :  { %20451 = vpow2.f32 %v12559_v41 }
0x411e   :  { %v20450_v7 = vpop.eup %20449 }
0x411f   :  { %v12561_v17 = vsel %vm175_vm0, %v20450_v7, 0.0  ;;  %v20452_v57 = vpop.eup %20451 }
0x4120   :  { %12562 = vadd.xlane.f32.xlu0 %v12561_v17  ;;  %v12564_v40 = vsel %vm175_vm0, %v20452_v57, 0.0 }
0x4124   :  { %12565 = vadd.xlane.f32.xlu0 %v12564_v40 }
0x413a   :  { %20235 = vrot.lane.b32.xlu0 %v22988_v20, %s23655_s28 }
0x41ad   :  { %v12563_v51 = vpop.xlane.xlu0 %12562 }
0x41ae   :  { %20453 = vrcp.f32 %v12563_v51 }
0x41b1   :  { %v12566_v35 = vpop.xlane.xlu0 %12565 }
0x41b2   :  { %20455 = vrcp.f32 %v12566_v35 }
0x41b5   :  { %v20236_v8 = vpop.permute.xlu0 %20235 }
0x41b6   :  { %v20238_v3 = vunpack.i.h.bf16 %v20236_v8  ;;  %v20237_v62 = vunpack.i.l.bf16 %v20236_v8 }
0x41b8   :  { %v19582_v34 = vpack.c.bf16 %v20238_v3, %v20237_v62  ;;  %v20454_v48 = vpop.eup %20453 }
0x41b9   :  { %v12568_v26 = vmul.f32 %v20454_v48, %v20450_v7 }
0x41ba   :  { %19584 = vmatprep.subr.msk.bf16.mxu1 %vm20594_vm3, %v19582_v34 }
0x41bb   :  { %v18250_v9 = vpop.f32.mrb[152].mxu0  ;;  %19587 = vmatpush3.bf16.xpose.msk.msra.mxu1 %vm20594_vm3, %v19582_v34 }
0x41bc   :  { %v12356_v45 = vpop.f32.mrb[153].mxu0  ;;  %v20456_v13 = vpop.eup %20455 }
0x41bd   :  { %18253 = vmatprep.mubr.msk.f32.mxu0 %vm367_vm2, %v12356_v45  ;;  %v12570_v60 = vmul.f32 %v20456_v13, %v20452_v57 }
0x41be   :  { %18254 = vmatmul.mubr.msk.f32.vlgmr.msra.gmra.mrb[154].mxu0 %vm367_vm2, %v18250_v9  ;;  %v18281_v42 = vpop.f32.mrb[152].mxu1 }
0x41bf   :  { %19571 = vmatpush3.bf16.msra.mxu0 %v19568_v14  ;;  %v12833_v39 = vmul.f32 0.35355338, %v18281_v42  ;;  %18267 = vmatprep.mubr.msk.f32.mxu0 %vm175_vm0, %v12568_v26  ;;  %v12823_v24 = vpop.f32.mrb[153].mxu1 }
0x41c0   :  { %v12832_v21 = vmul.f32 0.35355338, %v12823_v24  ;;  %18270 = vmatprep.subr.mxu0 %v15830_v22 }
0x41c1   :  { %v12835_v31 = vadd.f32 %v22891_v5, %v12833_v39 }
0x41c2   :  { %v12834_v47 = vadd.f32 %v22887_v55, %v12832_v21  ;;  %18268 = vmatmul.mubr.msk.f32.vlgmr.msra.gmra.mrb[156].mxu0 %vm175_vm0, %v12570_v60  ;;  %18299 = vmatmul.mubr.msk.f32.vlgmr.msra.gmra.mrb[154].mxu1 %vm367_vm2, %v13031_v15 }
0x41c3   :  { %v12839_v56 = vsel %vm175_vm0, %v12835_v31, -inf  ;;  %13842 = vmatprep.mubr.f32.mxu1 %v23661_v12  ;;  %18271 = vmatpush3.msra.mxu0 %v15830_v22  ;;  %v15832_v22 = vld [vmem:[%s22227_s19 + $0x38] sm:$0xff] }
0x41c4   :  { %12840 = vmax.xlane.f32.xlu1 %v12839_v56  ;;  %v12836_v27 = vsel %vm175_vm0, %v12834_v47, -inf }
0x41c5   :  { %12837 = vmax.xlane.f32.xlu0 %v12836_v27 }
0x41d5   :  { %20240 = vrot.lane.b32.xlu1 %v22988_v20, %s20497_s4  ;;  %s15214_s4 = sld [smem:[%s23629_s0 + %s20535_s26]]  }
0x41d9   :  { %20245 = vrot.lane.b32.xlu1 %v22988_v20, %s23654_s11 }
0x4251   :  { %v12841_v54 = vpop.xlane.xlu1 %12840 }
0x4252   :  { %v12843_v18 = vsub.f32 %v12835_v31, %v12841_v54  ;;  %v12838_v4 = vpop.xlane.xlu0 %12837 }
0x4253   :  { %v12842_v58 = vsub.f32 %v12834_v47, %v12838_v4 }
0x4254   :  { %v12846_v16 = vmul.f32 1.442695, %v12843_v18 }
0x4255   :  { %v12844_v43 = vmul.f32 1.442695, %v12842_v58  ;;  %v20241_v63 = vpop.permute.xlu1 %20240  ;;  %v15848_v58 = vld [vmem:[%s22277_s18 + $0x1] ss:$0 sm:$0xff] }
0x4256   :  { %v20243_v0 = vunpack.i.h.bf16 %v20241_v63  ;;  %v20242_v19 = vunpack.i.l.bf16 %v20241_v63 }
0x4257   :  { %20457 = vpow2.f32 %v12844_v43 }
0x4258   :  { %v19578_v25 = vpack.c.bf16 %v20243_v0, %v20242_v19  ;;  %20459 = vpow2.f32 %v12846_v16 }
0x4259   :  { %v20246_v40 = vpop.permute.xlu1 %20245 }
0x425a   :  { %19579 = vmatprep.subr.bf16.mxu0 %v19578_v25  ;;  %v20248_v35 = vunpack.i.h.bf16 %v20246_v40  ;;  %v20247_v8 = vunpack.i.l.bf16 %v20246_v40 }
0x4261   :  { %v20458_v38 = vpop.eup %20457 }
0x4262   :  { %v12848_v33 = vsel %vm175_vm0, %v20458_v38, 0.0  ;;  %v20460_v20 = vpop.eup %20459 }
0x4263   :  { %12849 = vadd.xlane.f32.xlu0 %v12848_v33  ;;  %v12851_v44 = vsel %vm175_vm0, %v20460_v20, 0.0 }
0x4267   :  { %12852 = vadd.xlane.f32.xlu0 %v12851_v44 }
0x4295   :  { %v18269_v46 = vpop.f32.mrb[156].mxu0  ;;  %v18300_v28 = vpop.f32.mrb[154].mxu1 }
0x4296   :  { %v12649_v32 = vpop.f32.mrb[157].mxu0  ;;  %v13110_v6 = vpop.f32.mrb[155].mxu1  ;;  %v13120_v14 = vmul.f32 0.35355338, %v18300_v28 }
0x4297   :  { %v13119_v30 = vmul.f32 0.35355338, %v13110_v6  ;;  %18272 = vmatprep.mubr.msk.f32.mxu0 %vm367_vm2, %v12649_v32 }
0x4298   :  { %18273 = vmatmul.mubr.msk.f32.vlgmr.msra.gmra.mrb[154].mxu0 %vm367_vm2, %v18269_v46  ;;  %v13122_v29 = vadd.f32 %v22891_v5, %v13120_v14  ;;  %v19588_v5 = vpack.c.bf16 %v20248_v35, %v20247_v8  ;;  %v15895_v35 = vld [vmem:[%s22297_s29 + $0x290] sm:$0xff] }
0x4299   :  { %v13121_v36 = vadd.f32 %v22887_v55, %v13119_v30  ;;  %19581 = vmatpush3.bf16.msra.mxu0 %v19578_v25 }
0x429a   :  { %18289 = vmatprep.subr.mxu0 %v15831_v61  ;;  %v13126_v37 = vsel %vm175_vm0, %v13122_v29, -inf }
0x429b   :  { %v13123_v41 = vsel %vm175_vm0, %v13121_v36, -inf }
0x429c   :  { %13124 = vmax.xlane.f32.xlu0 %v13123_v41 }
0x42a0   :  { %13127 = vmax.xlane.f32.xlu0 %v13126_v37  ;;  %v15896_v37 = vld [vmem:[%s22297_s29 + $0x298] sm:$0xff] }
0x42f0   :  { %v12850_v7 = vpop.xlane.xlu0 %12849 }
0x42f1   :  { %20461 = vrcp.f32 %v12850_v7  ;;  %v15877_v7 = vld [vmem:[%s22297_s29 + $0x200] sm:$0xff] }
0x42f4   :  { %v12853_v17 = vpop.xlane.xlu0 %12852 }
0x42f5   :  { %20463 = vrcp.f32 %v12853_v17  ;;  %v15893_v17 = vld [vmem:[%s22297_s29 + $0x280] sm:$0xff] }
0x42f6   :  { %v19594_v40 = vpack.c.bf16 %v15893_v17, %v15877_v7  ;;  %v15886_v17 = vld [vmem:[%s22297_s29 + $0x248] sm:$0xff] }
0x42fb   :  { %v20462_v57 = vpop.eup %20461 }
0x42fc   :  { %v12855_v51 = vmul.f32 %v20462_v57, %v20458_v38 }
0x42fe   :  { %18286 = vmatprep.mubr.msk.f32.mxu0 %vm175_vm0, %v12855_v51  ;;  %v15879_v51 = vld [vmem:[%s22297_s29 + $0x210] sm:$0xff] }
0x42ff   :  { %v20464_v55 = vpop.eup %20463  ;;  %v19602_v8 = vpack.c.bf16 %v15895_v35, %v15879_v51  ;;  %v15888_v51 = vld [vmem:[%s22297_s29 + $0x258] sm:$0xff] }
0x4300   :  { %v12857_v3 = vmul.f32 %v20464_v55, %v20460_v20  ;;  %v15910_v55 = vld [vmem:[%s22297_s29 + $0x308] sm:$0xff] }
0x4302   :  { %18287 = vmatmul.mubr.msk.f32.vlgmr.msra.gmra.mrb[158].mxu0 %vm175_vm0, %v12857_v3  ;;  %v15926_v3 = vld [vmem:[%s22297_s29 + $0x388] sm:$0xff] }
0x4303   :  { %18290 = vmatpush3.msra.mxu0 %v15831_v61  ;;  %v15878_v61 = vld [vmem:[%s22297_s29 + $0x208] sm:$0xff] }
0x4304   :  { %19589 = vmatprep.subr.bf16.mxu0 %v19588_v5 }
0x4329   :  { %v13125_v62 = vpop.xlane.xlu0 %13124 }
0x432a   :  { %v13129_v34 = vsub.f32 %v13121_v36, %v13125_v62  ;;  %v15894_v36 = vld [vmem:[%s22297_s29 + $0x288] sm:$0xff]  ;;  %v19596_v62 = vpack.c.bf16 %v15926_v3, %v15910_v55  ;;  %v15885_v55 = vld [vmem:[%s22297_s29 + $0x240] sm:$0xff] }
0x432b   :  { %v19592_v41 = vpack.c.bf16 %v15894_v36, %v15878_v61  ;;  %v15929_v36 = vld [vmem:[%s22297_s29 + $0x3a0] sm:$0xff] }
0x432c   :  { %v13131_v48 = vmul.f32 1.442695, %v13129_v34  ;;  %v15928_v34 = vld [vmem:[%s22297_s29 + $0x398] sm:$0xff] }
0x432d   :  { %v13128_v9 = vpop.xlane.xlu0 %13127  ;;  %19593 = vmatprep.subr.bf16.mxu1 %v19592_v41  ;;  %v15931_v41 = vld [vmem:[%s22297_s29 + $0x3b0] sm:$0xff] }
0x432e   :  { %20465 = vpow2.f32 %v13131_v48  ;;  %v13130_v45 = vsub.f32 %v13122_v29, %v13128_v9  ;;  %v15880_v29 = vld [vmem:[%s22297_s29 + $0x218] sm:$0xff]  ;;  %19595 = vmatpush1.bf16.msra.mxu1 %v19594_v40  ;;  %v15909_v48 = vld [vmem:[%s22297_s29 + $0x300] sm:$0xff]  ;;  %v15902_v40 = vld [vmem:[%s22297_s29 + $0x2c8] sm:$0xff] }
0x432f   :  { %v19600_v57 = vpack.c.bf16 %v15896_v37, %v15880_v29  ;;  %v15925_v9 = vld [vmem:[%s22297_s29 + $0x380] sm:$0xff]  ;;  %19597 = vmatprep.subr.bf16.mxu1 %v19596_v62  ;;  %v15915_v29 = vld [vmem:[%s22297_s29 + $0x330] sm:$0xff] }
0x4330   :  { %v13133_v13 = vmul.f32 1.442695, %v13130_v45  ;;  %v15887_v62 = vld [vmem:[%s22297_s29 + $0x250] sm:$0xff] }
0x4332   :  { %20467 = vpow2.f32 %v13133_v13  ;;  %v19598_v13 = vpack.c.bf16 %v15925_v9, %v15909_v48  ;;  %v19624_v48 = vpack.c.bf16 %v15902_v40, %v15886_v17  ;;  %v15943_v40 = vld [vmem:[%s22381_s17 + $0x800] sm:$0xff] }
0x4334   :  { %19599 = vmatpush1.bf16.msra.mxu1 %v19598_v13  ;;  %v15934_v13 = vld [vmem:[%s22297_s29 + $0x3c8] sm:$0xff] }
0x4338   :  { %v20466_v26 = vpop.eup %20465 }
0x4339   :  { %v13135_v42 = vsel %vm175_vm0, %v20466_v26, 0.0 }
0x433a   :  { %13136 = vadd.xlane.f32.xlu0 %v13135_v42  ;;  %v15927_v42 = vld [vmem:[%s22297_s29 + $0x390] sm:$0xff] }
0x433c   :  { %v20468_v39 = vpop.eup %20467 }
0x433d   :  { %v13138_v24 = vsel %vm175_vm0, %v20468_v39, 0.0 }
0x433e   :  { %13139 = vadd.xlane.f32.xlu0 %v13138_v24  ;;  %v15882_v24 = vld [vmem:[%s22297_s29 + $0x228] sm:$0xff] }
0x43c7   :  { %v13137_v60 = vpop.xlane.xlu0 %13136 }
0x43c8   :  { %20469 = vrcp.f32 %v13137_v60  ;;  %v15898_v60 = vld [vmem:[%s22297_s29 + $0x2a8] sm:$0xff] }
0x43cb   :  { %v13140_v21 = vpop.xlane.xlu0 %13139 }
0x43cc   :  { %20471 = vrcp.f32 %v13140_v21  ;;  %v15884_v21 = vld [vmem:[%s22297_s29 + $0x238] sm:$0xff] }
0x43d2   :  { %v20470_v15 = vpop.eup %20469 }
0x43d3   :  { %v13142_v27 = vmul.f32 %v20470_v15, %v20466_v26  ;;  %v15911_v26 = vld [vmem:[%s22297_s29 + $0x310] sm:$0xff]  ;;  %v19608_v15 = vpack.c.bf16 %v15898_v60, %v15882_v24  ;;  %v15917_v60 = vld [vmem:[%s22297_s29 + $0x340] sm:$0xff] }
0x43d5   :  { %v18288_v31 = vpop.f32.mrb[158].mxu0  ;;  %19609 = vmatprep.subr.bf16.mxu1 %v19608_v15  ;;  %v15919_v15 = vld [vmem:[%s22297_s29 + $0x350] sm:$0xff] }
0x43d6   :  { %v12936_v47 = vpop.f32.mrb[159].mxu0  ;;  %v20472_v56 = vpop.eup %20471 }
0x43d7   :  { %18291 = vmatprep.mubr.msk.f32.mxu0 %vm367_vm2, %v12936_v47  ;;  %v13144_v54 = vmul.f32 %v20472_v56, %v20468_v39  ;;  %v19606_v39 = vpack.c.bf16 %v15927_v42, %v15911_v26  ;;  %v15920_v26 = vld [vmem:[%s22297_s29 + $0x358] sm:$0xff] }
0x43d8   :  { %18292 = vmatmul.mubr.msk.f32.vlgmr.msra.gmra.mrb[154].mxu0 %vm367_vm2, %v18288_v31  ;;  %v15900_v31 = vld [vmem:[%s22297_s29 + $0x2b8] sm:$0xff] }
0x43d9   :  { %19591 = vmatpush3.bf16.msra.mxu0 %v19588_v5  ;;  %18305 = vmatprep.mubr.msk.f32.mxu0 %vm175_vm0, %v13142_v27  ;;  %v15912_v5 = vld [vmem:[%s22297_s29 + $0x318] sm:$0xff]  ;;  %v19616_v47 = vpack.c.bf16 %v15900_v31, %v15884_v21  ;;  %v15933_v21 = vld [vmem:[%s22297_s29 + $0x3c0] sm:$0xff]  ;;  %v15935_v31 = vld [vmem:[%s22297_s29 + $0x3d0] sm:$0xff] }
0x43da   :  { %18308 = vmatprep.subr.mxu0 %v15832_v22  ;;  %v19604_v45 = vpack.c.bf16 %v15928_v34, %v15912_v5  ;;  %v15901_v5 = vld [vmem:[%s22297_s29 + $0x2c0] sm:$0xff]  ;;  %v15903_v34 = vld [vmem:[%s22297_s29 + $0x2d0] sm:$0xff]  ;;  %v15936_v42 = vld [vmem:[%s22297_s29 + $0x3d8] sm:$0xff] }
0x43db   :  { %v19634_v24 = vpack.c.bf16 %v15903_v34, %v15887_v62  ;;  %v15962_v62 = vld [vmem:[%s22381_s17 + $0x898] sm:$0xff]  ;;  %v15993_v34 = vld [vmem:[%s22381_s17 + $0x990] sm:$0xff] }
0x43dc   :  { %18306 = vmatmul.mubr.msk.f32.vlgmr.msra.gmra.mrb[160].mxu0 %vm175_vm0, %v13144_v54 }
0x43dd   :  { %18309 = vmatpush3.msra.mxu0 %v15832_v22 }
0x43de   :  { %19601 = vmatprep.subr.bf16.mxu0 %v19600_v57 }
0x44af   :  { %v18307_v18 = vpop.f32.mrb[160].mxu0 }
0x44b0   :  { %v13223_v4 = vpop.f32.mrb[161].mxu0 }
0x44b1   :  { %18310 = vmatprep.mubr.msk.f32.mxu0 %vm367_vm2, %v13223_v4 }
0x44b2   :  { %18311 = vmatmul.mubr.msk.f32.vlgmr.msra.gmra.mrb[154].mxu0 %vm367_vm2, %v18307_v18 }
0x44b3   :  { %13919 = vmatprep.mubr.f32.mxu0 %v23661_v12  ;;  %19603 = vmatpush1.bf16.msra.mxu0 %v19602_v8  ;;  %v19622_v8 = vpack.c.bf16 %v15931_v41, %v15915_v29  ;;  %v15959_v29 = vld [vmem:[%s22381_s17 + $0x880] sm:$0xff]  ;;  %v15960_v41 = vld [vmem:[%s22381_s17 + $0x888] sm:$0xff] }
0x44b4   :  { %19605 = vmatprep.subr.bf16.mxu0 %v19604_v45  ;;  %v15918_v45 = vld [vmem:[%s22297_s29 + $0x348] sm:$0xff] }
0x44b7   :  { %19607 = vmatpush1.bf16.msra.mxu0 %v19606_v39  ;;  %v19626_v39 = vpack.c.bf16 %v15901_v5, %v15885_v55  ;;  %v15976_v55 = vld [vmem:[%s22381_s17 + $0x908] sm:$0xff]  ;;  %v15961_v5 = vld [vmem:[%s22381_s17 + $0x890] sm:$0xff] }
0x44b8   :  { %19617 = vmatprep.subr.bf16.mxu0 %v19616_v47  ;;  %v19628_v47 = vpack.c.bf16 %v15934_v13, %v15918_v45  ;;  %v15945_v13 = vld [vmem:[%s22381_s17 + $0x810] sm:$0xff] }
0x4585   :  { %v18312_v16 = vpop.f32.mrb[154].mxu0 }
0x4586   :  { %v19930_v43 = vadd.f32 %v18312_v16, %v15848_v58  ;;  %v13304_v63 = vpop.f32.mrb[155].mxu0  ;;  %v15875_v16 = vld [vmem:[%s22322_s6 + $0x1] ss:$0 sm:$0xff] }
0x4587   :  { %v19931_v0 = vadd.f32 %v15848_v58, %v13304_v63 }
0x4588   :  { %v13320_v19 = vadd.f32 %v19930_v43, %v23002_v1  ;;  %v15881_v43 = vld [vmem:[%s22297_s29 + $0x220] sm:$0xff] }
0x4589   :  { %v13319_v25 = vadd.f32 %v19931_v0, %v22998_v2  ;;  %v15897_v0 = vld [vmem:[%s22297_s29 + $0x2a0] sm:$0xff] }
0x458a   :  { %v13324_v38 = vsel %vm279_vm1, %v13320_v19, 0.0 }
0x458b   :  { %13325 = vadd.xlane.f32.xlu1 %v13324_v38  ;;  %v13321_v33 = vsel %vm279_vm1, %v13319_v25, 0.0  ;;  %v15876_v38 = vld [vmem:[%s22327_s10 + $0x1] ss:$0 sm:$0xff]  ;;  %s20536_s10 = smov 38  }
0x458c   :  { %13322 = vadd.xlane.f32.xlu0 %v13321_v33  ;;  %v15914_v33 = vld [vmem:[%s22297_s29 + $0x328] sm:$0xff]  ;;  %s15215_s9 = sld [smem:[%s23629_s0 + %s20536_s10]]  }
0x4618   :  { %v13326_v20 = vpop.xlane.xlu1 %13325 }
0x4619   :  { %v13328_v44 = vmul.f32 0.03125, %v13326_v20  ;;  %v13323_v46 = vpop.xlane.xlu0 %13322 }
0x461a   :  { %v13327_v28 = vmul.f32 0.03125, %v13323_v46  ;;  %v15916_v46 = vld [vmem:[%s22297_s29 + $0x338] sm:$0xff] }
0x461b   :  { %v23102_v32 = vsub.f32 %v13320_v19, %v13328_v44  ;;  %v15883_v19 = vld [vmem:[%s22297_s29 + $0x230] sm:$0xff]  ;;  %v15930_v44 = vld [vmem:[%s22297_s29 + $0x3a8] sm:$0xff] }
0x461c   :  { %v13329_v1 = vsub.f32 %v13319_v25, %v13327_v28  ;;  %v15899_v25 = vld [vmem:[%s22297_s29 + $0x2b0] sm:$0xff]  ;;  %v15932_v28 = vld [vmem:[%s22297_s29 + $0x3b8] sm:$0xff]  ;;  %v19612_v37 = vpack.c.bf16 %v15930_v44, %v15914_v33  ;;  %v15938_v33 = vld [vmem:[%s22297_s29 + $0x3e8] sm:$0xff] }
0x461d   :  { %v13332_v14 = vmul.f32 %v23102_v32, %v23102_v32  ;;  %v19620_v7 = vpack.c.bf16 %v15932_v28, %v15916_v46  ;;  %v15940_v44 = vld [vmem:[%s22297_s29 + $0x3f8] sm:$0xff] }
0x461e   :  { %v13331_v2 = vmul.f32 %v13329_v1, %v13329_v1 }
0x461f   :  { %v13336_v30 = vsel %vm279_vm1, %v13332_v14, 0.0  ;;  %v19618_v14 = vpack.c.bf16 %v15899_v25, %v15883_v19 }
0x4620   :  { %v13333_v6 = vsel %vm279_vm1, %v13331_v2, 0.0 }
0x4621   :  { %13334 = vadd.xlane.f32.xlu0 %v13333_v6  ;;  %v19610_v6 = vpack.c.bf16 %v15897_v0, %v15881_v43  ;;  %v15905_v43 = vld [vmem:[%s22297_s29 + $0x2e0] sm:$0xff]  ;;  %v15907_v0 = vld [vmem:[%s22297_s29 + $0x2f0] sm:$0xff] }
0x4625   :  { %13337 = vadd.xlane.f32.xlu0 %v13336_v30 }
0x46ae   :  { %v13335_v56 = vpop.xlane.xlu0 %13334 }
0x46af   :  { %v13339_v27 = vmul.f32 0.03125, %v13335_v56  ;;  %v19636_v56 = vpack.c.bf16 %v15936_v42, %v15920_v26  ;;  %v15946_v26 = vld [vmem:[%s22381_s17 + $0x818] sm:$0xff]  ;;  %v19660_v42 = vpack.c.bf16 %v15962_v62, %v15961_v5  ;;  %v15953_v5 = vld [vmem:[%s22381_s17 + $0x850] sm:$0xff] }
0x46b0   :  { %v15954_v62 = vld [vmem:[%s22381_s17 + $0x858] sm:$0xff] }
0x46b1   :  { %v13341_v22 = vadd.f32 1e-05, %v13339_v27  ;;  %v15890_v27 = vld [vmem:[%s22297_s29 + $0x268] sm:$0xff] }
0x46b2   :  { %v13338_v54 = vpop.xlane.xlu0 %13337 }
0x46b3   :  { %20473 = vrsqrt.f32 %v13341_v22  ;;  %v13340_v18 = vmul.f32 0.03125, %v13338_v54  ;;  %v15906_v22 = vld [vmem:[%s22297_s29 + $0x2e8] sm:$0xff]  ;;  %v15892_v54 = vld [vmem:[%s22297_s29 + $0x278] sm:$0xff] }
0x46b4   :  { %v19640_v19 = vpack.c.bf16 %v15906_v22, %v15890_v27  ;;  %v15947_v22 = vld [vmem:[%s22381_s17 + $0x820] sm:$0xff] }
0x46b5   :  { %v13342_v4 = vadd.f32 1e-05, %v13340_v18  ;;  %v15908_v18 = vld [vmem:[%s22297_s29 + $0x2f8] sm:$0xff] }
0x46b6   :  { %v19648_v25 = vpack.c.bf16 %v15908_v18, %v15892_v54  ;;  %v15948_v54 = vld [vmem:[%s22381_s17 + $0x828] sm:$0xff] }
0x46b7   :  { %20475 = vrsqrt.f32 %v13342_v4  ;;  %v19630_v4 = vpack.c.bf16 %v15933_v21, %v15917_v60  ;;  %v15978_v60 = vld [vmem:[%s22381_s17 + $0x918] sm:$0xff]  ;;  %v15963_v21 = vld [vmem:[%s22381_s17 + $0x8a0] sm:$0xff] }
0x46bd   :  { %v20474_v58 = vpop.eup %20473 }
0x46be   :  { %v13345_v63 = vmul.f32 %v20474_v58, %v13329_v1  ;;  %v15913_v1 = vld [vmem:[%s22297_s29 + $0x320] sm:$0xff]  ;;  %v19638_v58 = vpack.c.bf16 %v15935_v31, %v15919_v15  ;;  %v15964_v15 = vld [vmem:[%s22381_s17 + $0x8a8] sm:$0xff] }
0x46bf   :  { %v19614_v35 = vpack.c.bf16 %v15929_v36, %v15913_v1  ;;  %v15939_v1 = vld [vmem:[%s22297_s29 + $0x3f0] sm:$0xff]  ;;  %v15995_v31 = vld [vmem:[%s22381_s17 + $0x9a0] sm:$0xff]  ;;  %v19664_v18 = vpack.c.bf16 %v15964_v15, %v15963_v21 }
0x46c0   :  { %v13353_v20 = vmul.f32 %v15875_v16, %v13345_v63  ;;  %v15891_v63 = vld [vmem:[%s22297_s29 + $0x270] sm:$0xff]  ;;  %v15955_v21 = vld [vmem:[%s22381_s17 + $0x860] sm:$0xff] }
0x46c1   :  { %v20476_v2 = vpop.eup %20475  ;;  %v19650_v28 = vpack.c.bf16 %v15907_v0, %v15891_v63  ;;  %v15997_v63 = vld [vmem:[%s22381_s17 + $0x9b0] sm:$0xff]  ;;  %v15998_v0 = vld [vmem:[%s22381_s17 + $0x9b8] sm:$0xff] }
0x46c2   :  { %v23139_v30 = vadd.f32 %v15876_v38, %v13353_v20  ;;  %v13346_v61 = vmul.f32 %v20476_v2, %v23102_v32  ;;  %v15904_v32 = vld [vmem:[%s22297_s29 + $0x2d8] sm:$0xff]  ;;  %v15921_v2 = vld [vmem:[%s22297_s29 + $0x360] sm:$0xff] }
0x46c3   :  { %v19632_v9 = vpack.c.bf16 %v15904_v32, %v15888_v51  ;;  %v15924_v20 = vld [vmem:[%s22297_s29 + $0x378] sm:$0xff]  ;;  %v15944_v51 = vld [vmem:[%s22381_s17 + $0x808] sm:$0xff]  ;;  %v19656_v32 = vpack.c.bf16 %v15960_v41, %v15959_v29  ;;  %v15951_v29 = vld [vmem:[%s22381_s17 + $0x840] sm:$0xff] }
0x46c4   :  { %v13354_v57 = vmul.f32 %v15875_v16, %v13346_v61  ;;  %16200 = vmatmul.mubr.msk.f32.vlgmr.msra.gmra.mrb[156].mxu1 %vm279_vm1, %v23139_v30  ;;  %16202 = vmatmul.mubr.msk.f32.vlgmr.msra.gmra.mrb[162].mxu0 %vm279_vm1, %v23139_v30  ;;  %v15889_v16 = vld [vmem:[%s22297_s29 + $0x260] sm:$0xff]  ;;  %v19652_v36 = vpack.c.bf16 %v15940_v44, %v15924_v20  ;;  %v19700_v44 = vpack.c.bf16 %v15998_v0, %v15997_v63  ;;  %v15952_v41 = vld [vmem:[%s22381_s17 + $0x848] sm:$0xff]  ;;  %v15958_v63 = vld [vmem:[%s22381_s17 + $0x878] sm:$0xff] }
0x46c5   :  { %19611 = vmatpush1.bf16.msra.mxu1 %v19610_v6  ;;  %19619 = vmatpush1.bf16.msra.mxu0 %v19618_v14  ;;  %v19642_v46 = vpack.c.bf16 %v15905_v43, %v15889_v16  ;;  %v15937_v6 = vld [vmem:[%s22297_s29 + $0x3e0] sm:$0xff]  ;;  %v15923_v14 = vld [vmem:[%s22297_s29 + $0x370] sm:$0xff]  ;;  %v15980_v16 = vld [vmem:[%s22381_s17 + $0x928] sm:$0xff] }
0x46c6   :  { %v23154_v3 = vadd.f32 %v15876_v38, %v13354_v57  ;;  %13848 = vmatprep.mubr.f32.mxu1 %v23661_v12  ;;  %13925 = vmatprep.mubr.f32.mxu0 %v23661_v12  ;;  %v15922_v38 = vld [vmem:[%s22297_s29 + $0x368] sm:$0xff]  ;;  %v19646_v17 = vpack.c.bf16 %v15937_v6, %v15921_v2  ;;  %v19654_v57 = vpack.c.bf16 %v15939_v1, %v15923_v14  ;;  %v15965_v43 = vld [vmem:[%s22381_s17 + $0x8b0] sm:$0xff]  ;;  %v15967_v2 = vld [vmem:[%s22381_s17 + $0x8c0] sm:$0xff] }
0x46c7   :  { %19613 = vmatprep.subr.bf16.mxu1 %v19612_v37  ;;  %19621 = vmatprep.subr.bf16.mxu0 %v19620_v7  ;;  %v19644_v61 = vpack.c.bf16 %v15938_v33, %v15922_v38  ;;  %v15991_v37 = vld [vmem:[%s22381_s17 + $0x980] sm:$0xff]  ;;  %v15992_v7 = vld [vmem:[%s22381_s17 + $0x988] sm:$0xff]  ;;  %v15949_v38 = vld [vmem:[%s22381_s17 + $0x830] sm:$0xff] }
0x46c8   :  { %16201 = vmatmul.mubr.msk.f32.gmra.mrb[158].mxu1 %vm279_vm1, %v23154_v3  ;;  %16203 = vmatmul.mubr.msk.f32.gmra.mrb[164].mxu0 %vm279_vm1, %v23154_v3  ;;  %v15950_v33 = vld [vmem:[%s22381_s17 + $0x838] sm:$0xff]  ;;  %v15968_v6 = vld [vmem:[%s22381_s17 + $0x8c8] sm:$0xff]  ;;  %v15999_v14 = vld [vmem:[%s22381_s17 + $0x9c0] sm:$0xff] }
0x46c9   :  { %19615 = vmatpush1.bf16.msra.mxu1 %v19614_v35  ;;  %19623 = vmatpush1.bf16.msra.mxu0 %v19622_v8  ;;  %v19688_v35 = vpack.c.bf16 %v15992_v7, %v15991_v37  ;;  %v15975_v8 = vld [vmem:[%s22381_s17 + $0x900] sm:$0xff]  ;;  %v16000_v1 = vld [vmem:[%s22381_s17 + $0x9c8] sm:$0xff]  ;;  %v19672_v37 = vpack.c.bf16 %v15968_v6, %v15967_v2 }
0x46ca   :  { %13996 = vmatprep.mubr.f32.mxu1 %v23661_v12  ;;  %14073 = vmatprep.mubr.f32.mxu0 %v23661_v12  ;;  %v19690_v45 = vpack.c.bf16 %v15976_v55, %v15975_v8  ;;  %v19704_v7 = vpack.c.bf16 %v16000_v1, %v15999_v14  ;;  %v19674_v8 = vpack.c.bf16 %v15952_v41, %v15951_v29  ;;  %v16056_v2 = vld [vmem:[%s22381_s17 + $0xb88] sm:$0xff]  ;;  %v23294_v14 = vld [vmem:[%s22503_s15 + $0x10] sm:$0xff]  ;;  %v16007_v41 = vld [vmem:[%s22381_s17 + $0xa00] sm:$0xff] }
0x46cb   :  { %19625 = vmatprep.subr.bf16.mxu1 %v19624_v48  ;;  %19633 = vmatprep.subr.bf16.mxu0 %v19632_v9  ;;  %v15994_v48 = vld [vmem:[%s22381_s17 + $0x998] sm:$0xff]  ;;  %v19658_v9 = vpack.c.bf16 %v15944_v51, %v15943_v40  ;;  %v15969_v40 = vld [vmem:[%s22381_s17 + $0x8d0] sm:$0xff]  ;;  %v13695_v1 = vrot.slane %v23294_v14, %v20944_v49  ;;  %v13707_v29 = vrot.slane %v23294_v14, %v20956_v53 }
0x46cc   :  { %16204 = vmatmul.mubr.msk.f32.vlgmr.msra.gmra.mrb[160].mxu1 %vm279_vm1, %v23139_v30  ;;  %16206 = vmatmul.mubr.msk.f32.vlgmr.msra.gmra.mrb[166].mxu0 %vm279_vm1, %v23139_v30  ;;  %v15970_v51 = vld [vmem:[%s22381_s17 + $0x8d8] sm:$0xff] }
0x46cd   :  { %19627 = vmatpush1.bf16.msra.mxu1 %v19626_v39  ;;  %19635 = vmatpush1.bf16.msra.mxu0 %v19634_v24  ;;  %v19692_v39 = vpack.c.bf16 %v15994_v48, %v15993_v34  ;;  %v15977_v24 = vld [vmem:[%s22381_s17 + $0x910] sm:$0xff]  ;;  %v19676_v34 = vpack.c.bf16 %v15970_v51, %v15969_v40  ;;  %v16040_v40 = vld [vmem:[%s22381_s17 + $0xb08] sm:$0xff] }
0x46ce   :  { %14002 = vmatprep.mubr.f32.mxu1 %v23661_v12  ;;  %14079 = vmatprep.mubr.f32.mxu0 %v23661_v12  ;;  %v19694_v27 = vpack.c.bf16 %v15978_v60, %v15977_v24  ;;  %v19678_v24 = vpack.c.bf16 %v15954_v62, %v15953_v5  ;;  %v16025_v51 = vld [vmem:[%s22381_s17 + $0xa90] sm:$0xff]  ;;  %v16026_v5 = vld [vmem:[%s22381_s17 + $0xa98] sm:$0xff] }
0x46cf   :  { %19629 = vmatprep.subr.bf16.mxu1 %v19628_v47  ;;  %19637 = vmatprep.subr.bf16.mxu0 %v19636_v56  ;;  %v15996_v47 = vld [vmem:[%s22381_s17 + $0x9a8] sm:$0xff]  ;;  %v19662_v56 = vpack.c.bf16 %v15946_v26, %v15945_v13  ;;  %v15971_v13 = vld [vmem:[%s22381_s17 + $0x8e0] sm:$0xff]  ;;  %v16057_v62 = vld [vmem:[%s22381_s17 + $0xb90] sm:$0xff] }
0x46d0   :  { %16205 = vmatmul.mubr.msk.f32.gmra.mrb[162].mxu1 %vm279_vm1, %v23154_v3  ;;  %16207 = vmatmul.mubr.msk.f32.gmra.mrb[168].mxu0 %vm279_vm1, %v23154_v3  ;;  %v15972_v26 = vld [vmem:[%s22381_s17 + $0x8e8] sm:$0xff] }
0x46d1   :  { %19631 = vmatpush1.bf16.msra.mxu1 %v19630_v4  ;;  %19639 = vmatpush1.bf16.msra.mxu0 %v19638_v58  ;;  %v19696_v4 = vpack.c.bf16 %v15996_v47, %v15995_v31  ;;  %v15979_v58 = vld [vmem:[%s22381_s17 + $0x920] sm:$0xff]  ;;  %v19680_v15 = vpack.c.bf16 %v15972_v26, %v15971_v13  ;;  %v15956_v47 = vld [vmem:[%s22381_s17 + $0x868] sm:$0xff]  ;;  %v23314_v26 = vrot.slane %v23294_v14, %v20969_v59 }
0x46d2   :  { %14150 = vmatprep.mubr.f32.mxu1 %v23661_v12  ;;  %14227 = vmatprep.mubr.f32.mxu0 %v23661_v12 }
0x46d3   :  { %19641 = vmatprep.subr.bf16.mxu1 %v19640_v19  ;;  %19649 = vmatprep.subr.bf16.mxu0 %v19648_v25  ;;  %v19666_v19 = vpack.c.bf16 %v15948_v54, %v15947_v22  ;;  %v19698_v25 = vpack.c.bf16 %v15980_v16, %v15979_v58  ;;  %v19682_v22 = vpack.c.bf16 %v15956_v47, %v15955_v21  ;;  %v16005_v58 = vld [vmem:[%s22381_s17 + $0x9f0] sm:$0xff]  ;;  %v16010_v47 = vld [vmem:[%s22381_s17 + $0xa18] sm:$0xff] }
0x46d4   :  { %16208 = vmatmul.mubr.msk.f32.vlgmr.msra.gmra.mrb[164].mxu1 %vm279_vm1, %v23139_v30  ;;  %16210 = vmatmul.mubr.msk.f32.vlgmr.msra.gmra.mrb[170].mxu0 %vm279_vm1, %v23139_v30 }
0x46d5   :  { %19643 = vmatpush1.bf16.msra.mxu1 %v19642_v46  ;;  %19651 = vmatpush1.bf16.msra.mxu0 %v19650_v28  ;;  %v15981_v46 = vld [vmem:[%s22381_s17 + $0x930] sm:$0xff]  ;;  %v15982_v28 = vld [vmem:[%s22381_s17 + $0x938] sm:$0xff] }
0x46d6   :  { %14156 = vmatprep.mubr.f32.mxu1 %v23661_v12  ;;  %14233 = vmatprep.mubr.f32.mxu0 %v23661_v12 }
0x46d7   :  { %19645 = vmatprep.subr.bf16.mxu1 %v19644_v61  ;;  %19653 = vmatprep.subr.bf16.mxu0 %v19652_v36  ;;  %v19670_v61 = vpack.c.bf16 %v15950_v33, %v15949_v38  ;;  %v19702_v36 = vpack.c.bf16 %v15982_v28, %v15981_v46  ;;  %v15990_v38 = vld [vmem:[%s22381_s17 + $0x978] sm:$0xff]  ;;  %v16055_v46 = vld [vmem:[%s22381_s17 + $0xb80] sm:$0xff] }
0x46d8   :  { %16209 = vmatmul.mubr.msk.f32.gmra.mrb[166].mxu1 %vm279_vm1, %v23154_v3  ;;  %16211 = vmatmul.mubr.msk.f32.gmra.mrb[172].mxu0 %vm279_vm1, %v23154_v3  ;;  %v19752_v6 = vpack.c.bf16 %v16056_v2, %v16055_v46 }
0x46d9   :  { %19647 = vmatpush1.bf16.msra.mxu1 %v19646_v17  ;;  %19655 = vmatpush1.bf16.msra.mxu0 %v19654_v57  ;;  %v15983_v17 = vld [vmem:[%s22381_s17 + $0x940] sm:$0xff]  ;;  %v15984_v57 = vld [vmem:[%s22381_s17 + $0x948] sm:$0xff] }
0x46da   :  { %14304 = vmatprep.mubr.f32.mxu1 %v23661_v12  ;;  %14381 = vmatprep.mubr.f32.mxu0 %v23661_v12  ;;  %v19706_v55 = vpack.c.bf16 %v15984_v57, %v15983_v17  ;;  %v16039_v57 = vld [vmem:[%s22381_s17 + $0xb00] sm:$0xff] }
0x46db   :  { %19657 = vmatprep.subr.bf16.mxu1 %v19656_v32  ;;  %19689 = vmatprep.subr.bf16.mxu0 %v19688_v35  ;;  %v16001_v32 = vld [vmem:[%s22381_s17 + $0x9d0] sm:$0xff]  ;;  %v16002_v35 = vld [vmem:[%s22381_s17 + $0x9d8] sm:$0xff]  ;;  %v19754_v13 = vpack.c.bf16 %v16040_v40, %v16039_v57  ;;  %v16044_v57 = vld [vmem:[%s22381_s17 + $0xb28] sm:$0xff] }
0x46dc   :  { %16212 = vmatmul.mubr.msk.f32.vlgmr.msra.gmra.mrb[168].mxu1 %vm279_vm1, %v23139_v30  ;;  %16214 = vmatmul.mubr.msk.f32.vlgmr.msra.gmra.mrb[174].mxu0 %vm279_vm1, %v23139_v30  ;;  %v19708_v48 = vpack.c.bf16 %v16002_v35, %v16001_v32  ;;  %v16029_v40 = vld [vmem:[%s22381_s17 + $0xab0] sm:$0xff] }
0x46dd   :  { %14310 = vmatprep.mubr.f32.mxu1 %v23661_v12  ;;  %14387 = vmatprep.mubr.f32.mxu0 %v23661_v12  ;;  %v15966_v12 = vld [vmem:[%s22381_s17 + $0x8b8] sm:$0xff] }
0x46de   :  { %19659 = vmatpush3.bf16.msra.mxu1 %v19658_v9  ;;  %19691 = vmatpush3.bf16.msra.mxu0 %v19690_v45  ;;  %v19668_v20 = vpack.c.bf16 %v15966_v12, %v15965_v43  ;;  %v15985_v9 = vld [vmem:[%s22381_s17 + $0x950] sm:$0xff]  ;;  %v15986_v45 = vld [vmem:[%s22381_s17 + $0x958] sm:$0xff] }
0x46df   :  { %19661 = vmatprep.subr.bf16.mxu1 %v19660_v42  ;;  %19693 = vmatprep.subr.bf16.mxu0 %v19692_v39  ;;  %v16003_v42 = vld [vmem:[%s22381_s17 + $0x9e0] sm:$0xff]  ;;  %v16004_v39 = vld [vmem:[%s22381_s17 + $0x9e8] sm:$0xff]  ;;  %v19710_v60 = vpack.c.bf16 %v15986_v45, %v15985_v9  ;;  %v16006_v43 = vld [vmem:[%s22381_s17 + $0x9f8] sm:$0xff] }
0x46e0   :  { %16213 = vmatmul.mubr.msk.f32.gmra.mrb[170].mxu1 %vm279_vm1, %v23154_v3  ;;  %16215 = vmatmul.mubr.msk.f32.gmra.mrb[176].mxu0 %vm279_vm1, %v23154_v3  ;;  %v19712_v31 = vpack.c.bf16 %v16004_v39, %v16003_v42  ;;  %v15957_v12 = vld [vmem:[%s22381_s17 + $0x870] sm:$0xff]  ;;  %v19716_v0 = vpack.c.bf16 %v16006_v43, %v16005_v58  ;;  %v16027_v43 = vld [vmem:[%s22381_s17 + $0xaa0] sm:$0xff] }
0x46e1   :  { %v16009_v42 = vld [vmem:[%s22381_s17 + $0xa10] sm:$0xff] }
0x46e2   :  { %19663 = vmatpush3.bf16.msra.mxu1 %v19662_v56  ;;  %19695 = vmatpush3.bf16.msra.mxu0 %v19694_v27  ;;  %v15987_v56 = vld [vmem:[%s22381_s17 + $0x960] sm:$0xff]  ;;  %v15988_v27 = vld [vmem:[%s22381_s17 + $0x968] sm:$0xff]  ;;  %v19726_v2 = vpack.c.bf16 %v16010_v47, %v16009_v42  ;;  %v16014_v42 = vld [vmem:[%s22381_s17 + $0xa38] sm:$0xff] }
0x46e3   :  { %19665 = vmatprep.subr.bf16.mxu1 %v19664_v18  ;;  %19697 = vmatprep.subr.bf16.mxu0 %v19696_v4  ;;  %v19714_v54 = vpack.c.bf16 %v15988_v27, %v15987_v56  ;;  %v15973_v18 = vld [vmem:[%s22381_s17 + $0x8f0] sm:$0xff]  ;;  %v15974_v4 = vld [vmem:[%s22381_s17 + $0x8f8] sm:$0xff]  ;;  %v16031_v47 = vld [vmem:[%s22381_s17 + $0xac0] sm:$0xff] }
0x46e4   :  { %v19684_v16 = vpack.c.bf16 %v15974_v4, %v15973_v18  ;;  %v16041_v56 = vld [vmem:[%s22381_s17 + $0xb10] sm:$0xff] }
0x46e6   :  { %19667 = vmatpush3.bf16.msra.mxu1 %v19666_v19  ;;  %19699 = vmatpush3.bf16.msra.mxu0 %v19698_v25  ;;  %v19686_v19 = vpack.c.bf16 %v15958_v63, %v15957_v12  ;;  %v15989_v25 = vld [vmem:[%s22381_s17 + $0x970] sm:$0xff] }
0x46e7   :  { %19669 = vmatprep.subr.bf16.mxu1 %v19668_v20  ;;  %19701 = vmatprep.subr.bf16.mxu0 %v19700_v44  ;;  %v19718_v33 = vpack.c.bf16 %v15990_v38, %v15989_v25  ;;  %v16023_v20 = vld [vmem:[%s22381_s17 + $0xa80] sm:$0xff]  ;;  %v16024_v44 = vld [vmem:[%s22381_s17 + $0xa88] sm:$0xff] }
0x46e8   :  { %v19720_v28 = vpack.c.bf16 %v16024_v44, %v16023_v20  ;;  %v16059_v25 = vld [vmem:[%s22381_s17 + $0xba0] sm:$0xff]  ;;  %v16060_v38 = vld [vmem:[%s22381_s17 + $0xba8] sm:$0xff] }
0x46ea   :  { %19671 = vmatpush3.bf16.msra.mxu1 %v19670_v61  ;;  %19703 = vmatpush3.bf16.msra.mxu0 %v19702_v36  ;;  %v13703_v61 = vrot.slane %v23294_v14, %v20947_v50  ;;  %v13699_v36 = vrot.slane %v23294_v14, %v20953_v52 }
0x46eb   :  { %19673 = vmatprep.subr.bf16.mxu1 %v19672_v37  ;;  %19705 = vmatprep.subr.bf16.mxu0 %v19704_v7  ;;  %v16008_v37 = vld [vmem:[%s22381_s17 + $0xa08] sm:$0xff] }
0x46ec   :  { %v19722_v45 = vpack.c.bf16 %v16008_v37, %v16007_v41 }
0x46ee   :  { %19675 = vmatpush3.bf16.msra.mxu1 %v19674_v8  ;;  %19707 = vmatpush3.bf16.msra.mxu0 %v19706_v55 }
0x46ef   :  { %19677 = vmatprep.subr.bf16.mxu1 %v19676_v34  ;;  %19709 = vmatprep.subr.bf16.mxu0 %v19708_v48  ;;  %v16058_v34 = vld [vmem:[%s22381_s17 + $0xb98] sm:$0xff] }
0x46f2   :  { %19679 = vmatpush3.bf16.msra.mxu1 %v19678_v24  ;;  %19711 = vmatpush3.bf16.msra.mxu0 %v19710_v60 }
0x46f3   :  { %19681 = vmatprep.subr.bf16.mxu1 %v19680_v15  ;;  %19713 = vmatprep.subr.bf16.mxu0 %v19712_v31  ;;  %v19724_v15 = vpack.c.bf16 %v16026_v5, %v16025_v51  ;;  %v19756_v31 = vpack.c.bf16 %v16058_v34, %v16057_v62 }
0x46f6   :  { %19683 = vmatpush3.bf16.msra.mxu1 %v19682_v22  ;;  %19715 = vmatpush3.bf16.msra.mxu0 %v19714_v54 }
0x46f7   :  { %19685 = vmatprep.subr.bf16.mxu1 %v19684_v16  ;;  %19717 = vmatprep.subr.bf16.mxu0 %v19716_v0  ;;  %v16042_v16 = vld [vmem:[%s22381_s17 + $0xb18] sm:$0xff]  ;;  %v23323_v0 = vrot.slane %v23294_v14, %v20978_v10 }
0x46fa   :  { %19687 = vmatpush3.bf16.msra.mxu1 %v19686_v19  ;;  %19719 = vmatpush3.bf16.msra.mxu0 %v19718_v33  ;;  %v16028_v19 = vld [vmem:[%s22381_s17 + $0xaa8] sm:$0xff]  ;;  %v16011_v33 = vld [vmem:[%s22381_s17 + $0xa20] sm:$0xff] }
0x46fb   :  { %19721 = vmatprep.subr.bf16.mxu1 %v19720_v28  ;;  %19753 = vmatprep.subr.bf16.mxu0 %v19752_v6  ;;  %v19758_v6 = vpack.c.bf16 %v16042_v16, %v16041_v56  ;;  %v16032_v56 = vld [vmem:[%s22381_s17 + $0xac8] sm:$0xff]  ;;  %v16015_v16 = vld [vmem:[%s22381_s17 + $0xa40] sm:$0xff] }
0x4797   :  { %v13844_v7 = vpop.f32.mrb[156].mxu1  ;;  %v13921_v17 = vpop.f32.mrb[162].mxu0 }
0x4798   :  { %v13845_v32 = vadd.f32 %v13844_v7, %v13695_v1  ;;  %v13922_v35 = vadd.f32 %v13921_v17, %v13703_v61  ;;  %v13846_v8 = vpop.f32.mrb[157].mxu1  ;;  %v13923_v55 = vpop.f32.mrb[163].mxu0  ;;  %v19728_v7 = vpack.c.bf16 %v16028_v19, %v16027_v43  ;;  %v19760_v17 = vpack.c.bf16 %v16060_v38, %v16059_v25  ;;  %v16016_v43 = vld [vmem:[%s22381_s17 + $0xa48] sm:$0xff]  ;;  %v16047_v38 = vld [vmem:[%s22381_s17 + $0xb40] sm:$0xff] }
0x4799   :  { %v13847_v48 = vadd.f32 %v13846_v8, %v13699_v36  ;;  %v13924_v9 = vadd.f32 %v13923_v55, %v13707_v29  ;;  %v16061_v8 = vld [vmem:[%s22381_s17 + $0xbb0] sm:$0xff]  ;;  %v16062_v55 = vld [vmem:[%s22381_s17 + $0xbb8] sm:$0xff]  ;;  %v19736_v19 = vpack.c.bf16 %v16032_v56, %v16031_v47  ;;  %v16051_v56 = vld [vmem:[%s22381_s17 + $0xb60] sm:$0xff] }
0x479a   :  { %v14394_v27 = vmax.f32 %v13845_v32, 0.0  ;;  %v14396_v22 = vmax.f32 %v13922_v35, 0.0  ;;  %v16030_v35 = vld [vmem:[%s22381_s17 + $0xab8] sm:$0xff] }
0x479b   :  { %v14395_v39 = vmax.f32 %v13847_v48, 0.0  ;;  %v14397_v24 = vmax.f32 %v13924_v9, 0.0  ;;  %v13850_v60 = vpop.f32.mrb[158].mxu1  ;;  %v13927_v21 = vpop.f32.mrb[164].mxu0 }
0x479c   :  { %v13851_v54 = vadd.f32 %v13850_v60, %v13695_v1  ;;  %v13928_v18 = vadd.f32 %v13927_v21, %v13703_v61  ;;  %v13852_v4 = vpop.f32.mrb[159].mxu1  ;;  %v13929_v58 = vpop.f32.mrb[165].mxu0  ;;  %v16012_v1 = vld [vmem:[%s22381_s17 + $0xa28] sm:$0xff]  ;;  %v16043_v61 = vld [vmem:[%s22381_s17 + $0xb20] sm:$0xff]  ;;  %v19732_v60 = vpack.c.bf16 %v16030_v35, %v16029_v40  ;;  %v19764_v21 = vpack.c.bf16 %v16062_v55, %v16061_v8 }
0x479d   :  { %v13853_v12 = vadd.f32 %v13852_v4, %v13699_v36  ;;  %v13930_v63 = vadd.f32 %v13929_v58, %v13707_v29  ;;  %14496 = vmatprep.mubr.f32.mxu1 %v14395_v39  ;;  %14571 = vmatprep.mubr.f32.mxu0 %v14397_v24  ;;  %v19730_v9 = vpack.c.bf16 %v16012_v1, %v16011_v33  ;;  %v16048_v33 = vld [vmem:[%s22381_s17 + $0xb48] sm:$0xff]  ;;  %v16035_v35 = vld [vmem:[%s22381_s17 + $0xae0] sm:$0xff] }
0x479e   :  { %14497 = vmatmul.mubr.f32.vlgmr.msra.gmra.mrb[172].mxu1 %v14394_v27  ;;  %14572 = vmatmul.mubr.f32.vlgmr.msra.gmra.mrb[178].mxu0 %v14396_v22  ;;  %v14410_v36 = vmax.f32 %v13851_v54, 0.0  ;;  %v14412_v29 = vmax.f32 %v13928_v18, 0.0  ;;  %v16063_v27 = vld [vmem:[%s22381_s17 + $0xbc0] sm:$0xff]  ;;  %v16064_v22 = vld [vmem:[%s22381_s17 + $0xbc8] sm:$0xff] }
0x479f   :  { %v14411_v20 = vmax.f32 %v13853_v12, 0.0  ;;  %v14413_v44 = vmax.f32 %v13930_v63, 0.0  ;;  %19723 = vmatpush3.bf16.msra.mxu1 %v19722_v45  ;;  %19755 = vmatpush3.bf16.msra.mxu0 %v19754_v13  ;;  %v23329_v46 = vpop.f32.mrb[160].mxu1  ;;  %v23331_v28 = vpop.f32.mrb[166].mxu0  ;;  %v19762_v45 = vpack.c.bf16 %v16044_v57, %v16043_v61  ;;  %v16013_v13 = vld [vmem:[%s22381_s17 + $0xa30] sm:$0xff]  ;;  %v19768_v25 = vpack.c.bf16 %v16064_v22, %v16063_v27  ;;  %v16036_v8 = vld [vmem:[%s22381_s17 + $0xae8] sm:$0xff] }
0x47a0   :  { %v14000_v41 = vpop.f32.mrb[161].mxu1  ;;  %v14077_v37 = vpop.f32.mrb[167].mxu0  ;;  %19725 = vmatprep.subr.bf16.mxu1 %v19724_v15  ;;  %19757 = vmatprep.subr.bf16.mxu0 %v19756_v31  ;;  %v16045_v15 = vld [vmem:[%s22381_s17 + $0xb30] sm:$0xff]  ;;  %v16046_v31 = vld [vmem:[%s22381_s17 + $0xb38] sm:$0xff]  ;;  %v19734_v4 = vpack.c.bf16 %v16014_v42, %v16013_v13  ;;  %v16067_v55 = vld [vmem:[%s22381_s17 + $0xbe0] sm:$0xff] }
0x47a1   :  { %v14001_v51 = vadd.f32 %v14000_v41, %v23314_v26  ;;  %v14078_v32 = vadd.f32 %v14077_v37, %v23323_v0  ;;  %14501 = vmatprep.mubr.f32.mxu1 %v14411_v20  ;;  %14576 = vmatprep.mubr.f32.mxu0 %v14413_v44  ;;  %v19766_v58 = vpack.c.bf16 %v16046_v31, %v16045_v15  ;;  %v16033_v20 = vld [vmem:[%s22381_s17 + $0xad0] sm:$0xff]  ;;  %v16034_v44 = vld [vmem:[%s22381_s17 + $0xad8] sm:$0xff]  ;;  %v16019_v42 = vld [vmem:[%s22381_s17 + $0xa60] sm:$0xff] }
0x47a2   :  { %14502 = vmatmul.mubr.f32.gmra.mrb[174].mxu1 %v14410_v36  ;;  %14577 = vmatmul.mubr.f32.gmra.mrb[180].mxu0 %v14412_v29  ;;  %v19738_v36 = vpack.c.bf16 %v16016_v43, %v16015_v16  ;;  %v19770_v29 = vpack.c.bf16 %v16048_v33, %v16047_v38  ;;  %v16017_v41 = vld [vmem:[%s22381_s17 + $0xa50] sm:$0xff]  ;;  %v16018_v37 = vld [vmem:[%s22381_s17 + $0xa58] sm:$0xff]  ;;  %v19740_v57 = vpack.c.bf16 %v16034_v44, %v16033_v20  ;;  %v16052_v27 = vld [vmem:[%s22381_s17 + $0xb68] sm:$0xff] }
0x47a3   :  { %v14399_v5 = vmax.f32 %v14001_v51, 0.0  ;;  %v14401_v62 = vmax.f32 %v14078_v32, 0.0  ;;  %19727 = vmatpush3.bf16.msra.mxu1 %v19726_v2  ;;  %19759 = vmatpush3.bf16.msra.mxu0 %v19758_v6  ;;  %v23342_v34 = vpop.f32.mrb[162].mxu1  ;;  %v23344_v48 = vpop.f32.mrb[168].mxu0  ;;  %v16065_v2 = vld [vmem:[%s22381_s17 + $0xbd0] sm:$0xff]  ;;  %v16066_v6 = vld [vmem:[%s22381_s17 + $0xbd8] sm:$0xff]  ;;  %v19744_v31 = vpack.c.bf16 %v16036_v8, %v16035_v35  ;;  %v13711_v43 = vrot.slane %v23294_v14, %v21059_v11 }
0x47a4   :  { %v23348_v39 = vpop.f32.mrb[163].mxu1  ;;  %v23350_v24 = vpop.f32.mrb[169].mxu0  ;;  %19729 = vmatprep.subr.bf16.mxu1 %v19728_v7  ;;  %19761 = vmatprep.subr.bf16.mxu0 %v19760_v17  ;;  %v19772_v40 = vpack.c.bf16 %v16066_v6, %v16065_v2  ;;  %v16049_v51 = vld [vmem:[%s22381_s17 + $0xb50] sm:$0xff]  ;;  %v16050_v32 = vld [vmem:[%s22381_s17 + $0xb58] sm:$0xff]  ;;  %v19778_v33 = vpack.c.bf16 %v16052_v27, %v16051_v56  ;;  %v13719_v6 = vrot.slane %v23294_v14, %v21068_v23  ;;  %v16120_v35 = vld [vmem:[%s22381_s17 + $0xd88] sm:$0xff] }
0x47a5   :  { %14646 = vmatprep.mubr.f32.mxu1 %v14399_v5  ;;  %14721 = vmatprep.mubr.f32.mxu0 %v14401_v62  ;;  %v16068_v5 = vld [vmem:[%s22381_s17 + $0xbe8] sm:$0xff]  ;;  %v19774_v13 = vpack.c.bf16 %v16050_v32, %v16049_v51  ;;  %v16037_v22 = vld [vmem:[%s22381_s17 + $0xaf0] sm:$0xff]  ;;  %v16070_v16 = vld [vmem:[%s22381_s17 + $0xbf8] sm:$0xff] }
0x47a6   :  { %v19776_v47 = vpack.c.bf16 %v16068_v5, %v16067_v55  ;;  %v16021_v20 = vld [vmem:[%s22381_s17 + $0xa70] sm:$0xff]  ;;  %v16022_v44 = vld [vmem:[%s22381_s17 + $0xa78] sm:$0xff]  ;;  %v16088_v51 = vld [vmem:[%s22381_s17 + $0xc88] sm:$0xff]  ;;  %v14076_v56 = vadd.f32 %v23331_v28, %v13719_v6 }
0x47a7   :  { %19731 = vmatpush3.bf16.msra.mxu1 %v19730_v9  ;;  %19763 = vmatpush3.bf16.msra.mxu0 %v19762_v45  ;;  %v23358_v54 = vpop.f32.mrb[164].mxu1  ;;  %v23360_v18 = vpop.f32.mrb[170].mxu0  ;;  %v19742_v45 = vpack.c.bf16 %v16018_v37, %v16017_v41  ;;  %v16053_v2 = vld [vmem:[%s22381_s17 + $0xb70] sm:$0xff]  ;;  %v16119_v32 = vld [vmem:[%s22381_s17 + $0xd80] sm:$0xff]  ;;  %v23427_v8 = vld [vmem:[%s22503_s15 + $0x18] sm:$0xff]  ;;  %v19750_v5 = vpack.c.bf16 %v16022_v44, %v16021_v20 }
0x47a8   :  { %v23364_v12 = vpop.f32.mrb[165].mxu1  ;;  %v23366_v63 = vpop.f32.mrb[171].mxu0  ;;  %19733 = vmatprep.subr.bf16.mxu1 %v19732_v60  ;;  %19765 = vmatprep.subr.bf16.mxu0 %v19764_v21  ;;  %v16020_v60 = vld [vmem:[%s22381_s17 + $0xa68] sm:$0xff]  ;;  %v16071_v14 = vld [vmem:[%s22381_s17 + $0xc00] sm:$0xff]  ;;  %v19816_v27 = vpack.c.bf16 %v16120_v35, %v16119_v32  ;;  %v16106_v32 = vld [vmem:[%s22381_s17 + $0xd18] sm:$0xff] }
0x47a9   :  { %v19746_v38 = vpack.c.bf16 %v16020_v60, %v16019_v42  ;;  %v16072_v55 = vld [vmem:[%s22381_s17 + $0xc08] sm:$0xff]  ;;  %v16103_v42 = vld [vmem:[%s22381_s17 + $0xd00] sm:$0xff] }
0x47aa   :  { %v16104_v60 = vld [vmem:[%s22381_s17 + $0xd08] sm:$0xff]  ;;  %v19786_v28 = vpack.c.bf16 %v16072_v55, %v16071_v14  ;;  %v16075_v55 = vld [vmem:[%s22381_s17 + $0xc20] sm:$0xff] }
0x47ab   :  { %19735 = vmatpush3.bf16.msra.mxu1 %v19734_v4  ;;  %19767 = vmatpush3.bf16.msra.mxu0 %v19766_v58  ;;  %v23374_v1 = vpop.f32.mrb[166].mxu1  ;;  %v23376_v61 = vpop.f32.mrb[172].mxu0  ;;  %v16038_v4 = vld [vmem:[%s22381_s17 + $0xaf8] sm:$0xff]  ;;  %v16069_v58 = vld [vmem:[%s22381_s17 + $0xbf0] sm:$0xff]  ;;  %v19818_v20 = vpack.c.bf16 %v16104_v60, %v16103_v42 }
0x47ac   :  { %v23380_v7 = vpop.f32.mrb[167].mxu1  ;;  %v23382_v17 = vpop.f32.mrb[173].mxu0  ;;  %19737 = vmatprep.subr.bf16.mxu1 %v19736_v19  ;;  %19769 = vmatprep.subr.bf16.mxu0 %v19768_v25  ;;  %v19748_v41 = vpack.c.bf16 %v16038_v4, %v16037_v22  ;;  %v19780_v37 = vpack.c.bf16 %v16070_v16, %v16069_v58  ;;  %v16090_v22 = vld [vmem:[%s22381_s17 + $0xc98] sm:$0xff]  ;;  %v16121_v4 = vld [vmem:[%s22381_s17 + $0xd90] sm:$0xff]  ;;  %v14007_v16 = vadd.f32 %v23348_v39, %v23314_v26 }
0x47ad   :  { %v16122_v58 = vld [vmem:[%s22381_s17 + $0xd98] sm:$0xff] }
0x47ae   :  { %v19820_v39 = vpack.c.bf16 %v16122_v58, %v16121_v4  ;;  %v16126_v4 = vld [vmem:[%s22381_s17 + $0xdb8] sm:$0xff] }
0x47af   :  { %19739 = vmatpush3.bf16.msra.mxu1 %v19738_v36  ;;  %19771 = vmatpush3.bf16.msra.mxu0 %v19770_v29  ;;  %v23390_v62 = vpop.f32.mrb[168].mxu1  ;;  %v23392_v9 = vpop.f32.mrb[174].mxu0 }
0x47b0   :  { %v23396_v21 = vpop.f32.mrb[169].mxu1  ;;  %v23398_v15 = vpop.f32.mrb[175].mxu0  ;;  %19741 = vmatprep.subr.bf16.mxu1 %v19740_v57  ;;  %19773 = vmatprep.subr.bf16.mxu0 %v19772_v40  ;;  %v16054_v57 = vld [vmem:[%s22381_s17 + $0xb78] sm:$0xff]  ;;  %v16087_v40 = vld [vmem:[%s22381_s17 + $0xc80] sm:$0xff] }
0x47b3   :  { %19743 = vmatpush3.bf16.msra.mxu1 %v19742_v45  ;;  %19775 = vmatpush3.bf16.msra.mxu0 %v19774_v13  ;;  %v23408_v19 = vpop.f32.mrb[170].mxu1  ;;  %v23410_v25 = vpop.f32.mrb[176].mxu0  ;;  %v19782_v45 = vpack.c.bf16 %v16054_v57, %v16053_v2  ;;  %v19784_v13 = vpack.c.bf16 %v16088_v51, %v16087_v40  ;;  %v16074_v2 = vld [vmem:[%s22381_s17 + $0xc18] sm:$0xff]  ;;  %v16105_v51 = vld [vmem:[%s22381_s17 + $0xd10] sm:$0xff] }
0x47b4   :  { %v23417_v36 = vpop.f32.mrb[171].mxu1  ;;  %v23419_v29 = vpop.f32.mrb[177].mxu0  ;;  %19745 = vmatprep.subr.bf16.mxu1 %v19744_v31  ;;  %19777 = vmatprep.subr.bf16.mxu0 %v19776_v47  ;;  %v16089_v31 = vld [vmem:[%s22381_s17 + $0xc90] sm:$0xff]  ;;  %v13999_v47 = vadd.f32 %v23329_v46, %v13711_v43  ;;  %v23449_v46 = vrot.slane %v23427_v8, %v20956_v53  ;;  %v19822_v14 = vpack.c.bf16 %v16106_v32, %v16105_v51  ;;  %v16111_v32 = vld [vmem:[%s22381_s17 + $0xd40] sm:$0xff] }
0x47b5   :  { %v19788_v26 = vpack.c.bf16 %v16090_v22, %v16089_v31  ;;  %v16073_v53 = vld [vmem:[%s22381_s17 + $0xc10] sm:$0xff]  ;;  %v16107_v31 = vld [vmem:[%s22381_s17 + $0xd20] sm:$0xff] }
0x47b6   :  { %v14398_v44 = vmax.f32 %v13999_v47, 0.0  ;;  %v14232_v40 = vadd.f32 %v23366_v63, %v23449_v46  ;;  %v19790_v63 = vpack.c.bf16 %v16074_v2, %v16073_v53  ;;  %v16108_v47 = vld [vmem:[%s22381_s17 + $0xd28] sm:$0xff]  ;;  %v16125_v22 = vld [vmem:[%s22381_s17 + $0xdb0] sm:$0xff] }
0x47b7   :  { %19747 = vmatpush3.bf16.msra.mxu1 %v19746_v38  ;;  %19779 = vmatpush3.bf16.msra.mxu0 %v19778_v33  ;;  %v14084_v38 = vadd.f32 %v23350_v24, %v23323_v0  ;;  %v23445_v33 = vrot.slane %v23427_v8, %v20953_v52  ;;  %v14400_v0 = vmax.f32 %v14076_v56, 0.0  ;;  %v14005_v24 = vadd.f32 %v23342_v34, %v13711_v43  ;;  %v16091_v34 = vld [vmem:[%s22381_s17 + $0xca0] sm:$0xff]  ;;  %v16093_v56 = vld [vmem:[%s22381_s17 + $0xcb0] sm:$0xff]  ;;  %v16128_v53 = vld [vmem:[%s22381_s17 + $0xdc8] sm:$0xff] }
0x47b8   :  { %19749 = vmatprep.subr.bf16.mxu1 %v19748_v41  ;;  %19781 = vmatprep.subr.bf16.mxu0 %v19780_v37  ;;  %v14082_v52 = vadd.f32 %v23344_v48, %v13719_v6  ;;  %v14415_v41 = vmax.f32 %v14007_v16, 0.0  ;;  %v16092_v48 = vld [vmem:[%s22381_s17 + $0xca8] sm:$0xff]  ;;  %v16123_v43 = vld [vmem:[%s22381_s17 + $0xda0] sm:$0xff]  ;;  %v19826_v16 = vpack.c.bf16 %v16108_v47, %v16107_v31 }
0x47b9   :  { %v14417_v37 = vmax.f32 %v14084_v38, 0.0  ;;  %v14155_v57 = vadd.f32 %v23364_v12, %v23445_v33  ;;  %v16124_v6 = vld [vmem:[%s22381_s17 + $0xda8] sm:$0xff]  ;;  %v14414_v35 = vmax.f32 %v14005_v24, 0.0  ;;  %v19792_v42 = vpack.c.bf16 %v16092_v48, %v16091_v34  ;;  %v16077_v38 = vld [vmem:[%s22381_s17 + $0xc30] sm:$0xff]  ;;  %v16131_v47 = vld [vmem:[%s22381_s17 + $0xde0] sm:$0xff] }
0x47ba   :  { %v14416_v12 = vmax.f32 %v14082_v52, 0.0  ;;  %v19824_v60 = vpack.c.bf16 %v16124_v6, %v16123_v43  ;;  %v16096_v24 = vld [vmem:[%s22381_s17 + $0xcc8] sm:$0xff]  ;;  %v16127_v52 = vld [vmem:[%s22381_s17 + $0xdc0] sm:$0xff]  ;;  %v16097_v48 = vld [vmem:[%s22381_s17 + $0xcd0] sm:$0xff] }
0x47bb   :  { %19751 = vmatpush3.bf16.msra.mxu1 %v19750_v5  ;;  %19783 = vmatpush3.bf16.msra.mxu0 %v19782_v45  ;;  %v16076_v5 = vld [vmem:[%s22381_s17 + $0xc28] sm:$0xff]  ;;  %v14403_v45 = vmax.f32 %v14155_v57, 0.0  ;;  %v19832_v51 = vpack.c.bf16 %v16128_v53, %v16127_v52  ;;  %v16098_v43 = vld [vmem:[%s22381_s17 + $0xcd8] sm:$0xff]  ;;  %v16129_v6 = vld [vmem:[%s22381_s17 + $0xdd0] sm:$0xff] }
0x47bc   :  { %19785 = vmatprep.subr.bf16.mxu1 %v19784_v13  ;;  %19817 = vmatprep.subr.bf16.mxu0 %v19816_v27  ;;  %v14405_v13 = vmax.f32 %v14232_v40, 0.0  ;;  %v16094_v27 = vld [vmem:[%s22381_s17 + $0xcb8] sm:$0xff]  ;;  %v19794_v58 = vpack.c.bf16 %v16076_v5, %v16075_v55  ;;  %v16080_v57 = vld [vmem:[%s22381_s17 + $0xc48] sm:$0xff]  ;;  %v19804_v5 = vpack.c.bf16 %v16098_v43, %v16097_v48  ;;  %v16183_v48 = vld [vmem:[%s22381_s17 + $0xf80] sm:$0xff] }
0x47bd   :  { %v16112_v34 = vld [vmem:[%s22381_s17 + $0xd48] sm:$0xff]  ;;  %v16082_v55 = vld [vmem:[%s22381_s17 + $0xc58] sm:$0xff] }
0x47be   :  { %14647 = vmatmul.mubr.f32.vlgmr.msra.gmra.mrb[176].mxu1 %v14398_v44  ;;  %14722 = vmatmul.mubr.f32.vlgmr.msra.gmra.mrb[182].mxu0 %v14400_v0  ;;  %v16110_v44 = vld [vmem:[%s22381_s17 + $0xd38] sm:$0xff]  ;;  %v16095_v0 = vld [vmem:[%s22381_s17 + $0xcc0] sm:$0xff]  ;;  %v16100_v31 = vld [vmem:[%s22381_s17 + $0xce8] sm:$0xff] }
0x47bf   :  { %14651 = vmatprep.mubr.f32.mxu1 %v14415_v41  ;;  %14726 = vmatprep.mubr.f32.mxu0 %v14417_v37  ;;  %v16079_v37 = vld [vmem:[%s22381_s17 + $0xc40] sm:$0xff]  ;;  %v19800_v40 = vpack.c.bf16 %v16096_v24, %v16095_v0  ;;  %v16134_v0 = vld [vmem:[%s22381_s17 + $0xdf8] sm:$0xff]  ;;  %v13727_v24 = vrot.slane %v23427_v8, %v20944_v49  ;;  %v16184_v43 = vld [vmem:[%s22381_s17 + $0xf88] sm:$0xff] }
0x47c0   :  { %19787 = vmatpush3.bf16.msra.mxu1 %v19786_v28  ;;  %19819 = vmatpush3.bf16.msra.mxu0 %v19818_v20  ;;  %v16078_v28 = vld [vmem:[%s22381_s17 + $0xc38] sm:$0xff]  ;;  %v19796_v20 = vpack.c.bf16 %v16094_v27, %v16093_v56  ;;  %v16132_v56 = vld [vmem:[%s22381_s17 + $0xde8] sm:$0xff] }
0x47c1   :  { %19789 = vmatprep.subr.bf16.mxu1 %v19788_v26  ;;  %19821 = vmatprep.subr.bf16.mxu0 %v19820_v39  ;;  %v19828_v26 = vpack.c.bf16 %v16126_v4, %v16125_v22  ;;  %v16109_v39 = vld [vmem:[%s22381_s17 + $0xd30] sm:$0xff]  ;;  %v19798_v2 = vpack.c.bf16 %v16078_v28, %v16077_v38  ;;  %v16083_v4 = vld [vmem:[%s22381_s17 + $0xc60] sm:$0xff]  ;;  %v19840_v38 = vpack.c.bf16 %v16132_v56, %v16131_v47  ;;  %v16186_v47 = vld [vmem:[%s22381_s17 + $0xf98] sm:$0xff] }
0x47c2   :  { %14652 = vmatmul.mubr.f32.gmra.mrb[178].mxu1 %v14414_v35  ;;  %14727 = vmatmul.mubr.f32.gmra.mrb[184].mxu0 %v14416_v12  ;;  %v19830_v41 = vpack.c.bf16 %v16110_v44, %v16109_v39  ;;  %v16130_v35 = vld [vmem:[%s22381_s17 + $0xdd8] sm:$0xff]  ;;  %v19802_v12 = vpack.c.bf16 %v16080_v57, %v16079_v37  ;;  %v16115_v28 = vld [vmem:[%s22381_s17 + $0xd60] sm:$0xff]  ;;  %v16133_v44 = vld [vmem:[%s22381_s17 + $0xdf0] sm:$0xff]  ;;  %v13735_v57 = vrot.slane %v23427_v8, %v20947_v50 }
0x47c3   :  { %14796 = vmatprep.mubr.f32.mxu1 %v14403_v45  ;;  %14871 = vmatprep.mubr.f32.mxu0 %v14405_v13  ;;  %v19836_v45 = vpack.c.bf16 %v16130_v35, %v16129_v6  ;;  %v16113_v13 = vld [vmem:[%s22381_s17 + $0xd50] sm:$0xff]  ;;  %v16102_v39 = vld [vmem:[%s22381_s17 + $0xcf8] sm:$0xff]  ;;  %v19844_v49 = vpack.c.bf16 %v16134_v0, %v16133_v44  ;;  %v16135_v6 = vld [vmem:[%s22381_s17 + $0xe00] sm:$0xff]  ;;  %v14161_v56 = vadd.f32 %v23380_v7, %v23445_v33 }
0x47c4   :  { %19791 = vmatpush3.bf16.msra.mxu1 %v19790_v63  ;;  %19823 = vmatpush3.bf16.msra.mxu0 %v19822_v14  ;;  %v19834_v63 = vpack.c.bf16 %v16112_v34, %v16111_v32  ;;  %v16081_v14 = vld [vmem:[%s22381_s17 + $0xc50] sm:$0xff]  ;;  %v16151_v32 = vld [vmem:[%s22381_s17 + $0xe80] sm:$0xff]  ;;  %v16152_v34 = vld [vmem:[%s22381_s17 + $0xe88] sm:$0xff] }
0x47c5   :  { %19793 = vmatprep.subr.bf16.mxu1 %v19792_v42  ;;  %19825 = vmatprep.subr.bf16.mxu0 %v19824_v60  ;;  %v16114_v42 = vld [vmem:[%s22381_s17 + $0xd58] sm:$0xff]  ;;  %v16099_v60 = vld [vmem:[%s22381_s17 + $0xce0] sm:$0xff]  ;;  %v19806_v27 = vpack.c.bf16 %v16082_v55, %v16081_v14  ;;  %v16117_v37 = vld [vmem:[%s22381_s17 + $0xd70] sm:$0xff] }
0x47c6   :  { %v19838_v22 = vpack.c.bf16 %v16114_v42, %v16113_v13  ;;  %v16136_v35 = vld [vmem:[%s22381_s17 + $0xe08] sm:$0xff]  ;;  %v16167_v14 = vld [vmem:[%s22381_s17 + $0xf00] sm:$0xff]  ;;  %v14230_v13 = vadd.f32 %v23360_v18, %v13735_v57  ;;  %v19880_v42 = vpack.c.bf16 %v16184_v43, %v16183_v48  ;;  %v16170_v44 = vld [vmem:[%s22381_s17 + $0xf18] sm:$0xff] }
0x47c7   :  { %v16168_v55 = vld [vmem:[%s22381_s17 + $0xf08] sm:$0xff]  ;;  %v19850_v18 = vpack.c.bf16 %v16136_v35, %v16135_v6  ;;  %v16187_v0 = vld [vmem:[%s22381_s17 + $0xfa0] sm:$0xff]  ;;  %v16158_v48 = vld [vmem:[%s22381_s17 + $0xeb8] sm:$0xff] }
0x47c8   :  { %19795 = vmatpush3.bf16.msra.mxu1 %v19794_v58  ;;  %19827 = vmatpush3.bf16.msra.mxu0 %v19826_v16  ;;  %v16084_v58 = vld [vmem:[%s22381_s17 + $0xc68] sm:$0xff]  ;;  %v19808_v16 = vpack.c.bf16 %v16100_v31, %v16099_v60  ;;  %v16154_v60 = vld [vmem:[%s22381_s17 + $0xe98] sm:$0xff]  ;;  %v16185_v31 = vld [vmem:[%s22381_s17 + $0xf90] sm:$0xff] }
0x47c9   :  { %19797 = vmatprep.subr.bf16.mxu1 %v19796_v20  ;;  %19829 = vmatprep.subr.bf16.mxu0 %v19828_v26  ;;  %v16116_v20 = vld [vmem:[%s22381_s17 + $0xd68] sm:$0xff]  ;;  %v16101_v26 = vld [vmem:[%s22381_s17 + $0xcf0] sm:$0xff]  ;;  %v19810_v52 = vpack.c.bf16 %v16084_v58, %v16083_v4  ;;  %v19882_v4 = vpack.c.bf16 %v16168_v55, %v16167_v14  ;;  %v19884_v33 = vpack.c.bf16 %v16186_v47, %v16185_v31  ;;  %v16190_v6 = vld [vmem:[%s22381_s17 + $0xfb8] sm:$0xff] }
0x47ca   :  { %v19842_v53 = vpack.c.bf16 %v16116_v20, %v16115_v28  ;;  %v16189_v43 = vld [vmem:[%s22381_s17 + $0xfb0] sm:$0xff]  ;;  %v16192_v31 = vld [vmem:[%s22381_s17 + $0xfc8] sm:$0xff] }
0x47cb   :  { %v19892_v55 = vpack.c.bf16 %v16190_v6, %v16189_v43 }
0x47cc   :  { %19799 = vmatpush3.bf16.msra.mxu1 %v19798_v2  ;;  %19831 = vmatpush3.bf16.msra.mxu0 %v19830_v41  ;;  %v16085_v2 = vld [vmem:[%s22381_s17 + $0xc70] sm:$0xff]  ;;  %v16086_v41 = vld [vmem:[%s22381_s17 + $0xc78] sm:$0xff] }
0x47cd   :  { %19801 = vmatprep.subr.bf16.mxu1 %v19800_v40  ;;  %19833 = vmatprep.subr.bf16.mxu0 %v19832_v51  ;;  %v19812_v40 = vpack.c.bf16 %v16102_v39, %v16101_v26  ;;  %v16118_v51 = vld [vmem:[%s22381_s17 + $0xd78] sm:$0xff]  ;;  %v19814_v50 = vpack.c.bf16 %v16086_v41, %v16085_v2  ;;  %v16169_v39 = vld [vmem:[%s22381_s17 + $0xf10] sm:$0xff]  ;;  %v16139_v2 = vld [vmem:[%s22381_s17 + $0xe20] sm:$0xff] }
0x47ce   :  { %v16140_v41 = vld [vmem:[%s22381_s17 + $0xe28] sm:$0xff] }
0x47cf   :  { %v19858_v35 = vpack.c.bf16 %v16140_v41, %v16139_v2  ;;  %v16148_v2 = vld [vmem:[%s22381_s17 + $0xe68] sm:$0xff] }
0x47d0   :  { %19803 = vmatpush3.bf16.msra.mxu1 %v19802_v12  ;;  %19835 = vmatpush3.bf16.msra.mxu0 %v19834_v63  ;;  %v19846_v12 = vpack.c.bf16 %v16118_v51, %v16117_v37  ;;  %v19848_v63 = vpack.c.bf16 %v16152_v34, %v16151_v32  ;;  %v16171_v51 = vld [vmem:[%s22381_s17 + $0xf20] sm:$0xff]  ;;  %v16172_v32 = vld [vmem:[%s22381_s17 + $0xf28] sm:$0xff]  ;;  %v16157_v34 = vld [vmem:[%s22381_s17 + $0xeb0] sm:$0xff] }
0x47d1   :  { %19805 = vmatprep.subr.bf16.mxu1 %v19804_v5  ;;  %19837 = vmatprep.subr.bf16.mxu0 %v19836_v45  ;;  %v16153_v5 = vld [vmem:[%s22381_s17 + $0xe90] sm:$0xff]  ;;  %v14153_v45 = vadd.f32 %v23358_v54, %v13727_v24  ;;  %v23537_v54 = vrot.slane %v23427_v8, %v20978_v10  ;;  %v19860_v14 = vpack.c.bf16 %v16158_v48, %v16157_v34  ;;  %v16198_v34 = vld [vmem:[%s22381_s17 + $0xff8] sm:$0xff] }
0x47d2   :  { %v19852_v7 = vpack.c.bf16 %v16154_v60, %v16153_v5  ;;  %v16137_v10 = vld [vmem:[%s22381_s17 + $0xe10] sm:$0xff]  ;;  %v16191_v60 = vld [vmem:[%s22381_s17 + $0xfc0] sm:$0xff]  ;;  %v13743_v48 = vrot.slane %v23427_v8, %v21059_v11 }
0x47d3   :  { %v14402_v58 = vmax.f32 %v14153_v45, 0.0  ;;  %v14386_v26 = vadd.f32 %v23398_v15, %v23537_v54  ;;  %v16173_v5 = vld [vmem:[%s22381_s17 + $0xf30] sm:$0xff]  ;;  %v16174_v45 = vld [vmem:[%s22381_s17 + $0xf38] sm:$0xff] }
0x47d4   :  { %19807 = vmatpush3.bf16.msra.mxu1 %v19806_v27  ;;  %19839 = vmatpush3.bf16.msra.mxu0 %v19838_v22  ;;  %v14238_v27 = vadd.f32 %v23382_v17, %v23449_v46  ;;  %v23533_v22 = vrot.slane %v23427_v8, %v20969_v59  ;;  %v14404_v17 = vmax.f32 %v14230_v13, 0.0  ;;  %v14159_v46 = vadd.f32 %v23374_v1, %v13727_v24  ;;  %v16155_v1 = vld [vmem:[%s22381_s17 + $0xea0] sm:$0xff]  ;;  %v16188_v24 = vld [vmem:[%s22381_s17 + $0xfa8] sm:$0xff] }
0x47d5   :  { %19809 = vmatprep.subr.bf16.mxu1 %v19808_v16  ;;  %19841 = vmatprep.subr.bf16.mxu0 %v19840_v38  ;;  %v14236_v59 = vadd.f32 %v23376_v61, %v13735_v57  ;;  %v16138_v16 = vld [vmem:[%s22381_s17 + $0xe18] sm:$0xff]  ;;  %v14419_v38 = vmax.f32 %v14161_v56, 0.0  ;;  %v16156_v61 = vld [vmem:[%s22381_s17 + $0xea8] sm:$0xff]  ;;  %v14409_v57 = vmax.f32 %v14386_v26, 0.0  ;;  %v16159_v13 = vld [vmem:[%s22381_s17 + $0xec0] sm:$0xff]  ;;  %v19894_v56 = vpack.c.bf16 %v16174_v45, %v16173_v5 }
0x47d6   :  { %v14421_v28 = vmax.f32 %v14238_v27, 0.0  ;;  %v14309_v20 = vadd.f32 %v23396_v21, %v23533_v22  ;;  %v19854_v15 = vpack.c.bf16 %v16138_v16, %v16137_v10  ;;  %v16143_v27 = vld [vmem:[%s22381_s17 + $0xe40] sm:$0xff]  ;;  %v16194_v10 = vld [vmem:[%s22381_s17 + $0xfd8] sm:$0xff]  ;;  %v14307_v11 = vadd.f32 %v23390_v62, %v13743_v48 }
0x47d7   :  { %v14420_v21 = vmax.f32 %v14236_v59, 0.0  ;;  %v16193_v59 = vld [vmem:[%s22381_s17 + $0xfd0] sm:$0xff]  ;;  %v16182_v5 = vld [vmem:[%s22381_s17 + $0xf78] sm:$0xff] }
0x47d8   :  { %19811 = vmatpush3.bf16.msra.mxu1 %v19810_v52  ;;  %19843 = vmatpush3.bf16.msra.mxu0 %v19842_v53  ;;  %v14418_v52 = vmax.f32 %v14159_v46, 0.0  ;;  %v19886_v53 = vpack.c.bf16 %v16170_v44, %v16169_v39  ;;  %v14407_v37 = vmax.f32 %v14309_v20, 0.0  ;;  %v16162_v46 = vld [vmem:[%s22381_s17 + $0xed8] sm:$0xff]  ;;  %v19900_v39 = vpack.c.bf16 %v16194_v10, %v16193_v59  ;;  %v16177_v44 = vld [vmem:[%s22381_s17 + $0xf50] sm:$0xff] }
0x47d9   :  { %19813 = vmatprep.subr.bf16.mxu1 %v19812_v40  ;;  %19845 = vmatprep.subr.bf16.mxu0 %v19844_v49  ;;  %v19856_v40 = vpack.c.bf16 %v16156_v61, %v16155_v1  ;;  %v19888_v49 = vpack.c.bf16 %v16188_v24, %v16187_v0  ;;  %v16146_v20 = vld [vmem:[%s22381_s17 + $0xe58] sm:$0xff]  ;;  %v16163_v61 = vld [vmem:[%s22381_s17 + $0xee0] sm:$0xff]  ;;  %v16164_v0 = vld [vmem:[%s22381_s17 + $0xee8] sm:$0xff] }
0x47da   :  { %v16178_v1 = vld [vmem:[%s22381_s17 + $0xf58] sm:$0xff]  ;;  %v16195_v24 = vld [vmem:[%s22381_s17 + $0xfe0] sm:$0xff]  ;;  %v19872_v41 = vpack.c.bf16 %v16164_v0, %v16163_v61 }
0x47dc   :  { %19815 = vmatpush3.bf16.msra.mxu1 %v19814_v50  ;;  %19847 = vmatpush3.bf16.msra.mxu0 %v19846_v12  ;;  %v19890_v50 = vpack.c.bf16 %v16172_v32, %v16171_v51  ;;  %v16141_v12 = vld [vmem:[%s22381_s17 + $0xe30] sm:$0xff]  ;;  %v16166_v51 = vld [vmem:[%s22381_s17 + $0xef8] sm:$0xff] }
0x47dd   :  { %19849 = vmatprep.subr.bf16.mxu1 %v19848_v63  ;;  %19881 = vmatprep.subr.bf16.mxu0 %v19880_v42  ;;  %v16142_v63 = vld [vmem:[%s22381_s17 + $0xe38] sm:$0xff]  ;;  %v16160_v42 = vld [vmem:[%s22381_s17 + $0xec8] sm:$0xff]  ;;  %v16197_v32 = vld [vmem:[%s22381_s17 + $0xff0] sm:$0xff] }
0x47de   :  { %v19862_v47 = vpack.c.bf16 %v16142_v63, %v16141_v12  ;;  %v19908_v63 = vpack.c.bf16 %v16198_v34, %v16197_v32 }
0x47df   :  { %14797 = vmatmul.mubr.f32.vlgmr.msra.gmra.mrb[180].mxu1 %v14402_v58  ;;  %14872 = vmatmul.mubr.f32.vlgmr.msra.gmra.mrb[186].mxu0 %v14404_v17  ;;  %v16176_v58 = vld [vmem:[%s22381_s17 + $0xf48] sm:$0xff]  ;;  %v16161_v17 = vld [vmem:[%s22381_s17 + $0xed0] sm:$0xff] }
0x47e0   :  { %14801 = vmatprep.mubr.f32.mxu1 %v14419_v38  ;;  %14876 = vmatprep.mubr.f32.mxu0 %v14421_v28  ;;  %v16145_v28 = vld [vmem:[%s22381_s17 + $0xe50] sm:$0xff]  ;;  %v19868_v26 = vpack.c.bf16 %v16162_v46, %v16161_v17 }
0x47e1   :  { %19851 = vmatpush3.bf16.msra.mxu1 %v19850_v18  ;;  %19883 = vmatpush3.bf16.msra.mxu0 %v19882_v4  ;;  %v16144_v18 = vld [vmem:[%s22381_s17 + $0xe48] sm:$0xff]  ;;  %v19864_v4 = vpack.c.bf16 %v16160_v42, %v16159_v13 }
0x47e2   :  { %19853 = vmatprep.subr.bf16.mxu1 %v19852_v7  ;;  %19885 = vmatprep.subr.bf16.mxu0 %v19884_v33  ;;  %v19896_v7 = vpack.c.bf16 %v16192_v31, %v16191_v60  ;;  %v16175_v33 = vld [vmem:[%s22381_s17 + $0xf40] sm:$0xff]  ;;  %v19866_v16 = vpack.c.bf16 %v16144_v18, %v16143_v27  ;;  %v14406_v60 = vmax.f32 %v14307_v11, 0.0 }
0x47e3   :  { %14802 = vmatmul.mubr.f32.gmra.mrb[182].mxu1 %v14418_v52  ;;  %14877 = vmatmul.mubr.f32.gmra.mrb[188].mxu0 %v14420_v21  ;;  %v19898_v38 = vpack.c.bf16 %v16176_v58, %v16175_v33  ;;  %v16196_v52 = vld [vmem:[%s22381_s17 + $0xfe8] sm:$0xff]  ;;  %v19870_v21 = vpack.c.bf16 %v16146_v20, %v16145_v28 }
0x47e4   :  { %14946 = vmatprep.mubr.f32.mxu1 %v14407_v37  ;;  %15021 = vmatprep.mubr.f32.mxu0 %v14409_v57  ;;  %v19904_v37 = vpack.c.bf16 %v16196_v52, %v16195_v24  ;;  %v16179_v57 = vld [vmem:[%s22381_s17 + $0xf60] sm:$0xff] }
0x47e5   :  { %19855 = vmatpush3.bf16.msra.mxu1 %v19854_v15  ;;  %19887 = vmatpush3.bf16.msra.mxu0 %v19886_v53  ;;  %v19902_v15 = vpack.c.bf16 %v16178_v1, %v16177_v44  ;;  %v16147_v53 = vld [vmem:[%s22381_s17 + $0xe60] sm:$0xff] }
0x47e6   :  { %19857 = vmatprep.subr.bf16.mxu1 %v19856_v40  ;;  %19889 = vmatprep.subr.bf16.mxu0 %v19888_v49  ;;  %v16180_v40 = vld [vmem:[%s22381_s17 + $0xf68] sm:$0xff]  ;;  %v16165_v49 = vld [vmem:[%s22381_s17 + $0xef0] sm:$0xff]  ;;  %v19874_v43 = vpack.c.bf16 %v16148_v2, %v16147_v53 }
0x47e7   :  { %v19906_v6 = vpack.c.bf16 %v16180_v40, %v16179_v57  ;;  %v19876_v12 = vpack.c.bf16 %v16166_v51, %v16165_v49 }
0x47e9   :  { %19859 = vmatpush3.bf16.msra.mxu1 %v19858_v35  ;;  %19891 = vmatpush3.bf16.msra.mxu0 %v19890_v50  ;;  %v16149_v35 = vld [vmem:[%s22381_s17 + $0xe70] sm:$0xff]  ;;  %v13751_v50 = vrot.slane %v23427_v8, %v21068_v23  ;;  %v14315_v23 = vadd.f32 %v23417_v36, %v23533_v22  ;;  %v14392_v8 = vadd.f32 %v23419_v29, %v23537_v54  ;;  %v16216_v54 = vld [vmem:[%s22824_s14 + $0x1] ss:$0 sm:$0xff] }
0x47ea   :  { %19861 = vmatprep.subr.bf16.mxu1 %v19860_v14  ;;  %19893 = vmatprep.subr.bf16.mxu0 %v19892_v55  ;;  %v16150_v14 = vld [vmem:[%s22381_s17 + $0xe78] sm:$0xff]  ;;  %v16181_v55 = vld [vmem:[%s22381_s17 + $0xf70] sm:$0xff] }
0x47eb   :  { %v19878_v45 = vpack.c.bf16 %v16150_v14, %v16149_v35  ;;  %v19910_v13 = vpack.c.bf16 %v16182_v5, %v16181_v55  ;;  %v14384_v42 = vadd.f32 %v23392_v9, %v13751_v50  ;;  %v14423_v62 = vmax.f32 %v14315_v23, 0.0 }
0x47ec   :  { %v14425_v27 = vmax.f32 %v14392_v8, 0.0 }
0x47ed   :  { %19863 = vmatpush3.bf16.msra.mxu1 %v19862_v47  ;;  %19895 = vmatpush3.bf16.msra.mxu0 %v19894_v56  ;;  %v14408_v31 = vmax.f32 %v14384_v42, 0.0  ;;  %v14313_v47 = vadd.f32 %v23408_v19, %v13743_v48  ;;  %v14390_v56 = vadd.f32 %v23410_v25, %v13751_v50 }
0x47ee   :  { %19865 = vmatprep.subr.bf16.mxu1 %v19864_v4  ;;  %19897 = vmatprep.subr.bf16.mxu0 %v19896_v7 }
0x47ef   :  { %v14422_v9 = vmax.f32 %v14313_v47, 0.0  ;;  %v14424_v36 = vmax.f32 %v14390_v56, 0.0 }
0x47f1   :  { %19867 = vmatpush3.bf16.msra.mxu1 %v19866_v16  ;;  %19899 = vmatpush3.bf16.msra.mxu0 %v19898_v38 }
0x47f2   :  { %19869 = vmatprep.subr.bf16.mxu1 %v19868_v26  ;;  %19901 = vmatprep.subr.bf16.mxu0 %v19900_v39 }
0x47f5   :  { %19871 = vmatpush3.bf16.msra.mxu1 %v19870_v21  ;;  %19903 = vmatpush3.bf16.msra.mxu0 %v19902_v15 }
0x47f6   :  { %19873 = vmatprep.subr.bf16.mxu1 %v19872_v41  ;;  %19905 = vmatprep.subr.bf16.mxu0 %v19904_v37 }
0x47f9   :  { %19875 = vmatpush3.bf16.msra.mxu1 %v19874_v43  ;;  %19907 = vmatpush3.bf16.msra.mxu0 %v19906_v6 }
0x47fa   :  { %19877 = vmatprep.subr.bf16.mxu1 %v19876_v12  ;;  %19909 = vmatprep.subr.bf16.mxu0 %v19908_v63 }
0x47fd   :  { %19879 = vmatpush3.bf16.msra.mxu1 %v19878_v45  ;;  %19911 = vmatpush3.bf16.msra.mxu0 %v19910_v13 }
0x4800   :  { %14947 = vmatmul.mubr.f32.vlgmr.msra.gmra.mrb[184].mxu1 %v14406_v60  ;;  %15022 = vmatmul.mubr.f32.vlgmr.msra.gmra.mrb[190].mxu0 %v14408_v31 }
0x4801   :  { %14951 = vmatprep.mubr.f32.mxu1 %v14423_v62  ;;  %15026 = vmatprep.mubr.f32.mxu0 %v14425_v27 }
0x4804   :  { %14952 = vmatmul.mubr.f32.gmra.mrb[186].mxu1 %v14422_v9  ;;  %15027 = vmatmul.mubr.f32.gmra.mrb[192].mxu0 %v14424_v36 }
0x4871   :  { %v17484_v29 = vpop.f32.mrb[172].mxu1  ;;  %v17522_v22 = vpop.f32.mrb[178].mxu0 }
0x4872   :  { %v17485_v18 = vpop.f32.mrb[173].mxu1  ;;  %v17523_v4 = vpop.f32.mrb[179].mxu0 }
0x4873   :  { %v17486_v7 = vadd.f32 %v17485_v18, %v17484_v29  ;;  %v17524_v33 = vadd.f32 %v17523_v4, %v17522_v22 }
0x4875   :  { %v14499_v19 = vadd.f32 %v17486_v7, %v16216_v54  ;;  %v17487_v58 = vpop.f32.mrb[174].mxu1  ;;  %v17525_v25 = vpop.f32.mrb[180].mxu0 }
0x4876   :  { %v17488_v17 = vpop.f32.mrb[175].mxu1  ;;  %v17526_v46 = vpop.f32.mrb[181].mxu0 }
0x4877   :  { %v14574_v59 = vadd.f32 %v17524_v33, %v14499_v19  ;;  %v17489_v10 = vadd.f32 %v17488_v17, %v17487_v58  ;;  %v17527_v16 = vadd.f32 %v17526_v46, %v17525_v25 }
0x4879   :  { %v14504_v38 = vadd.f32 %v17489_v10, %v16216_v54 }
0x487b   :  { %v14579_v28 = vadd.f32 %v17527_v16, %v14504_v38 }
0x4891   :  { %v17560_v20 = vpop.f32.mrb[176].mxu1  ;;  %v17598_v26 = vpop.f32.mrb[182].mxu0 }
0x4892   :  { %v17561_v39 = vpop.f32.mrb[177].mxu1  ;;  %v17599_v44 = vpop.f32.mrb[183].mxu0 }
0x4893   :  { %v17562_v1 = vadd.f32 %v17561_v39, %v17560_v20  ;;  %v17600_v61 = vadd.f32 %v17599_v44, %v17598_v26  ;;  %v15082_v26 = vld [vmem:[%s15214_s4 + $0x10] sm:$0xff]  ;;  %v15083_v39 = vld [vmem:[%s15214_s4 + $0x18] sm:$0xff] }
0x4894   :  { %v19916_v44 = vpack.c.bf16 %v15083_v39, %v15082_v26 }
0x4895   :  { %v14649_v0 = vadd.f32 %v17562_v1, %v14574_v59  ;;  %v17563_v24 = vpop.f32.mrb[178].mxu1  ;;  %v17601_v52 = vpop.f32.mrb[184].mxu0 }
0x4896   :  { %v17564_v21 = vpop.f32.mrb[179].mxu1  ;;  %v17602_v15 = vpop.f32.mrb[185].mxu0 }
0x4897   :  { %v14724_v53 = vadd.f32 %v17600_v61, %v14649_v0  ;;  %v17565_v2 = vadd.f32 %v17564_v21, %v17563_v24  ;;  %v17603_v41 = vadd.f32 %v17602_v15, %v17601_v52 }
0x4899   :  { %v14654_v37 = vadd.f32 %v17565_v2, %v14579_v28  ;;  %v15081_v28 = vld [vmem:[%s15214_s4 + $0x8] sm:$0xff] }
0x489b   :  { %v14729_v57 = vadd.f32 %v17603_v41, %v14654_v37  ;;  %v16220_v41 = vld [vmem:[%s22845_s5 + $0x1] ss:$0 sm:$0xff]  ;;  %s15216_s5 = sld [smem:[%s23629_s0 + %s20537_s21]]  }
0x48b2   :  { %v17636_v40 = vpop.f32.mrb[180].mxu1  ;;  %v17674_v49 = vpop.f32.mrb[186].mxu0 }
0x48b3   :  { %v17637_v51 = vpop.f32.mrb[181].mxu1  ;;  %v17675_v32 = vpop.f32.mrb[187].mxu0 }
0x48b4   :  { %v17638_v34 = vadd.f32 %v17637_v51, %v17636_v40  ;;  %v17676_v48 = vadd.f32 %v17675_v32, %v17674_v49 }
0x48b6   :  { %v14799_v43 = vadd.f32 %v17638_v34, %v14724_v53  ;;  %v17639_v6 = vpop.f32.mrb[182].mxu1  ;;  %v17677_v35 = vpop.f32.mrb[188].mxu0  ;;  %v16219_v53 = vld [vmem:[%s22840_s12 + $0x1] ss:$0 sm:$0xff]  ;;  %v16221_v34 = vld [vmem:[%s15215_s9] ss:$0 sm:$0xff] }
0x48b7   :  { %v17640_v50 = vpop.f32.mrb[183].mxu1  ;;  %v17678_v12 = vpop.f32.mrb[189].mxu0 }
0x48b8   :  { %v14874_v63 = vadd.f32 %v17676_v48, %v14799_v43  ;;  %v17641_v14 = vadd.f32 %v17640_v50, %v17639_v6  ;;  %v17679_v55 = vadd.f32 %v17678_v12, %v17677_v35 }
0x48ba   :  { %v14804_v5 = vadd.f32 %v17641_v14, %v14729_v57 }
0x48bc   :  { %v14879_v45 = vadd.f32 %v17679_v55, %v14804_v5 }
0x48d3   :  { %v17712_v13 = vpop.f32.mrb[184].mxu1  ;;  %v17750_v11 = vpop.f32.mrb[190].mxu0 }
0x48d4   :  { %v17713_v42 = vpop.f32.mrb[185].mxu1  ;;  %v17751_v23 = vpop.f32.mrb[191].mxu0 }
0x48d5   :  { %v17714_v8 = vadd.f32 %v17713_v42, %v17712_v13  ;;  %v17752_v60 = vadd.f32 %v17751_v23, %v17750_v11 }
0x48d7   :  { %v14949_v31 = vadd.f32 %v17714_v8, %v14874_v63  ;;  %v17715_v47 = vpop.f32.mrb[186].mxu1  ;;  %v17753_v56 = vpop.f32.mrb[192].mxu0 }
0x48d8   :  { %v17716_v62 = vpop.f32.mrb[187].mxu1  ;;  %v17754_v27 = vpop.f32.mrb[193].mxu0 }
0x48d9   :  { %v15024_v9 = vadd.f32 %v17752_v60, %v14949_v31  ;;  %v17717_v36 = vadd.f32 %v17716_v62, %v17715_v47  ;;  %v17755_v29 = vadd.f32 %v17754_v27, %v17753_v56 }
0x48db   :  { %v14954_v22 = vadd.f32 %v17717_v36, %v14879_v45  ;;  %v15036_v54 = vadd.f32 %v15024_v9, %v23139_v30 }
0x48dd   :  { %v15029_v18 = vadd.f32 %v17755_v29, %v14954_v22  ;;  %v15038_v4 = vsel %vm279_vm1, %v15036_v54, 0.0 }
0x48de   :  { %15039 = vadd.xlane.f32.xlu0 %v15038_v4 }
0x48df   :  { %v15037_v7 = vadd.f32 %v15029_v18, %v23154_v3  ;;  %v15080_v3 = vld [vmem:[%s15214_s4] sm:$0xff] }
0x48e0   :  { %v19912_v20 = vpack.c.bf16 %v15081_v28, %v15080_v3 }
0x48e1   :  { %v15041_v33 = vsel %vm279_vm1, %v15037_v7, 0.0 }
0x48e2   :  { %15042 = vadd.xlane.f32.xlu0 %v15041_v33  ;;  %19913 = vmatprep.subr.bf16.mxu1 %v19912_v20 }
0x48e3   :  { %19915 = vmatpush3.bf16.msra.mxu1 %v19912_v20 }
0x48e4   :  { %19917 = vmatprep.subr.bf16.mxu1 %v19916_v44 }
0x48e7   :  { %19919 = vmatpush3.bf16.msra.mxu1 %v19916_v44 }
0x496b   :  { %v15040_v19 = vpop.xlane.xlu0 %15039 }
0x496c   :  { %v15044_v58 = vmul.f32 0.03125, %v15040_v19 }
0x496e   :  { %v15046_v25 = vsub.f32 %v15036_v54, %v15044_v58 }
0x496f   :  { %v15043_v17 = vpop.xlane.xlu0 %15042 }
0x4970   :  { %v15045_v46 = vmul.f32 0.03125, %v15043_v17  ;;  %v15048_v59 = vmul.f32 %v15046_v25, %v15046_v25 }
0x4972   :  { %v15047_v10 = vsub.f32 %v15037_v7, %v15045_v46  ;;  %v15050_v16 = vsel %vm279_vm1, %v15048_v59, 0.0 }
0x4973   :  { %15051 = vadd.xlane.f32.xlu0 %v15050_v16 }
0x4974   :  { %v15049_v30 = vmul.f32 %v15047_v10, %v15047_v10 }
0x4976   :  { %v15053_v38 = vsel %vm279_vm1, %v15049_v30, 0.0 }
0x4977   :  { %15054 = vadd.xlane.f32.xlu0 %v15053_v38 }
0x4a00   :  { %v15052_v1 = vpop.xlane.xlu0 %15051 }
0x4a01   :  { %v15056_v61 = vmul.f32 0.03125, %v15052_v1 }
0x4a03   :  { %v15058_v0 = vadd.f32 1e-05, %v15056_v61 }
0x4a04   :  { %v15055_v24 = vpop.xlane.xlu0 %15054 }
0x4a05   :  { %20477 = vrsqrt.f32 %v15058_v0  ;;  %v15057_v52 = vmul.f32 0.03125, %v15055_v24 }
0x4a07   :  { %v15059_v21 = vadd.f32 1e-05, %v15057_v52 }
0x4a09   :  { %20479 = vrsqrt.f32 %v15059_v21 }
0x4a0f   :  { %v20478_v15 = vpop.eup %20477 }
0x4a10   :  { %v15062_v2 = vmul.f32 %v20478_v15, %v15046_v25 }
0x4a12   :  { %v15070_v37 = vmul.f32 %v16219_v53, %v15062_v2 }
0x4a13   :  { %v20480_v57 = vpop.eup %20479 }
0x4a14   :  { %v15063_v40 = vmul.f32 %v20480_v57, %v15047_v10  ;;  %v15078_v49 = vadd.f32 %v16220_v41, %v15070_v37 }
0x4a16   :  { %v15071_v51 = vmul.f32 %v16219_v53, %v15063_v40  ;;  %18321 = vmatprep.mubr.msk.f32.mxu1 %vm279_vm1, %v15078_v49 }
0x4a18   :  { %v15079_v32 = vadd.f32 %v16220_v41, %v15071_v51 }
0x4a1a   :  { %18322 = vmatmul.mubr.msk.f32.vlgmr.msra.gmra.mrb[188].mxu1 %vm279_vm1, %v15079_v32 }
0x4aed   :  { %v18323_v48 = vpop.f32.mrb[188].mxu1 }
0x4aee   :  { %v15169_v43 = vadd.f32 %v18323_v48, %v16221_v34  ;;  %v15163_v6 = vpop.f32.mrb[189].mxu1 }
0x4aef   :  { %v15164_v35 = vadd.f32 %v16221_v34, %v15163_v6 }
0x4af0   :  { %15173 = vst [vmem:[%s15216_s5 + $0x8] sm:$0xff] %v15169_v43 }
0x4af1   :  { %15172 = vst [vmem:[%s15216_s5] sm:$0xff] %v15164_v35 }

</bundles_post_ra>
